<compile_context>
chip_gen: v5e
topology: v5e:2x2
jax: 0.10.0
libtpu: 0.0.40
codegen_flags: <defaults>
</compile_context>

<pallas_src>
import jax
import jax.numpy as jnp
from jax.experimental import pallas as pl
from jax.experimental.pallas import tpu as pltpu

NEG_SLOPE = 0.01   # nn.LeakyReLU default
BN_EPS = 1e-5      # nn.BatchNorm2d default
PAD_W = 3          # padding=(0, 3) on both convs
K_H = 5            # (5, 1) conv
K_W = 3            # (1, 3) conv

_CHANNELS = [(1, 25), (25, 50), (50, 100), (100, 200)]  # TODO(synk): cb7_8 uses Cin=100


# ----------------------------- static shape helpers -----------------------------

def _block_dims(h_in, w_in):
    ho = h_in - (K_H - 1)                    # (5,1) conv, stride_h=1, pad_h=0
    wc = (w_in + 2 * PAD_W - 1) // 2 + 1     # (5,1) conv, stride_w=2, pad_w=3
    wo = (wc + 2 * PAD_W - K_W) // 2 + 1     # (1,3) conv, stride_w=2, pad_w=3
    hp = ho // 2                             # MaxPool2d((2,1)), floor mode
    return ho, wc, wo, hp


def _shape_chain(c_eeg, t):
    h, w = c_eeg, t
    for _ in _CHANNELS:
        assert h >= K_H, "C_eeg too small to survive four conv blocks"
        ho, wc, wo, hp = _block_dims(h, w)
        assert hp >= 1 and wo >= 1
        h, w = hp, wo
    return h, w                              # (Hp4, Wo4)


# --------------------------------- fused kernel ---------------------------------

def _lrelu(v):
    return jnp.where(v >= 0, v, NEG_SLOPE * v)


def _conv_block(cols_in, w1_ref, b1_ref, w2_ref, b2_ref):
    """conv(5,1)s(1,2)p(0,3) + LeakyReLU -> conv(1,3)s(1,2)p(0,3) (BN pre-folded)
    + LeakyReLU + MaxPool2d((2,1)).  `cols_in` is a list (length W_in) of (H_in, Cin)
    values; returns a list (length W_out) of pooled (Hp, Cout) values."""
    w_in = len(cols_in)
    h_in, c_in = cols_in[0].shape
    c_out = w1_ref.shape[2]
    ho, wc, wo, hp = _block_dims(h_in, w_in)

    w1_taps = [w1_ref[kh] for kh in range(K_H)]        # (Cin, Cout) each
    w2_taps = [w2_ref[kw] for kw in range(K_W)]        # (Cout, Cout) each
    b1 = jnp.broadcast_to(b1_ref[...], (ho, c_out))    # hoisted out of column loops
    b2 = jnp.broadcast_to(b2_ref[...], (ho, c_out))

    # conv (5,1): each output width column depends on exactly one (maybe padded) input
    # column; height taps are plain contiguous slices + 2-D dots (VPU FMA when Cin==1).
    t1 = []
    for j in range(wc):
        src = 2 * j - PAD_W
        acc = b1
        if 0 <= src < w_in:
            xcol = cols_in[src]
            for kh in range(K_H):
                xs = xcol[kh:kh + ho, :]                       # (Ho, Cin)
                if c_in == 1:
                    acc = acc + xs * w1_taps[kh]               # (Ho,1)*(1,Cout) on VPU
                else:
                    acc = acc + jnp.dot(xs, w1_taps[kh],
                                        preferred_element_type=jnp.float32)
        t1.append(_lrelu(acc))

    # Row-pair selectors for MaxPool2d((2,1)) -> avoids strided slicing.
    r = jax.lax.broadcasted_iota(jnp.int32, (hp, ho), 0)
    c = jax.lax.broadcasted_iota(jnp.int32, (hp, ho), 1)
    sel_even = (c == 2 * r).astype(jnp.float32)
    sel_odd = (c == 2 * r + 1).astype(jnp.float32)

    out_cols = []
    for j in range(wo):
        y = b2                                                  # BN already folded in
        for kw in range(K_W):
            s2 = 2 * j + kw - PAD_W
            if 0 <= s2 < wc:
                y = y + jnp.dot(t1[s2], w2_taps[kw],
                                preferred_element_type=jnp.float32)
        y = _lrelu(y)
        pooled = jnp.maximum(
            jnp.dot(sel_even, y, preferred_element_type=jnp.float32),
            jnp.dot(sel_odd, y, preferred_element_type=jnp.float32))
        out_cols.append(pooled)
    return out_cols


def _fused_kernel(*refs):
    x_ref = refs[0]
    out_ref = refs[-1]
    wrefs = refs[1:-1]
    n_blocks = (len(wrefs) - 4) // 4

    # Per-sample input columns: x_ref block is (1, T, C_eeg, 1); column w -> (C_eeg, 1).
    t = x_ref.shape[1]
    cols = [x_ref[0, w] for w in range(t)]

    for blk in range(n_blocks):
        w1_ref, b1_ref, w2_ref, b2_ref = wrefs[4 * blk: 4 * blk + 4]
        cols = _conv_block(cols, w1_ref, b1_ref, w2_ref, b2_ref)

    w1l_ref, b1l_ref, w2l_ref, b2l_ref = wrefs[4 * n_blocks:]
    wo4 = len(cols)
    hp4 = cols[0].shape[0]

    # lin1 (NCHW .view(B,-1) flatten order folded into the w1l packing), no activation.
    z = b1l_ref[...]                                            # (1, 256)
    for w in range(wo4):
        for h in range(hp4):
            z = z + jnp.dot(cols[w][h:h + 1, :], w1l_ref[w, h],
                            preferred_element_type=jnp.float32)
    # Dropout(0.5): identity in eval mode.
    logits = jnp.dot(z, w2l_ref[...], preferred_element_type=jnp.float32) + b2l_ref[...]
    out_ref[0] = logits


# ---------------------------- parameters & packing ----------------------------

def init_params(key, c_eeg, t, num_classes=3):
    """Raw parameters mirroring the PyTorch module (incl. eval-mode BN buffers)."""
    hp4, wo4 = _shape_chain(c_eeg, t)
    l1 = _CHANNELS[-1][1] * hp4 * wo4
    keys = jax.random.split(key, 4 * len(_CHANNELS) + 4)

    def u(k, shape, fan_in):
        bound = 1.0 / (fan_in ** 0.5)
        return jax.random.uniform(k, shape, jnp.float32, -bound, bound)

    blocks = []
    ki = 0
    for cin, cout in _CHANNELS:
        w1 = u(keys[ki], (cout, cin, K_H, 1), cin * K_H); ki += 1
        b1 = u(keys[ki], (cout,), cin * K_H); ki += 1
        w2 = u(keys[ki], (cout, cout, 1, K_W), cout * K_W); ki += 1
        b2 = u(keys[ki], (cout,), cout * K_W); ki += 1
        bn = dict(gamma=jnp.ones((cout,), jnp.float32),
                  beta=jnp.zeros((cout,), jnp.float32),
                  mean=jnp.zeros((cout,), jnp.float32),
                  var=jnp.ones((cout,), jnp.float32))
        blocks.append(dict(w1=w1, b1=b1, w2=w2, b2=b2, bn=bn))

    lw1 = u(keys[ki], (256, l1), l1); ki += 1
    lb1 = u(keys[ki], (256,), l1); ki += 1
    lw2 = u(keys[ki], (num_classes, 256), 256); ki += 1
    lb2 = u(keys[ki], (num_classes,), 256); ki += 1
    return dict(blocks=blocks, lin1=(lw1, lb1), lin2=(lw2, lb2))


def pack_params(params, c_eeg, t):
    """Fold eval-mode BatchNorm into the (1,3) conv and pre-reshape/transpose all
    weights into the layouts the fused kernel consumes (done once, outside the hot path)."""
    hp4, wo4 = _shape_chain(c_eeg, t)
    c4 = _CHANNELS[-1][1]

    flat = []
    for blk in params["blocks"]:
        cout = blk["w1"].shape[0]
        # (Cout, Cin, 5, 1) -> (5, Cin, Cout)
        w1 = jnp.transpose(blk["w1"][:, :, :, 0], (2, 1, 0)).astype(jnp.float32)
        b1 = blk["b1"].reshape(1, cout).astype(jnp.float32)
        bn = blk["bn"]
        scale = bn["gamma"] / jnp.sqrt(bn["var"] + BN_EPS)
        shift = bn["beta"] - bn["mean"] * scale
        # (Cout, Cin, 1, 3) -> (3, Cin, Cout), scaled per output channel (BN fold)
        w2 = jnp.transpose(blk["w2"][:, :, 0, :], (2, 1, 0)) * scale[None, None, :]
        b2 = (blk["b2"] * scale + shift).reshape(1, cout)
        flat += [w1, b1, w2.astype(jnp.float32), b2.astype(jnp.float32)]

    lw1, lb1 = params["lin1"]
    lw2, lb2 = params["lin2"]
    num_classes = lw2.shape[0]
    # torch flatten order of (B, C4, Hp4, Wo4).view(B, -1): k = c*Hp4*Wo4 + h*Wo4 + w
    w1l = jnp.transpose(lw1.reshape(256, c4, hp4, wo4), (3, 2, 1, 0)).astype(jnp.float32)
    flat += [w1l,
             lb1.reshape(1, 256).astype(jnp.float32),
             jnp.transpose(lw2, (1, 0)).astype(jnp.float32),
             lb2.reshape(1, num_classes).astype(jnp.float32)]
    return flat


# ----------------------------------- forward -----------------------------------

def _whole_array_spec(arr):
    zeros = (0,) * arr.ndim
    return pl.BlockSpec(arr.shape, lambda b, _z=zeros: _z)


@jax.jit
def forward(packed, x):
    """x: (B, T, C_eeg) float32 -> logits (B, num_classes)."""
    B, T, C_eeg = x.shape
    num_classes = packed[-1].shape[1]
    # (B, T, C_eeg, 1): per-sample width columns with H=C_eeg on sublanes — same data
    # torch.permute(0,2,1).unsqueeze(1) feeds the convs, presented column-wise.
    x4 = x.astype(jnp.float32)[..., None]

    out = pl.pallas_call(
        _fused_kernel,
        out_shape=jax.ShapeDtypeStruct((B, 1, num_classes), jnp.float32),
        grid=(B,),
        in_specs=[pl.BlockSpec((1, T, C_eeg, 1), lambda b: (b, 0, 0, 0))]
                 + [_whole_array_spec(w) for w in packed],
        out_specs=pl.BlockSpec((1, 1, num_classes), lambda b: (b, 0, 0)),
        compiler_params=pltpu.CompilerParams(
            dimension_semantics=("parallel",),        # shards batch over TCs on v7x
            vmem_limit_bytes=32 * 1024 * 1024,
        ),
    )(x4, *packed)
    return out[:, 0, :]


if __name__ == "__main__":
    key = jax.random.PRNGKey(0)
    kx, kp = jax.random.split(key)
    # Smallest EEG-channel count that survives four (H-4 then H//2) blocks is 76.
    B, T, C_EEG = 2, 16, 76
    x = jax.random.normal(kx, (B, T, C_EEG), jnp.float32)
    params = init_params(kp, C_EEG, T, num_classes=3)
    packed = pack_params(params, C_EEG, T)
    out = jax.block_until_ready(forward(packed, x))
    assert out.shape == (B, 3) and out.dtype == jnp.float32
    print("KERNEL_OK")
</pallas_src>

<mosaic_0001>
module attributes {stable_mosaic.version = 11 : i64} {
  func.func @_fused_kernel(%arg0: i32, %arg1: memref<1x16x76x1xf32, #tpu.memory_space<vmem>>, %arg2: memref<5x1x25xf32, #tpu.memory_space<vmem>>, %arg3: memref<1x25xf32, #tpu.memory_space<vmem>>, %arg4: memref<3x25x25xf32, #tpu.memory_space<vmem>>, %arg5: memref<1x25xf32, #tpu.memory_space<vmem>>, %arg6: memref<5x25x50xf32, #tpu.memory_space<vmem>>, %arg7: memref<1x50xf32, #tpu.memory_space<vmem>>, %arg8: memref<3x50x50xf32, #tpu.memory_space<vmem>>, %arg9: memref<1x50xf32, #tpu.memory_space<vmem>>, %arg10: memref<5x50x100xf32, #tpu.memory_space<vmem>>, %arg11: memref<1x100xf32, #tpu.memory_space<vmem>>, %arg12: memref<3x100x100xf32, #tpu.memory_space<vmem>>, %arg13: memref<1x100xf32, #tpu.memory_space<vmem>>, %arg14: memref<5x100x200xf32, #tpu.memory_space<vmem>>, %arg15: memref<1x200xf32, #tpu.memory_space<vmem>>, %arg16: memref<3x200x200xf32, #tpu.memory_space<vmem>>, %arg17: memref<1x200xf32, #tpu.memory_space<vmem>>, %arg18: memref<5x1x200x256xf32, #tpu.memory_space<vmem>>, %arg19: memref<1x256xf32, #tpu.memory_space<vmem>>, %arg20: memref<256x3xf32, #tpu.memory_space<vmem>>, %arg21: memref<1x3xf32, #tpu.memory_space<vmem>>, %arg22: memref<1x1x3xf32, #tpu.memory_space<vmem>>) attributes {dimension_semantics = [#tpu.dimension_semantics<parallel>], iteration_bounds = array<i64: 2>, scalar_prefetch = 0 : i64, scratch_operands = 0 : i64, tpu.core_type = #tpu.core_type<tc>, window_params = [{transform_indices = @transform_0, window_bounds = array<i64: 1, 16, 76, 1>}, {pipeline_mode = #tpu.pipeline_mode<synchronous>, transform_indices = @transform_1, window_bounds = array<i64: 5, 1, 25>}, {pipeline_mode = #tpu.pipeline_mode<synchronous>, transform_indices = @transform_2, window_bounds = array<i64: 1, 25>}, {pipeline_mode = #tpu.pipeline_mode<synchronous>, transform_indices = @transform_3, window_bounds = array<i64: 3, 25, 25>}, {pipeline_mode = #tpu.pipeline_mode<synchronous>, transform_indices = @transform_4, window_bounds = array<i64: 1, 25>}, {pipeline_mode = #tpu.pipeline_mode<synchronous>, transform_indices = @transform_5, window_bounds = array<i64: 5, 25, 50>}, {pipeline_mode = #tpu.pipeline_mode<synchronous>, transform_indices = @transform_6, window_bounds = array<i64: 1, 50>}, {pipeline_mode = #tpu.pipeline_mode<synchronous>, transform_indices = @transform_7, window_bounds = array<i64: 3, 50, 50>}, {pipeline_mode = #tpu.pipeline_mode<synchronous>, transform_indices = @transform_8, window_bounds = array<i64: 1, 50>}, {pipeline_mode = #tpu.pipeline_mode<synchronous>, transform_indices = @transform_9, window_bounds = array<i64: 5, 50, 100>}, {pipeline_mode = #tpu.pipeline_mode<synchronous>, transform_indices = @transform_10, window_bounds = array<i64: 1, 100>}, {pipeline_mode = #tpu.pipeline_mode<synchronous>, transform_indices = @transform_11, window_bounds = array<i64: 3, 100, 100>}, {pipeline_mode = #tpu.pipeline_mode<synchronous>, transform_indices = @transform_12, window_bounds = array<i64: 1, 100>}, {pipeline_mode = #tpu.pipeline_mode<synchronous>, transform_indices = @transform_13, window_bounds = array<i64: 5, 100, 200>}, {pipeline_mode = #tpu.pipeline_mode<synchronous>, transform_indices = @transform_14, window_bounds = array<i64: 1, 200>}, {pipeline_mode = #tpu.pipeline_mode<synchronous>, transform_indices = @transform_15, window_bounds = array<i64: 3, 200, 200>}, {pipeline_mode = #tpu.pipeline_mode<synchronous>, transform_indices = @transform_16, window_bounds = array<i64: 1, 200>}, {pipeline_mode = #tpu.pipeline_mode<synchronous>, transform_indices = @transform_17, window_bounds = array<i64: 5, 1, 200, 256>}, {pipeline_mode = #tpu.pipeline_mode<synchronous>, transform_indices = @transform_18, window_bounds = array<i64: 1, 256>}, {pipeline_mode = #tpu.pipeline_mode<synchronous>, transform_indices = @transform_19, window_bounds = array<i64: 256, 3>}, {pipeline_mode = #tpu.pipeline_mode<synchronous>, transform_indices = @transform_20, window_bounds = array<i64: 1, 3>}, {transform_indices = @transform_21, window_bounds = array<i64: 1, 1, 3>}]} {
    %c0 = arith.constant 0 : index
    %c3 = arith.constant 3 : index
    %c0_0 = arith.constant 0 : index
    %c0_1 = arith.constant 0 : index
    %0 = vector.load %arg1[%c0, %c3, %c0_0, %c0_1] : memref<1x16x76x1xf32, #tpu.memory_space<vmem>>, vector<1x1x76x1xf32>
    %1 = vector.shape_cast %0 : vector<1x1x76x1xf32> to vector<76x1xf32>
    %c0_2 = arith.constant 0 : index
    %c5 = arith.constant 5 : index
    %c0_3 = arith.constant 0 : index
    %c0_4 = arith.constant 0 : index
    %2 = vector.load %arg1[%c0_2, %c5, %c0_3, %c0_4] : memref<1x16x76x1xf32, #tpu.memory_space<vmem>>, vector<1x1x76x1xf32>
    %3 = vector.shape_cast %2 : vector<1x1x76x1xf32> to vector<76x1xf32>
    %c0_5 = arith.constant 0 : index
    %c7 = arith.constant 7 : index
    %c0_6 = arith.constant 0 : index
    %c0_7 = arith.constant 0 : index
    %4 = vector.load %arg1[%c0_5, %c7, %c0_6, %c0_7] : memref<1x16x76x1xf32, #tpu.memory_space<vmem>>, vector<1x1x76x1xf32>
    %5 = vector.shape_cast %4 : vector<1x1x76x1xf32> to vector<76x1xf32>
    %c0_8 = arith.constant 0 : index
    %c11 = arith.constant 11 : index
    %c0_9 = arith.constant 0 : index
    %c0_10 = arith.constant 0 : index
    %6 = vector.load %arg1[%c0_8, %c11, %c0_9, %c0_10] : memref<1x16x76x1xf32, #tpu.memory_space<vmem>>, vector<1x1x76x1xf32>
    %7 = vector.shape_cast %6 : vector<1x1x76x1xf32> to vector<76x1xf32>
    %c0_11 = arith.constant 0 : index
    %c13 = arith.constant 13 : index
    %c0_12 = arith.constant 0 : index
    %c0_13 = arith.constant 0 : index
    %8 = vector.load %arg1[%c0_11, %c13, %c0_12, %c0_13] : memref<1x16x76x1xf32, #tpu.memory_space<vmem>>, vector<1x1x76x1xf32>
    %9 = vector.shape_cast %8 : vector<1x1x76x1xf32> to vector<76x1xf32>
    %c0_14 = arith.constant 0 : index
    %c15 = arith.constant 15 : index
    %c0_15 = arith.constant 0 : index
    %c0_16 = arith.constant 0 : index
    %10 = vector.load %arg1[%c0_14, %c15, %c0_15, %c0_16] : memref<1x16x76x1xf32, #tpu.memory_space<vmem>>, vector<1x1x76x1xf32>
    %11 = vector.shape_cast %10 : vector<1x1x76x1xf32> to vector<76x1xf32>
    %c0_17 = arith.constant 0 : index
    %c0_18 = arith.constant 0 : index
    %c0_19 = arith.constant 0 : index
    %12 = vector.load %arg2[%c0_17, %c0_18, %c0_19] : memref<5x1x25xf32, #tpu.memory_space<vmem>>, vector<1x1x25xf32>
    %13 = vector.shape_cast %12 : vector<1x1x25xf32> to vector<1x25xf32>
    %c1 = arith.constant 1 : index
    %c0_20 = arith.constant 0 : index
    %c0_21 = arith.constant 0 : index
    %14 = vector.load %arg2[%c1, %c0_20, %c0_21] : memref<5x1x25xf32, #tpu.memory_space<vmem>>, vector<1x1x25xf32>
    %15 = vector.shape_cast %14 : vector<1x1x25xf32> to vector<1x25xf32>
    %c2 = arith.constant 2 : index
    %c0_22 = arith.constant 0 : index
    %c0_23 = arith.constant 0 : index
    %16 = vector.load %arg2[%c2, %c0_22, %c0_23] : memref<5x1x25xf32, #tpu.memory_space<vmem>>, vector<1x1x25xf32>
    %17 = vector.shape_cast %16 : vector<1x1x25xf32> to vector<1x25xf32>
    %c3_24 = arith.constant 3 : index
    %c0_25 = arith.constant 0 : index
    %c0_26 = arith.constant 0 : index
    %18 = vector.load %arg2[%c3_24, %c0_25, %c0_26] : memref<5x1x25xf32, #tpu.memory_space<vmem>>, vector<1x1x25xf32>
    %19 = vector.shape_cast %18 : vector<1x1x25xf32> to vector<1x25xf32>
    %c4 = arith.constant 4 : index
    %c0_27 = arith.constant 0 : index
    %c0_28 = arith.constant 0 : index
    %20 = vector.load %arg2[%c4, %c0_27, %c0_28] : memref<5x1x25xf32, #tpu.memory_space<vmem>>, vector<1x1x25xf32>
    %21 = vector.shape_cast %20 : vector<1x1x25xf32> to vector<1x25xf32>
    %c0_29 = arith.constant 0 : index
    %c0_30 = arith.constant 0 : index
    %c0_31 = arith.constant 0 : index
    %22 = vector.load %arg4[%c0_29, %c0_30, %c0_31] : memref<3x25x25xf32, #tpu.memory_space<vmem>>, vector<1x25x25xf32>
    %23 = vector.shape_cast %22 : vector<1x25x25xf32> to vector<25x25xf32>
    %c1_32 = arith.constant 1 : index
    %c0_33 = arith.constant 0 : index
    %c0_34 = arith.constant 0 : index
    %24 = vector.load %arg4[%c1_32, %c0_33, %c0_34] : memref<3x25x25xf32, #tpu.memory_space<vmem>>, vector<1x25x25xf32>
    %25 = vector.shape_cast %24 : vector<1x25x25xf32> to vector<25x25xf32>
    %c2_35 = arith.constant 2 : index
    %c0_36 = arith.constant 0 : index
    %c0_37 = arith.constant 0 : index
    %26 = vector.load %arg4[%c2_35, %c0_36, %c0_37] : memref<3x25x25xf32, #tpu.memory_space<vmem>>, vector<1x25x25xf32>
    %27 = vector.shape_cast %26 : vector<1x25x25xf32> to vector<25x25xf32>
    %c0_38 = arith.constant 0 : index
    %c0_39 = arith.constant 0 : index
    %28 = vector.load %arg3[%c0_38, %c0_39] : memref<1x25xf32, #tpu.memory_space<vmem>>, vector<1x25xf32>
    %29 = vector.shape_cast %28 : vector<1x25xf32> to vector<1x25xf32>
    %30 = vector.broadcast %29 : vector<1x25xf32> to vector<72x25xf32>
    %c0_40 = arith.constant 0 : index
    %c0_41 = arith.constant 0 : index
    %31 = vector.load %arg5[%c0_40, %c0_41] : memref<1x25xf32, #tpu.memory_space<vmem>>, vector<1x25xf32>
    %32 = vector.shape_cast %31 : vector<1x25xf32> to vector<1x25xf32>
    %33 = vector.broadcast %32 : vector<1x25xf32> to vector<72x25xf32>
    %34 = vector.extract_strided_slice %1 {offsets = [0, 0], sizes = [72, 1], strides = [1, 1]} : vector<76x1xf32> to vector<72x1xf32>
    %35 = vector.broadcast %34 : vector<72x1xf32> to vector<72x25xf32>
    %36 = vector.broadcast %13 : vector<1x25xf32> to vector<72x25xf32>
    %37 = arith.mulf %35, %36 : vector<72x25xf32>
    %38 = arith.addf %30, %37 : vector<72x25xf32>
    %39 = vector.extract_strided_slice %1 {offsets = [1, 0], sizes = [72, 1], strides = [1, 1]} : vector<76x1xf32> to vector<72x1xf32>
    %40 = vector.broadcast %39 : vector<72x1xf32> to vector<72x25xf32>
    %41 = vector.broadcast %15 : vector<1x25xf32> to vector<72x25xf32>
    %42 = arith.mulf %40, %41 : vector<72x25xf32>
    %43 = arith.addf %38, %42 : vector<72x25xf32>
    %44 = vector.extract_strided_slice %1 {offsets = [2, 0], sizes = [72, 1], strides = [1, 1]} : vector<76x1xf32> to vector<72x1xf32>
    %45 = vector.broadcast %44 : vector<72x1xf32> to vector<72x25xf32>
    %46 = vector.broadcast %17 : vector<1x25xf32> to vector<72x25xf32>
    %47 = arith.mulf %45, %46 : vector<72x25xf32>
    %48 = arith.addf %43, %47 : vector<72x25xf32>
    %49 = vector.extract_strided_slice %1 {offsets = [3, 0], sizes = [72, 1], strides = [1, 1]} : vector<76x1xf32> to vector<72x1xf32>
    %50 = vector.broadcast %49 : vector<72x1xf32> to vector<72x25xf32>
    %51 = vector.broadcast %19 : vector<1x25xf32> to vector<72x25xf32>
    %52 = arith.mulf %50, %51 : vector<72x25xf32>
    %53 = arith.addf %48, %52 : vector<72x25xf32>
    %54 = vector.extract_strided_slice %1 {offsets = [4, 0], sizes = [72, 1], strides = [1, 1]} : vector<76x1xf32> to vector<72x1xf32>
    %55 = vector.broadcast %54 : vector<72x1xf32> to vector<72x25xf32>
    %56 = vector.broadcast %21 : vector<1x25xf32> to vector<72x25xf32>
    %57 = arith.mulf %55, %56 : vector<72x25xf32>
    %58 = arith.addf %53, %57 : vector<72x25xf32>
    %cst = arith.constant 0.000000e+00 : f32
    %59 = vector.broadcast %cst : f32 to vector<72x25xf32>
    %60 = arith.cmpf oge, %58, %59 : vector<72x25xf32>
    %cst_42 = arith.constant 0.00999999977 : f32
    %61 = vector.broadcast %cst_42 : f32 to vector<72x25xf32>
    %62 = arith.mulf %61, %58 : vector<72x25xf32>
    %63 = arith.select %60, %58, %62 : vector<72x25xi1>, vector<72x25xf32>
    %64 = vector.extract_strided_slice %3 {offsets = [0, 0], sizes = [72, 1], strides = [1, 1]} : vector<76x1xf32> to vector<72x1xf32>
    %65 = vector.broadcast %64 : vector<72x1xf32> to vector<72x25xf32>
    %66 = vector.broadcast %13 : vector<1x25xf32> to vector<72x25xf32>
    %67 = arith.mulf %65, %66 : vector<72x25xf32>
    %68 = arith.addf %30, %67 : vector<72x25xf32>
    %69 = vector.extract_strided_slice %3 {offsets = [1, 0], sizes = [72, 1], strides = [1, 1]} : vector<76x1xf32> to vector<72x1xf32>
    %70 = vector.broadcast %69 : vector<72x1xf32> to vector<72x25xf32>
    %71 = vector.broadcast %15 : vector<1x25xf32> to vector<72x25xf32>
    %72 = arith.mulf %70, %71 : vector<72x25xf32>
    %73 = arith.addf %68, %72 : vector<72x25xf32>
    %74 = vector.extract_strided_slice %3 {offsets = [2, 0], sizes = [72, 1], strides = [1, 1]} : vector<76x1xf32> to vector<72x1xf32>
    %75 = vector.broadcast %74 : vector<72x1xf32> to vector<72x25xf32>
    %76 = vector.broadcast %17 : vector<1x25xf32> to vector<72x25xf32>
    %77 = arith.mulf %75, %76 : vector<72x25xf32>
    %78 = arith.addf %73, %77 : vector<72x25xf32>
    %79 = vector.extract_strided_slice %3 {offsets = [3, 0], sizes = [72, 1], strides = [1, 1]} : vector<76x1xf32> to vector<72x1xf32>
    %80 = vector.broadcast %79 : vector<72x1xf32> to vector<72x25xf32>
    %81 = vector.broadcast %19 : vector<1x25xf32> to vector<72x25xf32>
    %82 = arith.mulf %80, %81 : vector<72x25xf32>
    %83 = arith.addf %78, %82 : vector<72x25xf32>
    %84 = vector.extract_strided_slice %3 {offsets = [4, 0], sizes = [72, 1], strides = [1, 1]} : vector<76x1xf32> to vector<72x1xf32>
    %85 = vector.broadcast %84 : vector<72x1xf32> to vector<72x25xf32>
    %86 = vector.broadcast %21 : vector<1x25xf32> to vector<72x25xf32>
    %87 = arith.mulf %85, %86 : vector<72x25xf32>
    %88 = arith.addf %83, %87 : vector<72x25xf32>
    %cst_43 = arith.constant 0.000000e+00 : f32
    %89 = vector.broadcast %cst_43 : f32 to vector<72x25xf32>
    %90 = arith.cmpf oge, %88, %89 : vector<72x25xf32>
    %cst_44 = arith.constant 0.00999999977 : f32
    %91 = vector.broadcast %cst_44 : f32 to vector<72x25xf32>
    %92 = arith.mulf %91, %88 : vector<72x25xf32>
    %93 = arith.select %90, %88, %92 : vector<72x25xi1>, vector<72x25xf32>
    %94 = vector.extract_strided_slice %5 {offsets = [0, 0], sizes = [72, 1], strides = [1, 1]} : vector<76x1xf32> to vector<72x1xf32>
    %95 = vector.broadcast %94 : vector<72x1xf32> to vector<72x25xf32>
    %96 = vector.broadcast %13 : vector<1x25xf32> to vector<72x25xf32>
    %97 = arith.mulf %95, %96 : vector<72x25xf32>
    %98 = arith.addf %30, %97 : vector<72x25xf32>
    %99 = vector.extract_strided_slice %5 {offsets = [1, 0], sizes = [72, 1], strides = [1, 1]} : vector<76x1xf32> to vector<72x1xf32>
    %100 = vector.broadcast %99 : vector<72x1xf32> to vector<72x25xf32>
    %101 = vector.broadcast %15 : vector<1x25xf32> to vector<72x25xf32>
    %102 = arith.mulf %100, %101 : vector<72x25xf32>
    %103 = arith.addf %98, %102 : vector<72x25xf32>
    %104 = vector.extract_strided_slice %5 {offsets = [2, 0], sizes = [72, 1], strides = [1, 1]} : vector<76x1xf32> to vector<72x1xf32>
    %105 = vector.broadcast %104 : vector<72x1xf32> to vector<72x25xf32>
    %106 = vector.broadcast %17 : vector<1x25xf32> to vector<72x25xf32>
    %107 = arith.mulf %105, %106 : vector<72x25xf32>
    %108 = arith.addf %103, %107 : vector<72x25xf32>
    %109 = vector.extract_strided_slice %5 {offsets = [3, 0], sizes = [72, 1], strides = [1, 1]} : vector<76x1xf32> to vector<72x1xf32>
    %110 = vector.broadcast %109 : vector<72x1xf32> to vector<72x25xf32>
    %111 = vector.broadcast %19 : vector<1x25xf32> to vector<72x25xf32>
    %112 = arith.mulf %110, %111 : vector<72x25xf32>
    %113 = arith.addf %108, %112 : vector<72x25xf32>
    %114 = vector.extract_strided_slice %5 {offsets = [4, 0], sizes = [72, 1], strides = [1, 1]} : vector<76x1xf32> to vector<72x1xf32>
    %115 = vector.broadcast %114 : vector<72x1xf32> to vector<72x25xf32>
    %116 = vector.broadcast %21 : vector<1x25xf32> to vector<72x25xf32>
    %117 = arith.mulf %115, %116 : vector<72x25xf32>
    %118 = arith.addf %113, %117 : vector<72x25xf32>
    %cst_45 = arith.constant 0.000000e+00 : f32
    %119 = vector.broadcast %cst_45 : f32 to vector<72x25xf32>
    %120 = arith.cmpf oge, %118, %119 : vector<72x25xf32>
    %cst_46 = arith.constant 0.00999999977 : f32
    %121 = vector.broadcast %cst_46 : f32 to vector<72x25xf32>
    %122 = arith.mulf %121, %118 : vector<72x25xf32>
    %123 = arith.select %120, %118, %122 : vector<72x25xi1>, vector<72x25xf32>
    %124 = vector.extract_strided_slice %7 {offsets = [0, 0], sizes = [72, 1], strides = [1, 1]} : vector<76x1xf32> to vector<72x1xf32>
    %125 = vector.broadcast %124 : vector<72x1xf32> to vector<72x25xf32>
    %126 = vector.broadcast %13 : vector<1x25xf32> to vector<72x25xf32>
    %127 = arith.mulf %125, %126 : vector<72x25xf32>
    %128 = arith.addf %30, %127 : vector<72x25xf32>
    %129 = vector.extract_strided_slice %7 {offsets = [1, 0], sizes = [72, 1], strides = [1, 1]} : vector<76x1xf32> to vector<72x1xf32>
    %130 = vector.broadcast %129 : vector<72x1xf32> to vector<72x25xf32>
    %131 = vector.broadcast %15 : vector<1x25xf32> to vector<72x25xf32>
    %132 = arith.mulf %130, %131 : vector<72x25xf32>
    %133 = arith.addf %128, %132 : vector<72x25xf32>
    %134 = vector.extract_strided_slice %7 {offsets = [2, 0], sizes = [72, 1], strides = [1, 1]} : vector<76x1xf32> to vector<72x1xf32>
    %135 = vector.broadcast %134 : vector<72x1xf32> to vector<72x25xf32>
    %136 = vector.broadcast %17 : vector<1x25xf32> to vector<72x25xf32>
    %137 = arith.mulf %135, %136 : vector<72x25xf32>
    %138 = arith.addf %133, %137 : vector<72x25xf32>
    %139 = vector.extract_strided_slice %7 {offsets = [3, 0], sizes = [72, 1], strides = [1, 1]} : vector<76x1xf32> to vector<72x1xf32>
    %140 = vector.broadcast %139 : vector<72x1xf32> to vector<72x25xf32>
    %141 = vector.broadcast %19 : vector<1x25xf32> to vector<72x25xf32>
    %142 = arith.mulf %140, %141 : vector<72x25xf32>
    %143 = arith.addf %138, %142 : vector<72x25xf32>
    %144 = vector.extract_strided_slice %7 {offsets = [4, 0], sizes = [72, 1], strides = [1, 1]} : vector<76x1xf32> to vector<72x1xf32>
    %145 = vector.broadcast %144 : vector<72x1xf32> to vector<72x25xf32>
    %146 = vector.broadcast %21 : vector<1x25xf32> to vector<72x25xf32>
    %147 = arith.mulf %145, %146 : vector<72x25xf32>
    %148 = arith.addf %143, %147 : vector<72x25xf32>
    %cst_47 = arith.constant 0.000000e+00 : f32
    %149 = vector.broadcast %cst_47 : f32 to vector<72x25xf32>
    %150 = arith.cmpf oge, %148, %149 : vector<72x25xf32>
    %cst_48 = arith.constant 0.00999999977 : f32
    %151 = vector.broadcast %cst_48 : f32 to vector<72x25xf32>
    %152 = arith.mulf %151, %148 : vector<72x25xf32>
    %153 = arith.select %150, %148, %152 : vector<72x25xi1>, vector<72x25xf32>
    %154 = vector.extract_strided_slice %9 {offsets = [0, 0], sizes = [72, 1], strides = [1, 1]} : vector<76x1xf32> to vector<72x1xf32>
    %155 = vector.broadcast %154 : vector<72x1xf32> to vector<72x25xf32>
    %156 = vector.broadcast %13 : vector<1x25xf32> to vector<72x25xf32>
    %157 = arith.mulf %155, %156 : vector<72x25xf32>
    %158 = arith.addf %30, %157 : vector<72x25xf32>
    %159 = vector.extract_strided_slice %9 {offsets = [1, 0], sizes = [72, 1], strides = [1, 1]} : vector<76x1xf32> to vector<72x1xf32>
    %160 = vector.broadcast %159 : vector<72x1xf32> to vector<72x25xf32>
    %161 = vector.broadcast %15 : vector<1x25xf32> to vector<72x25xf32>
    %162 = arith.mulf %160, %161 : vector<72x25xf32>
    %163 = arith.addf %158, %162 : vector<72x25xf32>
    %164 = vector.extract_strided_slice %9 {offsets = [2, 0], sizes = [72, 1], strides = [1, 1]} : vector<76x1xf32> to vector<72x1xf32>
    %165 = vector.broadcast %164 : vector<72x1xf32> to vector<72x25xf32>
    %166 = vector.broadcast %17 : vector<1x25xf32> to vector<72x25xf32>
    %167 = arith.mulf %165, %166 : vector<72x25xf32>
    %168 = arith.addf %163, %167 : vector<72x25xf32>
    %169 = vector.extract_strided_slice %9 {offsets = [3, 0], sizes = [72, 1], strides = [1, 1]} : vector<76x1xf32> to vector<72x1xf32>
    %170 = vector.broadcast %169 : vector<72x1xf32> to vector<72x25xf32>
    %171 = vector.broadcast %19 : vector<1x25xf32> to vector<72x25xf32>
    %172 = arith.mulf %170, %171 : vector<72x25xf32>
    %173 = arith.addf %168, %172 : vector<72x25xf32>
    %174 = vector.extract_strided_slice %9 {offsets = [4, 0], sizes = [72, 1], strides = [1, 1]} : vector<76x1xf32> to vector<72x1xf32>
    %175 = vector.broadcast %174 : vector<72x1xf32> to vector<72x25xf32>
    %176 = vector.broadcast %21 : vector<1x25xf32> to vector<72x25xf32>
    %177 = arith.mulf %175, %176 : vector<72x25xf32>
    %178 = arith.addf %173, %177 : vector<72x25xf32>
    %cst_49 = arith.constant 0.000000e+00 : f32
    %179 = vector.broadcast %cst_49 : f32 to vector<72x25xf32>
    %180 = arith.cmpf oge, %178, %179 : vector<72x25xf32>
    %cst_50 = arith.constant 0.00999999977 : f32
    %181 = vector.broadcast %cst_50 : f32 to vector<72x25xf32>
    %182 = arith.mulf %181, %178 : vector<72x25xf32>
    %183 = arith.select %180, %178, %182 : vector<72x25xi1>, vector<72x25xf32>
    %184 = vector.extract_strided_slice %11 {offsets = [0, 0], sizes = [72, 1], strides = [1, 1]} : vector<76x1xf32> to vector<72x1xf32>
    %185 = vector.broadcast %184 : vector<72x1xf32> to vector<72x25xf32>
    %186 = vector.broadcast %13 : vector<1x25xf32> to vector<72x25xf32>
    %187 = arith.mulf %185, %186 : vector<72x25xf32>
    %188 = arith.addf %30, %187 : vector<72x25xf32>
    %189 = vector.extract_strided_slice %11 {offsets = [1, 0], sizes = [72, 1], strides = [1, 1]} : vector<76x1xf32> to vector<72x1xf32>
    %190 = vector.broadcast %189 : vector<72x1xf32> to vector<72x25xf32>
    %191 = vector.broadcast %15 : vector<1x25xf32> to vector<72x25xf32>
    %192 = arith.mulf %190, %191 : vector<72x25xf32>
    %193 = arith.addf %188, %192 : vector<72x25xf32>
    %194 = vector.extract_strided_slice %11 {offsets = [2, 0], sizes = [72, 1], strides = [1, 1]} : vector<76x1xf32> to vector<72x1xf32>
    %195 = vector.broadcast %194 : vector<72x1xf32> to vector<72x25xf32>
    %196 = vector.broadcast %17 : vector<1x25xf32> to vector<72x25xf32>
    %197 = arith.mulf %195, %196 : vector<72x25xf32>
    %198 = arith.addf %193, %197 : vector<72x25xf32>
    %199 = vector.extract_strided_slice %11 {offsets = [3, 0], sizes = [72, 1], strides = [1, 1]} : vector<76x1xf32> to vector<72x1xf32>
    %200 = vector.broadcast %199 : vector<72x1xf32> to vector<72x25xf32>
    %201 = vector.broadcast %19 : vector<1x25xf32> to vector<72x25xf32>
    %202 = arith.mulf %200, %201 : vector<72x25xf32>
    %203 = arith.addf %198, %202 : vector<72x25xf32>
    %204 = vector.extract_strided_slice %11 {offsets = [4, 0], sizes = [72, 1], strides = [1, 1]} : vector<76x1xf32> to vector<72x1xf32>
    %205 = vector.broadcast %204 : vector<72x1xf32> to vector<72x25xf32>
    %206 = vector.broadcast %21 : vector<1x25xf32> to vector<72x25xf32>
    %207 = arith.mulf %205, %206 : vector<72x25xf32>
    %208 = arith.addf %203, %207 : vector<72x25xf32>
    %cst_51 = arith.constant 0.000000e+00 : f32
    %209 = vector.broadcast %cst_51 : f32 to vector<72x25xf32>
    %210 = arith.cmpf oge, %208, %209 : vector<72x25xf32>
    %cst_52 = arith.constant 0.00999999977 : f32
    %211 = vector.broadcast %cst_52 : f32 to vector<72x25xf32>
    %212 = arith.mulf %211, %208 : vector<72x25xf32>
    %213 = arith.select %210, %208, %212 : vector<72x25xi1>, vector<72x25xf32>
    %214 = tpu.iota {dimensions = array<i32: 0>} : vector<36x72xi32>
    %215 = tpu.iota {dimensions = array<i32: 1>} : vector<36x72xi32>
    %c2_i32 = arith.constant 2 : i32
    %216 = vector.broadcast %c2_i32 : i32 to vector<36x72xi32>
    %217 = arith.muli %216, %214 : vector<36x72xi32>
    %218 = arith.cmpi eq, %215, %217 : vector<36x72xi32>
    %219 = arith.extui %218 : vector<36x72xi1> to vector<36x72xi32>
    %220 = arith.sitofp %219 : vector<36x72xi32> to vector<36x72xf32>
    %c2_i32_53 = arith.constant 2 : i32
    %221 = vector.broadcast %c2_i32_53 : i32 to vector<36x72xi32>
    %222 = arith.muli %221, %214 : vector<36x72xi32>
    %c1_i32 = arith.constant 1 : i32
    %223 = vector.broadcast %c1_i32 : i32 to vector<36x72xi32>
    %224 = arith.addi %222, %223 : vector<36x72xi32>
    %225 = arith.cmpi eq, %215, %224 : vector<36x72xi32>
    %226 = arith.extui %225 : vector<36x72xi1> to vector<36x72xi32>
    %227 = arith.sitofp %226 : vector<36x72xi32> to vector<36x72xf32>
    %cst_54 = arith.constant dense<0.000000e+00> : vector<72x25xf32>
    %228 = tpu.matmul %63, %23, %cst_54 {dimension_numbers = #tpu.dot_dimension_numbers<[1], [0], [0], [1], [0, 0, 1, 1], [], []>} : vector<72x25xf32>, vector<25x25xf32>, vector<72x25xf32> -> vector<72x25xf32>
    %229 = arith.addf %33, %228 : vector<72x25xf32>
    %cst_55 = arith.constant dense<0.000000e+00> : vector<72x25xf32>
    %230 = tpu.matmul %93, %25, %cst_55 {dimension_numbers = #tpu.dot_dimension_numbers<[1], [0], [0], [1], [0, 0, 1, 1], [], []>} : vector<72x25xf32>, vector<25x25xf32>, vector<72x25xf32> -> vector<72x25xf32>
    %231 = arith.addf %229, %230 : vector<72x25xf32>
    %cst_56 = arith.constant dense<0.000000e+00> : vector<72x25xf32>
    %232 = tpu.matmul %123, %27, %cst_56 {dimension_numbers = #tpu.dot_dimension_numbers<[1], [0], [0], [1], [0, 0, 1, 1], [], []>} : vector<72x25xf32>, vector<25x25xf32>, vector<72x25xf32> -> vector<72x25xf32>
    %233 = arith.addf %231, %232 : vector<72x25xf32>
    %cst_57 = arith.constant 0.000000e+00 : f32
    %234 = vector.broadcast %cst_57 : f32 to vector<72x25xf32>
    %235 = arith.cmpf oge, %233, %234 : vector<72x25xf32>
    %cst_58 = arith.constant 0.00999999977 : f32
    %236 = vector.broadcast %cst_58 : f32 to vector<72x25xf32>
    %237 = arith.mulf %236, %233 : vector<72x25xf32>
    %238 = arith.select %235, %233, %237 : vector<72x25xi1>, vector<72x25xf32>
    %cst_59 = arith.constant dense<0.000000e+00> : vector<36x25xf32>
    %239 = tpu.matmul %220, %238, %cst_59 {dimension_numbers = #tpu.dot_dimension_numbers<[1], [0], [0], [1], [0, 0, 1, 1], [], []>} : vector<36x72xf32>, vector<72x25xf32>, vector<36x25xf32> -> vector<36x25xf32>
    %cst_60 = arith.constant dense<0.000000e+00> : vector<36x25xf32>
    %240 = tpu.matmul %227, %238, %cst_60 {dimension_numbers = #tpu.dot_dimension_numbers<[1], [0], [0], [1], [0, 0, 1, 1], [], []>} : vector<36x72xf32>, vector<72x25xf32>, vector<36x25xf32> -> vector<36x25xf32>
    %241 = arith.maximumf %239, %240 : vector<36x25xf32>
    %cst_61 = arith.constant dense<0.000000e+00> : vector<72x25xf32>
    %242 = tpu.matmul %153, %23, %cst_61 {dimension_numbers = #tpu.dot_dimension_numbers<[1], [0], [0], [1], [0, 0, 1, 1], [], []>} : vector<72x25xf32>, vector<25x25xf32>, vector<72x25xf32> -> vector<72x25xf32>
    %243 = arith.addf %33, %242 : vector<72x25xf32>
    %cst_62 = arith.constant dense<0.000000e+00> : vector<72x25xf32>
    %244 = tpu.matmul %183, %25, %cst_62 {dimension_numbers = #tpu.dot_dimension_numbers<[1], [0], [0], [1], [0, 0, 1, 1], [], []>} : vector<72x25xf32>, vector<25x25xf32>, vector<72x25xf32> -> vector<72x25xf32>
    %245 = arith.addf %243, %244 : vector<72x25xf32>
    %cst_63 = arith.constant dense<0.000000e+00> : vector<72x25xf32>
    %246 = tpu.matmul %213, %27, %cst_63 {dimension_numbers = #tpu.dot_dimension_numbers<[1], [0], [0], [1], [0, 0, 1, 1], [], []>} : vector<72x25xf32>, vector<25x25xf32>, vector<72x25xf32> -> vector<72x25xf32>
    %247 = arith.addf %245, %246 : vector<72x25xf32>
    %cst_64 = arith.constant 0.000000e+00 : f32
    %248 = vector.broadcast %cst_64 : f32 to vector<72x25xf32>
    %249 = arith.cmpf oge, %247, %248 : vector<72x25xf32>
    %cst_65 = arith.constant 0.00999999977 : f32
    %250 = vector.broadcast %cst_65 : f32 to vector<72x25xf32>
    %251 = arith.mulf %250, %247 : vector<72x25xf32>
    %252 = arith.select %249, %247, %251 : vector<72x25xi1>, vector<72x25xf32>
    %cst_66 = arith.constant dense<0.000000e+00> : vector<36x25xf32>
    %253 = tpu.matmul %220, %252, %cst_66 {dimension_numbers = #tpu.dot_dimension_numbers<[1], [0], [0], [1], [0, 0, 1, 1], [], []>} : vector<36x72xf32>, vector<72x25xf32>, vector<36x25xf32> -> vector<36x25xf32>
    %cst_67 = arith.constant dense<0.000000e+00> : vector<36x25xf32>
    %254 = tpu.matmul %227, %252, %cst_67 {dimension_numbers = #tpu.dot_dimension_numbers<[1], [0], [0], [1], [0, 0, 1, 1], [], []>} : vector<36x72xf32>, vector<72x25xf32>, vector<36x25xf32> -> vector<36x25xf32>
    %255 = arith.maximumf %253, %254 : vector<36x25xf32>
    %cst_68 = arith.constant 0.000000e+00 : f32
    %256 = vector.broadcast %cst_68 : f32 to vector<72x25xf32>
    %257 = arith.cmpf oge, %33, %256 : vector<72x25xf32>
    %cst_69 = arith.constant 0.00999999977 : f32
    %258 = vector.broadcast %cst_69 : f32 to vector<72x25xf32>
    %259 = arith.mulf %258, %33 : vector<72x25xf32>
    %260 = arith.select %257, %33, %259 : vector<72x25xi1>, vector<72x25xf32>
    %cst_70 = arith.constant dense<0.000000e+00> : vector<36x25xf32>
    %261 = tpu.matmul %220, %260, %cst_70 {dimension_numbers = #tpu.dot_dimension_numbers<[1], [0], [0], [1], [0, 0, 1, 1], [], []>} : vector<36x72xf32>, vector<72x25xf32>, vector<36x25xf32> -> vector<36x25xf32>
    %cst_71 = arith.constant dense<0.000000e+00> : vector<36x25xf32>
    %262 = tpu.matmul %227, %260, %cst_71 {dimension_numbers = #tpu.dot_dimension_numbers<[1], [0], [0], [1], [0, 0, 1, 1], [], []>} : vector<36x72xf32>, vector<72x25xf32>, vector<36x25xf32> -> vector<36x25xf32>
    %263 = arith.maximumf %261, %262 : vector<36x25xf32>
    %c0_72 = arith.constant 0 : index
    %c0_73 = arith.constant 0 : index
    %c0_74 = arith.constant 0 : index
    %264 = vector.load %arg6[%c0_72, %c0_73, %c0_74] : memref<5x25x50xf32, #tpu.memory_space<vmem>>, vector<1x25x50xf32>
    %265 = vector.shape_cast %264 : vector<1x25x50xf32> to vector<25x50xf32>
    %c1_75 = arith.constant 1 : index
    %c0_76 = arith.constant 0 : index
    %c0_77 = arith.constant 0 : index
    %266 = vector.load %arg6[%c1_75, %c0_76, %c0_77] : memref<5x25x50xf32, #tpu.memory_space<vmem>>, vector<1x25x50xf32>
    %267 = vector.shape_cast %266 : vector<1x25x50xf32> to vector<25x50xf32>
    %c2_78 = arith.constant 2 : index
    %c0_79 = arith.constant 0 : index
    %c0_80 = arith.constant 0 : index
    %268 = vector.load %arg6[%c2_78, %c0_79, %c0_80] : memref<5x25x50xf32, #tpu.memory_space<vmem>>, vector<1x25x50xf32>
    %269 = vector.shape_cast %268 : vector<1x25x50xf32> to vector<25x50xf32>
    %c3_81 = arith.constant 3 : index
    %c0_82 = arith.constant 0 : index
    %c0_83 = arith.constant 0 : index
    %270 = vector.load %arg6[%c3_81, %c0_82, %c0_83] : memref<5x25x50xf32, #tpu.memory_space<vmem>>, vector<1x25x50xf32>
    %271 = vector.shape_cast %270 : vector<1x25x50xf32> to vector<25x50xf32>
    %c4_84 = arith.constant 4 : index
    %c0_85 = arith.constant 0 : index
    %c0_86 = arith.constant 0 : index
    %272 = vector.load %arg6[%c4_84, %c0_85, %c0_86] : memref<5x25x50xf32, #tpu.memory_space<vmem>>, vector<1x25x50xf32>
    %273 = vector.shape_cast %272 : vector<1x25x50xf32> to vector<25x50xf32>
    %c0_87 = arith.constant 0 : index
    %c0_88 = arith.constant 0 : index
    %c0_89 = arith.constant 0 : index
    %274 = vector.load %arg8[%c0_87, %c0_88, %c0_89] : memref<3x50x50xf32, #tpu.memory_space<vmem>>, vector<1x50x50xf32>
    %275 = vector.shape_cast %274 : vector<1x50x50xf32> to vector<50x50xf32>
    %c1_90 = arith.constant 1 : index
    %c0_91 = arith.constant 0 : index
    %c0_92 = arith.constant 0 : index
    %276 = vector.load %arg8[%c1_90, %c0_91, %c0_92] : memref<3x50x50xf32, #tpu.memory_space<vmem>>, vector<1x50x50xf32>
    %277 = vector.shape_cast %276 : vector<1x50x50xf32> to vector<50x50xf32>
    %c2_93 = arith.constant 2 : index
    %c0_94 = arith.constant 0 : index
    %c0_95 = arith.constant 0 : index
    %278 = vector.load %arg8[%c2_93, %c0_94, %c0_95] : memref<3x50x50xf32, #tpu.memory_space<vmem>>, vector<1x50x50xf32>
    %279 = vector.shape_cast %278 : vector<1x50x50xf32> to vector<50x50xf32>
    %c0_96 = arith.constant 0 : index
    %c0_97 = arith.constant 0 : index
    %280 = vector.load %arg7[%c0_96, %c0_97] : memref<1x50xf32, #tpu.memory_space<vmem>>, vector<1x50xf32>
    %281 = vector.shape_cast %280 : vector<1x50xf32> to vector<1x50xf32>
    %282 = vector.broadcast %281 : vector<1x50xf32> to vector<32x50xf32>
    %c0_98 = arith.constant 0 : index
    %c0_99 = arith.constant 0 : index
    %283 = vector.load %arg9[%c0_98, %c0_99] : memref<1x50xf32, #tpu.memory_space<vmem>>, vector<1x50xf32>
    %284 = vector.shape_cast %283 : vector<1x50xf32> to vector<1x50xf32>
    %285 = vector.broadcast %284 : vector<1x50xf32> to vector<32x50xf32>
    %286 = vector.extract_strided_slice %241 {offsets = [0, 0], sizes = [32, 25], strides = [1, 1]} : vector<36x25xf32> to vector<32x25xf32>
    %cst_100 = arith.constant dense<0.000000e+00> : vector<32x50xf32>
    %287 = tpu.matmul %286, %265, %cst_100 {dimension_numbers = #tpu.dot_dimension_numbers<[1], [0], [0], [1], [0, 0, 1, 1], [], []>} : vector<32x25xf32>, vector<25x50xf32>, vector<32x50xf32> -> vector<32x50xf32>
    %288 = arith.addf %282, %287 : vector<32x50xf32>
    %289 = vector.extract_strided_slice %241 {offsets = [1, 0], sizes = [32, 25], strides = [1, 1]} : vector<36x25xf32> to vector<32x25xf32>
    %cst_101 = arith.constant dense<0.000000e+00> : vector<32x50xf32>
    %290 = tpu.matmul %289, %267, %cst_101 {dimension_numbers = #tpu.dot_dimension_numbers<[1], [0], [0], [1], [0, 0, 1, 1], [], []>} : vector<32x25xf32>, vector<25x50xf32>, vector<32x50xf32> -> vector<32x50xf32>
    %291 = arith.addf %288, %290 : vector<32x50xf32>
    %292 = vector.extract_strided_slice %241 {offsets = [2, 0], sizes = [32, 25], strides = [1, 1]} : vector<36x25xf32> to vector<32x25xf32>
    %cst_102 = arith.constant dense<0.000000e+00> : vector<32x50xf32>
    %293 = tpu.matmul %292, %269, %cst_102 {dimension_numbers = #tpu.dot_dimension_numbers<[1], [0], [0], [1], [0, 0, 1, 1], [], []>} : vector<32x25xf32>, vector<25x50xf32>, vector<32x50xf32> -> vector<32x50xf32>
    %294 = arith.addf %291, %293 : vector<32x50xf32>
    %295 = vector.extract_strided_slice %241 {offsets = [3, 0], sizes = [32, 25], strides = [1, 1]} : vector<36x25xf32> to vector<32x25xf32>
    %cst_103 = arith.constant dense<0.000000e+00> : vector<32x50xf32>
    %296 = tpu.matmul %295, %271, %cst_103 {dimension_numbers = #tpu.dot_dimension_numbers<[1], [0], [0], [1], [0, 0, 1, 1], [], []>} : vector<32x25xf32>, vector<25x50xf32>, vector<32x50xf32> -> vector<32x50xf32>
    %297 = arith.addf %294, %296 : vector<32x50xf32>
    %298 = vector.extract_strided_slice %241 {offsets = [4, 0], sizes = [32, 25], strides = [1, 1]} : vector<36x25xf32> to vector<32x25xf32>
    %cst_104 = arith.constant dense<0.000000e+00> : vector<32x50xf32>
    %299 = tpu.matmul %298, %273, %cst_104 {dimension_numbers = #tpu.dot_dimension_numbers<[1], [0], [0], [1], [0, 0, 1, 1], [], []>} : vector<32x25xf32>, vector<25x50xf32>, vector<32x50xf32> -> vector<32x50xf32>
    %300 = arith.addf %297, %299 : vector<32x50xf32>
    %cst_105 = arith.constant 0.000000e+00 : f32
    %301 = vector.broadcast %cst_105 : f32 to vector<32x50xf32>
    %302 = arith.cmpf oge, %300, %301 : vector<32x50xf32>
    %cst_106 = arith.constant 0.00999999977 : f32
    %303 = vector.broadcast %cst_106 : f32 to vector<32x50xf32>
    %304 = arith.mulf %303, %300 : vector<32x50xf32>
    %305 = arith.select %302, %300, %304 : vector<32x50xi1>, vector<32x50xf32>
    %306 = vector.extract_strided_slice %255 {offsets = [0, 0], sizes = [32, 25], strides = [1, 1]} : vector<36x25xf32> to vector<32x25xf32>
    %cst_107 = arith.constant dense<0.000000e+00> : vector<32x50xf32>
    %307 = tpu.matmul %306, %265, %cst_107 {dimension_numbers = #tpu.dot_dimension_numbers<[1], [0], [0], [1], [0, 0, 1, 1], [], []>} : vector<32x25xf32>, vector<25x50xf32>, vector<32x50xf32> -> vector<32x50xf32>
    %308 = arith.addf %282, %307 : vector<32x50xf32>
    %309 = vector.extract_strided_slice %255 {offsets = [1, 0], sizes = [32, 25], strides = [1, 1]} : vector<36x25xf32> to vector<32x25xf32>
    %cst_108 = arith.constant dense<0.000000e+00> : vector<32x50xf32>
    %310 = tpu.matmul %309, %267, %cst_108 {dimension_numbers = #tpu.dot_dimension_numbers<[1], [0], [0], [1], [0, 0, 1, 1], [], []>} : vector<32x25xf32>, vector<25x50xf32>, vector<32x50xf32> -> vector<32x50xf32>
    %311 = arith.addf %308, %310 : vector<32x50xf32>
    %312 = vector.extract_strided_slice %255 {offsets = [2, 0], sizes = [32, 25], strides = [1, 1]} : vector<36x25xf32> to vector<32x25xf32>
    %cst_109 = arith.constant dense<0.000000e+00> : vector<32x50xf32>
    %313 = tpu.matmul %312, %269, %cst_109 {dimension_numbers = #tpu.dot_dimension_numbers<[1], [0], [0], [1], [0, 0, 1, 1], [], []>} : vector<32x25xf32>, vector<25x50xf32>, vector<32x50xf32> -> vector<32x50xf32>
    %314 = arith.addf %311, %313 : vector<32x50xf32>
    %315 = vector.extract_strided_slice %255 {offsets = [3, 0], sizes = [32, 25], strides = [1, 1]} : vector<36x25xf32> to vector<32x25xf32>
    %cst_110 = arith.constant dense<0.000000e+00> : vector<32x50xf32>
    %316 = tpu.matmul %315, %271, %cst_110 {dimension_numbers = #tpu.dot_dimension_numbers<[1], [0], [0], [1], [0, 0, 1, 1], [], []>} : vector<32x25xf32>, vector<25x50xf32>, vector<32x50xf32> -> vector<32x50xf32>
    %317 = arith.addf %314, %316 : vector<32x50xf32>
    %318 = vector.extract_strided_slice %255 {offsets = [4, 0], sizes = [32, 25], strides = [1, 1]} : vector<36x25xf32> to vector<32x25xf32>
    %cst_111 = arith.constant dense<0.000000e+00> : vector<32x50xf32>
    %319 = tpu.matmul %318, %273, %cst_111 {dimension_numbers = #tpu.dot_dimension_numbers<[1], [0], [0], [1], [0, 0, 1, 1], [], []>} : vector<32x25xf32>, vector<25x50xf32>, vector<32x50xf32> -> vector<32x50xf32>
    %320 = arith.addf %317, %319 : vector<32x50xf32>
    %cst_112 = arith.constant 0.000000e+00 : f32
    %321 = vector.broadcast %cst_112 : f32 to vector<32x50xf32>
    %322 = arith.cmpf oge, %320, %321 : vector<32x50xf32>
    %cst_113 = arith.constant 0.00999999977 : f32
    %323 = vector.broadcast %cst_113 : f32 to vector<32x50xf32>
    %324 = arith.mulf %323, %320 : vector<32x50xf32>
    %325 = arith.select %322, %320, %324 : vector<32x50xi1>, vector<32x50xf32>
    %326 = vector.extract_strided_slice %263 {offsets = [0, 0], sizes = [32, 25], strides = [1, 1]} : vector<36x25xf32> to vector<32x25xf32>
    %cst_114 = arith.constant dense<0.000000e+00> : vector<32x50xf32>
    %327 = tpu.matmul %326, %265, %cst_114 {dimension_numbers = #tpu.dot_dimension_numbers<[1], [0], [0], [1], [0, 0, 1, 1], [], []>} : vector<32x25xf32>, vector<25x50xf32>, vector<32x50xf32> -> vector<32x50xf32>
    %328 = arith.addf %282, %327 : vector<32x50xf32>
    %329 = vector.extract_strided_slice %263 {offsets = [1, 0], sizes = [32, 25], strides = [1, 1]} : vector<36x25xf32> to vector<32x25xf32>
    %cst_115 = arith.constant dense<0.000000e+00> : vector<32x50xf32>
    %330 = tpu.matmul %329, %267, %cst_115 {dimension_numbers = #tpu.dot_dimension_numbers<[1], [0], [0], [1], [0, 0, 1, 1], [], []>} : vector<32x25xf32>, vector<25x50xf32>, vector<32x50xf32> -> vector<32x50xf32>
    %331 = arith.addf %328, %330 : vector<32x50xf32>
    %332 = vector.extract_strided_slice %263 {offsets = [2, 0], sizes = [32, 25], strides = [1, 1]} : vector<36x25xf32> to vector<32x25xf32>
    %cst_116 = arith.constant dense<0.000000e+00> : vector<32x50xf32>
    %333 = tpu.matmul %332, %269, %cst_116 {dimension_numbers = #tpu.dot_dimension_numbers<[1], [0], [0], [1], [0, 0, 1, 1], [], []>} : vector<32x25xf32>, vector<25x50xf32>, vector<32x50xf32> -> vector<32x50xf32>
    %334 = arith.addf %331, %333 : vector<32x50xf32>
    %335 = vector.extract_strided_slice %263 {offsets = [3, 0], sizes = [32, 25], strides = [1, 1]} : vector<36x25xf32> to vector<32x25xf32>
    %cst_117 = arith.constant dense<0.000000e+00> : vector<32x50xf32>
    %336 = tpu.matmul %335, %271, %cst_117 {dimension_numbers = #tpu.dot_dimension_numbers<[1], [0], [0], [1], [0, 0, 1, 1], [], []>} : vector<32x25xf32>, vector<25x50xf32>, vector<32x50xf32> -> vector<32x50xf32>
    %337 = arith.addf %334, %336 : vector<32x50xf32>
    %338 = vector.extract_strided_slice %263 {offsets = [4, 0], sizes = [32, 25], strides = [1, 1]} : vector<36x25xf32> to vector<32x25xf32>
    %cst_118 = arith.constant dense<0.000000e+00> : vector<32x50xf32>
    %339 = tpu.matmul %338, %273, %cst_118 {dimension_numbers = #tpu.dot_dimension_numbers<[1], [0], [0], [1], [0, 0, 1, 1], [], []>} : vector<32x25xf32>, vector<25x50xf32>, vector<32x50xf32> -> vector<32x50xf32>
    %340 = arith.addf %337, %339 : vector<32x50xf32>
    %cst_119 = arith.constant 0.000000e+00 : f32
    %341 = vector.broadcast %cst_119 : f32 to vector<32x50xf32>
    %342 = arith.cmpf oge, %340, %341 : vector<32x50xf32>
    %cst_120 = arith.constant 0.00999999977 : f32
    %343 = vector.broadcast %cst_120 : f32 to vector<32x50xf32>
    %344 = arith.mulf %343, %340 : vector<32x50xf32>
    %345 = arith.select %342, %340, %344 : vector<32x50xi1>, vector<32x50xf32>
    %346 = tpu.iota {dimensions = array<i32: 0>} : vector<16x32xi32>
    %347 = tpu.iota {dimensions = array<i32: 1>} : vector<16x32xi32>
    %c2_i32_121 = arith.constant 2 : i32
    %348 = vector.broadcast %c2_i32_121 : i32 to vector<16x32xi32>
    %349 = arith.muli %348, %346 : vector<16x32xi32>
    %350 = arith.cmpi eq, %347, %349 : vector<16x32xi32>
    %351 = arith.extui %350 : vector<16x32xi1> to vector<16x32xi32>
    %352 = arith.sitofp %351 : vector<16x32xi32> to vector<16x32xf32>
    %c2_i32_122 = arith.constant 2 : i32
    %353 = vector.broadcast %c2_i32_122 : i32 to vector<16x32xi32>
    %354 = arith.muli %353, %346 : vector<16x32xi32>
    %c1_i32_123 = arith.constant 1 : i32
    %355 = vector.broadcast %c1_i32_123 : i32 to vector<16x32xi32>
    %356 = arith.addi %354, %355 : vector<16x32xi32>
    %357 = arith.cmpi eq, %347, %356 : vector<16x32xi32>
    %358 = arith.extui %357 : vector<16x32xi1> to vector<16x32xi32>
    %359 = arith.sitofp %358 : vector<16x32xi32> to vector<16x32xf32>
    %cst_124 = arith.constant dense<0.000000e+00> : vector<32x50xf32>
    %360 = tpu.matmul %305, %275, %cst_124 {dimension_numbers = #tpu.dot_dimension_numbers<[1], [0], [0], [1], [0, 0, 1, 1], [], []>} : vector<32x50xf32>, vector<50x50xf32>, vector<32x50xf32> -> vector<32x50xf32>
    %361 = arith.addf %285, %360 : vector<32x50xf32>
    %cst_125 = arith.constant dense<0.000000e+00> : vector<32x50xf32>
    %362 = tpu.matmul %325, %277, %cst_125 {dimension_numbers = #tpu.dot_dimension_numbers<[1], [0], [0], [1], [0, 0, 1, 1], [], []>} : vector<32x50xf32>, vector<50x50xf32>, vector<32x50xf32> -> vector<32x50xf32>
    %363 = arith.addf %361, %362 : vector<32x50xf32>
    %cst_126 = arith.constant dense<0.000000e+00> : vector<32x50xf32>
    %364 = tpu.matmul %345, %279, %cst_126 {dimension_numbers = #tpu.dot_dimension_numbers<[1], [0], [0], [1], [0, 0, 1, 1], [], []>} : vector<32x50xf32>, vector<50x50xf32>, vector<32x50xf32> -> vector<32x50xf32>
    %365 = arith.addf %363, %364 : vector<32x50xf32>
    %cst_127 = arith.constant 0.000000e+00 : f32
    %366 = vector.broadcast %cst_127 : f32 to vector<32x50xf32>
    %367 = arith.cmpf oge, %365, %366 : vector<32x50xf32>
    %cst_128 = arith.constant 0.00999999977 : f32
    %368 = vector.broadcast %cst_128 : f32 to vector<32x50xf32>
    %369 = arith.mulf %368, %365 : vector<32x50xf32>
    %370 = arith.select %367, %365, %369 : vector<32x50xi1>, vector<32x50xf32>
    %cst_129 = arith.constant dense<0.000000e+00> : vector<16x50xf32>
    %371 = tpu.matmul %352, %370, %cst_129 {dimension_numbers = #tpu.dot_dimension_numbers<[1], [0], [0], [1], [0, 0, 1, 1], [], []>} : vector<16x32xf32>, vector<32x50xf32>, vector<16x50xf32> -> vector<16x50xf32>
    %cst_130 = arith.constant dense<0.000000e+00> : vector<16x50xf32>
    %372 = tpu.matmul %359, %370, %cst_130 {dimension_numbers = #tpu.dot_dimension_numbers<[1], [0], [0], [1], [0, 0, 1, 1], [], []>} : vector<16x32xf32>, vector<32x50xf32>, vector<16x50xf32> -> vector<16x50xf32>
    %373 = arith.maximumf %371, %372 : vector<16x50xf32>
    %cst_131 = arith.constant 0.000000e+00 : f32
    %374 = vector.broadcast %cst_131 : f32 to vector<32x50xf32>
    %375 = arith.cmpf oge, %285, %374 : vector<32x50xf32>
    %cst_132 = arith.constant 0.00999999977 : f32
    %376 = vector.broadcast %cst_132 : f32 to vector<32x50xf32>
    %377 = arith.mulf %376, %285 : vector<32x50xf32>
    %378 = arith.select %375, %285, %377 : vector<32x50xi1>, vector<32x50xf32>
    %cst_133 = arith.constant dense<0.000000e+00> : vector<16x50xf32>
    %379 = tpu.matmul %352, %378, %cst_133 {dimension_numbers = #tpu.dot_dimension_numbers<[1], [0], [0], [1], [0, 0, 1, 1], [], []>} : vector<16x32xf32>, vector<32x50xf32>, vector<16x50xf32> -> vector<16x50xf32>
    %cst_134 = arith.constant dense<0.000000e+00> : vector<16x50xf32>
    %380 = tpu.matmul %359, %378, %cst_134 {dimension_numbers = #tpu.dot_dimension_numbers<[1], [0], [0], [1], [0, 0, 1, 1], [], []>} : vector<16x32xf32>, vector<32x50xf32>, vector<16x50xf32> -> vector<16x50xf32>
    %381 = arith.maximumf %379, %380 : vector<16x50xf32>
    %c0_135 = arith.constant 0 : index
    %c0_136 = arith.constant 0 : index
    %c0_137 = arith.constant 0 : index
    %382 = vector.load %arg10[%c0_135, %c0_136, %c0_137] : memref<5x50x100xf32, #tpu.memory_space<vmem>>, vector<1x50x100xf32>
    %383 = vector.shape_cast %382 : vector<1x50x100xf32> to vector<50x100xf32>
    %c1_138 = arith.constant 1 : index
    %c0_139 = arith.constant 0 : index
    %c0_140 = arith.constant 0 : index
    %384 = vector.load %arg10[%c1_138, %c0_139, %c0_140] : memref<5x50x100xf32, #tpu.memory_space<vmem>>, vector<1x50x100xf32>
    %385 = vector.shape_cast %384 : vector<1x50x100xf32> to vector<50x100xf32>
    %c2_141 = arith.constant 2 : index
    %c0_142 = arith.constant 0 : index
    %c0_143 = arith.constant 0 : index
    %386 = vector.load %arg10[%c2_141, %c0_142, %c0_143] : memref<5x50x100xf32, #tpu.memory_space<vmem>>, vector<1x50x100xf32>
    %387 = vector.shape_cast %386 : vector<1x50x100xf32> to vector<50x100xf32>
    %c3_144 = arith.constant 3 : index
    %c0_145 = arith.constant 0 : index
    %c0_146 = arith.constant 0 : index
    %388 = vector.load %arg10[%c3_144, %c0_145, %c0_146] : memref<5x50x100xf32, #tpu.memory_space<vmem>>, vector<1x50x100xf32>
    %389 = vector.shape_cast %388 : vector<1x50x100xf32> to vector<50x100xf32>
    %c4_147 = arith.constant 4 : index
    %c0_148 = arith.constant 0 : index
    %c0_149 = arith.constant 0 : index
    %390 = vector.load %arg10[%c4_147, %c0_148, %c0_149] : memref<5x50x100xf32, #tpu.memory_space<vmem>>, vector<1x50x100xf32>
    %391 = vector.shape_cast %390 : vector<1x50x100xf32> to vector<50x100xf32>
    %c0_150 = arith.constant 0 : index
    %c0_151 = arith.constant 0 : index
    %c0_152 = arith.constant 0 : index
    %392 = vector.load %arg12[%c0_150, %c0_151, %c0_152] : memref<3x100x100xf32, #tpu.memory_space<vmem>>, vector<1x100x100xf32>
    %393 = vector.shape_cast %392 : vector<1x100x100xf32> to vector<100x100xf32>
    %c1_153 = arith.constant 1 : index
    %c0_154 = arith.constant 0 : index
    %c0_155 = arith.constant 0 : index
    %394 = vector.load %arg12[%c1_153, %c0_154, %c0_155] : memref<3x100x100xf32, #tpu.memory_space<vmem>>, vector<1x100x100xf32>
    %395 = vector.shape_cast %394 : vector<1x100x100xf32> to vector<100x100xf32>
    %c2_156 = arith.constant 2 : index
    %c0_157 = arith.constant 0 : index
    %c0_158 = arith.constant 0 : index
    %396 = vector.load %arg12[%c2_156, %c0_157, %c0_158] : memref<3x100x100xf32, #tpu.memory_space<vmem>>, vector<1x100x100xf32>
    %397 = vector.shape_cast %396 : vector<1x100x100xf32> to vector<100x100xf32>
    %c0_159 = arith.constant 0 : index
    %c0_160 = arith.constant 0 : index
    %398 = vector.load %arg11[%c0_159, %c0_160] : memref<1x100xf32, #tpu.memory_space<vmem>>, vector<1x100xf32>
    %399 = vector.shape_cast %398 : vector<1x100xf32> to vector<1x100xf32>
    %400 = vector.broadcast %399 : vector<1x100xf32> to vector<12x100xf32>
    %c0_161 = arith.constant 0 : index
    %c0_162 = arith.constant 0 : index
    %401 = vector.load %arg13[%c0_161, %c0_162] : memref<1x100xf32, #tpu.memory_space<vmem>>, vector<1x100xf32>
    %402 = vector.shape_cast %401 : vector<1x100xf32> to vector<1x100xf32>
    %403 = vector.broadcast %402 : vector<1x100xf32> to vector<12x100xf32>
    %cst_163 = arith.constant 0.000000e+00 : f32
    %404 = vector.broadcast %cst_163 : f32 to vector<12x100xf32>
    %405 = arith.cmpf oge, %400, %404 : vector<12x100xf32>
    %cst_164 = arith.constant 0.00999999977 : f32
    %406 = vector.broadcast %cst_164 : f32 to vector<12x100xf32>
    %407 = arith.mulf %406, %400 : vector<12x100xf32>
    %408 = arith.select %405, %400, %407 : vector<12x100xi1>, vector<12x100xf32>
    %cst_165 = arith.constant 0.000000e+00 : f32
    %409 = vector.broadcast %cst_165 : f32 to vector<12x100xf32>
    %410 = arith.cmpf oge, %400, %409 : vector<12x100xf32>
    %cst_166 = arith.constant 0.00999999977 : f32
    %411 = vector.broadcast %cst_166 : f32 to vector<12x100xf32>
    %412 = arith.mulf %411, %400 : vector<12x100xf32>
    %413 = arith.select %410, %400, %412 : vector<12x100xi1>, vector<12x100xf32>
    %414 = vector.extract_strided_slice %373 {offsets = [0, 0], sizes = [12, 50], strides = [1, 1]} : vector<16x50xf32> to vector<12x50xf32>
    %cst_167 = arith.constant dense<0.000000e+00> : vector<12x100xf32>
    %415 = tpu.matmul %414, %383, %cst_167 {dimension_numbers = #tpu.dot_dimension_numbers<[1], [0], [0], [1], [0, 0, 1, 1], [], []>} : vector<12x50xf32>, vector<50x100xf32>, vector<12x100xf32> -> vector<12x100xf32>
    %416 = arith.addf %400, %415 : vector<12x100xf32>
    %417 = vector.extract_strided_slice %373 {offsets = [1, 0], sizes = [12, 50], strides = [1, 1]} : vector<16x50xf32> to vector<12x50xf32>
    %cst_168 = arith.constant dense<0.000000e+00> : vector<12x100xf32>
    %418 = tpu.matmul %417, %385, %cst_168 {dimension_numbers = #tpu.dot_dimension_numbers<[1], [0], [0], [1], [0, 0, 1, 1], [], []>} : vector<12x50xf32>, vector<50x100xf32>, vector<12x100xf32> -> vector<12x100xf32>
    %419 = arith.addf %416, %418 : vector<12x100xf32>
    %420 = vector.extract_strided_slice %373 {offsets = [2, 0], sizes = [12, 50], strides = [1, 1]} : vector<16x50xf32> to vector<12x50xf32>
    %cst_169 = arith.constant dense<0.000000e+00> : vector<12x100xf32>
    %421 = tpu.matmul %420, %387, %cst_169 {dimension_numbers = #tpu.dot_dimension_numbers<[1], [0], [0], [1], [0, 0, 1, 1], [], []>} : vector<12x50xf32>, vector<50x100xf32>, vector<12x100xf32> -> vector<12x100xf32>
    %422 = arith.addf %419, %421 : vector<12x100xf32>
    %423 = vector.extract_strided_slice %373 {offsets = [3, 0], sizes = [12, 50], strides = [1, 1]} : vector<16x50xf32> to vector<12x50xf32>
    %cst_170 = arith.constant dense<0.000000e+00> : vector<12x100xf32>
    %424 = tpu.matmul %423, %389, %cst_170 {dimension_numbers = #tpu.dot_dimension_numbers<[1], [0], [0], [1], [0, 0, 1, 1], [], []>} : vector<12x50xf32>, vector<50x100xf32>, vector<12x100xf32> -> vector<12x100xf32>
    %425 = arith.addf %422, %424 : vector<12x100xf32>
    %426 = vector.extract_strided_slice %373 {offsets = [4, 0], sizes = [12, 50], strides = [1, 1]} : vector<16x50xf32> to vector<12x50xf32>
    %cst_171 = arith.constant dense<0.000000e+00> : vector<12x100xf32>
    %427 = tpu.matmul %426, %391, %cst_171 {dimension_numbers = #tpu.dot_dimension_numbers<[1], [0], [0], [1], [0, 0, 1, 1], [], []>} : vector<12x50xf32>, vector<50x100xf32>, vector<12x100xf32> -> vector<12x100xf32>
    %428 = arith.addf %425, %427 : vector<12x100xf32>
    %cst_172 = arith.constant 0.000000e+00 : f32
    %429 = vector.broadcast %cst_172 : f32 to vector<12x100xf32>
    %430 = arith.cmpf oge, %428, %429 : vector<12x100xf32>
    %cst_173 = arith.constant 0.00999999977 : f32
    %431 = vector.broadcast %cst_173 : f32 to vector<12x100xf32>
    %432 = arith.mulf %431, %428 : vector<12x100xf32>
    %433 = arith.select %430, %428, %432 : vector<12x100xi1>, vector<12x100xf32>
    %434 = vector.extract_strided_slice %381 {offsets = [0, 0], sizes = [12, 50], strides = [1, 1]} : vector<16x50xf32> to vector<12x50xf32>
    %cst_174 = arith.constant dense<0.000000e+00> : vector<12x100xf32>
    %435 = tpu.matmul %434, %383, %cst_174 {dimension_numbers = #tpu.dot_dimension_numbers<[1], [0], [0], [1], [0, 0, 1, 1], [], []>} : vector<12x50xf32>, vector<50x100xf32>, vector<12x100xf32> -> vector<12x100xf32>
    %436 = arith.addf %400, %435 : vector<12x100xf32>
    %437 = vector.extract_strided_slice %381 {offsets = [1, 0], sizes = [12, 50], strides = [1, 1]} : vector<16x50xf32> to vector<12x50xf32>
    %cst_175 = arith.constant dense<0.000000e+00> : vector<12x100xf32>
    %438 = tpu.matmul %437, %385, %cst_175 {dimension_numbers = #tpu.dot_dimension_numbers<[1], [0], [0], [1], [0, 0, 1, 1], [], []>} : vector<12x50xf32>, vector<50x100xf32>, vector<12x100xf32> -> vector<12x100xf32>
    %439 = arith.addf %436, %438 : vector<12x100xf32>
    %440 = vector.extract_strided_slice %381 {offsets = [2, 0], sizes = [12, 50], strides = [1, 1]} : vector<16x50xf32> to vector<12x50xf32>
    %cst_176 = arith.constant dense<0.000000e+00> : vector<12x100xf32>
    %441 = tpu.matmul %440, %387, %cst_176 {dimension_numbers = #tpu.dot_dimension_numbers<[1], [0], [0], [1], [0, 0, 1, 1], [], []>} : vector<12x50xf32>, vector<50x100xf32>, vector<12x100xf32> -> vector<12x100xf32>
    %442 = arith.addf %439, %441 : vector<12x100xf32>
    %443 = vector.extract_strided_slice %381 {offsets = [3, 0], sizes = [12, 50], strides = [1, 1]} : vector<16x50xf32> to vector<12x50xf32>
    %cst_177 = arith.constant dense<0.000000e+00> : vector<12x100xf32>
    %444 = tpu.matmul %443, %389, %cst_177 {dimension_numbers = #tpu.dot_dimension_numbers<[1], [0], [0], [1], [0, 0, 1, 1], [], []>} : vector<12x50xf32>, vector<50x100xf32>, vector<12x100xf32> -> vector<12x100xf32>
    %445 = arith.addf %442, %444 : vector<12x100xf32>
    %446 = vector.extract_strided_slice %381 {offsets = [4, 0], sizes = [12, 50], strides = [1, 1]} : vector<16x50xf32> to vector<12x50xf32>
    %cst_178 = arith.constant dense<0.000000e+00> : vector<12x100xf32>
    %447 = tpu.matmul %446, %391, %cst_178 {dimension_numbers = #tpu.dot_dimension_numbers<[1], [0], [0], [1], [0, 0, 1, 1], [], []>} : vector<12x50xf32>, vector<50x100xf32>, vector<12x100xf32> -> vector<12x100xf32>
    %448 = arith.addf %445, %447 : vector<12x100xf32>
    %cst_179 = arith.constant 0.000000e+00 : f32
    %449 = vector.broadcast %cst_179 : f32 to vector<12x100xf32>
    %450 = arith.cmpf oge, %448, %449 : vector<12x100xf32>
    %cst_180 = arith.constant 0.00999999977 : f32
    %451 = vector.broadcast %cst_180 : f32 to vector<12x100xf32>
    %452 = arith.mulf %451, %448 : vector<12x100xf32>
    %453 = arith.select %450, %448, %452 : vector<12x100xi1>, vector<12x100xf32>
    %cst_181 = arith.constant 0.000000e+00 : f32
    %454 = vector.broadcast %cst_181 : f32 to vector<12x100xf32>
    %455 = arith.cmpf oge, %400, %454 : vector<12x100xf32>
    %cst_182 = arith.constant 0.00999999977 : f32
    %456 = vector.broadcast %cst_182 : f32 to vector<12x100xf32>
    %457 = arith.mulf %456, %400 : vector<12x100xf32>
    %458 = arith.select %455, %400, %457 : vector<12x100xi1>, vector<12x100xf32>
    %459 = tpu.iota {dimensions = array<i32: 0>} : vector<6x12xi32>
    %460 = tpu.iota {dimensions = array<i32: 1>} : vector<6x12xi32>
    %c2_i32_183 = arith.constant 2 : i32
    %461 = vector.broadcast %c2_i32_183 : i32 to vector<6x12xi32>
    %462 = arith.muli %461, %459 : vector<6x12xi32>
    %463 = arith.cmpi eq, %460, %462 : vector<6x12xi32>
    %464 = arith.extui %463 : vector<6x12xi1> to vector<6x12xi32>
    %465 = arith.sitofp %464 : vector<6x12xi32> to vector<6x12xf32>
    %c2_i32_184 = arith.constant 2 : i32
    %466 = vector.broadcast %c2_i32_184 : i32 to vector<6x12xi32>
    %467 = arith.muli %466, %459 : vector<6x12xi32>
    %c1_i32_185 = arith.constant 1 : i32
    %468 = vector.broadcast %c1_i32_185 : i32 to vector<6x12xi32>
    %469 = arith.addi %467, %468 : vector<6x12xi32>
    %470 = arith.cmpi eq, %460, %469 : vector<6x12xi32>
    %471 = arith.extui %470 : vector<6x12xi1> to vector<6x12xi32>
    %472 = arith.sitofp %471 : vector<6x12xi32> to vector<6x12xf32>
    %cst_186 = arith.constant dense<0.000000e+00> : vector<12x100xf32>
    %473 = tpu.matmul %408, %395, %cst_186 {dimension_numbers = #tpu.dot_dimension_numbers<[1], [0], [0], [1], [0, 0, 1, 1], [], []>} : vector<12x100xf32>, vector<100x100xf32>, vector<12x100xf32> -> vector<12x100xf32>
    %474 = arith.addf %403, %473 : vector<12x100xf32>
    %cst_187 = arith.constant dense<0.000000e+00> : vector<12x100xf32>
    %475 = tpu.matmul %413, %397, %cst_187 {dimension_numbers = #tpu.dot_dimension_numbers<[1], [0], [0], [1], [0, 0, 1, 1], [], []>} : vector<12x100xf32>, vector<100x100xf32>, vector<12x100xf32> -> vector<12x100xf32>
    %476 = arith.addf %474, %475 : vector<12x100xf32>
    %cst_188 = arith.constant 0.000000e+00 : f32
    %477 = vector.broadcast %cst_188 : f32 to vector<12x100xf32>
    %478 = arith.cmpf oge, %476, %477 : vector<12x100xf32>
    %cst_189 = arith.constant 0.00999999977 : f32
    %479 = vector.broadcast %cst_189 : f32 to vector<12x100xf32>
    %480 = arith.mulf %479, %476 : vector<12x100xf32>
    %481 = arith.select %478, %476, %480 : vector<12x100xi1>, vector<12x100xf32>
    %cst_190 = arith.constant dense<0.000000e+00> : vector<6x100xf32>
    %482 = tpu.matmul %465, %481, %cst_190 {dimension_numbers = #tpu.dot_dimension_numbers<[1], [0], [0], [1], [0, 0, 1, 1], [], []>} : vector<6x12xf32>, vector<12x100xf32>, vector<6x100xf32> -> vector<6x100xf32>
    %cst_191 = arith.constant dense<0.000000e+00> : vector<6x100xf32>
    %483 = tpu.matmul %472, %481, %cst_191 {dimension_numbers = #tpu.dot_dimension_numbers<[1], [0], [0], [1], [0, 0, 1, 1], [], []>} : vector<6x12xf32>, vector<12x100xf32>, vector<6x100xf32> -> vector<6x100xf32>
    %484 = arith.maximumf %482, %483 : vector<6x100xf32>
    %cst_192 = arith.constant dense<0.000000e+00> : vector<12x100xf32>
    %485 = tpu.matmul %433, %393, %cst_192 {dimension_numbers = #tpu.dot_dimension_numbers<[1], [0], [0], [1], [0, 0, 1, 1], [], []>} : vector<12x100xf32>, vector<100x100xf32>, vector<12x100xf32> -> vector<12x100xf32>
    %486 = arith.addf %403, %485 : vector<12x100xf32>
    %cst_193 = arith.constant dense<0.000000e+00> : vector<12x100xf32>
    %487 = tpu.matmul %453, %395, %cst_193 {dimension_numbers = #tpu.dot_dimension_numbers<[1], [0], [0], [1], [0, 0, 1, 1], [], []>} : vector<12x100xf32>, vector<100x100xf32>, vector<12x100xf32> -> vector<12x100xf32>
    %488 = arith.addf %486, %487 : vector<12x100xf32>
    %cst_194 = arith.constant dense<0.000000e+00> : vector<12x100xf32>
    %489 = tpu.matmul %458, %397, %cst_194 {dimension_numbers = #tpu.dot_dimension_numbers<[1], [0], [0], [1], [0, 0, 1, 1], [], []>} : vector<12x100xf32>, vector<100x100xf32>, vector<12x100xf32> -> vector<12x100xf32>
    %490 = arith.addf %488, %489 : vector<12x100xf32>
    %cst_195 = arith.constant 0.000000e+00 : f32
    %491 = vector.broadcast %cst_195 : f32 to vector<12x100xf32>
    %492 = arith.cmpf oge, %490, %491 : vector<12x100xf32>
    %cst_196 = arith.constant 0.00999999977 : f32
    %493 = vector.broadcast %cst_196 : f32 to vector<12x100xf32>
    %494 = arith.mulf %493, %490 : vector<12x100xf32>
    %495 = arith.select %492, %490, %494 : vector<12x100xi1>, vector<12x100xf32>
    %cst_197 = arith.constant dense<0.000000e+00> : vector<6x100xf32>
    %496 = tpu.matmul %465, %495, %cst_197 {dimension_numbers = #tpu.dot_dimension_numbers<[1], [0], [0], [1], [0, 0, 1, 1], [], []>} : vector<6x12xf32>, vector<12x100xf32>, vector<6x100xf32> -> vector<6x100xf32>
    %cst_198 = arith.constant dense<0.000000e+00> : vector<6x100xf32>
    %497 = tpu.matmul %472, %495, %cst_198 {dimension_numbers = #tpu.dot_dimension_numbers<[1], [0], [0], [1], [0, 0, 1, 1], [], []>} : vector<6x12xf32>, vector<12x100xf32>, vector<6x100xf32> -> vector<6x100xf32>
    %498 = arith.maximumf %496, %497 : vector<6x100xf32>
    %c0_199 = arith.constant 0 : index
    %c0_200 = arith.constant 0 : index
    %c0_201 = arith.constant 0 : index
    %499 = vector.load %arg14[%c0_199, %c0_200, %c0_201] : memref<5x100x200xf32, #tpu.memory_space<vmem>>, vector<1x100x200xf32>
    %500 = vector.shape_cast %499 : vector<1x100x200xf32> to vector<100x200xf32>
    %c1_202 = arith.constant 1 : index
    %c0_203 = arith.constant 0 : index
    %c0_204 = arith.constant 0 : index
    %501 = vector.load %arg14[%c1_202, %c0_203, %c0_204] : memref<5x100x200xf32, #tpu.memory_space<vmem>>, vector<1x100x200xf32>
    %502 = vector.shape_cast %501 : vector<1x100x200xf32> to vector<100x200xf32>
    %c2_205 = arith.constant 2 : index
    %c0_206 = arith.constant 0 : index
    %c0_207 = arith.constant 0 : index
    %503 = vector.load %arg14[%c2_205, %c0_206, %c0_207] : memref<5x100x200xf32, #tpu.memory_space<vmem>>, vector<1x100x200xf32>
    %504 = vector.shape_cast %503 : vector<1x100x200xf32> to vector<100x200xf32>
    %c3_208 = arith.constant 3 : index
    %c0_209 = arith.constant 0 : index
    %c0_210 = arith.constant 0 : index
    %505 = vector.load %arg14[%c3_208, %c0_209, %c0_210] : memref<5x100x200xf32, #tpu.memory_space<vmem>>, vector<1x100x200xf32>
    %506 = vector.shape_cast %505 : vector<1x100x200xf32> to vector<100x200xf32>
    %c4_211 = arith.constant 4 : index
    %c0_212 = arith.constant 0 : index
    %c0_213 = arith.constant 0 : index
    %507 = vector.load %arg14[%c4_211, %c0_212, %c0_213] : memref<5x100x200xf32, #tpu.memory_space<vmem>>, vector<1x100x200xf32>
    %508 = vector.shape_cast %507 : vector<1x100x200xf32> to vector<100x200xf32>
    %c0_214 = arith.constant 0 : index
    %c0_215 = arith.constant 0 : index
    %c0_216 = arith.constant 0 : index
    %509 = vector.load %arg16[%c0_214, %c0_215, %c0_216] : memref<3x200x200xf32, #tpu.memory_space<vmem>>, vector<1x200x200xf32>
    %510 = vector.shape_cast %509 : vector<1x200x200xf32> to vector<200x200xf32>
    %c1_217 = arith.constant 1 : index
    %c0_218 = arith.constant 0 : index
    %c0_219 = arith.constant 0 : index
    %511 = vector.load %arg16[%c1_217, %c0_218, %c0_219] : memref<3x200x200xf32, #tpu.memory_space<vmem>>, vector<1x200x200xf32>
    %512 = vector.shape_cast %511 : vector<1x200x200xf32> to vector<200x200xf32>
    %c2_220 = arith.constant 2 : index
    %c0_221 = arith.constant 0 : index
    %c0_222 = arith.constant 0 : index
    %513 = vector.load %arg16[%c2_220, %c0_221, %c0_222] : memref<3x200x200xf32, #tpu.memory_space<vmem>>, vector<1x200x200xf32>
    %514 = vector.shape_cast %513 : vector<1x200x200xf32> to vector<200x200xf32>
    %c0_223 = arith.constant 0 : index
    %c0_224 = arith.constant 0 : index
    %515 = vector.load %arg15[%c0_223, %c0_224] : memref<1x200xf32, #tpu.memory_space<vmem>>, vector<1x200xf32>
    %516 = vector.shape_cast %515 : vector<1x200xf32> to vector<1x200xf32>
    %517 = vector.broadcast %516 : vector<1x200xf32> to vector<2x200xf32>
    %c0_225 = arith.constant 0 : index
    %c0_226 = arith.constant 0 : index
    %518 = vector.load %arg17[%c0_225, %c0_226] : memref<1x200xf32, #tpu.memory_space<vmem>>, vector<1x200xf32>
    %519 = vector.shape_cast %518 : vector<1x200xf32> to vector<1x200xf32>
    %520 = vector.broadcast %519 : vector<1x200xf32> to vector<2x200xf32>
    %cst_227 = arith.constant 0.000000e+00 : f32
    %521 = vector.broadcast %cst_227 : f32 to vector<2x200xf32>
    %522 = arith.cmpf oge, %517, %521 : vector<2x200xf32>
    %cst_228 = arith.constant 0.00999999977 : f32
    %523 = vector.broadcast %cst_228 : f32 to vector<2x200xf32>
    %524 = arith.mulf %523, %517 : vector<2x200xf32>
    %525 = arith.select %522, %517, %524 : vector<2x200xi1>, vector<2x200xf32>
    %cst_229 = arith.constant 0.000000e+00 : f32
    %526 = vector.broadcast %cst_229 : f32 to vector<2x200xf32>
    %527 = arith.cmpf oge, %517, %526 : vector<2x200xf32>
    %cst_230 = arith.constant 0.00999999977 : f32
    %528 = vector.broadcast %cst_230 : f32 to vector<2x200xf32>
    %529 = arith.mulf %528, %517 : vector<2x200xf32>
    %530 = arith.select %527, %517, %529 : vector<2x200xi1>, vector<2x200xf32>
    %531 = vector.extract_strided_slice %484 {offsets = [0, 0], sizes = [2, 100], strides = [1, 1]} : vector<6x100xf32> to vector<2x100xf32>
    %cst_231 = arith.constant dense<0.000000e+00> : vector<2x200xf32>
    %532 = tpu.matmul %531, %500, %cst_231 {dimension_numbers = #tpu.dot_dimension_numbers<[1], [0], [0], [1], [0, 0, 1, 1], [], []>} : vector<2x100xf32>, vector<100x200xf32>, vector<2x200xf32> -> vector<2x200xf32>
    %533 = arith.addf %517, %532 : vector<2x200xf32>
    %534 = vector.extract_strided_slice %484 {offsets = [1, 0], sizes = [2, 100], strides = [1, 1]} : vector<6x100xf32> to vector<2x100xf32>
    %cst_232 = arith.constant dense<0.000000e+00> : vector<2x200xf32>
    %535 = tpu.matmul %534, %502, %cst_232 {dimension_numbers = #tpu.dot_dimension_numbers<[1], [0], [0], [1], [0, 0, 1, 1], [], []>} : vector<2x100xf32>, vector<100x200xf32>, vector<2x200xf32> -> vector<2x200xf32>
    %536 = arith.addf %533, %535 : vector<2x200xf32>
    %537 = vector.extract_strided_slice %484 {offsets = [2, 0], sizes = [2, 100], strides = [1, 1]} : vector<6x100xf32> to vector<2x100xf32>
    %cst_233 = arith.constant dense<0.000000e+00> : vector<2x200xf32>
    %538 = tpu.matmul %537, %504, %cst_233 {dimension_numbers = #tpu.dot_dimension_numbers<[1], [0], [0], [1], [0, 0, 1, 1], [], []>} : vector<2x100xf32>, vector<100x200xf32>, vector<2x200xf32> -> vector<2x200xf32>
    %539 = arith.addf %536, %538 : vector<2x200xf32>
    %540 = vector.extract_strided_slice %484 {offsets = [3, 0], sizes = [2, 100], strides = [1, 1]} : vector<6x100xf32> to vector<2x100xf32>
    %cst_234 = arith.constant dense<0.000000e+00> : vector<2x200xf32>
    %541 = tpu.matmul %540, %506, %cst_234 {dimension_numbers = #tpu.dot_dimension_numbers<[1], [0], [0], [1], [0, 0, 1, 1], [], []>} : vector<2x100xf32>, vector<100x200xf32>, vector<2x200xf32> -> vector<2x200xf32>
    %542 = arith.addf %539, %541 : vector<2x200xf32>
    %543 = vector.extract_strided_slice %484 {offsets = [4, 0], sizes = [2, 100], strides = [1, 1]} : vector<6x100xf32> to vector<2x100xf32>
    %cst_235 = arith.constant dense<0.000000e+00> : vector<2x200xf32>
    %544 = tpu.matmul %543, %508, %cst_235 {dimension_numbers = #tpu.dot_dimension_numbers<[1], [0], [0], [1], [0, 0, 1, 1], [], []>} : vector<2x100xf32>, vector<100x200xf32>, vector<2x200xf32> -> vector<2x200xf32>
    %545 = arith.addf %542, %544 : vector<2x200xf32>
    %cst_236 = arith.constant 0.000000e+00 : f32
    %546 = vector.broadcast %cst_236 : f32 to vector<2x200xf32>
    %547 = arith.cmpf oge, %545, %546 : vector<2x200xf32>
    %cst_237 = arith.constant 0.00999999977 : f32
    %548 = vector.broadcast %cst_237 : f32 to vector<2x200xf32>
    %549 = arith.mulf %548, %545 : vector<2x200xf32>
    %550 = arith.select %547, %545, %549 : vector<2x200xi1>, vector<2x200xf32>
    %551 = vector.extract_strided_slice %498 {offsets = [0, 0], sizes = [2, 100], strides = [1, 1]} : vector<6x100xf32> to vector<2x100xf32>
    %cst_238 = arith.constant dense<0.000000e+00> : vector<2x200xf32>
    %552 = tpu.matmul %551, %500, %cst_238 {dimension_numbers = #tpu.dot_dimension_numbers<[1], [0], [0], [1], [0, 0, 1, 1], [], []>} : vector<2x100xf32>, vector<100x200xf32>, vector<2x200xf32> -> vector<2x200xf32>
    %553 = arith.addf %517, %552 : vector<2x200xf32>
    %554 = vector.extract_strided_slice %498 {offsets = [1, 0], sizes = [2, 100], strides = [1, 1]} : vector<6x100xf32> to vector<2x100xf32>
    %cst_239 = arith.constant dense<0.000000e+00> : vector<2x200xf32>
    %555 = tpu.matmul %554, %502, %cst_239 {dimension_numbers = #tpu.dot_dimension_numbers<[1], [0], [0], [1], [0, 0, 1, 1], [], []>} : vector<2x100xf32>, vector<100x200xf32>, vector<2x200xf32> -> vector<2x200xf32>
    %556 = arith.addf %553, %555 : vector<2x200xf32>
    %557 = vector.extract_strided_slice %498 {offsets = [2, 0], sizes = [2, 100], strides = [1, 1]} : vector<6x100xf32> to vector<2x100xf32>
    %cst_240 = arith.constant dense<0.000000e+00> : vector<2x200xf32>
    %558 = tpu.matmul %557, %504, %cst_240 {dimension_numbers = #tpu.dot_dimension_numbers<[1], [0], [0], [1], [0, 0, 1, 1], [], []>} : vector<2x100xf32>, vector<100x200xf32>, vector<2x200xf32> -> vector<2x200xf32>
    %559 = arith.addf %556, %558 : vector<2x200xf32>
    %560 = vector.extract_strided_slice %498 {offsets = [3, 0], sizes = [2, 100], strides = [1, 1]} : vector<6x100xf32> to vector<2x100xf32>
    %cst_241 = arith.constant dense<0.000000e+00> : vector<2x200xf32>
    %561 = tpu.matmul %560, %506, %cst_241 {dimension_numbers = #tpu.dot_dimension_numbers<[1], [0], [0], [1], [0, 0, 1, 1], [], []>} : vector<2x100xf32>, vector<100x200xf32>, vector<2x200xf32> -> vector<2x200xf32>
    %562 = arith.addf %559, %561 : vector<2x200xf32>
    %563 = vector.extract_strided_slice %498 {offsets = [4, 0], sizes = [2, 100], strides = [1, 1]} : vector<6x100xf32> to vector<2x100xf32>
    %cst_242 = arith.constant dense<0.000000e+00> : vector<2x200xf32>
    %564 = tpu.matmul %563, %508, %cst_242 {dimension_numbers = #tpu.dot_dimension_numbers<[1], [0], [0], [1], [0, 0, 1, 1], [], []>} : vector<2x100xf32>, vector<100x200xf32>, vector<2x200xf32> -> vector<2x200xf32>
    %565 = arith.addf %562, %564 : vector<2x200xf32>
    %cst_243 = arith.constant 0.000000e+00 : f32
    %566 = vector.broadcast %cst_243 : f32 to vector<2x200xf32>
    %567 = arith.cmpf oge, %565, %566 : vector<2x200xf32>
    %cst_244 = arith.constant 0.00999999977 : f32
    %568 = vector.broadcast %cst_244 : f32 to vector<2x200xf32>
    %569 = arith.mulf %568, %565 : vector<2x200xf32>
    %570 = arith.select %567, %565, %569 : vector<2x200xi1>, vector<2x200xf32>
    %cst_245 = arith.constant 0.000000e+00 : f32
    %571 = vector.broadcast %cst_245 : f32 to vector<2x200xf32>
    %572 = arith.cmpf oge, %517, %571 : vector<2x200xf32>
    %cst_246 = arith.constant 0.00999999977 : f32
    %573 = vector.broadcast %cst_246 : f32 to vector<2x200xf32>
    %574 = arith.mulf %573, %517 : vector<2x200xf32>
    %575 = arith.select %572, %517, %574 : vector<2x200xi1>, vector<2x200xf32>
    %cst_247 = arith.constant 0.000000e+00 : f32
    %576 = vector.broadcast %cst_247 : f32 to vector<2x200xf32>
    %577 = arith.cmpf oge, %517, %576 : vector<2x200xf32>
    %cst_248 = arith.constant 0.00999999977 : f32
    %578 = vector.broadcast %cst_248 : f32 to vector<2x200xf32>
    %579 = arith.mulf %578, %517 : vector<2x200xf32>
    %580 = arith.select %577, %517, %579 : vector<2x200xi1>, vector<2x200xf32>
    %581 = tpu.iota {dimensions = array<i32: 0>} : vector<1x2xi32>
    %582 = tpu.iota {dimensions = array<i32: 1>} : vector<1x2xi32>
    %c2_i32_249 = arith.constant 2 : i32
    %583 = vector.broadcast %c2_i32_249 : i32 to vector<1x2xi32>
    %584 = arith.muli %583, %581 : vector<1x2xi32>
    %585 = arith.cmpi eq, %582, %584 : vector<1x2xi32>
    %586 = arith.extui %585 : vector<1x2xi1> to vector<1x2xi32>
    %587 = arith.sitofp %586 : vector<1x2xi32> to vector<1x2xf32>
    %c2_i32_250 = arith.constant 2 : i32
    %588 = vector.broadcast %c2_i32_250 : i32 to vector<1x2xi32>
    %589 = arith.muli %588, %581 : vector<1x2xi32>
    %c1_i32_251 = arith.constant 1 : i32
    %590 = vector.broadcast %c1_i32_251 : i32 to vector<1x2xi32>
    %591 = arith.addi %589, %590 : vector<1x2xi32>
    %592 = arith.cmpi eq, %582, %591 : vector<1x2xi32>
    %593 = arith.extui %592 : vector<1x2xi1> to vector<1x2xi32>
    %594 = arith.sitofp %593 : vector<1x2xi32> to vector<1x2xf32>
    %cst_252 = arith.constant 0.000000e+00 : f32
    %595 = vector.broadcast %cst_252 : f32 to vector<2x200xf32>
    %596 = arith.cmpf oge, %520, %595 : vector<2x200xf32>
    %cst_253 = arith.constant 0.00999999977 : f32
    %597 = vector.broadcast %cst_253 : f32 to vector<2x200xf32>
    %598 = arith.mulf %597, %520 : vector<2x200xf32>
    %599 = arith.select %596, %520, %598 : vector<2x200xi1>, vector<2x200xf32>
    %cst_254 = arith.constant dense<0.000000e+00> : vector<1x200xf32>
    %600 = tpu.matmul %587, %599, %cst_254 {dimension_numbers = #tpu.dot_dimension_numbers<[1], [0], [0], [1], [0, 0, 1, 1], [], []>} : vector<1x2xf32>, vector<2x200xf32>, vector<1x200xf32> -> vector<1x200xf32>
    %cst_255 = arith.constant dense<0.000000e+00> : vector<1x200xf32>
    %601 = tpu.matmul %594, %599, %cst_255 {dimension_numbers = #tpu.dot_dimension_numbers<[1], [0], [0], [1], [0, 0, 1, 1], [], []>} : vector<1x2xf32>, vector<2x200xf32>, vector<1x200xf32> -> vector<1x200xf32>
    %602 = arith.maximumf %600, %601 : vector<1x200xf32>
    %cst_256 = arith.constant dense<0.000000e+00> : vector<2x200xf32>
    %603 = tpu.matmul %525, %512, %cst_256 {dimension_numbers = #tpu.dot_dimension_numbers<[1], [0], [0], [1], [0, 0, 1, 1], [], []>} : vector<2x200xf32>, vector<200x200xf32>, vector<2x200xf32> -> vector<2x200xf32>
    %604 = arith.addf %520, %603 : vector<2x200xf32>
    %cst_257 = arith.constant dense<0.000000e+00> : vector<2x200xf32>
    %605 = tpu.matmul %530, %514, %cst_257 {dimension_numbers = #tpu.dot_dimension_numbers<[1], [0], [0], [1], [0, 0, 1, 1], [], []>} : vector<2x200xf32>, vector<200x200xf32>, vector<2x200xf32> -> vector<2x200xf32>
    %606 = arith.addf %604, %605 : vector<2x200xf32>
    %cst_258 = arith.constant 0.000000e+00 : f32
    %607 = vector.broadcast %cst_258 : f32 to vector<2x200xf32>
    %608 = arith.cmpf oge, %606, %607 : vector<2x200xf32>
    %cst_259 = arith.constant 0.00999999977 : f32
    %609 = vector.broadcast %cst_259 : f32 to vector<2x200xf32>
    %610 = arith.mulf %609, %606 : vector<2x200xf32>
    %611 = arith.select %608, %606, %610 : vector<2x200xi1>, vector<2x200xf32>
    %cst_260 = arith.constant dense<0.000000e+00> : vector<1x200xf32>
    %612 = tpu.matmul %587, %611, %cst_260 {dimension_numbers = #tpu.dot_dimension_numbers<[1], [0], [0], [1], [0, 0, 1, 1], [], []>} : vector<1x2xf32>, vector<2x200xf32>, vector<1x200xf32> -> vector<1x200xf32>
    %cst_261 = arith.constant dense<0.000000e+00> : vector<1x200xf32>
    %613 = tpu.matmul %594, %611, %cst_261 {dimension_numbers = #tpu.dot_dimension_numbers<[1], [0], [0], [1], [0, 0, 1, 1], [], []>} : vector<1x2xf32>, vector<2x200xf32>, vector<1x200xf32> -> vector<1x200xf32>
    %614 = arith.maximumf %612, %613 : vector<1x200xf32>
    %cst_262 = arith.constant dense<0.000000e+00> : vector<2x200xf32>
    %615 = tpu.matmul %530, %510, %cst_262 {dimension_numbers = #tpu.dot_dimension_numbers<[1], [0], [0], [1], [0, 0, 1, 1], [], []>} : vector<2x200xf32>, vector<200x200xf32>, vector<2x200xf32> -> vector<2x200xf32>
    %616 = arith.addf %520, %615 : vector<2x200xf32>
    %cst_263 = arith.constant dense<0.000000e+00> : vector<2x200xf32>
    %617 = tpu.matmul %550, %512, %cst_263 {dimension_numbers = #tpu.dot_dimension_numbers<[1], [0], [0], [1], [0, 0, 1, 1], [], []>} : vector<2x200xf32>, vector<200x200xf32>, vector<2x200xf32> -> vector<2x200xf32>
    %618 = arith.addf %616, %617 : vector<2x200xf32>
    %cst_264 = arith.constant dense<0.000000e+00> : vector<2x200xf32>
    %619 = tpu.matmul %570, %514, %cst_264 {dimension_numbers = #tpu.dot_dimension_numbers<[1], [0], [0], [1], [0, 0, 1, 1], [], []>} : vector<2x200xf32>, vector<200x200xf32>, vector<2x200xf32> -> vector<2x200xf32>
    %620 = arith.addf %618, %619 : vector<2x200xf32>
    %cst_265 = arith.constant 0.000000e+00 : f32
    %621 = vector.broadcast %cst_265 : f32 to vector<2x200xf32>
    %622 = arith.cmpf oge, %620, %621 : vector<2x200xf32>
    %cst_266 = arith.constant 0.00999999977 : f32
    %623 = vector.broadcast %cst_266 : f32 to vector<2x200xf32>
    %624 = arith.mulf %623, %620 : vector<2x200xf32>
    %625 = arith.select %622, %620, %624 : vector<2x200xi1>, vector<2x200xf32>
    %cst_267 = arith.constant dense<0.000000e+00> : vector<1x200xf32>
    %626 = tpu.matmul %587, %625, %cst_267 {dimension_numbers = #tpu.dot_dimension_numbers<[1], [0], [0], [1], [0, 0, 1, 1], [], []>} : vector<1x2xf32>, vector<2x200xf32>, vector<1x200xf32> -> vector<1x200xf32>
    %cst_268 = arith.constant dense<0.000000e+00> : vector<1x200xf32>
    %627 = tpu.matmul %594, %625, %cst_268 {dimension_numbers = #tpu.dot_dimension_numbers<[1], [0], [0], [1], [0, 0, 1, 1], [], []>} : vector<1x2xf32>, vector<2x200xf32>, vector<1x200xf32> -> vector<1x200xf32>
    %628 = arith.maximumf %626, %627 : vector<1x200xf32>
    %cst_269 = arith.constant dense<0.000000e+00> : vector<2x200xf32>
    %629 = tpu.matmul %570, %510, %cst_269 {dimension_numbers = #tpu.dot_dimension_numbers<[1], [0], [0], [1], [0, 0, 1, 1], [], []>} : vector<2x200xf32>, vector<200x200xf32>, vector<2x200xf32> -> vector<2x200xf32>
    %630 = arith.addf %520, %629 : vector<2x200xf32>
    %cst_270 = arith.constant dense<0.000000e+00> : vector<2x200xf32>
    %631 = tpu.matmul %575, %512, %cst_270 {dimension_numbers = #tpu.dot_dimension_numbers<[1], [0], [0], [1], [0, 0, 1, 1], [], []>} : vector<2x200xf32>, vector<200x200xf32>, vector<2x200xf32> -> vector<2x200xf32>
    %632 = arith.addf %630, %631 : vector<2x200xf32>
    %cst_271 = arith.constant dense<0.000000e+00> : vector<2x200xf32>
    %633 = tpu.matmul %580, %514, %cst_271 {dimension_numbers = #tpu.dot_dimension_numbers<[1], [0], [0], [1], [0, 0, 1, 1], [], []>} : vector<2x200xf32>, vector<200x200xf32>, vector<2x200xf32> -> vector<2x200xf32>
    %634 = arith.addf %632, %633 : vector<2x200xf32>
    %cst_272 = arith.constant 0.000000e+00 : f32
    %635 = vector.broadcast %cst_272 : f32 to vector<2x200xf32>
    %636 = arith.cmpf oge, %634, %635 : vector<2x200xf32>
    %cst_273 = arith.constant 0.00999999977 : f32
    %637 = vector.broadcast %cst_273 : f32 to vector<2x200xf32>
    %638 = arith.mulf %637, %634 : vector<2x200xf32>
    %639 = arith.select %636, %634, %638 : vector<2x200xi1>, vector<2x200xf32>
    %cst_274 = arith.constant dense<0.000000e+00> : vector<1x200xf32>
    %640 = tpu.matmul %587, %639, %cst_274 {dimension_numbers = #tpu.dot_dimension_numbers<[1], [0], [0], [1], [0, 0, 1, 1], [], []>} : vector<1x2xf32>, vector<2x200xf32>, vector<1x200xf32> -> vector<1x200xf32>
    %cst_275 = arith.constant dense<0.000000e+00> : vector<1x200xf32>
    %641 = tpu.matmul %594, %639, %cst_275 {dimension_numbers = #tpu.dot_dimension_numbers<[1], [0], [0], [1], [0, 0, 1, 1], [], []>} : vector<1x2xf32>, vector<2x200xf32>, vector<1x200xf32> -> vector<1x200xf32>
    %642 = arith.maximumf %640, %641 : vector<1x200xf32>
    %cst_276 = arith.constant dense<0.000000e+00> : vector<2x200xf32>
    %643 = tpu.matmul %580, %510, %cst_276 {dimension_numbers = #tpu.dot_dimension_numbers<[1], [0], [0], [1], [0, 0, 1, 1], [], []>} : vector<2x200xf32>, vector<200x200xf32>, vector<2x200xf32> -> vector<2x200xf32>
    %644 = arith.addf %520, %643 : vector<2x200xf32>
    %cst_277 = arith.constant 0.000000e+00 : f32
    %645 = vector.broadcast %cst_277 : f32 to vector<2x200xf32>
    %646 = arith.cmpf oge, %644, %645 : vector<2x200xf32>
    %cst_278 = arith.constant 0.00999999977 : f32
    %647 = vector.broadcast %cst_278 : f32 to vector<2x200xf32>
    %648 = arith.mulf %647, %644 : vector<2x200xf32>
    %649 = arith.select %646, %644, %648 : vector<2x200xi1>, vector<2x200xf32>
    %cst_279 = arith.constant dense<0.000000e+00> : vector<1x200xf32>
    %650 = tpu.matmul %587, %649, %cst_279 {dimension_numbers = #tpu.dot_dimension_numbers<[1], [0], [0], [1], [0, 0, 1, 1], [], []>} : vector<1x2xf32>, vector<2x200xf32>, vector<1x200xf32> -> vector<1x200xf32>
    %cst_280 = arith.constant dense<0.000000e+00> : vector<1x200xf32>
    %651 = tpu.matmul %594, %649, %cst_280 {dimension_numbers = #tpu.dot_dimension_numbers<[1], [0], [0], [1], [0, 0, 1, 1], [], []>} : vector<1x2xf32>, vector<2x200xf32>, vector<1x200xf32> -> vector<1x200xf32>
    %652 = arith.maximumf %650, %651 : vector<1x200xf32>
    %c0_281 = arith.constant 0 : index
    %c0_282 = arith.constant 0 : index
    %653 = vector.load %arg19[%c0_281, %c0_282] : memref<1x256xf32, #tpu.memory_space<vmem>>, vector<1x256xf32>
    %c0_283 = arith.constant 0 : index
    %c0_284 = arith.constant 0 : index
    %c0_285 = arith.constant 0 : index
    %c0_286 = arith.constant 0 : index
    %654 = vector.load %arg18[%c0_283, %c0_284, %c0_285, %c0_286] : memref<5x1x200x256xf32, #tpu.memory_space<vmem>>, vector<1x1x200x256xf32>
    %655 = vector.shape_cast %654 : vector<1x1x200x256xf32> to vector<200x256xf32>
    %cst_287 = arith.constant dense<0.000000e+00> : vector<1x256xf32>
    %656 = tpu.matmul %602, %655, %cst_287 {dimension_numbers = #tpu.dot_dimension_numbers<[1], [0], [0], [1], [0, 0, 1, 1], [], []>} : vector<1x200xf32>, vector<200x256xf32>, vector<1x256xf32> -> vector<1x256xf32>
    %657 = arith.addf %653, %656 : vector<1x256xf32>
    %c1_288 = arith.constant 1 : index
    %c0_289 = arith.constant 0 : index
    %c0_290 = arith.constant 0 : index
    %c0_291 = arith.constant 0 : index
    %658 = vector.load %arg18[%c1_288, %c0_289, %c0_290, %c0_291] : memref<5x1x200x256xf32, #tpu.memory_space<vmem>>, vector<1x1x200x256xf32>
    %659 = vector.shape_cast %658 : vector<1x1x200x256xf32> to vector<200x256xf32>
    %cst_292 = arith.constant dense<0.000000e+00> : vector<1x256xf32>
    %660 = tpu.matmul %614, %659, %cst_292 {dimension_numbers = #tpu.dot_dimension_numbers<[1], [0], [0], [1], [0, 0, 1, 1], [], []>} : vector<1x200xf32>, vector<200x256xf32>, vector<1x256xf32> -> vector<1x256xf32>
    %661 = arith.addf %657, %660 : vector<1x256xf32>
    %c2_293 = arith.constant 2 : index
    %c0_294 = arith.constant 0 : index
    %c0_295 = arith.constant 0 : index
    %c0_296 = arith.constant 0 : index
    %662 = vector.load %arg18[%c2_293, %c0_294, %c0_295, %c0_296] : memref<5x1x200x256xf32, #tpu.memory_space<vmem>>, vector<1x1x200x256xf32>
    %663 = vector.shape_cast %662 : vector<1x1x200x256xf32> to vector<200x256xf32>
    %cst_297 = arith.constant dense<0.000000e+00> : vector<1x256xf32>
    %664 = tpu.matmul %628, %663, %cst_297 {dimension_numbers = #tpu.dot_dimension_numbers<[1], [0], [0], [1], [0, 0, 1, 1], [], []>} : vector<1x200xf32>, vector<200x256xf32>, vector<1x256xf32> -> vector<1x256xf32>
    %665 = arith.addf %661, %664 : vector<1x256xf32>
    %c3_298 = arith.constant 3 : index
    %c0_299 = arith.constant 0 : index
    %c0_300 = arith.constant 0 : index
    %c0_301 = arith.constant 0 : index
    %666 = vector.load %arg18[%c3_298, %c0_299, %c0_300, %c0_301] : memref<5x1x200x256xf32, #tpu.memory_space<vmem>>, vector<1x1x200x256xf32>
    %667 = vector.shape_cast %666 : vector<1x1x200x256xf32> to vector<200x256xf32>
    %cst_302 = arith.constant dense<0.000000e+00> : vector<1x256xf32>
    %668 = tpu.matmul %642, %667, %cst_302 {dimension_numbers = #tpu.dot_dimension_numbers<[1], [0], [0], [1], [0, 0, 1, 1], [], []>} : vector<1x200xf32>, vector<200x256xf32>, vector<1x256xf32> -> vector<1x256xf32>
    %669 = arith.addf %665, %668 : vector<1x256xf32>
    %c4_303 = arith.constant 4 : index
    %c0_304 = arith.constant 0 : index
    %c0_305 = arith.constant 0 : index
    %c0_306 = arith.constant 0 : index
    %670 = vector.load %arg18[%c4_303, %c0_304, %c0_305, %c0_306] : memref<5x1x200x256xf32, #tpu.memory_space<vmem>>, vector<1x1x200x256xf32>
    %671 = vector.shape_cast %670 : vector<1x1x200x256xf32> to vector<200x256xf32>
    %cst_307 = arith.constant dense<0.000000e+00> : vector<1x256xf32>
    %672 = tpu.matmul %652, %671, %cst_307 {dimension_numbers = #tpu.dot_dimension_numbers<[1], [0], [0], [1], [0, 0, 1, 1], [], []>} : vector<1x200xf32>, vector<200x256xf32>, vector<1x256xf32> -> vector<1x256xf32>
    %673 = arith.addf %669, %672 : vector<1x256xf32>
    %c0_308 = arith.constant 0 : index
    %c0_309 = arith.constant 0 : index
    %674 = vector.load %arg20[%c0_308, %c0_309] : memref<256x3xf32, #tpu.memory_space<vmem>>, vector<256x3xf32>
    %cst_310 = arith.constant dense<0.000000e+00> : vector<1x3xf32>
    %675 = tpu.matmul %673, %674, %cst_310 {dimension_numbers = #tpu.dot_dimension_numbers<[1], [0], [0], [1], [0, 0, 1, 1], [], []>} : vector<1x256xf32>, vector<256x3xf32>, vector<1x3xf32> -> vector<1x3xf32>
    %c0_311 = arith.constant 0 : index
    %c0_312 = arith.constant 0 : index
    %676 = vector.load %arg21[%c0_311, %c0_312] : memref<1x3xf32, #tpu.memory_space<vmem>>, vector<1x3xf32>
    %677 = arith.addf %675, %676 : vector<1x3xf32>
    %c0_313 = arith.constant 0 : index
    %c0_314 = arith.constant 0 : index
    %c0_315 = arith.constant 0 : index
    %678 = vector.load %arg22[%c0_313, %c0_314, %c0_315] : memref<1x1x3xf32, #tpu.memory_space<vmem>>, vector<1x1x3xf32>
    %679 = vector.shape_cast %678 : vector<1x1x3xf32> to vector<1x3xf32>
    %680 = vector.shape_cast %677 : vector<1x3xf32> to vector<1x1x3xf32>
    tpu.vector_store %arg22[%c0_313, %c0_314, %c0_315], %680 {strides = array<i32>} : memref<1x1x3xf32, #tpu.memory_space<vmem>>, vector<1x1x3xf32>,
    return
  }
  func.func @transform_0(%arg0: i32) -> (i32, i32, i32, i32) {
    %c0_i32 = arith.constant 0 : i32
    %c0_i32_0 = arith.constant 0 : i32
    %c0_i32_1 = arith.constant 0 : i32
    %c0_i32_2 = arith.constant 0 : i32
    return %arg0, %c0_i32, %c0_i32_0, %c0_i32_1 : i32, i32, i32, i32
  }
  func.func @transform_1(%arg0: i32) -> (i32, i32, i32) {
    %c0_i32 = arith.constant 0 : i32
    %c0_i32_0 = arith.constant 0 : i32
    %c0_i32_1 = arith.constant 0 : i32
    %c0_i32_2 = arith.constant 0 : i32
    return %c0_i32, %c0_i32_0, %c0_i32_1 : i32, i32, i32
  }
  func.func @transform_2(%arg0: i32) -> (i32, i32) {
    %c0_i32 = arith.constant 0 : i32
    %c0_i32_0 = arith.constant 0 : i32
    %c0_i32_1 = arith.constant 0 : i32
    return %c0_i32, %c0_i32_0 : i32, i32
  }
  func.func @transform_3(%arg0: i32) -> (i32, i32, i32) {
    %c0_i32 = arith.constant 0 : i32
    %c0_i32_0 = arith.constant 0 : i32
    %c0_i32_1 = arith.constant 0 : i32
    %c0_i32_2 = arith.constant 0 : i32
    return %c0_i32, %c0_i32_0, %c0_i32_1 : i32, i32, i32
  }
  func.func @transform_4(%arg0: i32) -> (i32, i32) {
    %c0_i32 = arith.constant 0 : i32
    %c0_i32_0 = arith.constant 0 : i32
    %c0_i32_1 = arith.constant 0 : i32
    return %c0_i32, %c0_i32_0 : i32, i32
  }
  func.func @transform_5(%arg0: i32) -> (i32, i32, i32) {
    %c0_i32 = arith.constant 0 : i32
    %c0_i32_0 = arith.constant 0 : i32
    %c0_i32_1 = arith.constant 0 : i32
    %c0_i32_2 = arith.constant 0 : i32
    return %c0_i32, %c0_i32_0, %c0_i32_1 : i32, i32, i32
  }
  func.func @transform_6(%arg0: i32) -> (i32, i32) {
    %c0_i32 = arith.constant 0 : i32
    %c0_i32_0 = arith.constant 0 : i32
    %c0_i32_1 = arith.constant 0 : i32
    return %c0_i32, %c0_i32_0 : i32, i32
  }
  func.func @transform_7(%arg0: i32) -> (i32, i32, i32) {
    %c0_i32 = arith.constant 0 : i32
    %c0_i32_0 = arith.constant 0 : i32
    %c0_i32_1 = arith.constant 0 : i32
    %c0_i32_2 = arith.constant 0 : i32
    return %c0_i32, %c0_i32_0, %c0_i32_1 : i32, i32, i32
  }
  func.func @transform_8(%arg0: i32) -> (i32, i32) {
    %c0_i32 = arith.constant 0 : i32
    %c0_i32_0 = arith.constant 0 : i32
    %c0_i32_1 = arith.constant 0 : i32
    return %c0_i32, %c0_i32_0 : i32, i32
  }
  func.func @transform_9(%arg0: i32) -> (i32, i32, i32) {
    %c0_i32 = arith.constant 0 : i32
    %c0_i32_0 = arith.constant 0 : i32
    %c0_i32_1 = arith.constant 0 : i32
    %c0_i32_2 = arith.constant 0 : i32
    return %c0_i32, %c0_i32_0, %c0_i32_1 : i32, i32, i32
  }
  func.func @transform_10(%arg0: i32) -> (i32, i32) {
    %c0_i32 = arith.constant 0 : i32
    %c0_i32_0 = arith.constant 0 : i32
    %c0_i32_1 = arith.constant 0 : i32
    return %c0_i32, %c0_i32_0 : i32, i32
  }
  func.func @transform_11(%arg0: i32) -> (i32, i32, i32) {
    %c0_i32 = arith.constant 0 : i32
    %c0_i32_0 = arith.constant 0 : i32
    %c0_i32_1 = arith.constant 0 : i32
    %c0_i32_2 = arith.constant 0 : i32
    return %c0_i32, %c0_i32_0, %c0_i32_1 : i32, i32, i32
  }
  func.func @transform_12(%arg0: i32) -> (i32, i32) {
    %c0_i32 = arith.constant 0 : i32
    %c0_i32_0 = arith.constant 0 : i32
    %c0_i32_1 = arith.constant 0 : i32
    return %c0_i32, %c0_i32_0 : i32, i32
  }
  func.func @transform_13(%arg0: i32) -> (i32, i32, i32) {
    %c0_i32 = arith.constant 0 : i32
    %c0_i32_0 = arith.constant 0 : i32
    %c0_i32_1 = arith.constant 0 : i32
    %c0_i32_2 = arith.constant 0 : i32
    return %c0_i32, %c0_i32_0, %c0_i32_1 : i32, i32, i32
  }
  func.func @transform_14(%arg0: i32) -> (i32, i32) {
    %c0_i32 = arith.constant 0 : i32
    %c0_i32_0 = arith.constant 0 : i32
    %c0_i32_1 = arith.constant 0 : i32
    return %c0_i32, %c0_i32_0 : i32, i32
  }
  func.func @transform_15(%arg0: i32) -> (i32, i32, i32) {
    %c0_i32 = arith.constant 0 : i32
    %c0_i32_0 = arith.constant 0 : i32
    %c0_i32_1 = arith.constant 0 : i32
    %c0_i32_2 = arith.constant 0 : i32
    return %c0_i32, %c0_i32_0, %c0_i32_1 : i32, i32, i32
  }
  func.func @transform_16(%arg0: i32) -> (i32, i32) {
    %c0_i32 = arith.constant 0 : i32
    %c0_i32_0 = arith.constant 0 : i32
    %c0_i32_1 = arith.constant 0 : i32
    return %c0_i32, %c0_i32_0 : i32, i32
  }
  func.func @transform_17(%arg0: i32) -> (i32, i32, i32, i32) {
    %c0_i32 = arith.constant 0 : i32
    %c0_i32_0 = arith.constant 0 : i32
    %c0_i32_1 = arith.constant 0 : i32
    %c0_i32_2 = arith.constant 0 : i32
    %c0_i32_3 = arith.constant 0 : i32
    return %c0_i32, %c0_i32_0, %c0_i32_1, %c0_i32_2 : i32, i32, i32, i32
  }
  func.func @transform_18(%arg0: i32) -> (i32, i32) {
    %c0_i32 = arith.constant 0 : i32
    %c0_i32_0 = arith.constant 0 : i32
    %c0_i32_1 = arith.constant 0 : i32
    return %c0_i32, %c0_i32_0 : i32, i32
  }
  func.func @transform_19(%arg0: i32) -> (i32, i32) {
    %c0_i32 = arith.constant 0 : i32
    %c0_i32_0 = arith.constant 0 : i32
    %c0_i32_1 = arith.constant 0 : i32
    return %c0_i32, %c0_i32_0 : i32, i32
  }
  func.func @transform_20(%arg0: i32) -> (i32, i32) {
    %c0_i32 = arith.constant 0 : i32
    %c0_i32_0 = arith.constant 0 : i32
    %c0_i32_1 = arith.constant 0 : i32
    return %c0_i32, %c0_i32_0 : i32, i32
  }
  func.func @transform_21(%arg0: i32) -> (i32, i32, i32) {
    %c0_i32 = arith.constant 0 : i32
    %c0_i32_0 = arith.constant 0 : i32
    %c0_i32_1 = arith.constant 0 : i32
    return %arg0, %c0_i32, %c0_i32_0 : i32, i32, i32
  }
}

</mosaic_0001>

<bundles_post_ra>
// kernel: forward.1
= control target key start
LH: loop header
LB: loop body
LE: loop exit
PB: predicated region body
PF: predicated region fallthrough
CT: control target
= control target key end

     0   :  { %s15981_s0 = inlined_call_operand.vmem [shape: f32[2,16,76,1], index: 0, kind: input, shape index: {}]   ;;  %s15982_s1 = inlined_call_operand.vmem [shape: f32[5,1,25], index: 1, kind: input, shape index: {}]   ;;  %s15983_s2 = inlined_call_operand.vmem [shape: f32[1,25], index: 2, kind: input, shape index: {}]   ;;  %s15984_s3 = inlined_call_operand.vmem [shape: f32[3,25,25], index: 3, kind: input, shape index: {}]   ;;  %s15985_s4 = inlined_call_operand.vmem [shape: f32[1,25], index: 4, kind: input, shape index: {}]   ;;  %s15986_s5 = inlined_call_operand.vmem [shape: f32[5,25,50], index: 5, kind: input, shape index: {}]   ;;  %s15987_s6 = inlined_call_operand.vmem [shape: f32[1,50], index: 6, kind: input, shape index: {}]   ;;  %s15988_s7 = inlined_call_operand.vmem [shape: f32[3,50,50], index: 7, kind: input, shape index: {}]   ;;  %s15989_s8 = inlined_call_operand.vmem [shape: f32[1,50], index: 8, kind: input, shape index: {}]   ;;  %s15990_s9 = inlined_call_operand.vmem [shape: f32[5,50,100], index: 9, kind: input, shape index: {}]   ;;  %s15991_s10 = inlined_call_operand.vmem [shape: f32[1,100], index: 10, kind: input, shape index: {}]   ;;  %s15992_s11 = inlined_call_operand.vmem [shape: f32[3,100,100], index: 11, kind: input, shape index: {}]   ;;  %s15993_s12 = inlined_call_operand.vmem [shape: f32[1,100], index: 12, kind: input, shape index: {}]   ;;  %s15994_s13 = inlined_call_operand.vmem [shape: f32[5,100,200], index: 13, kind: input, shape index: {}]   ;;  %s15995_s14 = inlined_call_operand.vmem [shape: f32[1,200], index: 14, kind: input, shape index: {}]   ;;  %s15996_s15 = inlined_call_operand.vmem [shape: f32[3,200,200], index: 15, kind: input, shape index: {}]   ;;  %s15997_s16 = inlined_call_operand.vmem [shape: f32[1,200], index: 16, kind: input, shape index: {}]   ;;  %s15998_s17 = inlined_call_operand.vmem [shape: f32[5,1,200,256], index: 17, kind: input, shape index: {}]   ;;  %s15999_s18 = inlined_call_operand.vmem [shape: f32[1,256], index: 18, kind: input, shape index: {}]   ;;  %s16000_s19 = inlined_call_operand.vmem [shape: f32[256,3], index: 19, kind: input, shape index: {}]   ;;  %s16001_s20 = inlined_call_operand.vmem [shape: f32[1,3], index: 20, kind: input, shape index: {}]   ;;  %s16002_s21 = inlined_call_operand.hbm [shape: f32[2,1,3], index: 21, kind: output, shape index: {}]  }
   0x1   :  { %16248 = sst [smem:[#allocation80_spill]] %s15981_s0 }
   0x2   :  { %16249 = sst [smem:[#allocation81_spill]] %s15982_s1 }
   0x3   :  { %16250 = sst [smem:[#allocation82_spill]] %s15983_s2 }
   0x4   :  { %16251 = sst [smem:[#allocation83_spill]] %s15984_s3 }
   0x5   :  { %16252 = sst [smem:[#allocation84_spill]] %s15985_s4 }
   0x6   :  { %16253 = sst [smem:[#allocation85_spill]] %s15986_s5 }
   0x7   :  { %16254 = sst [smem:[#allocation86_spill]] %s15987_s6 }
   0x8   :  { %16255 = sst [smem:[#allocation87_spill]] %s15988_s7 }
   0x9   :  { %16256 = sst [smem:[#allocation88_spill]] %s15989_s8 }
   0xa   :  { %16257 = sst [smem:[#allocation89_spill]] %s15990_s9 }
   0xb   :  { %26 = vsyncpa [#allocation3], 0 }
   0xc   :  { %28 = vsyncpa [#allocation3 + $0x1], 0  ;;  %s9109_s2 = smov 0   ;;  %s9111_s25 = smov 0  }
   0xd   :  { %s9113_s26 = smov 0   ;;  %s9115_s27 = smov 0  }
   0xe LB: > { %16258 = sst [smem:[#allocation5_spill]] %s8983_s2  ;;  %s9130_s3 = sadd.s32 4294967295, %s8995_s27   ;;  %s8995_s27 = sphi %s9115_s27, %s17097_s27   ;;  %s8991_s26 = sphi %s9113_s26, %s17099_s26   ;;  %s8987_s25 = sphi %s9111_s25, %s17101_s25   ;;  %s8983_s2 = sphi %s9109_s2, %s17100_s2  }
   0xf   : > { %16259 = sst [smem:[#allocation6_spill]] %s8991_s26  ;;  %s7944_s28 = sadd.s32 4294967294, %s8995_s27  }
  0x10   : > { %16260 = sst [smem:[#allocation7_spill]] %s8995_s27  ;;  %s9134_s29 = sadd.s32 1, %s8995_s27  }
  0x11   : > { %16261 = sst [smem:[#allocation8_spill]] %s9134_s29  ;;  %s487_s0 = sadd.s32 1, %s8991_s26 }
  0x12   : > { %s484_s4 = ssub.s32 %s8995_s27, %s9134_s29  ;;  %p497_p0 = scmp.ne.s32.totalorder %s8991_s26, %s8987_s25 }
  0x13   : > { %p485_p1 = scmp.eq.s32.totalorder %s484_s4, 0  ;;  %p498_p2 = scmp.eq.s32.totalorder %s9130_s3, 1 }
  0x14   : > { %p503_p3 = scmp.ne.s32.totalorder %s8987_s25, %s8983_s2  ;;  %p504_p4 = scmp.eq.s32.totalorder %s7944_s28, 1 }
  0x15   : > { %s9145_s30 = scalar_select %p485_p1, %s8991_s26, %s487_s0  }
  0x16   : > { %p9147_p5 = por %p498_p2, %p497_p0  ;;  %p9151_p6 = por %p504_p4, %p503_p3 }
  0x17   : > { %16262 = sst [smem:[#allocation9_spill]] %s9145_s30  ;;  %p7947_p7 = scmp.ge.s32.totalorder %s8995_s27, 1 }
  0x18   : > { %s16263_s5 = scalar_select %p9147_p5, 1, 0 }
  0x19   : > { %s16265_s22 = scalar_select %p9151_p6, 1, 0 }
  0x1a   : > { %16264 = sst [smem:[#allocation10_spill]] %s16263_s5  ;;  %p590_p8 = scmp.lt.s32.totalorder %s8995_s27, 3 }
  0x1b   : > { %16266 = sst [smem:[#allocation11_spill]] %s16265_s22 }
  0x1c   : > { %p591_p9 = pnand %p7947_p7, %p590_p8 }
  0x1e   : > { %594 = sbr.rel (%p591_p9) target bundleno = 2918 (0xb66), region = 104 }
  0x23   : > { %p649_p10 = scmp.lt.s32.totalorder %s9130_s3, 1  ;;  %v8997_v0 = vmov 0   ;;  %s16267_s0 = sld [smem:[#allocation80_spill]]  ;;  %vm2784_vm0 = vcmask 1040384   ;;  %vm845_vm1 = vcmask 1046528   ;;  %vm906_vm2 = vcmask 1045504  }
  0x24   : > { %8909 = vset.pattern.permute.xlu2 %v8997_v0  ;;  %8908 = vset.pattern.permute.xlu1 %v8997_v0  ;;  %s16268_s24 = sld [smem:[#allocation81_spill]]  ;;  %vm967_vm3 = vcmask 1044480   ;;  %vm1028_vm4 = vcmask 1043456   ;;  %vm2756_vm5 = vcmask 203776  }
  0x25   : > { %8907 = vset.pattern.permute.xlu0 %v8997_v0  ;;  %s650_s23 = scalar_select %p649_p10, %s9130_s3, 1 }
  0x26   : > { %s16269_s30 = sld [smem:[#allocation83_spill]] }
  0x27   : > { %s8865_s1 = smul.u32 1280, %s650_s23  ;;  %s16270_s27 = sld [smem:[#allocation82_spill]] }
  0x28   : > { %s16873_s29 = sld [smem:[#allocation84_spill]]  ;;  %s7885_s23 = scalar_lea.hbm %s16002_s21, %s9130_s3 }
  0x29   : > { %s9162_s4 = scalar_lea.vmem %s16267_s0, %s8865_s1  ;;  %s16880_s28 = sld [smem:[#allocation85_spill]] }
  0x2a   : > { %v7971_v1 = vld [vmem:[%s9162_s4 + $0x240] sm:$0xff]  ;;  %v7969_v2 = vld [vmem:[%s9162_s4 + $0x230] sm:$0xff]  ;;  %v7970_v4 = vld [vmem:[%s9162_s4 + $0x238] sm:$0xff]  ;;  %s16881_s6 = sld [smem:[#allocation86_spill]]  ;;  %s7889_s22 = sshll.u32 %s7885_s23, 4  ;;  %s7890_s22 = int_to_ptr.hbm [resolvable:$true] %s7889_s22 }
  0x2b   : > { %v7949_v3 = vld [vmem:[%s9162_s4 + $0xf0] sm:$0xff]  ;;  %1428 = vperm.xlu2 %8909, %v7971_v1   ;;  %1418 = vperm.xlu0 %8907, %v7969_v2   ;;  %v7951_v5 = vld [vmem:[%s9162_s4 + $0x100] sm:$0xff]  ;;  %v7950_v6 = vld [vmem:[%s9162_s4 + $0xf8] sm:$0xff]  ;;  %s16882_s7 = sld [smem:[#allocation87_spill]] }
  0x2c   : > { %753 = vperm.xlu1 %8908, %v7949_v3   ;;  %v7960_v7 = vld [vmem:[%s9162_s4 + $0x198] sm:$0xff]  ;;  %v7972_v8 = vld [vmem:[%s9162_s4 + $0x248] sm:$0xff]  ;;  %v7961_v9 = vld [vmem:[%s9162_s4 + $0x1a0] sm:$0xff]  ;;  %s16883_s8 = sld [smem:[#allocation88_spill]] }
  0x2d   : > { %v7952_v10 = vld [vmem:[%s9162_s4 + $0x108] sm:$0xff]  ;;  %v7973_v11 = vld [vmem:[%s9162_s4 + $0x250] sm:$0xff]  ;;  %v7974_v14 = vld [vmem:[%s9162_s4 + $0x258] sm:$0xff]  ;;  %s16271_s5 = smov %s16270_s27  ;;  %s16884_s9 = sld [smem:[#allocation89_spill]] }
  0x2e   : > { %v7962_v12 = vld [vmem:[%s9162_s4 + $0x1a8] sm:$0xff]  ;;  %v7953_v13 = vld [vmem:[%s9162_s4 + $0x110] sm:$0xff]  ;;  %v7954_v16 = vld [vmem:[%s9162_s4 + $0x118] sm:$0xff] }
  0x2f   : > { %v7963_v15 = vld [vmem:[%s9162_s4 + $0x1b0] sm:$0xff]  ;;  %v7975_v17 = vld [vmem:[%s9162_s4 + $0x260] sm:$0xff]  ;;  %v7964_v18 = vld [vmem:[%s9162_s4 + $0x1b8] sm:$0xff] }
  0x30   : > { %v7955_v19 = vld [vmem:[%s9162_s4 + $0x120] sm:$0xff]  ;;  %v7976_v20 = vld [vmem:[%s9162_s4 + $0x268] sm:$0xff]  ;;  %v7977_v23 = vld [vmem:[%s9162_s4 + $0x270] sm:$0xff] }
  0x31   : > { %v7965_v21 = vld [vmem:[%s9162_s4 + $0x1c0] sm:$0xff]  ;;  %v7956_v22 = vld [vmem:[%s9162_s4 + $0x128] sm:$0xff]  ;;  %v7957_v25 = vld [vmem:[%s9162_s4 + $0x130] sm:$0xff] }
  0x32   : > { %v7966_v24 = vld [vmem:[%s9162_s4 + $0x1c8] sm:$0xff]  ;;  %v7978_v26 = vld [vmem:[%s9162_s4 + $0x278] sm:$0xf]  ;;  %v7967_v27 = vld [vmem:[%s9162_s4 + $0x1d0] sm:$0xff] }
  0x33   : > { %1423 = vperm.xlu0 %8907, %v7970_v4   ;;  %763 = vperm.xlu2 %8909, %v7951_v5   ;;  %v7958_v28 = vld [vmem:[%s9162_s4 + $0x138] sm:$0xf]  ;;  %v7959_v29 = vld [vmem:[%s9162_s4 + $0x190] sm:$0xff]  ;;  %v8001_v38 = vld [vmem:[%s9162_s4 + $0x4c0] sm:$0xff] }
  0x34   : > { %758 = vperm.xlu1 %8908, %v7950_v6   ;;  %v7968_v30 = vld [vmem:[%s9162_s4 + $0x1d8] sm:$0xf]  ;;  %v7999_v31 = vld [vmem:[%s9162_s4 + $0x4b0] sm:$0xff]  ;;  %v7991_v39 = vld [vmem:[%s9162_s4 + $0x420] sm:$0xff] }
  0x35   : > { %v7979_v32 = vld [vmem:[%s9162_s4 + $0x370] sm:$0xff]  ;;  %v8000_v33 = vld [vmem:[%s9162_s4 + $0x4b8] sm:$0xff]  ;;  %v7981_v40 = vld [vmem:[%s9162_s4 + $0x380] sm:$0xff] }
  0x36   : > { %v7980_v34 = vld [vmem:[%s9162_s4 + $0x378] sm:$0xff]  ;;  %v7989_v36 = vld [vmem:[%s9162_s4 + $0x410] sm:$0xff]  ;;  %v8002_v42 = vld [vmem:[%s9162_s4 + $0x4c8] sm:$0xff] }
  0x37   : > { %v7990_v35 = vld [vmem:[%s9162_s4 + $0x418] sm:$0xff]  ;;  %v7992_v43 = vld [vmem:[%s9162_s4 + $0x428] sm:$0xff]  ;;  %v9209_v45 = vld [vmem:[%s16268_s24] ss:$0 sm:$0xff] }
  0x38   : > { %v7982_v44 = vld [vmem:[%s9162_s4 + $0x388] sm:$0xff]  ;;  %v9214_v46 = vld [vmem:[%s16269_s30 + $0x18] sm:$0x1]  ;;  %v9222_v48 = vld [vmem:[%s16268_s24 + $0x1] ss:$0 sm:$0xff] }
  0x39   : > { %v8020_v47 = vld [vmem:[%s16269_s30 + $0x58] sm:$0x1]  ;;  %v9227_v49 = vld [vmem:[%s16268_s24 + $0x2] ss:$0 sm:$0xff]  ;;  %v9232_v50 = vld [vmem:[%s16268_s24 + $0x3] ss:$0 sm:$0xff]  ;;  %8031 = vmatpush.msk.msra.mxu0 %vm2784_vm0, %v9214_v46 }
  0x3a   : > { %8051 = vmatpush.msk.msra.mxu2 %vm2784_vm0, %v8020_v47  ;;  %v9240_v52 = vld [vmem:[%s16269_s30 + $0x10] sm:$0xff]  ;;  %v9248_v54 = vld [vmem:[%s16269_s30 + $0x8] sm:$0xff]  ;;  %v9257_v56 = vld [vmem:[%s16268_s24 + $0x4] ss:$0 sm:$0xff] }
  0x3b   : > { %1100 = vperm.xlu0 %8907, %v7960_v7   ;;  %1433 = vperm.xlu2 %8909, %v7972_v8   ;;  %v8019_v53 = vld [vmem:[%s16269_s30 + $0x50] sm:$0xff]  ;;  %v8018_v55 = vld [vmem:[%s16269_s30 + $0x48] sm:$0xff]  ;;  %v9262_v57 = vld [vmem:[%s16269_s30] sm:$0xff] }
  0x3c   : > { %1105 = vperm.xlu1 %8908, %v7961_v9   ;;  %2801 = vmatpush.msra.mxu0 %v9240_v52  ;;  %v9267_v58 = vld [vmem:[%s16270_s27] ss:$0 sm:$0xff]  ;;  %v8003_v62 = vld [vmem:[%s9162_s4 + $0x4d0] sm:$0xff]  ;;  %s647_s27 = sand.u32 1, %s8987_s25  }
  0x3d   : > { %2967 = vmatpush.msra.mxu2 %v8019_v53  ;;  %v7993_v63 = vld [vmem:[%s9162_s4 + $0x430] sm:$0xff]  ;;  %v8017_v4 = vld [vmem:[%s16269_s30 + $0x40] sm:$0xff]  ;;  %s648_s26 = scalar_lea.vmem [#allocation2], %s647_s27 }
  0x3e   : > { %2802 = vmatpush.msra.mxu0 %v9248_v54  ;;  %v7983_v3 = vld [vmem:[%s9162_s4 + $0x390] sm:$0xff] }
  0x3f   : > { %2968 = vmatpush.msra.mxu2 %v8018_v55 }
  0x40   : > { %2803 = vmatpush.msra.mxu0 %v9262_v57 }
  0x41   : > { %2969 = vmatpush.msra.mxu2 %v8017_v4 }
  0x43   : > { %768 = vperm.xlu0 %8907, %v7952_v10   ;;  %1438 = vperm.xlu2 %8909, %v7973_v11  }
  0x44   : > { %1110 = vperm.xlu1 %8908, %v7962_v12   ;;  %8091 = vmatpush.msk.msrb.mxu2 %vm2784_vm0, %v8020_v47 }
  0x46   : > { %3334 = vmatpush.msrb.mxu2 %v8019_v53 }
  0x48   : > { %3335 = vmatpush.msrb.mxu2 %v8018_v55 }
  0x4a   : > { %3336 = vmatpush.msrb.mxu2 %v8017_v4 }
  0x4b   : > { %773 = vperm.xlu0 %8907, %v7953_v13   ;;  %1443 = vperm.xlu2 %8909, %v7974_v14  }
  0x4c   : > { %1115 = vperm.xlu1 %8908, %v7963_v15   ;;  %v7995_v15 = vld [vmem:[%s9162_s4 + $0x440] sm:$0xff] }
  0x53   : > { %778 = vperm.xlu0 %8907, %v7954_v16   ;;  %1448 = vperm.xlu2 %8909, %v7975_v17  }
  0x54   : > { %1120 = vperm.xlu1 %8908, %v7964_v18  }
  0x5b   : > { %783 = vperm.xlu0 %8907, %v7955_v19   ;;  %1453 = vperm.xlu2 %8909, %v7976_v20  }
  0x5c   : > { %1125 = vperm.xlu1 %8908, %v7965_v21   ;;  %v7985_v21 = vld [vmem:[%s9162_s4 + $0x3a0] sm:$0xff] }
  0x63   : > { %788 = vperm.xlu0 %8907, %v7956_v22   ;;  %1458 = vperm.xlu2 %8909, %v7977_v23  }
  0x64   : > { %1130 = vperm.xlu1 %8908, %v7966_v24  }
  0x6b   : > { %793 = vperm.xlu0 %8907, %v7957_v25   ;;  %1481 = vperm.xlu2 %8909, %v7978_v26  }
  0x6c   : > { %1135 = vperm.xlu1 %8908, %v7967_v27  }
  0x73   : > { %819 = vperm.xlu0 %8907, %v7958_v28   ;;  %1095 = vperm.xlu2 %8909, %v7959_v29  }
  0x74   : > { %1158 = vperm.xlu1 %8908, %v7968_v30  }
  0x7b   : > { %2387 = vperm.xlu0 %8907, %v7999_v31   ;;  %1741 = vperm.xlu2 %8909, %v7979_v32  }
  0x7c   : > { %2392 = vperm.xlu1 %8908, %v8000_v33  }
  0x83   : > { %1746 = vperm.xlu0 %8907, %v7980_v34   ;;  %2069 = vperm.xlu2 %8909, %v7990_v35   ;;  %v8004_v34 = vld [vmem:[%s9162_s4 + $0x4d8] sm:$0xff] }
  0x84   : > { %2064 = vperm.xlu1 %8908, %v7989_v36   ;;  %v7994_v35 = vld [vmem:[%s9162_s4 + $0x438] sm:$0xff] }
  0x85   : > { %v1429_v37 = vpop.permute.xlu2 %1428 }
  0x86   : > { %v1463_v59 = vmul.f32 %v9209_v45, %v1429_v37  ;;  %v9271_v60 = vmul.f32 %v9222_v48, %v1429_v37  ;;  %v9274_v61 = vmul.f32 %v9227_v49, %v1429_v37  ;;  %v9280_v0 = vmul.f32 %v9232_v50, %v1429_v37 }
  0x87   : > { %v9283_v1 = vmul.f32 %v9257_v56, %v1429_v37 }
  0x88   : > { %16272 = vst [vmem:[#allocation12_spill] sm:$0xff] %v9280_v0  ;;  %v9308_v11 = vadd.f32 %v9267_v58, %v1463_v59  ;;  %v16016_v12 = vrot.slane %v9271_v60, 1  ;;  %v7987_v0 = vld [vmem:[%s9162_s4 + $0x3b0] sm:$0xff] }
  0x89   : > { %16273 = vst [vmem:[#allocation13_spill] sm:$0xff] %v9283_v1  ;;  %v7997_v1 = vld [vmem:[%s9162_s4 + $0x450] sm:$0xff] }
  0x8a   : > { %16275 = vst [vmem:[#allocation15_spill] sm:$0xff] %v9308_v11 }
  0x8b   : > { %2397 = vperm.xlu0 %8907, %v8001_v38   ;;  %2074 = vperm.xlu2 %8909, %v7991_v39  }
  0x8c   : > { %1751 = vperm.xlu1 %8908, %v7981_v40   ;;  %v7984_v40 = vld [vmem:[%s9162_s4 + $0x398] sm:$0xff] }
  0x8d   : > { %v764_v41 = vpop.permute.xlu2 %763 }
  0x8e   : > { %v801_v2 = vmul.f32 %v9209_v45, %v764_v41  ;;  %v9291_v5 = vmul.f32 %v9222_v48, %v764_v41  ;;  %v9294_v6 = vmul.f32 %v9227_v49, %v764_v41  ;;  %v9297_v7 = vmul.f32 %v9232_v50, %v764_v41 }
  0x8f   : > { %v9301_v8 = vmul.f32 %v9257_v56, %v764_v41 }
  0x90   : > { %v9318_v17 = vadd.f32 %v9267_v58, %v801_v2 }
  0x92   : > { %16277 = vst [vmem:[#allocation17_spill] sm:$0xff] %v9318_v17 }
  0x93   : > { %2402 = vperm.xlu0 %8907, %v8002_v42   ;;  %2079 = vperm.xlu2 %8909, %v7992_v43  }
  0x94   : > { %1756 = vperm.xlu1 %8908, %v7982_v44  }
  0x95   : > { %v1434_v51 = vpop.permute.xlu2 %1433 }
  0x96   : > { %v1464_v9 = vmul.f32 %v9209_v45, %v1434_v51  ;;  %v9305_v10 = vmul.f32 %v9222_v48, %v1434_v51  ;;  %v9313_v14 = vmul.f32 %v9227_v49, %v1434_v51  ;;  %v9321_v18 = vmul.f32 %v9232_v50, %v1434_v51 }
  0x97   : > { %v9334_v29 = vmul.f32 %v9257_v56, %v1434_v51 }
  0x98   : > { %16274 = vst [vmem:[#allocation14_spill] sm:$0xff] %v9305_v10  ;;  %v9330_v27 = vadd.f32 %v9267_v58, %v1464_v9  ;;  %v16015_v28 = vrot.slane %v9305_v10, 1 }
  0x99   : > { %16276 = vst [vmem:[#allocation16_spill] sm:$0xff] %v9313_v14 }
  0x9a   : > { %16278 = vst [vmem:[#allocation18_spill] sm:$0xff] %v9321_v18 }
  0x9b   : > { %2407 = vperm.xlu0 %8907, %v8003_v62   ;;  %2084 = vperm.xlu2 %8909, %v7993_v63   ;;  %16279 = vst [vmem:[#allocation19_spill] sm:$0xff] %v9330_v27  ;;  %v7996_v27 = vld [vmem:[%s9162_s4 + $0x448] sm:$0xff] }
  0x9c   : > { %1761 = vperm.xlu1 %8908, %v7983_v3   ;;  %16280 = vst [vmem:[#allocation20_spill] sm:$0xff] %v9334_v29  ;;  %v8016_v3 = vld [vmem:[%s16269_s30 + $0x38] sm:$0x1] }
  0x9d   : > { %v1419_v19 = vpop.permute.xlu0 %1418  ;;  %v1439_v20 = vpop.permute.xlu2 %1438  ;;  %8861 = vmatpush.msk.msra.mxu1 %vm2784_vm0, %v8016_v3  ;;  %8041 = vmatpush.msk.msrb.mxu0 %vm2784_vm0, %v8016_v3 }
  0x9e   : > { %v1461_v24 = vmul.f32 %v9209_v45, %v1419_v19  ;;  %v754_v25 = vpop.permute.xlu1 %753  ;;  %v9338_v31 = vmul.f32 %v9222_v48, %v1419_v19  ;;  %v9341_v32 = vmul.f32 %v9227_v49, %v1419_v19  ;;  %v9344_v33 = vmul.f32 %v9232_v50, %v1419_v19 }
  0x9f   : > { %v9350_v37 = vmul.f32 %v9257_v56, %v1419_v19  ;;  %v1465_v38 = vmul.f32 %v9209_v45, %v1439_v20  ;;  %v9354_v39 = vmul.f32 %v9222_v48, %v1439_v20  ;;  %v9361_v42 = vmul.f32 %v9227_v49, %v1439_v20  ;;  %v9480_v19 = vld [vmem:[%s16269_s30 + $0x20] sm:$0xff] }
  0xa0   : > { %v9358_v41 = vadd.f32 %v9267_v58, %v1461_v24  ;;  %v9364_v43 = vmul.f32 %v9232_v50, %v1439_v20  ;;  %v9367_v44 = vmul.f32 %v9257_v56, %v1439_v20  ;;  %v799_v51 = vmul.f32 %v9209_v45, %v754_v25 }
  0xa1   : > { %16281 = vst [vmem:[#allocation21_spill] sm:$0xff] %v9354_v39  ;;  %v9372_v53 = vmul.f32 %v9222_v48, %v754_v25  ;;  %v9375_v55 = vmul.f32 %v9227_v49, %v754_v25  ;;  %v9381_v2 = vmul.f32 %v9232_v50, %v754_v25  ;;  %v9385_v9 = vadd.f32 %v9267_v58, %v1465_v38 }
  0xa2   : > { %16282 = vst [vmem:[#allocation22_spill] sm:$0xff] %v9361_v42  ;;  %v9389_v20 = vmul.f32 %v9257_v56, %v754_v25  ;;  %v9396_v36 = vadd.f32 %v9267_v58, %v799_v51  ;;  %v8005_v51 = vld [vmem:[%s9162_s4 + $0x4e0] sm:$0xff]  ;;  %v8006_v42 = vld [vmem:[%s9162_s4 + $0x4e8] sm:$0xff] }
  0xa3   : > { %16283 = vst [vmem:[#allocation23_spill] sm:$0xff] %v9364_v43  ;;  %2412 = vperm.xlu0 %8907, %v8004_v34   ;;  %2089 = vperm.xlu2 %8909, %v7994_v35   ;;  %v9447_v35 = vsel %vm845_vm1, %v16016_v12, %v16015_v28 }
  0xa4   : > { %16284 = vst [vmem:[#allocation24_spill] sm:$0xff] %v9367_v44  ;;  %1766 = vperm.xlu1 %8908, %v7984_v40  }
  0xa5   : > { %16285 = vst [vmem:[#allocation25_spill] sm:$0xff] %v9385_v9  ;;  %v1424_v24 = vpop.permute.xlu0 %1423  ;;  %v1444_v34 = vpop.permute.xlu2 %1443 }
  0xa6   : > { %v1462_v40 = vmul.f32 %v9209_v45, %v1424_v24  ;;  %v759_v38 = vpop.permute.xlu1 %758  ;;  %v9401_v30 = vmul.f32 %v9222_v48, %v1424_v24  ;;  %v9405_v47 = vmul.f32 %v9227_v49, %v1424_v24  ;;  %v9408_v4 = vmul.f32 %v9232_v50, %v1424_v24  ;;  %16290 = vst [vmem:[#allocation30_spill] sm:$0xff] %v9447_v35 }
  0xa7   : > { %v9411_v16 = vmul.f32 %v9257_v56, %v1424_v24  ;;  %v1466_v26 = vmul.f32 %v9209_v45, %v1444_v34  ;;  %v9418_v23 = vmul.f32 %v9222_v48, %v1444_v34  ;;  %v9421_v22 = vmul.f32 %v9227_v49, %v1444_v34  ;;  %v9430_v24 = vld [vmem:[%s16269_s30 + $0x30] sm:$0xff] }
  0xa8   : > { %v9433_v63 = vadd.f32 %v9267_v58, %v1462_v40  ;;  %v9436_v13 = vmul.f32 %v9232_v50, %v1444_v34  ;;  %v9439_v62 = vmul.f32 %v9257_v56, %v1444_v34  ;;  %v800_v40 = vmul.f32 %v9209_v45, %v759_v38  ;;  %v9460_v34 = vld [vmem:[%s16269_s30 + $0x28] sm:$0xff]  ;;  %8862 = vmatpush.msra.mxu1 %v9430_v24 }
  0xa9   : > { %16286 = vst [vmem:[#allocation26_spill] sm:$0xff] %v9418_v23  ;;  %v9452_v25 = vmul.f32 %v9222_v48, %v759_v38  ;;  %v9455_v59 = vmul.f32 %v9227_v49, %v759_v38  ;;  %v9466_v9 = vmul.f32 %v9232_v50, %v759_v38  ;;  %v9475_v43 = vmul.f32 %v9257_v56, %v759_v38 }
  0xaa   : > { %16287 = vst [vmem:[#allocation27_spill] sm:$0xff] %v9421_v22  ;;  %8863 = vmatpush.msra.mxu1 %v9460_v34  ;;  %2884 = vmatpush.msrb.mxu0 %v9430_v24  ;;  %v16297_v39 = vrot.slane %v9401_v30, 1 }
  0xab   : > { %16288 = vst [vmem:[#allocation28_spill] sm:$0xff] %v9436_v13  ;;  %2417 = vperm.xlu0 %8907, %v8005_v51   ;;  %2094 = vperm.xlu2 %8909, %v7995_v15   ;;  %v9470_v51 = vadd.f32 %v9267_v58, %v1466_v26  ;;  %v7986_v26 = vld [vmem:[%s9162_s4 + $0x3a8] sm:$0xff] }
  0xac   : > { %16289 = vst [vmem:[#allocation29_spill] sm:$0xff] %v9439_v62  ;;  %1771 = vperm.xlu1 %8908, %v7985_v21   ;;  %8864 = vmatpush.msra.mxu1 %v9480_v19 }
  0xad   : > { %16291 = vst [vmem:[#allocation31_spill] sm:$0xff] %v9470_v51  ;;  %v1101_v28 = vpop.permute.xlu0 %1100  ;;  %v1449_v12 = vpop.permute.xlu2 %1448  ;;  %v9491_v51 = vadd.f32 %v9267_v58, %v800_v40  ;;  %2885 = vmatpush.msrb.mxu0 %v9460_v34 }
  0xae   : > { %v1139_v44 = vmul.f32 %v9209_v45, %v1101_v28  ;;  %v9487_v38 = vmul.f32 %v9222_v48, %v1101_v28  ;;  %v1106_v15 = vpop.permute.xlu1 %1105  ;;  %v9496_v21 = vmul.f32 %v9227_v49, %v1101_v28  ;;  %v9501_v62 = vmul.f32 %v9232_v50, %v1101_v28  ;;  %8081 = vmatpush.msk.msrb.mxu1 %vm2784_vm0, %v8016_v3 }
  0xaf   : > { %v9504_v13 = vmul.f32 %v9257_v56, %v1101_v28  ;;  %v1467_v40 = vmul.f32 %v9209_v45, %v1449_v12  ;;  %v9512_v22 = vmul.f32 %v9222_v48, %v1449_v12  ;;  %v9515_v10 = vmul.f32 %v9227_v49, %v1449_v12  ;;  %2886 = vmatpush.msrb.mxu0 %v9480_v19 }
  0xb0   : > { %16292 = vst [vmem:[#allocation32_spill] sm:$0xff] %v9496_v21  ;;  %v16298_v28 = vrot.slane %v9338_v31, 1  ;;  %v9528_v23 = vadd.f32 %v9267_v58, %v1139_v44  ;;  %v9532_v14 = vmul.f32 %v9232_v50, %v1449_v12  ;;  %v9535_v35 = vmul.f32 %v9257_v56, %v1449_v12  ;;  %3254 = vmatpush.msrb.mxu1 %v9430_v24  ;;  %v8007_v24 = vld [vmem:[%s9162_s4 + $0x4f0] sm:$0xff] }
  0xb1   : > { %16293 = vst [vmem:[#allocation33_spill] sm:$0xff] %v9501_v62  ;;  %v9543_v3 = vmul.f32 %v9227_v49, %v1106_v15  ;;  %v9548_v11 = vadd.f32 %v9267_v58, %v1467_v40  ;;  %v9551_v12 = vmul.f32 %v9232_v50, %v1106_v15 }
  0xb2   : > { %16294 = vst [vmem:[#allocation34_spill] sm:$0xff] %v9504_v13  ;;  %v9523_v29 = vsel %vm845_vm1, %v16298_v28, %v16297_v39  ;;  %v1140_v39 = vmul.f32 %v9209_v45, %v1106_v15  ;;  %v9540_v28 = vmul.f32 %v9222_v48, %v1106_v15  ;;  %3255 = vmatpush.msrb.mxu1 %v9460_v34 }
  0xb3   : > { %16295 = vst [vmem:[#allocation35_spill] sm:$0xff] %v9512_v22  ;;  %2422 = vperm.xlu0 %8907, %v8006_v42   ;;  %2099 = vperm.xlu2 %8909, %v7996_v27   ;;  %v9558_v42 = vmul.f32 %v9257_v56, %v1106_v15  ;;  %v16306_v15 = vrot.slane %v9372_v53, 1 }
  0xb4   : > { %16296 = vst [vmem:[#allocation36_spill] sm:$0xff] %v9515_v10  ;;  %1776 = vperm.xlu1 %8908, %v7986_v26   ;;  %v9570_v27 = vadd.f32 %v9267_v58, %v1140_v39  ;;  %v16305_v10 = vrot.slane %v9452_v25, 1  ;;  %3256 = vmatpush.msrb.mxu1 %v9480_v19 }
  0xb5   : > { %16299 = vst [vmem:[#allocation37_spill] sm:$0xff] %v9532_v14  ;;  %v769_v18 = vpop.permute.xlu0 %768  ;;  %v1454_v44 = vpop.permute.xlu2 %1453 }
  0xb6   : > { %16300 = vst [vmem:[#allocation38_spill] sm:$0xff] %v9535_v35  ;;  %v802_v26 = vmul.f32 %v9209_v45, %v769_v18  ;;  %v9567_v31 = vmul.f32 %v9227_v49, %v769_v18  ;;  %v9575_v40 = vmul.f32 %v9232_v50, %v769_v18  ;;  %v9580_v35 = vmul.f32 %v9257_v56, %v769_v18  ;;  %v1111_v39 = vpop.permute.xlu1 %1110 }
  0xb7   : > { %16301 = vst [vmem:[#allocation39_spill] sm:$0xff] %v9548_v11  ;;  %v9564_v11 = vmul.f32 %v9222_v48, %v769_v18  ;;  %v1468_v14 = vmul.f32 %v9209_v45, %v1454_v44  ;;  %v848_v22 = vsel %vm845_vm1, %v16306_v15, %v16305_v10  ;;  %v9594_v17 = vmul.f32 %v9222_v48, %v1454_v44 }
  0xb8   : > { %16302 = vst [vmem:[#allocation40_spill] sm:$0xff] %v9558_v42  ;;  %v9591_v34 = vadd.f32 %v9267_v58, %v802_v26  ;;  %v9597_v18 = vmul.f32 %v9227_v49, %v1454_v44  ;;  %v9605_v15 = vmul.f32 %v9232_v50, %v1454_v44  ;;  %v9608_v26 = vmul.f32 %v9257_v56, %v1454_v44 }
  0xb9   : > { %16303 = vst [vmem:[#allocation41_spill] sm:$0xff] %v9570_v27  ;;  %v9613_v13 = vmul.f32 %v9222_v48, %v1111_v39  ;;  %v874_v42 = vadd.f32 %v848_v22, %v9396_v36  ;;  %v9618_v10 = vadd.f32 %v9267_v58, %v1468_v14  ;;  %v9621_v53 = vmul.f32 %v9227_v49, %v1111_v39  ;;  %v8008_v27 = vld [vmem:[%s9162_s4 + $0x4f8] sm:$0xf] }
  0xba   : > { %16304 = vst [vmem:[#allocation42_spill] sm:$0xff] %v9575_v40  ;;  %v9624_v44 = vmul.f32 %v9232_v50, %v1111_v39  ;;  %v9629_v22 = vmul.f32 %v9257_v56, %v1111_v39  ;;  %v16313_v36 = vrot.slane %v9455_v59, 2  ;;  %v16314_v14 = vrot.slane %v9375_v55, 2 }
  0xbb   : > { %16307 = vst [vmem:[#allocation43_spill] sm:$0xff] %v9591_v34  ;;  %v1141_v34 = vmul.f32 %v9209_v45, %v1111_v39  ;;  %2427 = vperm.xlu0 %8907, %v8007_v24   ;;  %2104 = vperm.xlu2 %8909, %v7997_v1   ;;  %v16315_v55 = vrot.slane %v9466_v9, 3 }
  0xbc   : > { %16308 = vst [vmem:[#allocation44_spill] sm:$0xff] %v9594_v17  ;;  %1781 = vperm.xlu1 %8908, %v7987_v0   ;;  %v909_v24 = vsel %vm906_vm2, %v16314_v14, %v16313_v36  ;;  %v1532_v0 = vadd.f32 %v9523_v29, %v9358_v41  ;;  %v16316_v36 = vrot.slane %v9381_v2, 3  ;;  %v16319_v2 = vrot.slane %v9475_v43, 4 }
  0xbd   : > { %16309 = vst [vmem:[#allocation45_spill] sm:$0xff] %v9597_v18  ;;  %v935_v1 = vadd.f32 %v909_v24, %v874_v42  ;;  %v774_v40 = vpop.permute.xlu0 %773  ;;  %v9641_v39 = vadd.f32 %v9267_v58, %v1141_v34  ;;  %v16318_v42 = vrot.slane %v9341_v32, 2  ;;  %v16321_v32 = vrot.slane %v9408_v4, 3 }
  0xbe   : > { %16310 = vst [vmem:[#allocation46_spill] sm:$0xff] %v9605_v15  ;;  %v970_v14 = vsel %vm967_vm3, %v16316_v36, %v16315_v55  ;;  %v16320_v55 = vrot.slane %v9389_v20, 4  ;;  %v803_v24 = vmul.f32 %v9209_v45, %v774_v40  ;;  %v16323_v15 = vrot.slane %v9411_v16, 4 }
  0xbf   : > { %16311 = vst [vmem:[#allocation47_spill] sm:$0xff] %v9608_v26  ;;  %v996_v34 = vadd.f32 %v970_v14, %v935_v1  ;;  %v1459_v26 = vpop.permute.xlu2 %1458  ;;  %v7998_v1 = vld [vmem:[%s9162_s4 + $0x458] sm:$0xf]  ;;  %v16324_v41 = vrot.slane %v9350_v37, 4 }
  0xc0   : > { %16312 = vst [vmem:[#allocation48_spill] sm:$0xff] %v9618_v10  ;;  %v16317_v10 = vrot.slane %v9405_v47, 2  ;;  %v1031_v36 = vsel %vm1028_vm4, %v16320_v55, %v16319_v2  ;;  %v9677_v2 = vmul.f32 %v9222_v48, %v774_v40  ;;  %v9680_v55 = vmul.f32 %v9227_v49, %v774_v40 }
  0xc1   : > { %v1057_v14 = vadd.f32 %v1031_v36, %v996_v34  ;;  %v1677_v20 = vsel %vm1028_vm4, %v16324_v41, %v16323_v15  ;;  %v1116_v34 = vpop.permute.xlu1 %1115  ;;  %v9690_v15 = vmul.f32 %v9222_v48, %v1459_v26  ;;  %v9693_v41 = vadd.f32 %v9267_v58, %v803_v24 }
  0xc2   : > { %v1563_v29 = vsel %vm906_vm2, %v16318_v42, %v16317_v10  ;;  %v16322_v10 = vrot.slane %v9344_v33, 3  ;;  %v9683_v33 = vmul.f32 %v9232_v50, %v774_v40  ;;  %v9710_v18 = vmul.f32 %v9222_v48, %v1116_v34 }
  0xc3   : > { %v1589_v19 = vadd.f32 %v1563_v29, %v1532_v0  ;;  %v7988_v0 = vld [vmem:[%s9162_s4 + $0x3b8] sm:$0xf]  ;;  %2450 = vperm.xlu0 %8907, %v8008_v27   ;;  %vm1066_vm6 = vcmp.ge.f32.partialorder %v1057_v14, 0.0  ;;  %v1075_v37 = vmul.f32 0.01, %v1057_v14  ;;  %16325 = vst [vmem:[#allocation49_spill] sm:$0xff] %v9690_v15  ;;  %2127 = vperm.xlu2 %8909, %v7998_v1   ;;  %v9725_v24 = vmul.f32 %v9232_v50, %v1116_v34 }
  0xc4   : > { %v1620_v42 = vsel %vm967_vm3, %v16322_v10, %v16321_v32  ;;  %v9686_v32 = vmul.f32 %v9257_v56, %v774_v40  ;;  %1804 = vperm.xlu1 %8908, %v7988_v0   ;;  %v9696_v10 = vmul.f32 %v9227_v49, %v1459_v26  ;;  %v9699_v40 = vmul.f32 %v9232_v50, %v1459_v26 }
  0xc5   : > { %v1646_v29 = vadd.f32 %v1620_v42, %v1589_v19  ;;  %v1469_v19 = vmul.f32 %v9209_v45, %v1459_v26  ;;  %v9702_v42 = vmul.f32 %v9257_v56, %v1459_v26  ;;  %v1084_v27 = vsel %vm1066_vm6, %v1057_v14, %v1075_v37 }
  0xc6   : > { %16326 = vst [vmem:[#allocation50_spill] sm:$0xff] %v9696_v10  ;;  %8032 = vmatmul.msk.f32.vlgmr.msra.gmra.mxu0 %vm2756_vm5, %v1084_v27  ;;  %v9722_v0 = vmul.f32 %v9227_v49, %v1116_v34  ;;  %v9741_v37 = vmul.f32 %v9257_v56, %v1116_v34 }
  0xc7   : > { %v1703_v36 = vadd.f32 %v1677_v20, %v1646_v29  ;;  %16327 = vst [vmem:[#allocation51_spill] sm:$0xff] %v9699_v40  ;;  %v1142_v20 = vmul.f32 %v9209_v45, %v1116_v34  ;;  %v9714_v14 = vadd.f32 %v9267_v58, %v1469_v19  ;;  %8071 = vmatpush.msk.msra.mxu0 %vm2784_vm0, %v9214_v46  ;;  %v16330_v19 = vrot.slane %v9452_v25, 1  ;;  %v16375_v40 = vld [vmem:[#allocation30_spill] sm:$0xff] }
  0xc8   : > { %16328 = vst [vmem:[#allocation52_spill] sm:$0xff] %v9702_v42  ;;  %v16331_v25 = vrot.slane %v9294_v6, 2  ;;  %v16333_v46 = vrot.slane %v9540_v28, 1  ;;  %v16337_v42 = vrot.slane %v9271_v60, 1 }
  0xc9   : > { %vm1712_vm7 = vcmp.ge.f32.partialorder %v1703_v36, 0.0  ;;  %v1721_v29 = vmul.f32 0.01, %v1703_v36  ;;  %3174 = vmatpush.msra.mxu0 %v9240_v52  ;;  %v16335_v52 = vrot.slane %v9297_v7, 3 }
  0xcb   : > { %v1730_v17 = vsel %vm1712_vm7, %v1703_v36, %v1721_v29  ;;  %v16329_v36 = vrot.slane %v9291_v5, 1  ;;  %3175 = vmatpush.msra.mxu0 %v9248_v54 }
  0xcc   : > { %8052 = vmatmul.msk.f32.vlgmr.msra.gmra.mxu2 %vm2756_vm5, %v1730_v17  ;;  %v9735_v17 = vadd.f32 %v9267_v58, %v1142_v20  ;;  %v16334_v20 = vrot.slane %v9487_v38, 1 }
  0xcd   : > { %v850_v29 = vsel %vm845_vm1, %v16330_v19, %v16329_v36  ;;  %v16332_v36 = vrot.slane %v9455_v59, 2  ;;  %v16338_v59 = vrot.slane %v9401_v30, 1  ;;  %v16341_v30 = vrot.slane %v9301_v8, 4  ;;  %3176 = vmatpush.msra.mxu0 %v9262_v57  ;;  %v1482_v57 = vpop.permute.xlu2 %1481 }
  0xce   : > { %v875_v1 = vadd.f32 %v850_v29, %v9491_v51  ;;  %v1185_v26 = vsel %vm845_vm1, %v16334_v20, %v16333_v46  ;;  %v16336_v29 = vrot.slane %v9466_v9, 3  ;;  %v16339_v46 = vrot.slane %v9543_v3, 2 }
  0xcf   : > { %v911_v19 = vsel %vm906_vm2, %v16332_v36, %v16331_v25  ;;  %v1210_v27 = vadd.f32 %v1185_v26, %v9528_v23  ;;  %v1508_v25 = vsel %vm845_vm1, %v16338_v59, %v16337_v42  ;;  %v16340_v9 = vrot.slane %v9496_v21, 2  ;;  %v779_v26 = vpop.permute.xlu0 %778  ;;  %v16354_v36 = vld [vmem:[#allocation13_spill] sm:$0xff] }
  0xd0   : > { %v936_v51 = vadd.f32 %v911_v19, %v875_v1  ;;  %v972_v34 = vsel %vm967_vm3, %v16336_v29, %v16335_v52  ;;  %v1533_v23 = vadd.f32 %v1508_v25, %v9433_v63  ;;  %v16342_v42 = vrot.slane %v9475_v43, 4  ;;  %v16349_v43 = vld [vmem:[#allocation34_spill] sm:$0xff] }
  0xd1   : > { %v1242_v19 = vsel %vm906_vm2, %v16340_v9, %v16339_v46  ;;  %v16343_v52 = vrot.slane %v9274_v61, 2  ;;  %v16344_v29 = vrot.slane %v9405_v47, 2  ;;  %v16345_v46 = vrot.slane %v9551_v12, 3 }
  0xd2   : > { %v997_v60 = vadd.f32 %v972_v34, %v936_v51  ;;  %v1033_v54 = vsel %vm1028_vm4, %v16342_v42, %v16341_v30  ;;  %v1267_v20 = vadd.f32 %v1242_v19, %v1210_v27  ;;  %v16346_v63 = vrot.slane %v9501_v62, 3  ;;  %v16347_v34 = vld [vmem:[#allocation40_spill] sm:$0xff] }
  0xd3   : > { %v1565_v59 = vsel %vm906_vm2, %v16344_v29, %v16343_v52  ;;  %v16348_v25 = vrot.slane %v16347_v34, 4  ;;  %v16350_v9 = vrot.slane %v16349_v43, 4  ;;  %v16351_v30 = vld [vmem:[#allocation12_spill] sm:$0xff]  ;;  %v16353_v47 = vrot.slane %v9408_v4, 3 }
  0xd4   : > { %v1299_v51 = vsel %vm967_vm3, %v16346_v63, %v16345_v46  ;;  %v1590_v19 = vadd.f32 %v1565_v59, %v1533_v23  ;;  %v16352_v42 = vrot.slane %v16351_v30, 3  ;;  %v1058_v29 = vadd.f32 %v1033_v54, %v997_v60 }
  0xd5   : > { %v1356_v27 = vsel %vm1028_vm4, %v16350_v9, %v16348_v25  ;;  %v1324_v1 = vadd.f32 %v1299_v51, %v1267_v20  ;;  %v16355_v62 = vrot.slane %v16354_v36, 4  ;;  %v16356_v46 = vrot.slane %v9411_v16, 4  ;;  %v1121_v9 = vpop.permute.xlu1 %1120 }
  0xd6   : > { %v1622_v52 = vsel %vm967_vm3, %v16353_v47, %v16352_v42  ;;  %v804_v43 = vmul.f32 %v9209_v45, %v779_v26  ;;  %v9806_v23 = vmul.f32 %v9222_v48, %v779_v26  ;;  %v9809_v59 = vmul.f32 %v9227_v49, %v779_v26 }
  0xd7   : > { %v1679_v63 = vsel %vm1028_vm4, %v16356_v46, %v16355_v62  ;;  %v1647_v21 = vadd.f32 %v1622_v52, %v1590_v19  ;;  %v9812_v4 = vmul.f32 %v9232_v50, %v779_v26  ;;  %vm1067_vm8 = vcmp.ge.f32.partialorder %v1058_v29, 0.0 }
  0xd8   : > { %v1076_v60 = vmul.f32 0.01, %v1058_v29  ;;  %v1381_v54 = vadd.f32 %v1356_v27, %v1324_v1  ;;  %v1493_v20 = vmul.f32 %v9222_v48, %v1482_v57  ;;  %v9816_v62 = vmul.f32 %v9257_v56, %v779_v26 }
  0xd9   : > { %v1704_v16 = vadd.f32 %v1679_v63, %v1647_v21  ;;  %v1550_v51 = vmul.f32 %v9227_v49, %v1482_v57  ;;  %v9820_v25 = vmul.f32 %v9232_v50, %v1482_v57  ;;  %v9824_v21 = vmul.f32 %v9257_v56, %v1482_v57 }
  0xda   : > { %v1085_v19 = vsel %vm1067_vm8, %v1058_v29, %v1076_v60  ;;  %vm1390_vm9 = vcmp.ge.f32.partialorder %v1381_v54, 0.0  ;;  %v1399_v42 = vmul.f32 0.01, %v1381_v54  ;;  %v1521_v47 = vrot.slane %v1493_v20, 1 }
  0xdb   : > { %16357 = vst [vmem:[#allocation40_spill] sm:$0xff] %v9820_v25  ;;  %8033 = vmatmul.msk.f32.gmra.mxu0 %vm2756_vm5, %v1085_v19  ;;  %vm1713_vm10 = vcmp.ge.f32.partialorder %v1704_v16, 0.0  ;;  %v1722_v1 = vmul.f32 0.01, %v1704_v16  ;;  %v1578_v27 = vrot.slane %v1550_v51, 2  ;;  %v16359_v46 = vrot.slane %v9690_v15, 1 }
  0xdc   : > { %16358 = vst [vmem:[#allocation12_spill] sm:$0xff] %v9824_v21  ;;  %v1408_v52 = vsel %vm1390_vm9, %v1381_v54, %v1399_v42  ;;  %v1143_v29 = vmul.f32 %v9209_v45, %v1121_v9  ;;  %v9833_v20 = vadd.f32 %v9267_v58, %v804_v43  ;;  %v9837_v57 = vmul.f32 %v9222_v48, %v1121_v9  ;;  %v16373_v25 = vld [vmem:[#allocation41_spill] sm:$0xff]  ;;  %v16388_v15 = vld [vmem:[#allocation20_spill] sm:$0xff] }
  0xdd   : > { %v1522_v63 = vsel %vm845_vm1, %v16359_v46, %v1521_v47  ;;  %8043 = vmatmul.msk.f32.vlgmr.msra.gmra.mxu1 %vm2756_vm5, %v1408_v52  ;;  %v1731_v60 = vsel %vm1713_vm10, %v1704_v16, %v1722_v1  ;;  %v16361_v43 = vrot.slane %v9696_v10, 2  ;;  %v16363_v46 = vrot.slane %v9564_v11, 1  ;;  %v16378_v10 = vld [vmem:[#allocation16_spill] sm:$0xff] }
  0xde   : > { %8053 = vmatmul.msk.f32.gmra.mxu2 %vm2756_vm5, %v1731_v60  ;;  %v9845_v16 = vadd.f32 %v1522_v63, %v9714_v14  ;;  %v16364_v60 = vrot.slane %v9291_v5, 1  ;;  %v9859_v42 = vadd.f32 %v9267_v58, %v1143_v29  ;;  %v9862_v47 = vmul.f32 %v9227_v49, %v1121_v9  ;;  %v16365_v63 = vld [vmem:[#allocation17_spill] sm:$0xff] }
  0xdf   : > { %v9850_v1 = vsel %vm906_vm2, %v16361_v43, %v1578_v27  ;;  %v9865_v14 = vmul.f32 %v9232_v50, %v1121_v9  ;;  %v784_v43 = vpop.permute.xlu0 %783  ;;  %v9870_v54 = vmul.f32 %v9257_v56, %v1121_v9  ;;  %v16366_v5 = vrot.slane %v9567_v31, 2 }
  0xe0   : > { %16360 = vst [vmem:[#allocation13_spill] sm:$0xff] %v9845_v16  ;;  %v852_v19 = vsel %vm845_vm1, %v16364_v60, %v16363_v46  ;;  %v16367_v46 = vrot.slane %v9294_v6, 2  ;;  %v16368_v60 = vrot.slane %v9613_v13, 1  ;;  %v16369_v51 = vrot.slane %v9540_v28, 1  ;;  %v16374_v16 = vld [vmem:[#allocation15_spill] sm:$0xff] }
  0xe1   : > { %16362 = vst [vmem:[#allocation53_spill] sm:$0xff] %v9850_v1  ;;  %v876_v27 = vadd.f32 %v852_v19, %v16365_v63  ;;  %v16370_v19 = vld [vmem:[#allocation42_spill] sm:$0xff]  ;;  %v16372_v52 = vrot.slane %v9297_v7, 3  ;;  %v1534_v6 = vadd.f32 %v16375_v40, %v16374_v16  ;;  %v805_v40 = vmul.f32 %v9209_v45, %v784_v43 }
  0xe2   : > { %v913_v29 = vsel %vm906_vm2, %v16367_v46, %v16366_v5  ;;  %v1187_v26 = vsel %vm845_vm1, %v16369_v51, %v16368_v60  ;;  %v16371_v63 = vrot.slane %v16370_v19, 3  ;;  %v16376_v5 = vrot.slane %v9621_v53, 2  ;;  %v16381_v7 = vld [vmem:[#allocation18_spill] sm:$0xff] }
  0xe3   : > { %v937_v21 = vadd.f32 %v913_v29, %v876_v27  ;;  %v1211_v1 = vadd.f32 %v1187_v26, %v16373_v25  ;;  %v16377_v46 = vrot.slane %v9543_v3, 2  ;;  %v16379_v51 = vrot.slane %v16378_v10, 2 }
  0xe4   : > { %v974_v9 = vsel %vm967_vm3, %v16372_v52, %v16371_v63  ;;  %v16380_v27 = vrot.slane %v9274_v61, 2  ;;  %v16382_v60 = vrot.slane %v16381_v7, 3  ;;  %v16383_v52 = vrot.slane %v16351_v30, 3 }
  0xe5   : > { %v1244_v28 = vsel %vm906_vm2, %v16377_v46, %v16376_v5  ;;  %v998_v16 = vadd.f32 %v974_v9, %v937_v21  ;;  %v1096_v5 = vpop.permute.xlu2 %1095  ;;  %v16384_v61 = vrot.slane %v9580_v35, 4  ;;  %v16386_v30 = vrot.slane %v9624_v44, 3 }
  0xe6   : > { %v1567_v29 = vsel %vm906_vm2, %v16380_v27, %v16379_v51  ;;  %v1624_v25 = vsel %vm967_vm3, %v16383_v52, %v16382_v60  ;;  %v1268_v3 = vadd.f32 %v1244_v28, %v1211_v1  ;;  %v16385_v51 = vrot.slane %v9301_v8, 4 }
  0xe7   : > { %v1591_v63 = vadd.f32 %v1567_v29, %v1534_v6  ;;  %v16387_v60 = vrot.slane %v9551_v12, 3  ;;  %v16389_v26 = vrot.slane %v16388_v15, 4  ;;  %v16390_v21 = vrot.slane %v16354_v36, 4 }
  0xe8   : > { %v1035_v27 = vsel %vm1028_vm4, %v16385_v51, %v16384_v61  ;;  %v16391_v8 = vrot.slane %v9629_v22, 4  ;;  %v16392_v61 = vrot.slane %v16347_v34, 4  ;;  %v9930_v12 = vadd.f32 %v9267_v58, %v805_v40 }
  0xe9   : > { %v1301_v52 = vsel %vm967_vm3, %v16387_v60, %v16386_v30  ;;  %v1681_v1 = vsel %vm1028_vm4, %v16390_v21, %v16389_v26  ;;  %v1059_v6 = vadd.f32 %v1035_v27, %v998_v16  ;;  %v1648_v29 = vadd.f32 %v1624_v25, %v1591_v63  ;;  %v1126_v63 = vpop.permute.xlu1 %1125 }
  0xea   : > { %v1325_v28 = vadd.f32 %v1301_v52, %v1268_v3  ;;  %v1358_v51 = vsel %vm1028_vm4, %v16392_v61, %v16391_v8  ;;  %v9933_v30 = vmul.f32 %v9222_v48, %v784_v43  ;;  %v1138_v36 = vmul.f32 %v9209_v45, %v1096_v5 }
  0xeb   : > { %vm1068_vm11 = vcmp.ge.f32.partialorder %v1059_v6, 0.0  ;;  %v1077_v26 = vmul.f32 0.01, %v1059_v6  ;;  %v1705_v16 = vadd.f32 %v1681_v1, %v1648_v29  ;;  %v9937_v25 = vmul.f32 %v9227_v49, %v784_v43 }
  0xec   : > { %v1382_v60 = vadd.f32 %v1358_v51, %v1325_v28  ;;  %v9940_v3 = vmul.f32 %v9232_v50, %v784_v43  ;;  %v9943_v34 = vmul.f32 %v9257_v56, %v784_v43  ;;  %v1161_v40 = vmul.f32 %v9222_v48, %v1096_v5 }
  0xed   : > { %v1086_v27 = vsel %vm1068_vm11, %v1059_v6, %v1077_v26  ;;  %vm1714_vm13 = vcmp.ge.f32.partialorder %v1705_v16, 0.0  ;;  %v1723_v21 = vmul.f32 0.01, %v1705_v16  ;;  %v9948_v28 = vmul.f32 %v9227_v49, %v1096_v5 }
  0xee   : > { %vm1391_vm12 = vcmp.ge.f32.partialorder %v1382_v60, 0.0  ;;  %v1400_v52 = vmul.f32 0.01, %v1382_v60  ;;  %8034 = vmatmul.msk.f32.gmra.mxu0 %vm2756_vm5, %v1086_v27  ;;  %v1181_v1 = vrot.slane %v1161_v40, 1  ;;  %v9951_v29 = vmul.f32 %v9232_v50, %v1096_v5 }
  0xef   : > { %16393 = vst [vmem:[#allocation17_spill] sm:$0xff] %v9948_v28  ;;  %v1147_v43 = vadd.f32 %v9267_v58, %v1138_v36  ;;  %v9955_v61 = vmul.f32 %v9257_v56, %v1096_v5  ;;  %v1144_v6 = vmul.f32 %v9209_v45, %v1126_v63  ;;  %v1732_v51 = vsel %vm1714_vm13, %v1705_v16, %v1723_v21  ;;  %v16400_v16 = vld [vmem:[#allocation43_spill] sm:$0xff]  ;;  %v16407_v5 = vld [vmem:[#allocation14_spill] sm:$0xff] }
  0xf0   : > { %16394 = vst [vmem:[#allocation42_spill] sm:$0xff] %v9951_v29  ;;  %v1409_v8 = vsel %vm1391_vm12, %v1382_v60, %v1400_v52  ;;  %v16396_v26 = vrot.slane %v9487_v38, 1  ;;  %v9963_v27 = vmul.f32 %v9222_v48, %v1126_v63  ;;  %v9966_v9 = vmul.f32 %v9227_v49, %v1126_v63  ;;  %8054 = vmatmul.msk.f32.gmra.mxu2 %vm2756_vm5, %v1732_v51  ;;  %v16419_v28 = vld [vmem:[#allocation23_spill] sm:$0xff] }
  0xf1   : > { %16395 = vst [vmem:[#allocation41_spill] sm:$0xff] %v9955_v61  ;;  %8044 = vmatmul.msk.f32.gmra.mxu1 %vm2756_vm5, %v1409_v8  ;;  %v9976_v21 = vmul.f32 %v9232_v50, %v1126_v63  ;;  %v16398_v8 = vrot.slane %v9564_v11, 1  ;;  %v9987_v60 = vadd.f32 %v9267_v58, %v1144_v6  ;;  %v16401_v46 = vrot.slane %v9680_v55, 2  ;;  %v789_v61 = vpop.permute.xlu0 %788 }
  0xf2   : > { %v1183_v40 = vsel %vm845_vm1, %v1181_v1, %v16396_v26  ;;  %v16397_v1 = vrot.slane %v9677_v2, 1  ;;  %v16402_v29 = vrot.slane %v9567_v31, 2  ;;  %v10003_v6 = vmul.f32 %v9257_v56, %v1126_v63 }
  0xf3   : > { %v9983_v26 = vadd.f32 %v1183_v40, %v1147_v43  ;;  %v16403_v43 = vrot.slane %v9710_v18, 1  ;;  %v16404_v40 = vrot.slane %v9613_v13, 1  ;;  %v16408_v52 = vrot.slane %v16407_v5, 1 }
  0xf4   : > { %v854_v51 = vsel %vm845_vm1, %v16398_v8, %v16397_v1  ;;  %v915_v11 = vsel %vm906_vm2, %v16402_v29, %v16401_v46  ;;  %v16409_v46 = vrot.slane %v9683_v33, 3  ;;  %v16410_v29 = vrot.slane %v16370_v19, 3 }
  0xf5   : > { %16399 = vst [vmem:[#allocation15_spill] sm:$0xff] %v9983_v26  ;;  %v877_v38 = vadd.f32 %v854_v51, %v16400_v16  ;;  %v1189_v1 = vsel %vm845_vm1, %v16404_v40, %v16403_v43  ;;  %v16405_v51 = vld [vmem:[#allocation21_spill] sm:$0xff]  ;;  %v16411_v43 = vrot.slane %v9722_v0, 2  ;;  %v16412_v63 = vrot.slane %v9621_v53, 2  ;;  %v16414_v40 = vld [vmem:[#allocation22_spill] sm:$0xff] }
  0xf6   : > { %v1212_v8 = vadd.f32 %v1189_v1, %v9641_v39  ;;  %v16406_v36 = vrot.slane %v16405_v51, 1  ;;  %v976_v13 = vsel %vm967_vm3, %v16410_v29, %v16409_v46  ;;  %v16413_v39 = vld [vmem:[#allocation19_spill] sm:$0xff]  ;;  %v16415_v1 = vrot.slane %v16414_v40, 2 }
  0xf7   : > { %v938_v16 = vadd.f32 %v915_v11, %v877_v38  ;;  %v1246_v38 = vsel %vm906_vm2, %v16412_v63, %v16411_v43  ;;  %v16416_v5 = vrot.slane %v16378_v10, 2  ;;  %v16417_v26 = vrot.slane %v9686_v32, 4  ;;  %v10167_v32 = vld [vmem:[%s16268_s24] ss:$0 sm:$0xff] }
  0xf8   : > { %v1512_v31 = vsel %vm845_vm1, %v16408_v52, %v16406_v36  ;;  %v16418_v19 = vrot.slane %v9580_v35, 4  ;;  %v1269_v29 = vadd.f32 %v1246_v38, %v1212_v8  ;;  %v16420_v53 = vrot.slane %v16419_v28, 3 }
  0xf9   : > { %v1535_v11 = vadd.f32 %v1512_v31, %v16413_v39  ;;  %v1569_v36 = vsel %vm906_vm2, %v16416_v5, %v16415_v1  ;;  %v999_v52 = vadd.f32 %v976_v13, %v938_v16  ;;  %v16421_v43 = vrot.slane %v16381_v7, 3 }
  0xfa   : > { %v1037_v46 = vsel %vm1028_vm4, %v16418_v19, %v16417_v26  ;;  %v16422_v63 = vrot.slane %v9725_v24, 3  ;;  %v16423_v10 = vrot.slane %v9624_v44, 3  ;;  %v806_v13 = vmul.f32 %v9209_v45, %v789_v61 }
  0xfb   : > { %v1626_v31 = vsel %vm967_vm3, %v16421_v43, %v16420_v53  ;;  %v1592_v16 = vadd.f32 %v1569_v36, %v1535_v11  ;;  %v10044_v35 = vmul.f32 %v9222_v48, %v789_v61  ;;  %v1060_v38 = vadd.f32 %v1037_v46, %v999_v52  ;;  %v16426_v53 = vld [vmem:[#allocation24_spill] sm:$0xff] }
  0xfc   : > { %v1303_v39 = vsel %vm967_vm3, %v16423_v10, %v16422_v63  ;;  %v16424_v1 = vrot.slane %v9741_v37, 4  ;;  %v16425_v5 = vrot.slane %v9629_v22, 4  ;;  %v16427_v11 = vrot.slane %v16426_v53, 4  ;;  %v1742_v10 = vpop.permute.xlu2 %1741 }
  0xfd   : > { %v1326_v7 = vadd.f32 %v1303_v39, %v1269_v29  ;;  %v1649_v19 = vadd.f32 %v1626_v31, %v1592_v16  ;;  %v16428_v36 = vrot.slane %v16388_v15, 4  ;;  %v10059_v63 = vmul.f32 %v9227_v49, %v789_v61  ;;  %v1131_v16 = vpop.permute.xlu1 %1130 }
  0xfe   : > { %v1360_v44 = vsel %vm1028_vm4, %v16425_v5, %v16424_v1  ;;  %vm1069_vm14 = vcmp.ge.f32.partialorder %v1060_v38, 0.0  ;;  %v1078_v52 = vmul.f32 0.01, %v1060_v38  ;;  %v10062_v29 = vmul.f32 %v9232_v50, %v789_v61 }
  0xff   : > { %v1683_v43 = vsel %vm1028_vm4, %v16428_v36, %v16427_v11  ;;  %v1383_v46 = vadd.f32 %v1360_v44, %v1326_v7  ;;  %v10065_v39 = vadd.f32 %v9267_v58, %v806_v13  ;;  %v10069_v15 = vmul.f32 %v9257_v56, %v789_v61 }
 0x100   : > { %v1706_v22 = vadd.f32 %v1683_v43, %v1649_v19  ;;  %v1087_v1 = vsel %vm1069_vm14, %v1060_v38, %v1078_v52  ;;  %v1784_v11 = vmul.f32 %v9209_v45, %v1742_v10  ;;  %v10074_v44 = vmul.f32 %v9222_v48, %v1742_v10 }
 0x101   : > { %vm1392_vm15 = vcmp.ge.f32.partialorder %v1383_v46, 0.0  ;;  %v1401_v5 = vmul.f32 0.01, %v1383_v46  ;;  %8035 = vmatmul.msk.f32.gmra.mxu0 %vm2756_vm5, %v1087_v1  ;;  %v10077_v13 = vmul.f32 %v9227_v49, %v1742_v10  ;;  %v10080_v61 = vmul.f32 %v9232_v50, %v1742_v10 }
 0x102   : > { %vm1715_vm6 = vcmp.ge.f32.partialorder %v1706_v22, 0.0  ;;  %v1724_v7 = vmul.f32 0.01, %v1706_v22  ;;  %16429 = vst [vmem:[#allocation30_spill] sm:$0xff] %v10074_v44  ;;  %v10083_v38 = vmul.f32 %v9257_v56, %v1742_v10  ;;  %v1145_v36 = vmul.f32 %v9209_v45, %v1131_v16 }
 0x103   : > { %16430 = vst [vmem:[#allocation16_spill] sm:$0xff] %v10077_v13  ;;  %v1410_v19 = vsel %vm1392_vm15, %v1383_v46, %v1401_v5  ;;  %v10090_v31 = vmul.f32 %v9222_v48, %v1131_v16  ;;  %v10095_v5 = vadd.f32 %v9267_v58, %v1784_v11  ;;  %v10098_v10 = vmul.f32 %v9227_v49, %v1131_v16  ;;  %v16442_v11 = vld [vmem:[#allocation26_spill] sm:$0xff]  ;;  %v16447_v48 = vld [vmem:[#allocation25_spill] sm:$0xff] }
 0x104   : > { %16431 = vst [vmem:[#allocation18_spill] sm:$0xff] %v10080_v61  ;;  %8045 = vmatmul.msk.f32.gmra.mxu1 %vm2756_vm5, %v1410_v19  ;;  %v1733_v43 = vsel %vm1715_vm6, %v1706_v22, %v1724_v7  ;;  %v16434_v45 = vrot.slane %v9806_v23, 1  ;;  %v16435_v22 = vrot.slane %v9677_v2, 1  ;;  %v10114_v1 = vadd.f32 %v9267_v58, %v1145_v36 }
 0x105   : > { %16432 = vst [vmem:[#allocation20_spill] sm:$0xff] %v10083_v38  ;;  %8055 = vmatmul.msk.f32.gmra.mxu2 %vm2756_vm5, %v1733_v43  ;;  %v10108_v43 = vmul.f32 %v9232_v50, %v1131_v16  ;;  %v16436_v2 = vrot.slane %v9809_v59, 2  ;;  %v10123_v50 = vmul.f32 %v9257_v56, %v1131_v16  ;;  %v16440_v36 = vrot.slane %v9812_v4, 3 }
 0x106   : > { %16433 = vst [vmem:[#allocation43_spill] sm:$0xff] %v10095_v5  ;;  %v856_v7 = vsel %vm845_vm1, %v16435_v22, %v16434_v45  ;;  %v16437_v45 = vrot.slane %v9680_v55, 2  ;;  %v16441_v55 = vrot.slane %v9683_v33, 3  ;;  %v16443_v56 = vrot.slane %v16442_v11, 1 }
 0x107   : > { %v878_v46 = vadd.f32 %v856_v7, %v9693_v41  ;;  %v16438_v41 = vrot.slane %v9837_v57, 1  ;;  %v16439_v7 = vrot.slane %v9710_v18, 1  ;;  %v16444_v16 = vrot.slane %v16405_v51, 1 }
 0x108   : > { %v917_v22 = vsel %vm906_vm2, %v16437_v45, %v16436_v2  ;;  %v978_v2 = vsel %vm967_vm3, %v16441_v55, %v16440_v36  ;;  %v16446_v58 = vrot.slane %v9722_v0, 2  ;;  %v16454_v0 = vrot.slane %v16414_v40, 2 }
 0x109   : > { %v939_v19 = vadd.f32 %v917_v22, %v878_v46  ;;  %v1191_v49 = vsel %vm845_vm1, %v16439_v7, %v16438_v41  ;;  %v1514_v46 = vsel %vm845_vm1, %v16444_v16, %v16443_v56  ;;  %v794_v22 = vpop.permute.xlu0 %793  ;;  %v16445_v7 = vrot.slane %v9862_v47, 2 }
 0x10a   : > { %v1213_v45 = vadd.f32 %v1191_v49, %v9735_v17  ;;  %v1536_v36 = vadd.f32 %v1514_v46, %v16447_v48  ;;  %v16448_v17 = vrot.slane %v9816_v62, 4  ;;  %v16449_v49 = vmov %v16417_v26 }
 0x10b   : > { %v1000_v41 = vadd.f32 %v978_v2, %v939_v19  ;;  %v1248_v33 = vsel %vm906_vm2, %v16446_v58, %v16445_v7  ;;  %v16450_v56 = vrot.slane %v9865_v14, 3  ;;  %v16451_v16 = vrot.slane %v9725_v24, 3  ;;  %v16452_v2 = vld [vmem:[#allocation27_spill] sm:$0xff] }
 0x10c   : > { %v1039_v51 = vsel %vm1028_vm4, %v16449_v49, %v16448_v17  ;;  %v1270_v55 = vadd.f32 %v1248_v33, %v1213_v45  ;;  %v16453_v18 = vrot.slane %v16452_v2, 2  ;;  %v807_v45 = vmul.f32 %v10167_v32, %v794_v22  ;;  %v10173_v24 = vld [vmem:[%s16268_s24 + $0x1] ss:$0 sm:$0xff]  ;;  %v16457_v17 = vld [vmem:[#allocation28_spill] sm:$0xff] }
 0x10d   : > { %v1305_v19 = vsel %vm967_vm3, %v16451_v16, %v16450_v56  ;;  %v1061_v48 = vadd.f32 %v1039_v51, %v1000_v41  ;;  %v10176_v7 = vmul.f32 %v10173_v24, %v794_v22  ;;  %v16455_v41 = vrot.slane %v9870_v54, 4 }
 0x10e   : > { %v1571_v58 = vsel %vm906_vm2, %v16454_v0, %v16453_v18  ;;  %v1327_v18 = vadd.f32 %v1305_v19, %v1270_v55  ;;  %v16456_v33 = vrot.slane %v9741_v37, 4  ;;  %v16458_v49 = vrot.slane %v16457_v17, 3  ;;  %v2070_v19 = vpop.permute.xlu2 %2069  ;;  %v10197_v37 = vld [vmem:[%s16268_s24 + $0x2] ss:$0 sm:$0xff] }
 0x10f   : > { %v1593_v46 = vadd.f32 %v1571_v58, %v1536_v36  ;;  %v16459_v51 = vrot.slane %v16419_v28, 3  ;;  %vm1070_vm7 = vcmp.ge.f32.partialorder %v1061_v48, 0.0  ;;  %v1079_v16 = vmul.f32 0.01, %v1061_v48  ;;  %v16460_v58 = vld [vmem:[#allocation29_spill] sm:$0xff] }
 0x110   : > { %v1362_v36 = vsel %vm1028_vm4, %v16456_v33, %v16455_v41  ;;  %v16461_v52 = vrot.slane %v16460_v58, 4  ;;  %v16462_v40 = vrot.slane %v16426_v53, 4  ;;  %v10200_v28 = vmul.f32 %v10197_v37, %v794_v22  ;;  %v10213_v53 = vld [vmem:[%s16268_s24 + $0x4] ss:$0 sm:$0xff]  ;;  %v10221_v33 = vld [vmem:[%s16271_s5] ss:$0 sm:$0xff] }
 0x111   : > { %v1628_v56 = vsel %vm967_vm3, %v16459_v51, %v16458_v49  ;;  %v1384_v8 = vadd.f32 %v1362_v36, %v1327_v18  ;;  %v10224_v36 = vadd.f32 %v10221_v33, %v807_v45  ;;  %v10241_v26 = vmul.f32 %v10213_v53, %v2070_v19 }
 0x112   : > { %v1650_v0 = vadd.f32 %v1628_v56, %v1593_v46  ;;  %v1685_v55 = vsel %vm1028_vm4, %v16462_v40, %v16461_v52  ;;  %v10205_v46 = vld [vmem:[%s16268_s24 + $0x3] ss:$0 sm:$0xff]  ;;  %v10216_v52 = vmul.f32 %v10213_v53, %v794_v22  ;;  %v1088_v40 = vsel %vm1070_vm7, %v1061_v48, %v1079_v16  ;;  %v1136_v48 = vpop.permute.xlu1 %1135 }
 0x113   : > { %v10208_v41 = vmul.f32 %v10205_v46, %v794_v22  ;;  %8036 = vmatmul.msk.f32.gmra.mxu0 %vm2756_vm5, %v1088_v40  ;;  %vm1393_vm8 = vcmp.ge.f32.partialorder %v1384_v8, 0.0  ;;  %v1402_v51 = vmul.f32 0.01, %v1384_v8  ;;  %v2108_v56 = vmul.f32 %v10167_v32, %v2070_v19  ;;  %16466 = vst [vmem:[#allocation22_spill] sm:$0xff] %v10241_v26 }
 0x114   : > { %v1707_v18 = vadd.f32 %v1685_v55, %v1650_v0  ;;  %v10230_v22 = vmul.f32 %v10173_v24, %v2070_v19  ;;  %v10233_v0 = vmul.f32 %v10197_v37, %v2070_v19  ;;  %v10236_v45 = vmul.f32 %v10205_v46, %v2070_v19 }
 0x115   : > { %v1411_v55 = vsel %vm1393_vm8, %v1384_v8, %v1402_v51  ;;  %v1146_v5 = vmul.f32 %v10167_v32, %v1136_v48  ;;  %v10247_v13 = vmul.f32 %v10173_v24, %v1136_v48  ;;  %v10251_v8 = vadd.f32 %v10221_v33, %v2108_v56  ;;  %v820_v51 = vpop.permute.xlu0 %819 }
 0x116   : > { %16463 = vst [vmem:[#allocation21_spill] sm:$0xff] %v10230_v22  ;;  %vm1716_vm9 = vcmp.ge.f32.partialorder %v1707_v18, 0.0  ;;  %v1725_v16 = vmul.f32 0.01, %v1707_v18  ;;  %8046 = vmatmul.msk.f32.gmra.mxu1 %vm2756_vm5, %v1411_v55  ;;  %v10255_v19 = vmul.f32 %v10197_v37, %v1136_v48  ;;  %v16468_v55 = vrot.slane %v9933_v30, 1  ;;  %v16486_v22 = vld [vmem:[#allocation36_spill] sm:$0xff] }
 0x117   : > { %16464 = vst [vmem:[#allocation14_spill] sm:$0xff] %v10233_v0  ;;  %v10270_v49 = vmul.f32 %v10213_v53, %v1136_v48  ;;  %v16473_v40 = vrot.slane %v9837_v57, 1  ;;  %v16476_v57 = vrot.slane %v9966_v9, 2  ;;  %v16482_v26 = vrot.slane %v9816_v62, 4 }
 0x118   : > { %16465 = vst [vmem:[#allocation19_spill] sm:$0xff] %v10236_v45  ;;  %v1734_v38 = vsel %vm1716_vm9, %v1707_v18, %v1725_v16  ;;  %v16469_v18 = vrot.slane %v9806_v23, 1  ;;  %v16471_v23 = vrot.slane %v9809_v59, 2  ;;  %v10283_v45 = vadd.f32 %v10221_v33, %v1146_v5 }
 0x119   : > { %8056 = vmatmul.msk.f32.gmra.mxu2 %vm2756_vm5, %v1734_v38  ;;  %16467 = vst [vmem:[#allocation23_spill] sm:$0xff] %v10251_v8  ;;  %v10265_v38 = vmul.f32 %v10205_v46, %v1136_v48  ;;  %v16470_v8 = vrot.slane %v9937_v25, 2  ;;  %v16474_v59 = vrot.slane %v9940_v3, 3  ;;  %v895_v62 = vmul.f32 %v10197_v37, %v820_v51 }
 0x11a   : > { %v858_v16 = vsel %vm845_vm1, %v16469_v18, %v16468_v55  ;;  %v16472_v18 = vrot.slane %v9963_v27, 1  ;;  %v1159_v44 = vpop.permute.xlu1 %1158 }
 0x11b   : > { %v879_v56 = vadd.f32 %v858_v16, %v9833_v20  ;;  %v919_v55 = vsel %vm906_vm2, %v16471_v23, %v16470_v8  ;;  %v16475_v8 = vrot.slane %v9812_v4, 3 }
 0x11c   : > { %v1193_v61 = vsel %vm845_vm1, %v16473_v40, %v16472_v18  ;;  %v16477_v40 = vrot.slane %v9862_v47, 2  ;;  %v16478_v18 = vld [vmem:[#allocation35_spill] sm:$0xff]  ;;  %v16484_v47 = vrot.slane %v9976_v21, 3 }
 0x11d   : > { %v940_v16 = vadd.f32 %v919_v55, %v879_v56  ;;  %v1214_v48 = vadd.f32 %v1193_v61, %v9859_v42  ;;  %v980_v23 = vsel %vm967_vm3, %v16475_v8, %v16474_v59  ;;  %v16479_v20 = vrot.slane %v16478_v18, 1  ;;  %v16483_v8 = vld [vmem:[#allocation31_spill] sm:$0xff] }
 0x11e   : > { %v1250_v5 = vsel %vm906_vm2, %v16477_v40, %v16476_v57  ;;  %v16480_v56 = vrot.slane %v16442_v11, 1  ;;  %v16481_v55 = vrot.slane %v9943_v34, 4  ;;  %v16485_v57 = vrot.slane %v9865_v14, 3 }
 0x11f   : > { %v1001_v61 = vadd.f32 %v980_v23, %v940_v16  ;;  %v1271_v59 = vadd.f32 %v1250_v5, %v1214_v48  ;;  %v16487_v11 = vrot.slane %v16486_v22, 2  ;;  %v834_v23 = vmul.f32 %v10173_v24, %v820_v51 }
 0x120   : > { %v1516_v42 = vsel %vm845_vm1, %v16480_v56, %v16479_v20  ;;  %v1041_v4 = vsel %vm1028_vm4, %v16482_v26, %v16481_v55  ;;  %v1307_v40 = vsel %vm967_vm3, %v16485_v57, %v16484_v47  ;;  %v16488_v20 = vrot.slane %v16452_v2, 2 }
 0x121   : > { %v1537_v0 = vadd.f32 %v1516_v42, %v16483_v8  ;;  %v1062_v48 = vadd.f32 %v1041_v4, %v1001_v61  ;;  %v1328_v5 = vadd.f32 %v1307_v40, %v1271_v59  ;;  %v16489_v42 = vrot.slane %v10003_v6, 4  ;;  %v16491_v8 = vld [vmem:[#allocation37_spill] sm:$0xff]  ;;  %v2075_v59 = vpop.permute.xlu2 %2074 }
 0x122   : > { %v1573_v16 = vsel %vm906_vm2, %v16488_v20, %v16487_v11  ;;  %v16490_v14 = vrot.slane %v9870_v54, 4  ;;  %v16492_v47 = vrot.slane %v16491_v8, 3  ;;  %v16493_v2 = vrot.slane %v16457_v17, 3  ;;  %v16494_v54 = vld [vmem:[#allocation38_spill] sm:$0xff] }
 0x123   : > { %v1594_v56 = vadd.f32 %v1573_v16, %v1537_v0  ;;  %v863_v11 = vrot.slane %v834_v23, 1  ;;  %v10333_v20 = vmul.f32 %v10205_v46, %v820_v51  ;;  %vm1071_vm10 = vcmp.ge.f32.partialorder %v1062_v48, 0.0 }
 0x124   : > { %v1364_v55 = vsel %vm1028_vm4, %v16490_v14, %v16489_v42  ;;  %v1630_v57 = vsel %vm967_vm3, %v16493_v2, %v16492_v47  ;;  %v1080_v61 = vmul.f32 0.01, %v1062_v48  ;;  %v16495_v16 = vrot.slane %v16494_v54, 4 }
 0x125   : > { %v1385_v4 = vadd.f32 %v1364_v55, %v1328_v5  ;;  %v1651_v0 = vadd.f32 %v1630_v57, %v1594_v56  ;;  %v16496_v42 = vrot.slane %v16460_v58, 4  ;;  %v924_v17 = vrot.slane %v895_v62, 2 }
 0x126   : > { %v10342_v47 = vmul.f32 %v10213_v53, %v820_v51  ;;  %v1089_v23 = vsel %vm1071_vm10, %v1062_v48, %v1080_v61  ;;  %v16497_v5 = vrot.slane %v10176_v7, 1  ;;  %v2109_v58 = vmul.f32 %v10167_v32, %v2075_v59 }
 0x127   : > { %v1687_v14 = vsel %vm1028_vm4, %v16496_v42, %v16495_v16  ;;  %vm1394_vm11 = vcmp.ge.f32.partialorder %v1385_v4, 0.0  ;;  %v1403_v2 = vmul.f32 0.01, %v1385_v4  ;;  %8037 = vmatmul.msk.f32.gmra.mxu0 %vm2756_vm5, %v1089_v23  ;;  %v10351_v62 = vmul.f32 %v10173_v24, %v2075_v59 }
 0x128   : > { %v1708_v26 = vadd.f32 %v1687_v14, %v1651_v0  ;;  %v864_v56 = vsel %vm845_vm1, %v16497_v5, %v863_v11  ;;  %v10354_v57 = vmul.f32 %v10197_v37, %v2075_v59  ;;  %v10359_v0 = vmul.f32 %v10205_v46, %v2075_v59 }
 0x129   : > { %v1412_v51 = vsel %vm1394_vm11, %v1385_v4, %v1403_v2  ;;  %v10362_v11 = vmul.f32 %v10213_v53, %v2075_v59  ;;  %v1170_v16 = vmul.f32 %v10173_v24, %v1159_v44  ;;  %v16498_v4 = vrot.slane %v10200_v28, 2 }
 0x12a   : > { %vm1717_vm12 = vcmp.ge.f32.partialorder %v1708_v26, 0.0  ;;  %v1726_v48 = vmul.f32 0.01, %v1708_v26  ;;  %8047 = vmatmul.msk.f32.gmra.mxu1 %vm2756_vm5, %v1412_v51  ;;  %v1227_v23 = vmul.f32 %v10197_v37, %v1159_v44  ;;  %v10372_v2 = vmul.f32 %v10205_v46, %v1159_v44 }
 0x12b   : > { %v10368_v14 = vsel %vm906_vm2, %v16498_v4, %v924_v17  ;;  %v10376_v5 = vadd.f32 %v864_v56, %v10224_v36  ;;  %v10379_v59 = vadd.f32 %v10221_v33, %v2109_v58  ;;  %v16500_v51 = vrot.slane %v10044_v35, 1  ;;  %v2388_v56 = vpop.permute.xlu0 %2387 }
 0x12c   : > { %v1735_v42 = vsel %vm1717_vm12, %v1708_v26, %v1726_v48  ;;  %v10382_v26 = vmul.f32 %v10213_v53, %v1159_v44  ;;  %v16501_v17 = vrot.slane %v9933_v30, 1  ;;  %v16502_v44 = vrot.slane %v10059_v63, 2 }
 0x12d   : > { %8057 = vmatmul.msk.f32.gmra.mxu2 %vm2756_vm5, %v1735_v42  ;;  %16499 = vst [vmem:[#allocation24_spill] sm:$0xff] %v10379_v59  ;;  %v1198_v42 = vrot.slane %v1170_v16, 1  ;;  %v16503_v55 = vrot.slane %v9937_v25, 2  ;;  %v16504_v30 = vrot.slane %v10090_v31, 1  ;;  %v1255_v61 = vrot.slane %v1227_v23, 2  ;;  %v16514_v16 = vld [vmem:[#allocation39_spill] sm:$0xff] }
 0x12e   : > { %v860_v48 = vsel %vm845_vm1, %v16501_v17, %v16500_v51  ;;  %v16505_v51 = vrot.slane %v9963_v27, 1  ;;  %v16506_v4 = vrot.slane %v10062_v29, 3  ;;  %v16507_v25 = vrot.slane %v9940_v3, 3 }
 0x12f   : > { %v880_v36 = vadd.f32 %v860_v48, %v9930_v12  ;;  %v921_v40 = vsel %vm906_vm2, %v16503_v55, %v16502_v44  ;;  %v16508_v44 = vrot.slane %v10098_v10, 2  ;;  %v16509_v27 = vrot.slane %v9966_v9, 2 }
 0x130   : > { %v1195_v17 = vsel %vm845_vm1, %v16505_v51, %v16504_v30  ;;  %v982_v55 = vsel %vm967_vm3, %v16507_v25, %v16506_v4  ;;  %v16510_v30 = vld [vmem:[#allocation44_spill] sm:$0xff]  ;;  %v16515_v25 = vrot.slane %v10069_v15, 4  ;;  %v16516_v9 = vrot.slane %v9943_v34, 4 }
 0x131   : > { %v941_v12 = vadd.f32 %v921_v40, %v880_v36  ;;  %v1215_v48 = vadd.f32 %v1195_v17, %v9987_v60  ;;  %v1252_v23 = vsel %vm906_vm2, %v16509_v27, %v16508_v44  ;;  %v16511_v51 = vrot.slane %v16510_v30, 1 }
 0x132   : > { %v16512_v40 = vrot.slane %v16478_v18, 1  ;;  %v16513_v36 = vrot.slane %v10247_v13, 1  ;;  %v1043_v44 = vsel %vm1028_vm4, %v16516_v9, %v16515_v25  ;;  %v16517_v27 = vrot.slane %v10108_v43, 3 }
 0x133   : > { %v1002_v58 = vadd.f32 %v982_v55, %v941_v12  ;;  %v1272_v3 = vadd.f32 %v1252_v23, %v1215_v48  ;;  %v16518_v18 = vrot.slane %v9976_v21, 3  ;;  %v16522_v48 = vrot.slane %v10255_v19, 2 }
 0x134   : > { %v1518_v60 = vsel %vm845_vm1, %v16512_v40, %v16511_v51  ;;  %v1199_v17 = vsel %vm845_vm1, %v16513_v36, %v1198_v42  ;;  %v16519_v40 = vld [vmem:[#allocation45_spill] sm:$0xff]  ;;  %v16521_v42 = vrot.slane %v16486_v22, 2  ;;  %v16523_v36 = vrot.slane %v10123_v50, 4 }
 0x135   : > { %v1538_v4 = vadd.f32 %v1518_v60, %v16514_v16  ;;  %v1309_v51 = vsel %vm967_vm3, %v16518_v18, %v16517_v27  ;;  %v16520_v59 = vrot.slane %v16519_v40, 2  ;;  %v2430_v16 = vmul.f32 %v10167_v32, %v2388_v56 }
 0x136   : > { %v10445_v34 = vsel %vm906_vm2, %v16522_v48, %v1255_v61  ;;  %v1063_v55 = vadd.f32 %v1043_v44, %v1002_v58  ;;  %v1329_v23 = vadd.f32 %v1309_v51, %v1272_v3  ;;  %v10448_v21 = vadd.f32 %v1199_v17, %v10283_v45  ;;  %v2080_v45 = vpop.permute.xlu2 %2079  ;;  %v16528_v17 = vld [vmem:[#allocation47_spill] sm:$0xff] }
 0x137   : > { %v1575_v12 = vsel %vm906_vm2, %v16521_v42, %v16520_v59  ;;  %v16524_v25 = vrot.slane %v10003_v6, 4  ;;  %v16525_v59 = vld [vmem:[#allocation46_spill] sm:$0xff]  ;;  %v16527_v27 = vrot.slane %v16491_v8, 3  ;;  %v2453_v61 = vmul.f32 %v10173_v24, %v2388_v56 }
 0x138   : > { %v1595_v60 = vadd.f32 %v1575_v12, %v1538_v4  ;;  %v16526_v9 = vrot.slane %v16525_v59, 3  ;;  %vm1072_vm13 = vcmp.ge.f32.partialorder %v1063_v55, 0.0  ;;  %v1081_v58 = vmul.f32 0.01, %v1063_v55 }
 0x139   : > { %v1366_v22 = vsel %vm1028_vm4, %v16524_v25, %v16523_v36  ;;  %v16529_v44 = vrot.slane %v16528_v17, 4  ;;  %v16530_v51 = vrot.slane %v16494_v54, 4  ;;  %v10467_v42 = vadd.f32 %v10221_v33, %v2430_v16  ;;  %v2393_v36 = vpop.permute.xlu1 %2392 }
 0x13a   : > { %v1632_v18 = vsel %vm967_vm3, %v16527_v27, %v16526_v9  ;;  %v1386_v3 = vadd.f32 %v1366_v22, %v1329_v23  ;;  %v10470_v8 = vmul.f32 %v10197_v37, %v2388_v56  ;;  %v10473_v12 = vmul.f32 %v10205_v46, %v2388_v56 }
 0x13b   : > { %v1652_v4 = vadd.f32 %v1632_v18, %v1595_v60  ;;  %v1689_v6 = vsel %vm1028_vm4, %v16530_v51, %v16529_v44  ;;  %v1090_v48 = vsel %vm1072_vm13, %v1063_v55, %v1081_v58  ;;  %v2473_v25 = vrot.slane %v2453_v61, 1 }
 0x13c   : > { %vm1395_vm14 = vcmp.ge.f32.partialorder %v1386_v3, 0.0  ;;  %v1404_v23 = vmul.f32 0.01, %v1386_v3  ;;  %8038 = vmatmul.msk.f32.gmra.mxu0 %vm2756_vm5, %v1090_v48  ;;  %v10477_v54 = vmul.f32 %v10213_v53, %v2388_v56  ;;  %v2110_v16 = vmul.f32 %v10167_v32, %v2080_v45 }
 0x13d   : > { %v1709_v60 = vadd.f32 %v1689_v6, %v1652_v4  ;;  %v10481_v22 = vmul.f32 %v10173_v24, %v2080_v45  ;;  %v10484_v55 = vmul.f32 %v10197_v37, %v2080_v45  ;;  %v10488_v18 = vmul.f32 %v10205_v46, %v2080_v45 }
 0x13e   : > { %v1413_v9 = vsel %vm1395_vm14, %v1386_v3, %v1404_v23  ;;  %v10491_v61 = vmul.f32 %v10213_v53, %v2080_v45  ;;  %v2431_v56 = vmul.f32 %v10167_v32, %v2393_v36  ;;  %v10495_v58 = vmul.f32 %v10173_v24, %v2393_v36 }
 0x13f   : > { %vm1718_vm15 = vcmp.ge.f32.partialorder %v1709_v60, 0.0  ;;  %v1727_v27 = vmul.f32 0.01, %v1709_v60  ;;  %8048 = vmatmul.msk.f32.gmra.mxu1 %vm2756_vm5, %v1413_v9  ;;  %v10500_v51 = vmul.f32 %v10197_v37, %v2393_v36  ;;  %v10505_v45 = vadd.f32 %v10221_v33, %v2110_v16 }
 0x140   : > { %16531 = vst [vmem:[#allocation26_spill] sm:$0xff] %v10491_v61  ;;  %v10508_v48 = vmul.f32 %v10205_v46, %v2393_v36  ;;  %v16533_v23 = vrot.slane %v10176_v7, 1  ;;  %v16535_v7 = vrot.slane %v10200_v28, 2  ;;  %v10531_v44 = vmul.f32 %v10213_v53, %v2393_v36  ;;  %v16541_v36 = vld [vmem:[#allocation49_spill] sm:$0xff] }
 0x141   : > { %v1736_v4 = vsel %vm1718_vm15, %v1709_v60, %v1727_v27  ;;  %16532 = vst [vmem:[#allocation25_spill] sm:$0xff] %v10505_v45  ;;  %v16534_v60 = vrot.slane %v10044_v35, 1  ;;  %v10522_v45 = vadd.f32 %v10221_v33, %v2431_v56  ;;  %v16536_v35 = vrot.slane %v10059_v63, 2  ;;  %v1747_v56 = vpop.permute.xlu0 %1746 }
 0x142   : > { %8058 = vmatmul.msk.f32.gmra.mxu2 %vm2756_vm5, %v1736_v4  ;;  %v16091_v4 = vrot.slane %v10495_v58, 1  ;;  %v16539_v28 = vrot.slane %v10208_v41, 3  ;;  %v16540_v63 = vrot.slane %v10062_v29, 3  ;;  %v16545_v29 = vrot.slane %v10098_v10, 2 }
 0x143   : > { %v862_v9 = vsel %vm845_vm1, %v16534_v60, %v16533_v23  ;;  %v923_v23 = vsel %vm906_vm2, %v16536_v35, %v16535_v7  ;;  %v16542_v60 = vrot.slane %v16541_v36, 1  ;;  %v16549_v36 = vld [vmem:[#allocation50_spill] sm:$0xff] }
 0x144   : > { %v881_v6 = vadd.f32 %v862_v9, %v10065_v39  ;;  %v16537_v39 = vrot.slane %v10247_v13, 1  ;;  %v16538_v9 = vrot.slane %v10090_v31, 1  ;;  %v984_v7 = vsel %vm967_vm3, %v16540_v63, %v16539_v28  ;;  %v16546_v28 = vld [vmem:[#allocation48_spill] sm:$0xff] }
 0x145   : > { %v10553_v31 = vsel %vm845_vm1, %v2473_v25, %v16091_v4  ;;  %v16551_v25 = vrot.slane %v16519_v40, 2  ;;  %v16554_v40 = vld [vmem:[#allocation51_spill] sm:$0xff] }
 0x146   : > { %v942_v27 = vadd.f32 %v923_v23, %v881_v6  ;;  %v1197_v3 = vsel %vm845_vm1, %v16538_v9, %v16537_v39  ;;  %v16543_v6 = vrot.slane %v16510_v30, 1  ;;  %v16544_v39 = vrot.slane %v10255_v19, 2 }
 0x147   : > { %v1216_v35 = vadd.f32 %v1197_v3, %v10114_v1  ;;  %v16547_v3 = vrot.slane %v10216_v52, 4  ;;  %v16548_v30 = vrot.slane %v10069_v15, 4  ;;  %v10572_v19 = vmul.f32 %v10173_v24, %v1747_v56 }
 0x148   : > { %v1520_v13 = vsel %vm845_vm1, %v16543_v6, %v16542_v60  ;;  %v1003_v23 = vadd.f32 %v984_v7, %v942_v27  ;;  %v1254_v9 = vsel %vm906_vm2, %v16545_v29, %v16544_v39  ;;  %v16550_v6 = vrot.slane %v16549_v36, 2 }
 0x149   : > { %v1539_v1 = vadd.f32 %v1520_v13, %v16546_v28  ;;  %v1045_v60 = vsel %vm1028_vm4, %v16548_v30, %v16547_v3  ;;  %v1273_v63 = vadd.f32 %v1254_v9, %v1216_v35  ;;  %v16552_v7 = vrot.slane %v10265_v38, 3 }
 0x14a   : > { %v1577_v27 = vsel %vm906_vm2, %v16551_v25, %v16550_v6  ;;  %v1064_v10 = vadd.f32 %v1045_v60, %v1003_v23  ;;  %v16553_v13 = vrot.slane %v10108_v43, 3  ;;  %v10580_v29 = vmul.f32 %v10197_v37, %v1747_v56  ;;  %v2085_v25 = vpop.permute.xlu2 %2084 }
 0x14b   : > { %v1596_v15 = vadd.f32 %v1577_v27, %v1539_v1  ;;  %v16555_v28 = vrot.slane %v16554_v40, 3  ;;  %v16556_v3 = vrot.slane %v16525_v59, 3  ;;  %v16092_v23 = vrot.slane %v10572_v19, 1 }
 0x14c   : > { %v1311_v39 = vsel %vm967_vm3, %v16553_v13, %v16552_v7  ;;  %vm1073_vm6 = vcmp.ge.f32.partialorder %v1064_v10, 0.0  ;;  %v1082_v60 = vmul.f32 0.01, %v1064_v10  ;;  %v16557_v43 = vrot.slane %v10270_v49, 4 }
 0x14d   : > { %v1330_v9 = vadd.f32 %v1311_v39, %v1273_v63  ;;  %v1634_v30 = vsel %vm967_vm3, %v16556_v3, %v16555_v28  ;;  %v16558_v1 = vrot.slane %v10123_v50, 4  ;;  %v16559_v63 = vld [vmem:[#allocation52_spill] sm:$0xff]  ;;  %v16561_v13 = vrot.slane %v16528_v17, 4  ;;  %v16562_v17 = vld [vmem:[#allocation30_spill] sm:$0xff] }
 0x14e   : > { %v1653_v6 = vadd.f32 %v1634_v30, %v1596_v15  ;;  %v16560_v7 = vrot.slane %v16559_v63, 4  ;;  %v1785_v39 = vmul.f32 %v10167_v32, %v1747_v56  ;;  %v10601_v28 = vmul.f32 %v10205_v46, %v1747_v56 }
 0x14f   : > { %v1368_v36 = vsel %vm1028_vm4, %v16558_v1, %v16557_v43  ;;  %v1091_v3 = vsel %vm1073_vm6, %v1064_v10, %v1082_v60  ;;  %v16093_v50 = vrot.slane %v10580_v29, 2  ;;  %v10605_v43 = vmul.f32 %v10213_v53, %v1747_v56 }
 0x150   : > { %v1387_v27 = vadd.f32 %v1368_v36, %v1330_v9  ;;  %v1691_v59 = vsel %vm1028_vm4, %v16561_v13, %v16560_v7  ;;  %8039 = vmatmul.msk.f32.gmra.mxu0 %vm2756_vm5, %v1091_v3  ;;  %v16563_v9 = vrot.slane %v16562_v17, 1  ;;  %v2111_v1 = vmul.f32 %v10167_v32, %v2085_v25  ;;  %v2065_v36 = vpop.permute.xlu1 %2064  ;;  %v16567_v17 = vld [vmem:[#allocation16_spill] sm:$0xff] }
 0x151   : > { %v1710_v4 = vadd.f32 %v1691_v59, %v1653_v6  ;;  %v10615_v60 = vmul.f32 %v10173_v24, %v2085_v25  ;;  %v10618_v56 = vmul.f32 %v10197_v37, %v2085_v25  ;;  %v10621_v7 = vadd.f32 %v10221_v33, %v1785_v39 }
 0x152   : > { %vm1396_vm7 = vcmp.ge.f32.partialorder %v1387_v27, 0.0  ;;  %v1405_v15 = vmul.f32 0.01, %v1387_v27  ;;  %v1829_v30 = vsel %vm845_vm1, %v16563_v9, %v16092_v23  ;;  %v10625_v59 = vmul.f32 %v10205_v46, %v2085_v25 }
 0x153   : > { %vm1719_vm8 = vcmp.ge.f32.partialorder %v1710_v4, 0.0  ;;  %v1728_v10 = vmul.f32 0.01, %v1710_v4  ;;  %16564 = vst [vmem:[#allocation27_spill] sm:$0xff] %v10615_v60  ;;  %v16568_v9 = vrot.slane %v16567_v17, 2  ;;  %v2130_v39 = vmul.f32 %v10173_v24, %v2065_v36 }
 0x154   : > { %16565 = vst [vmem:[#allocation28_spill] sm:$0xff] %v10618_v56  ;;  %v1414_v6 = vsel %vm1396_vm7, %v1387_v27, %v1405_v15  ;;  %v10636_v27 = vmul.f32 %v10213_v53, %v2085_v25  ;;  %v16570_v15 = vld [vmem:[#allocation43_spill] sm:$0xff]  ;;  %v10651_v25 = vmul.f32 %v10197_v37, %v2065_v36  ;;  %v10666_v35 = vmul.f32 %v10213_v53, %v2065_v36 }
 0x155   : > { %16566 = vst [vmem:[#allocation29_spill] sm:$0xff] %v10625_v59  ;;  %8049 = vmatmul.msk.f32.gmra.mxu1 %vm2756_vm5, %v1414_v6  ;;  %v1737_v3 = vsel %vm1719_vm8, %v1710_v4, %v1728_v10  ;;  %v10633_v23 = vsel %vm906_vm2, %v16568_v9, %v16093_v50  ;;  %v10641_v13 = vadd.f32 %v1829_v30, %v16570_v15  ;;  %v2150_v15 = vrot.slane %v2130_v39, 1  ;;  %v16579_v9 = vld [vmem:[#allocation53_spill] sm:$0xff] }
 0x156   : > { %16569 = vst [vmem:[#allocation35_spill] sm:$0xff] %v10636_v27  ;;  %8059 = vmatmul.msk.f32.gmra.mxu2 %vm2756_vm5, %v1737_v3  ;;  %v10645_v4 = vadd.f32 %v10221_v33, %v2111_v1  ;;  %v2107_v10 = vmul.f32 %v10167_v32, %v2065_v36  ;;  %v943_v3 = vadd.f32 %v10368_v14, %v10376_v5  ;;  %v16572_v1 = vrot.slane %v10333_v20, 3  ;;  %v16606_v27 = vld [vmem:[#allocation41_spill] sm:$0xff] }
 0x157   : > { %v10657_v50 = vmul.f32 %v10205_v46, %v2065_v36  ;;  %v16573_v6 = vrot.slane %v10208_v41, 3  ;;  %v1274_v14 = vadd.f32 %v10445_v34, %v10448_v21  ;;  %v16574_v39 = vrot.slane %v10342_v47, 4  ;;  %v16578_v36 = vld [vmem:[#allocation13_spill] sm:$0xff] }
 0x158   : > { %16571 = vst [vmem:[#allocation31_spill] sm:$0xff] %v10645_v4  ;;  %v2116_v5 = vadd.f32 %v10221_v33, %v2107_v10  ;;  %v16575_v30 = vrot.slane %v10216_v52, 4  ;;  %v16576_v41 = vrot.slane %v10372_v2, 3  ;;  %v16580_v10 = vld [vmem:[#allocation40_spill] sm:$0xff]  ;;  %v16582_v47 = vrot.slane %v16554_v40, 3 }
 0x159   : > { %v986_v17 = vsel %vm967_vm3, %v16573_v6, %v16572_v1  ;;  %v16577_v6 = vrot.slane %v10265_v38, 3  ;;  %v16581_v4 = vrot.slane %v16580_v10, 3  ;;  %v16587_v40 = vld [vmem:[#allocation12_spill] sm:$0xff] }
 0x15a   : > { %v1004_v16 = vadd.f32 %v986_v17, %v943_v3  ;;  %v1047_v20 = vsel %vm1028_vm4, %v16575_v30, %v16574_v39  ;;  %v1597_v17 = vadd.f32 %v16579_v9, %v16578_v36  ;;  %v2398_v30 = vpop.permute.xlu0 %2397  ;;  %v16583_v39 = vld [vmem:[#allocation21_spill] sm:$0xff]  ;;  %v16586_v9 = vrot.slane %v10270_v49, 4 }
 0x15b   : > { %v1313_v1 = vsel %vm967_vm3, %v16577_v6, %v16576_v41  ;;  %v1636_v52 = vsel %vm967_vm3, %v16582_v47, %v16581_v4  ;;  %v16584_v2 = vrot.slane %v16583_v39, 1  ;;  %v16585_v6 = vrot.slane %v10382_v26, 4  ;;  %v2090_v47 = vpop.permute.xlu2 %2089 }
 0x15c   : > { %v1065_v34 = vadd.f32 %v1047_v20, %v1004_v16  ;;  %v1331_v21 = vadd.f32 %v1313_v1, %v1274_v14  ;;  %v1654_v14 = vadd.f32 %v1636_v52, %v1597_v17  ;;  %v16588_v36 = vrot.slane %v16587_v40, 4 }
 0x15d   : > { %v2152_v38 = vsel %vm845_vm1, %v2150_v15, %v16584_v2  ;;  %v1370_v16 = vsel %vm1028_vm4, %v16586_v9, %v16585_v6  ;;  %v16589_v4 = vrot.slane %v16559_v63, 4  ;;  %v2432_v2 = vmul.f32 %v10167_v32, %v2398_v30 }
 0x15e   : > { %vm1074_vm9 = vcmp.ge.f32.partialorder %v1065_v34, 0.0  ;;  %v1083_v20 = vmul.f32 0.01, %v1065_v34  ;;  %v1388_v1 = vadd.f32 %v1370_v16, %v1331_v21  ;;  %v10705_v26 = vmul.f32 %v10173_v24, %v2398_v30  ;;  %v1752_v16 = vpop.permute.xlu1 %1751 }
 0x15f   : > { %v1693_v10 = vsel %vm1028_vm4, %v16589_v4, %v16588_v36  ;;  %v10708_v49 = vmul.f32 %v10197_v37, %v2398_v30  ;;  %v10711_v21 = vmul.f32 %v10205_v46, %v2398_v30  ;;  %v10715_v6 = vmul.f32 %v10213_v53, %v2398_v30 }
 0x160   : > { %v1711_v15 = vadd.f32 %v1693_v10, %v1654_v14  ;;  %v1092_v17 = vsel %vm1074_vm9, %v1065_v34, %v1083_v20  ;;  %vm1397_vm10 = vcmp.ge.f32.partialorder %v1388_v1, 0.0  ;;  %v1406_v52 = vmul.f32 0.01, %v1388_v1 }
 0x161   : > { %8040 = vmatmul.msk.f32.gmra.mxu0 %vm2756_vm5, %v1092_v17  ;;  %v2112_v9 = vmul.f32 %v10167_v32, %v2090_v47  ;;  %v10719_v40 = vmul.f32 %v10173_v24, %v2090_v47  ;;  %v10722_v34 = vmul.f32 %v10197_v37, %v2090_v47  ;;  %v10725_v20 = vmul.f32 %v10205_v46, %v2090_v47  ;;  %v16597_v17 = vld [vmem:[#allocation17_spill] sm:$0xff] }
 0x162   : > { %vm1720_vm11 = vcmp.ge.f32.partialorder %v1711_v15, 0.0  ;;  %v1729_v63 = vmul.f32 0.01, %v1711_v15  ;;  %v1415_v14 = vsel %vm1397_vm10, %v1388_v1, %v1406_v52  ;;  %v10727_v36 = vadd.f32 %v2152_v38, %v2116_v5 }
 0x163   : > { %16590 = vst [vmem:[#allocation36_spill] sm:$0xff] %v10719_v40  ;;  %8050 = vmatmul.msk.f32.gmra.mxu1 %vm2756_vm5, %v1415_v14  ;;  %v10732_v10 = vmul.f32 %v10213_v53, %v2090_v47  ;;  %v10736_v1 = vadd.f32 %v10221_v33, %v2432_v2  ;;  %v1786_v5 = vmul.f32 %v10167_v32, %v1752_v16  ;;  %v16598_v41 = vrot.slane %v16597_v17, 2  ;;  %v2403_v40 = vpop.permute.xlu0 %2402  ;;  %v16600_v17 = vld [vmem:[#allocation33_spill] sm:$0xff] }
 0x164   : > { %16591 = vst [vmem:[#allocation37_spill] sm:$0xff] %v10722_v34  ;;  %v1738_v30 = vsel %vm1720_vm11, %v1711_v15, %v1729_v63  ;;  %v10744_v15 = vadd.f32 %v10221_v33, %v2112_v9  ;;  %v10747_v47 = vmul.f32 %v10173_v24, %v1752_v16  ;;  %v10759_v9 = vmul.f32 %v10197_v37, %v1752_v16 }
 0x165   : > { %16592 = vst [vmem:[#allocation38_spill] sm:$0xff] %v10725_v20  ;;  %8060 = vmatmul.msk.f32.gmra.mxu2 %vm2756_vm5, %v1738_v30  ;;  %v16595_v30 = vld [vmem:[#allocation32_spill] sm:$0xff]  ;;  %v10762_v3 = vmul.f32 %v10205_v46, %v1752_v16  ;;  %v10766_v2 = vadd.f32 %v10221_v33, %v1786_v5  ;;  %v16601_v14 = vrot.slane %v16600_v17, 3  ;;  %v16607_v5 = vrot.slane %v16606_v27, 4  ;;  %v2095_v27 = vpop.permute.xlu2 %2094 }
 0x166   : > { %16593 = vst [vmem:[#allocation44_spill] sm:$0xff] %v10732_v10  ;;  %v16596_v52 = vrot.slane %v16595_v30, 2  ;;  %v10769_v30 = vmul.f32 %v10213_v53, %v1752_v16  ;;  %v2501_v10 = vadd.f32 %v10553_v31, %v10467_v42  ;;  %v16608_v16 = vrot.slane %v10500_v51, 2 }
 0x167   : > { %16594 = vst [vmem:[#allocation39_spill] sm:$0xff] %v10744_v15  ;;  %v16599_v15 = vld [vmem:[#allocation15_spill] sm:$0xff]  ;;  %v16609_v17 = vrot.slane %v10470_v8, 2  ;;  %v16611_v42 = vrot.slane %v10473_v12, 3  ;;  %v10802_v8 = vmul.f32 %v10205_v46, %v2403_v40 }
 0x168   : > { %v1240_v38 = vsel %vm906_vm2, %v16598_v41, %v16596_v52  ;;  %v16602_v41 = vld [vmem:[#allocation42_spill] sm:$0xff] }
 0x169   : > { %v1266_v63 = vadd.f32 %v1240_v38, %v16599_v15  ;;  %v16603_v52 = vrot.slane %v16602_v41, 3  ;;  %v16604_v38 = vld [vmem:[#allocation34_spill] sm:$0xff]  ;;  %v2532_v41 = vsel %vm906_vm2, %v16609_v17, %v16608_v16  ;;  %16612 = vst [vmem:[#allocation45_spill] sm:$0xff] %v10802_v8  ;;  %v16614_v16 = vrot.slane %v10531_v44, 4 }
 0x16a   : > { %v16605_v15 = vrot.slane %v16604_v38, 4  ;;  %v2558_v56 = vadd.f32 %v2532_v41, %v2501_v10  ;;  %v10799_v38 = vmul.f32 %v10197_v37, %v2403_v40  ;;  %v10805_v10 = vmul.f32 %v10213_v53, %v2403_v40 }
 0x16b   : > { %v1297_v4 = vsel %vm967_vm3, %v16603_v52, %v16601_v14  ;;  %v16610_v14 = vrot.slane %v10508_v48, 3  ;;  %v16615_v17 = vrot.slane %v10477_v54, 4  ;;  %v2113_v41 = vmul.f32 %v10167_v32, %v2095_v27 }
 0x16c   : > { %v1323_v34 = vadd.f32 %v1297_v4, %v1266_v63  ;;  %v1354_v59 = vsel %vm1028_vm4, %v16607_v5, %v16605_v15  ;;  %v2433_v4 = vmul.f32 %v10167_v32, %v2403_v40  ;;  %v10796_v63 = vmul.f32 %v10173_v24, %v2403_v40  ;;  %16613 = vst [vmem:[#allocation46_spill] sm:$0xff] %v10805_v10  ;;  %v2408_v10 = vpop.permute.xlu0 %2407 }
 0x16d   : > { %v2589_v31 = vsel %vm967_vm3, %v16611_v42, %v16610_v14  ;;  %v10816_v14 = vmul.f32 %v10173_v24, %v2095_v27  ;;  %v10828_v40 = vmul.f32 %v10197_v37, %v2095_v27  ;;  %v1912_v54 = vadd.f32 %v10633_v23, %v10641_v13 }
 0x16e   : > { %v1380_v52 = vadd.f32 %v1354_v59, %v1323_v34  ;;  %v2615_v5 = vadd.f32 %v2589_v31, %v2558_v56  ;;  %v2646_v59 = vsel %vm1028_vm4, %v16615_v17, %v16614_v16  ;;  %v10820_v12 = vadd.f32 %v10221_v33, %v2433_v4  ;;  %v1757_v31 = vpop.permute.xlu1 %1756 }
 0x16f   : > { %16616 = vst [vmem:[#allocation47_spill] sm:$0xff] %v10816_v14  ;;  %v10831_v4 = vmul.f32 %v10205_v46, %v2095_v27  ;;  %v10845_v16 = vmul.f32 %v10197_v37, %v1757_v31  ;;  %v16634_v13 = vrot.slane %v10657_v50, 3  ;;  %v2434_v50 = vmul.f32 %v10167_v32, %v2408_v10 }
 0x170   : > { %vm1389_vm12 = vcmp.ge.f32.partialorder %v1380_v52, 0.0  ;;  %v1398_v34 = vmul.f32 0.01, %v1380_v52  ;;  %v2672_v42 = vadd.f32 %v2646_v59, %v2615_v5  ;;  %16617 = vst [vmem:[#allocation49_spill] sm:$0xff] %v10820_v12  ;;  %v10834_v5 = vadd.f32 %v10221_v33, %v2113_v41 }
 0x171   : > { %16618 = vst [vmem:[#allocation48_spill] sm:$0xff] %v10828_v40  ;;  %v10838_v59 = vmul.f32 %v10213_v53, %v2095_v27  ;;  %v10851_v41 = vmul.f32 %v10205_v46, %v1757_v31  ;;  %v10854_v27 = vmul.f32 %v10213_v53, %v1757_v31  ;;  %v16627_v12 = vrot.slane %v10651_v25, 2 }
 0x172   : > { %v1407_v15 = vsel %vm1389_vm12, %v1380_v52, %v1398_v34  ;;  %vm2681_vm13 = vcmp.ge.f32.partialorder %v2672_v42, 0.0  ;;  %v2690_v20 = vmul.f32 0.01, %v2672_v42  ;;  %16619 = vst [vmem:[#allocation50_spill] sm:$0xff] %v10831_v4  ;;  %v1787_v34 = vmul.f32 %v10167_v32, %v1757_v31 }
 0x173   : > { %8042 = vmatmul.msk.f32.vlgmr.msrb.gmra.mxu0 %vm2756_vm5, %v1407_v15  ;;  %16620 = vst [vmem:[#allocation51_spill] sm:$0xff] %v10834_v5  ;;  %v10842_v15 = vmul.f32 %v10173_v24, %v1757_v31  ;;  %v16622_v52 = vrot.slane %v10601_v28, 3  ;;  %v16625_v5 = vld [vmem:[#allocation14_spill] sm:$0xff] }
 0x174   : > { %16621 = vst [vmem:[#allocation52_spill] sm:$0xff] %v10838_v59  ;;  %v2699_v17 = vsel %vm2681_vm13, %v2672_v42, %v2690_v20  ;;  %v16623_v20 = vld [vmem:[#allocation18_spill] sm:$0xff]  ;;  %v16626_v14 = vrot.slane %v16625_v5, 2 }
 0x175   : > { %8092 = vmatmul.msk.f32.vlgmr.msrb.gmra.mxu2 %vm2756_vm5, %v2699_v17  ;;  %v16624_v42 = vrot.slane %v16623_v20, 3  ;;  %v10871_v20 = vadd.f32 %v10221_v33, %v1787_v34  ;;  %v2100_v34 = vpop.permute.xlu2 %2099 }
 0x176   : > { %v2209_v23 = vsel %vm906_vm2, %v16627_v12, %v16626_v14  ;;  %v16632_v12 = vld [vmem:[#allocation19_spill] sm:$0xff]  ;;  %v10914_v59 = vmul.f32 %v10197_v37, %v2100_v34  ;;  %v10920_v17 = vmul.f32 %v10213_v53, %v2100_v34 }
 0x177   : > { %v1943_v56 = vsel %vm967_vm3, %v16624_v42, %v16622_v52  ;;  %v2235_v31 = vadd.f32 %v2209_v23, %v10727_v36  ;;  %16628 = vst [vmem:[#allocation30_spill] sm:$0xff] %v10871_v20  ;;  %v16629_v52 = vrot.slane %v10605_v43, 4  ;;  %v16630_v42 = vld [vmem:[#allocation20_spill] sm:$0xff]  ;;  %v16633_v14 = vrot.slane %v16632_v12, 3 }
 0x178   : > { %v1969_v60 = vadd.f32 %v1943_v56, %v1912_v54  ;;  %v16631_v61 = vrot.slane %v16630_v42, 4  ;;  %v16635_v42 = vld [vmem:[#allocation22_spill] sm:$0xff]  ;;  %v10894_v54 = vmul.f32 %v10173_v24, %v2408_v10  ;;  %16642 = vst [vmem:[#allocation40_spill] sm:$0xff] %v10920_v17  ;;  %v16658_v17 = vrot.slane %v10605_v43, 4 }
 0x179   : > { %v2266_v56 = vsel %vm967_vm3, %v16634_v13, %v16633_v14  ;;  %v16636_v4 = vrot.slane %v16635_v42, 4 }
 0x17a   : > { %v2000_v25 = vsel %vm1028_vm4, %v16631_v61, %v16629_v52  ;;  %v2292_v8 = vadd.f32 %v2266_v56, %v2235_v31  ;;  %v16637_v61 = vrot.slane %v10666_v35, 4  ;;  %v10900_v31 = vmul.f32 %v10205_v46, %v2408_v10 }
 0x17b   : > { %v2026_v23 = vadd.f32 %v2000_v25, %v1969_v60  ;;  %v10897_v60 = vmul.f32 %v10197_v37, %v2408_v10  ;;  %v10903_v25 = vmul.f32 %v10213_v53, %v2408_v10  ;;  %v2114_v35 = vmul.f32 %v10167_v32, %v2100_v34 }
 0x17c   : > { %v2323_v52 = vsel %vm1028_vm4, %v16637_v61, %v16636_v4  ;;  %16638 = vst [vmem:[#allocation16_spill] sm:$0xff] %v10900_v31  ;;  %v1762_v4 = vpop.permute.xlu1 %1761  ;;  %v10917_v10 = vmul.f32 %v10205_v46, %v2100_v34  ;;  %v16647_v31 = vrot.slane %v10580_v29, 2  ;;  %v16651_v29 = vrot.slane %v10762_v3, 3 }
 0x17d   : > { %vm2035_vm14 = vcmp.ge.f32.partialorder %v2026_v23, 0.0  ;;  %v2044_v13 = vmul.f32 0.01, %v2026_v23  ;;  %v2349_v14 = vadd.f32 %v2323_v52, %v2292_v8  ;;  %16639 = vst [vmem:[#allocation43_spill] sm:$0xff] %v10903_v25  ;;  %v10907_v8 = vmul.f32 %v10173_v24, %v2100_v34 }
 0x17e   : > { %v10911_v52 = vadd.f32 %v10221_v33, %v2434_v50  ;;  %v1788_v36 = vmul.f32 %v10167_v32, %v1762_v4  ;;  %v10925_v40 = vmul.f32 %v10173_v24, %v1762_v4  ;;  %v10932_v20 = vmul.f32 %v10197_v37, %v1762_v4 }
 0x17f   : > { %v2053_v56 = vsel %vm2035_vm14, %v2026_v23, %v2044_v13  ;;  %vm2358_vm15 = vcmp.ge.f32.partialorder %v2349_v14, 0.0  ;;  %v2367_v61 = vmul.f32 0.01, %v2349_v14  ;;  %16640 = vst [vmem:[#allocation13_spill] sm:$0xff] %v10907_v8  ;;  %v10935_v34 = vadd.f32 %v10221_v33, %v2114_v35 }
 0x180   : > { %8072 = vmatmul.msk.f32.vlgmr.msra.gmra.mxu0 %vm2756_vm5, %v2053_v56  ;;  %16641 = vst [vmem:[#allocation53_spill] sm:$0xff] %v10911_v52  ;;  %v16644_v13 = vrot.slane %v10747_v47, 1  ;;  %v16646_v8 = vrot.slane %v10759_v9, 2 }
 0x181   : > { %v2376_v23 = vsel %vm2358_vm15, %v2349_v14, %v2367_v61  ;;  %16643 = vst [vmem:[#allocation21_spill] sm:$0xff] %v10935_v34  ;;  %v10939_v61 = vmul.f32 %v10205_v46, %v1762_v4  ;;  %v10951_v34 = vadd.f32 %v10221_v33, %v1788_v36  ;;  %v2413_v14 = vpop.permute.xlu0 %2412 }
 0x182   : > { %8082 = vmatmul.msk.f32.vlgmr.msrb.gmra.mxu1 %vm2756_vm5, %v2376_v23  ;;  %v16645_v23 = vrot.slane %v10572_v19, 1  ;;  %v1888_v19 = vsel %vm906_vm2, %v16647_v31, %v16646_v8  ;;  %v16652_v31 = vrot.slane %v10601_v28, 3  ;;  %v11003_v43 = vmul.f32 %v10173_v24, %v2413_v14 }
 0x184   : > { %v1831_v50 = vsel %vm845_vm1, %v16645_v23, %v16644_v13  ;;  %v16648_v13 = vrot.slane %v10351_v62, 1  ;;  %v16649_v23 = vrot.slane %v16583_v39, 1  ;;  %v1945_v8 = vsel %vm967_vm3, %v16652_v31, %v16651_v29 }
 0x185   : > { %v1856_v35 = vadd.f32 %v1831_v50, %v10621_v7  ;;  %v10966_v7 = vmul.f32 %v10213_v53, %v1762_v4  ;;  %v16650_v50 = vld [vmem:[#allocation23_spill] sm:$0xff]  ;;  %v16653_v39 = vrot.slane %v10354_v57, 2  ;;  %v16655_v4 = vrot.slane %v10705_v26, 1 }
 0x186   : > { %v2154_v52 = vsel %vm845_vm1, %v16649_v23, %v16648_v13  ;;  %v16654_v13 = vrot.slane %v16625_v5, 2  ;;  %v16659_v5 = vrot.slane %v10359_v0, 3 }
 0x187   : > { %v1913_v36 = vadd.f32 %v1888_v19, %v1856_v35  ;;  %v2179_v56 = vadd.f32 %v2154_v52, %v16650_v50  ;;  %v16656_v35 = vrot.slane %v10495_v58, 1  ;;  %v16657_v50 = vrot.slane %v10769_v30, 4 }
 0x188   : > { %v2211_v23 = vsel %vm906_vm2, %v16654_v13, %v16653_v39  ;;  %v16660_v39 = vrot.slane %v16632_v12, 3  ;;  %v16661_v58 = vrot.slane %v10708_v49, 2  ;;  %v16663_v12 = vrot.slane %v10362_v11, 4 }
 0x189   : > { %v2477_v52 = vsel %vm845_vm1, %v16656_v35, %v16655_v4  ;;  %v1970_v19 = vadd.f32 %v1945_v8, %v1913_v36  ;;  %v2002_v28 = vsel %vm1028_vm4, %v16658_v17, %v16657_v50  ;;  %v2236_v29 = vadd.f32 %v2211_v23, %v2179_v56 }
 0x18a   : > { %v2502_v31 = vadd.f32 %v2477_v52, %v10522_v45  ;;  %v2268_v13 = vsel %vm967_vm3, %v16660_v39, %v16659_v5  ;;  %v16662_v4 = vrot.slane %v10500_v51, 2  ;;  %v2435_v8 = vmul.f32 %v10167_v32, %v2413_v14 }
 0x18b   : > { %v2027_v45 = vadd.f32 %v2002_v28, %v1970_v19  ;;  %v2293_v56 = vadd.f32 %v2268_v13, %v2236_v29  ;;  %v16664_v35 = vrot.slane %v16635_v42, 4  ;;  %v16665_v51 = vrot.slane %v10711_v21, 3  ;;  %v2105_v13 = vpop.permute.xlu2 %2104 }
 0x18c   : > { %v2534_v36 = vsel %vm906_vm2, %v16662_v4, %v16661_v58  ;;  %v16666_v50 = vrot.slane %v10508_v48, 3  ;;  %v16667_v39 = vrot.slane %v10715_v6, 4  ;;  %v16668_v58 = vrot.slane %v10531_v44, 4 }
 0x18d   : > { %v2559_v23 = vadd.f32 %v2534_v36, %v2502_v31  ;;  %v2325_v52 = vsel %vm1028_vm4, %v16664_v35, %v16663_v12  ;;  %v11022_v28 = vmul.f32 %v10197_v37, %v2413_v14  ;;  %vm2036_vm6 = vcmp.ge.f32.partialorder %v2027_v45, 0.0 }
 0x18e   : > { %v2591_v5 = vsel %vm967_vm3, %v16666_v50, %v16665_v51  ;;  %v2648_v19 = vsel %vm1028_vm4, %v16668_v58, %v16667_v39  ;;  %v2045_v29 = vmul.f32 0.01, %v2027_v45  ;;  %v2350_v42 = vadd.f32 %v2325_v52, %v2293_v56  ;;  %v1767_v50 = vpop.permute.xlu1 %1766 }
 0x18f   : > { %v2616_v31 = vadd.f32 %v2591_v5, %v2559_v23  ;;  %v11025_v4 = vadd.f32 %v10221_v33, %v2435_v8  ;;  %v11029_v36 = vmul.f32 %v10205_v46, %v2413_v14  ;;  %v11032_v44 = vmul.f32 %v10213_v53, %v2413_v14 }
 0x190   : > { %v2054_v12 = vsel %vm2036_vm6, %v2027_v45, %v2045_v29  ;;  %vm2359_vm7 = vcmp.ge.f32.partialorder %v2350_v42, 0.0  ;;  %v2368_v35 = vmul.f32 0.01, %v2350_v42  ;;  %v2115_v56 = vmul.f32 %v10167_v32, %v2105_v13 }
 0x191   : > { %v2673_v51 = vadd.f32 %v2648_v19, %v2616_v31  ;;  %8073 = vmatmul.msk.f32.gmra.mxu0 %vm2756_vm5, %v2054_v12  ;;  %v11037_v8 = vmul.f32 %v10173_v24, %v2105_v13  ;;  %v11040_v23 = vmul.f32 %v10197_v37, %v2105_v13  ;;  %v11043_v52 = vmul.f32 %v10205_v46, %v2105_v13 }
 0x192   : > { %v2377_v14 = vsel %vm2359_vm7, %v2350_v42, %v2368_v35  ;;  %v11046_v5 = vmul.f32 %v10213_v53, %v2105_v13  ;;  %v1789_v19 = vmul.f32 %v10167_v32, %v1767_v50  ;;  %v11053_v29 = vmul.f32 %v10173_v24, %v1767_v50  ;;  %v11195_v24 = vld [vmem:[%s16271_s5] ss:$0 sm:$0xff]  ;;  %s8953_s5 = scalar_lea.hbm %s16002_s21, 2 }
 0x193   : > { %16669 = vst [vmem:[#allocation12_spill] sm:$0xff] %v11037_v8  ;;  %vm2682_vm8 = vcmp.ge.f32.partialorder %v2673_v51, 0.0  ;;  %v2691_v45 = vmul.f32 0.01, %v2673_v51  ;;  %8083 = vmatmul.msk.f32.gmra.mxu1 %vm2756_vm5, %v2377_v14  ;;  %v11057_v42 = vmul.f32 %v10197_v37, %v1767_v50  ;;  %v16673_v13 = vrot.slane %v10842_v15, 1 }
 0x194   : > { %16670 = vst [vmem:[#allocation32_spill] sm:$0xff] %v11040_v23  ;;  %v16674_v35 = vrot.slane %v10747_v47, 1  ;;  %v11066_v58 = vadd.f32 %v10221_v33, %v2115_v56  ;;  %v16132_v32 = vrot.slane %v11037_v8, 1  ;;  %v11076_v47 = vmul.f32 %v10213_v53, %v1767_v50 }
 0x195   : > { %16671 = vst [vmem:[#allocation17_spill] sm:$0xff] %v11043_v52  ;;  %v2700_v31 = vsel %vm2682_vm8, %v2673_v51, %v2691_v45  ;;  %v11071_v51 = vmul.f32 %v10205_v46, %v1767_v50  ;;  %v16676_v12 = vrot.slane %v10759_v9, 2  ;;  %v16677_v39 = vrot.slane %v10481_v22, 1  ;;  %v2418_v9 = vpop.permute.xlu0 %2417  ;;  %v16698_v50 = vld [vmem:[#allocation46_spill] sm:$0xff] }
 0x196   : > { %16672 = vst [vmem:[#allocation15_spill] sm:$0xff] %v11046_v5  ;;  %v1833_v14 = vsel %vm845_vm1, %v16674_v35, %v16673_v13  ;;  %8093 = vmatmul.msk.f32.gmra.mxu2 %vm2756_vm5, %v2700_v31  ;;  %v11080_v31 = vadd.f32 %v10221_v33, %v1789_v19  ;;  %v16675_v35 = vrot.slane %v10845_v16, 2  ;;  %v16678_v45 = vrot.slane %v10351_v62, 1 }
 0x197   : > { %v1857_v13 = vadd.f32 %v1833_v14, %v10766_v2  ;;  %v16679_v14 = vld [vmem:[#allocation24_spill] sm:$0xff]  ;;  %v16680_v19 = vrot.slane %v10796_v63, 1  ;;  %v16681_v48 = vrot.slane %v10705_v26, 1  ;;  %v16695_v26 = vld [vmem:[#allocation45_spill] sm:$0xff] }
 0x198   : > { %v1890_v46 = vsel %vm906_vm2, %v16676_v12, %v16675_v35  ;;  %v2156_v53 = vsel %vm845_vm1, %v16678_v45, %v16677_v39  ;;  %v16682_v12 = vrot.slane %v10851_v41, 3  ;;  %v16683_v35 = vrot.slane %v10762_v3, 3 }
 0x199   : > { %v1914_v2 = vadd.f32 %v1890_v46, %v1857_v13  ;;  %v2180_v33 = vadd.f32 %v2156_v53, %v16679_v14  ;;  %v2479_v56 = vsel %vm845_vm1, %v16681_v48, %v16680_v19  ;;  %v16684_v39 = vrot.slane %v10484_v55, 2 }
 0x19a   : > { %v1947_v62 = vsel %vm967_vm3, %v16683_v35, %v16682_v12  ;;  %v16685_v45 = vrot.slane %v10354_v57, 2  ;;  %v2503_v46 = vadd.f32 %v2479_v56, %v10736_v1  ;;  %v16686_v14 = vrot.slane %v10799_v38, 2 }
 0x19b   : > { %v1971_v53 = vadd.f32 %v1947_v62, %v1914_v2  ;;  %v16687_v19 = vrot.slane %v10708_v49, 2  ;;  %v16688_v12 = vrot.slane %v10854_v27, 4  ;;  %v16689_v35 = vrot.slane %v10769_v30, 4  ;;  %v16692_v2 = vld [vmem:[#allocation26_spill] sm:$0xff] }
 0x19c   : > { %v2213_v13 = vsel %vm906_vm2, %v16685_v45, %v16684_v39  ;;  %v16690_v39 = vrot.slane %v10488_v18, 3  ;;  %v16691_v1 = vrot.slane %v10359_v0, 3  ;;  %v16694_v62 = vrot.slane %v10362_v11, 4  ;;  %v11146_v11 = vld [vmem:[%s16268_s24] ss:$0 sm:$0xff] }
 0x19d   : > { %v2237_v48 = vadd.f32 %v2213_v13, %v2180_v33  ;;  %v2536_v3 = vsel %vm906_vm2, %v16687_v19, %v16686_v14  ;;  %v2004_v57 = vsel %vm1028_vm4, %v16689_v35, %v16688_v12  ;;  %v16693_v33 = vrot.slane %v16692_v2, 4  ;;  %v2128_v13 = vpop.permute.xlu2 %2127 }
 0x19e   : > { %v2270_v56 = vsel %vm967_vm3, %v16691_v1, %v16690_v39  ;;  %v2560_v45 = vadd.f32 %v2536_v3, %v2503_v46  ;;  %v2028_v14 = vadd.f32 %v2004_v57, %v1971_v53  ;;  %v16696_v30 = vrot.slane %v16695_v26, 3 }
 0x19f   : > { %v2327_v49 = vsel %vm1028_vm4, %v16694_v62, %v16693_v33  ;;  %v2294_v19 = vadd.f32 %v2270_v56, %v2237_v48  ;;  %v16697_v12 = vrot.slane %v10711_v21, 3  ;;  %v16699_v0 = vrot.slane %v16698_v50, 4  ;;  %v11152_v21 = vld [vmem:[%s16268_s24 + $0x1] ss:$0 sm:$0xff]  ;;  %v11169_v62 = vld [vmem:[%s16268_s24 + $0x3] ss:$0 sm:$0xff] }
 0x1a0   : > { %v16700_v39 = vrot.slane %v10715_v6, 4  ;;  %v2436_v46 = vmul.f32 %v11146_v11, %v2418_v9  ;;  %v11155_v53 = vmul.f32 %v11152_v21, %v2418_v9  ;;  %v11160_v6 = vld [vmem:[%s16268_s24 + $0x2] ss:$0 sm:$0xff]  ;;  %vm2037_vm9 = vcmp.ge.f32.partialorder %v2028_v14, 0.0 }
 0x1a1   : > { %v2593_v35 = vsel %vm967_vm3, %v16697_v12, %v16696_v30  ;;  %v11163_v48 = vmul.f32 %v11160_v6, %v2418_v9  ;;  %v2046_v3 = vmul.f32 0.01, %v2028_v14  ;;  %v2351_v57 = vadd.f32 %v2327_v49, %v2294_v19  ;;  %v1772_v49 = vpop.permute.xlu1 %1771  ;;  %v11180_v19 = vld [vmem:[%s16268_s24 + $0x4] ss:$0 sm:$0xff] }
 0x1a2   : > { %v2650_v1 = vsel %vm1028_vm4, %v16700_v39, %v16699_v0  ;;  %v2617_v17 = vadd.f32 %v2593_v35, %v2560_v45  ;;  %v2139_v56 = vmul.f32 %v11152_v21, %v2128_v13  ;;  %v11172_v45 = vmul.f32 %v11169_v62, %v2418_v9 }
 0x1a3   : > { %v2196_v30 = vmul.f32 %v11160_v6, %v2128_v13  ;;  %v2253_v12 = vmul.f32 %v11169_v62, %v2128_v13  ;;  %v2055_v35 = vsel %vm2037_vm9, %v2028_v14, %v2046_v3  ;;  %vm2360_vm10 = vcmp.ge.f32.partialorder %v2351_v57, 0.0 }
 0x1a4   : > { %v2674_v33 = vadd.f32 %v2650_v1, %v2617_v17  ;;  %v2369_v0 = vmul.f32 0.01, %v2351_v57  ;;  %v2167_v39 = vrot.slane %v2139_v56, 1  ;;  %8074 = vmatmul.msk.f32.gmra.mxu0 %vm2756_vm5, %v2055_v35  ;;  %v11183_v1 = vmul.f32 %v11180_v19, %v2418_v9 }
 0x1a5   : > { %v11186_v25 = vmul.f32 %v11180_v19, %v2128_v13  ;;  %v2224_v56 = vrot.slane %v2196_v30, 2  ;;  %v2281_v35 = vrot.slane %v2253_v12, 3  ;;  %v11198_v9 = vadd.f32 %v11195_v24, %v2436_v46 }
 0x1a6   : > { %vm2683_vm11 = vcmp.ge.f32.partialorder %v2674_v33, 0.0  ;;  %v2692_v17 = vmul.f32 0.01, %v2674_v33  ;;  %v2378_v14 = vsel %vm2360_vm10, %v2351_v57, %v2369_v0  ;;  %v2168_v3 = vsel %vm845_vm1, %v16132_v32, %v2167_v39  ;;  %v16707_v39 = vld [vmem:[#allocation30_spill] sm:$0xff] }
 0x1a7   : > { %16701 = vst [vmem:[#allocation33_spill] sm:$0xff] %v11186_v25  ;;  %8084 = vmatmul.msk.f32.gmra.mxu1 %vm2756_vm5, %v2378_v14  ;;  %v1790_v57 = vmul.f32 %v11146_v11, %v1772_v49  ;;  %v11207_v0 = vmul.f32 %v11152_v21, %v1772_v49  ;;  %v16702_v14 = vrot.slane %v10925_v40, 1  ;;  %v16704_v12 = vrot.slane %v11040_v23, 2 }
 0x1a8   : > { %v2701_v37 = vsel %vm2683_vm11, %v2674_v33, %v2692_v17  ;;  %v2186_v33 = vadd.f32 %v2168_v3, %v11066_v58  ;;  %v11212_v17 = vmul.f32 %v11160_v6, %v1772_v49  ;;  %v16705_v3 = vrot.slane %v11043_v52, 3  ;;  %v2423_v52 = vpop.permute.xlu0 %2422 }
 0x1a9   : > { %8094 = vmatmul.msk.f32.gmra.mxu2 %vm2756_vm5, %v2701_v37  ;;  %v16703_v37 = vrot.slane %v10842_v15, 1  ;;  %v2225_v58 = vsel %vm906_vm2, %v16704_v12, %v2224_v56  ;;  %v11228_v46 = vmul.f32 %v11169_v62, %v1772_v49  ;;  %v11232_v25 = vadd.f32 %v11195_v24, %v1790_v57 }
 0x1aa   : > { %v11225_v30 = vsel %vm967_vm3, %v16705_v3, %v2281_v35  ;;  %v11235_v15 = vmul.f32 %v11180_v19, %v1772_v49  ;;  %v16709_v56 = vrot.slane %v10845_v16, 2  ;;  %v16712_v3 = vrot.slane %v10481_v22, 1 }
 0x1ab   : > { %v1835_v32 = vsel %vm845_vm1, %v16703_v37, %v16702_v14  ;;  %16706 = vst [vmem:[#allocation42_spill] sm:$0xff] %v11225_v30  ;;  %v16708_v14 = vrot.slane %v10932_v20, 2  ;;  %v16710_v37 = vld [vmem:[#allocation27_spill] sm:$0xff]  ;;  %v11247_v5 = vadd.f32 %v2225_v58, %v2186_v33  ;;  %v16715_v23 = vrot.slane %v10939_v61, 3 }
 0x1ac   : > { %v1858_v13 = vadd.f32 %v1835_v32, %v16707_v39  ;;  %v16711_v35 = vrot.slane %v16710_v37, 1  ;;  %v16714_v39 = vld [vmem:[#allocation25_spill] sm:$0xff]  ;;  %v16716_v16 = vrot.slane %v10851_v41, 3  ;;  %v16719_v22 = vrot.slane %v10484_v55, 2 }
 0x1ad   : > { %v1892_v12 = vsel %vm906_vm2, %v16709_v56, %v16708_v14  ;;  %16713 = vst [vmem:[#allocation34_spill] sm:$0xff] %v11247_v5  ;;  %v16717_v56 = vld [vmem:[#allocation28_spill] sm:$0xff]  ;;  %v16720_v58 = vrot.slane %v10894_v54, 1  ;;  %v16724_v55 = vrot.slane %v10854_v27, 4  ;;  %v16732_v27 = vrot.slane %v16692_v2, 4  ;;  %v16736_v5 = vld [vmem:[#allocation43_spill] sm:$0xff] }
 0x1ae   : > { %v2158_v30 = vsel %vm845_vm1, %v16712_v3, %v16711_v35  ;;  %v1915_v57 = vadd.f32 %v1892_v12, %v1858_v13  ;;  %v1949_v14 = vsel %vm967_vm3, %v16716_v16, %v16715_v23  ;;  %v16718_v8 = vrot.slane %v16717_v56, 2  ;;  %v1777_v23 = vpop.permute.xlu1 %1776  ;;  %v16733_v12 = vld [vmem:[#allocation16_spill] sm:$0xff] }
 0x1af   : > { %v2181_v49 = vadd.f32 %v2158_v30, %v16714_v39  ;;  %v16721_v13 = vrot.slane %v10796_v63, 1  ;;  %v16722_v39 = vld [vmem:[#allocation49_spill] sm:$0xff]  ;;  %v16723_v16 = vrot.slane %v10966_v7, 4  ;;  %v16727_v63 = vrot.slane %v10488_v18, 3 }
 0x1b0   : > { %v2215_v33 = vsel %vm906_vm2, %v16719_v22, %v16718_v8  ;;  %v1972_v35 = vadd.f32 %v1949_v14, %v1915_v57  ;;  %v16725_v22 = vld [vmem:[#allocation29_spill] sm:$0xff]  ;;  %v16728_v57 = vrot.slane %v10897_v60, 2  ;;  %v16734_v18 = vrot.slane %v16733_v12, 3 }
 0x1b1   : > { %v2481_v30 = vsel %vm845_vm1, %v16721_v13, %v16720_v58  ;;  %v2238_v3 = vadd.f32 %v2215_v33, %v2181_v49  ;;  %v2006_v8 = vsel %vm1028_vm4, %v16724_v55, %v16723_v16  ;;  %v16726_v32 = vrot.slane %v16725_v22, 3 }
 0x1b2   : > { %v2504_v41 = vadd.f32 %v2481_v30, %v16722_v39  ;;  %v16729_v49 = vrot.slane %v10799_v38, 2  ;;  %v2029_v33 = vadd.f32 %v2006_v8, %v1972_v35  ;;  %v16730_v30 = vld [vmem:[#allocation35_spill] sm:$0xff]  ;;  %v16737_v38 = vrot.slane %v16736_v5, 4 }
 0x1b3   : > { %v2272_v58 = vsel %vm967_vm3, %v16727_v63, %v16726_v32  ;;  %v16731_v39 = vrot.slane %v16730_v30, 4  ;;  %v16735_v32 = vrot.slane %v16695_v26, 3  ;;  %v11302_v2 = vmul.f32 %v11152_v21, %v2423_v52 }
 0x1b4   : > { %v2538_v14 = vsel %vm906_vm2, %v16729_v49, %v16728_v57  ;;  %v2295_v13 = vadd.f32 %v2272_v58, %v2238_v3  ;;  %v16738_v57 = vrot.slane %v16698_v50, 4  ;;  %v2437_v3 = vmul.f32 %v11146_v11, %v2423_v52 }
 0x1b5   : > { %v2329_v16 = vsel %vm1028_vm4, %v16732_v27, %v16731_v39  ;;  %v2561_v55 = vadd.f32 %v2538_v14, %v2504_v41  ;;  %v2595_v63 = vsel %vm967_vm3, %v16735_v32, %v16734_v18  ;;  %vm2038_vm12 = vcmp.ge.f32.partialorder %v2029_v33, 0.0 }
 0x1b6   : > { %v2652_v35 = vsel %vm1028_vm4, %v16738_v57, %v16737_v38  ;;  %v2047_v41 = vmul.f32 0.01, %v2029_v33  ;;  %v2352_v8 = vadd.f32 %v2329_v16, %v2295_v13  ;;  %v11305_v49 = vmul.f32 %v11160_v6, %v2423_v52  ;;  %v11344_v38 = vpop.f32.mrf.mxu0 }
 0x1b7   : > { %v2618_v58 = vadd.f32 %v2595_v63, %v2561_v55  ;;  %v11308_v26 = vmul.f32 %v11169_v62, %v2423_v52  ;;  %v11311_v14 = vmul.f32 %v11180_v19, %v2423_v52  ;;  %v1791_v50 = vmul.f32 %v11146_v11, %v1777_v23  ;;  %16743 = vst [vmem:[#allocation14_spill] sm:$0xff] %v11344_v38 }
 0x1b8   : > { %v2056_v39 = vsel %vm2038_vm12, %v2029_v33, %v2047_v41  ;;  %vm2361_vm13 = vcmp.ge.f32.partialorder %v2352_v8, 0.0  ;;  %v2370_v27 = vmul.f32 0.01, %v2352_v8  ;;  %v11316_v13 = vadd.f32 %v11195_v24, %v2437_v3 }
 0x1b9   : > { %16739 = vst [vmem:[#allocation41_spill] sm:$0xff] %v11311_v14  ;;  %v2675_v18 = vadd.f32 %v2652_v35, %v2618_v58  ;;  %8075 = vmatmul.msk.f32.gmra.mxu0 %vm2756_vm5, %v2056_v39  ;;  %v11320_v55 = vmul.f32 %v11152_v21, %v1777_v23  ;;  %v11323_v32 = vmul.f32 %v11160_v6, %v1777_v23  ;;  %v16741_v3 = vrot.slane %v11053_v29, 1  ;;  %v16762_v14 = vld [vmem:[#allocation38_spill] sm:$0xff] }
 0x1ba   : > { %16740 = vst [vmem:[#allocation18_spill] sm:$0xff] %v11316_v13  ;;  %v2379_v52 = vsel %vm2361_vm13, %v2352_v8, %v2370_v27  ;;  %v11326_v33 = vmul.f32 %v11169_v62, %v1777_v23  ;;  %v11332_v35 = vmul.f32 %v11180_v19, %v1777_v23  ;;  %v16742_v41 = vrot.slane %v10925_v40, 1 }
 0x1bb   : > { %vm2684_vm14 = vcmp.ge.f32.partialorder %v2675_v18, 0.0  ;;  %v2693_v63 = vmul.f32 0.01, %v2675_v18  ;;  %8085 = vmatmul.msk.f32.gmra.mxu1 %vm2756_vm5, %v2379_v52  ;;  %v11341_v27 = vadd.f32 %v11195_v24, %v1791_v50  ;;  %v16744_v40 = vrot.slane %v11057_v42, 2 }
 0x1bc   : > { %v1837_v8 = vsel %vm845_vm1, %v16742_v41, %v16741_v3  ;;  %v16745_v3 = vrot.slane %v10932_v20, 2  ;;  %v16748_v50 = vrot.slane %v16710_v37, 1  ;;  %v16750_v23 = vrot.slane %v11003_v43, 1  ;;  %v2428_v20 = vpop.permute.xlu0 %2427 }
 0x1bd   : > { %v2702_v58 = vsel %vm2684_vm14, %v2675_v18, %v2693_v63  ;;  %v1859_v52 = vadd.f32 %v1837_v8, %v10951_v34  ;;  %v16746_v63 = vld [vmem:[#allocation36_spill] sm:$0xff]  ;;  %v16751_v57 = vrot.slane %v10894_v54, 1  ;;  %v16753_v37 = vrot.slane %v10939_v61, 3 }
 0x1be   : > { %8095 = vmatmul.msk.f32.gmra.mxu2 %vm2756_vm5, %v2702_v58  ;;  %v1894_v18 = vsel %vm906_vm2, %v16745_v3, %v16744_v40  ;;  %v16747_v41 = vrot.slane %v16746_v63, 1  ;;  %v16749_v58 = vld [vmem:[#allocation31_spill] sm:$0xff]  ;;  %v16752_v3 = vrot.slane %v11071_v51, 3  ;;  %v16760_v61 = vrot.slane %v11022_v28, 2 }
 0x1bf   : > { %v1916_v39 = vadd.f32 %v1894_v18, %v1859_v52  ;;  %v2483_v38 = vsel %vm845_vm1, %v16751_v57, %v16750_v23  ;;  %v16756_v52 = vrot.slane %v16717_v56, 2  ;;  %v16758_v57 = vrot.slane %v11076_v47, 4 }
 0x1c0   : > { %v2160_v34 = vsel %vm845_vm1, %v16748_v50, %v16747_v41  ;;  %v1951_v41 = vsel %vm967_vm3, %v16753_v37, %v16752_v3  ;;  %v16754_v50 = vld [vmem:[#allocation37_spill] sm:$0xff]  ;;  %v16759_v23 = vrot.slane %v10966_v7, 4  ;;  %v16761_v3 = vrot.slane %v10897_v60, 2 }
 0x1c1   : > { %v2182_v16 = vadd.f32 %v2160_v34, %v16749_v58  ;;  %v16755_v8 = vrot.slane %v16754_v50, 2  ;;  %v16757_v34 = vld [vmem:[#allocation53_spill] sm:$0xff]  ;;  %v1973_v54 = vadd.f32 %v1951_v41, %v1916_v39  ;;  %v16763_v56 = vrot.slane %v16762_v14, 3  ;;  %v16765_v39 = vld [vmem:[#allocation44_spill] sm:$0xff] }
 0x1c2   : > { %v2505_v58 = vadd.f32 %v2483_v38, %v16757_v34  ;;  %v2008_v40 = vsel %vm1028_vm4, %v16759_v23, %v16758_v57  ;;  %v2540_v37 = vsel %vm906_vm2, %v16761_v3, %v16760_v61  ;;  %v16766_v41 = vrot.slane %v16765_v39, 4 }
 0x1c3   : > { %v2217_v18 = vsel %vm906_vm2, %v16756_v52, %v16755_v8  ;;  %v16764_v8 = vrot.slane %v16725_v22, 3  ;;  %v16767_v52 = vrot.slane %v16730_v30, 4  ;;  %v16768_v60 = vrot.slane %v11029_v36, 3  ;;  %v11409_v30 = vpop.permute.xlu1 %1781 }
 0x1c4   : > { %v2239_v13 = vadd.f32 %v2217_v18, %v2182_v16  ;;  %v2562_v34 = vadd.f32 %v2540_v37, %v2505_v58  ;;  %v2438_v16 = vmul.f32 %v11146_v11, %v2428_v20  ;;  %v2030_v18 = vadd.f32 %v2008_v40, %v1973_v54 }
 0x1c5   : > { %v2274_v38 = vsel %vm967_vm3, %v16764_v8, %v16763_v56  ;;  %v2331_v7 = vsel %vm1028_vm4, %v16767_v52, %v16766_v41  ;;  %v16769_v23 = vrot.slane %v16733_v12, 3  ;;  %v16770_v22 = vrot.slane %v11032_v44, 4 }
 0x1c6   : > { %v2296_v57 = vadd.f32 %v2274_v38, %v2239_v13  ;;  %v16771_v3 = vrot.slane %v16736_v5, 4  ;;  %v11412_v58 = vmul.f32 %v11152_v21, %v2428_v20  ;;  %v11415_v13 = vmul.f32 %v11160_v6, %v2428_v20 }
 0x1c7   : > { %v2597_v61 = vsel %vm967_vm3, %v16769_v23, %v16768_v60  ;;  %v11418_v40 = vmul.f32 %v11169_v62, %v2428_v20  ;;  %vm2039_vm15 = vcmp.ge.f32.partialorder %v2030_v18, 0.0  ;;  %v2048_v12 = vmul.f32 0.01, %v2030_v18 }
 0x1c8   : > { %v2654_v56 = vsel %vm1028_vm4, %v16771_v3, %v16770_v22  ;;  %v2619_v8 = vadd.f32 %v2597_v61, %v2562_v34  ;;  %v2353_v54 = vadd.f32 %v2331_v7, %v2296_v57  ;;  %v11421_v37 = vmul.f32 %v11180_v19, %v2428_v20  ;;  %v11436_v20 = vpop.f32.mrf.mxu2  ;;  %v11438_v57 = vpop.f32.mrf.mxu0  ;;  %v16784_v22 = vld [vmem:[#allocation39_spill] sm:$0xff] }
 0x1c9   : > { %v11424_v38 = vadd.f32 %v11195_v24, %v2438_v16  ;;  %v1792_v41 = vmul.f32 %v11146_v11, %v11409_v30  ;;  %v11430_v52 = vmul.f32 %v11152_v21, %v11409_v30  ;;  %v2057_v34 = vsel %vm2039_vm15, %v2030_v18, %v2048_v12  ;;  %16772 = vst [vmem:[#allocation20_spill] sm:$0xff] %v11436_v20  ;;  %v11443_v61 = vpop.f32.mrf.mxu1  ;;  %v2451_v3 = vpop.permute.xlu0 %2450 }
 0x1ca   : > { %v2676_v5 = vadd.f32 %v2654_v56, %v2619_v8  ;;  %vm2362_vm6 = vcmp.ge.f32.partialorder %v2353_v54, 0.0  ;;  %v2371_v60 = vmul.f32 0.01, %v2353_v54  ;;  %v11434_v7 = vmul.f32 %v11160_v6, %v11409_v30  ;;  %16773 = vst [vmem:[#allocation19_spill] sm:$0xff] %v11438_v57  ;;  %8076 = vmatmul.msk.f32.gmra.mxu0 %vm2756_vm5, %v2057_v34 }
 0x1cb   : > { %16774 = vst [vmem:[#allocation22_spill] sm:$0xff] %v11443_v61  ;;  %v16775_v56 = vrot.slane %v11207_v0, 1  ;;  %v16776_v8 = vrot.slane %v11053_v29, 1  ;;  %v11454_v11 = vadd.f32 %v11195_v24, %v1792_v41  ;;  %v11458_v23 = vmul.f32 %v11169_v62, %v11409_v30  ;;  %v16779_v24 = vld [vmem:[#allocation47_spill] sm:$0xff] }
 0x1cc   : > { %vm2685_vm7 = vcmp.ge.f32.partialorder %v2676_v5, 0.0  ;;  %v2694_v16 = vmul.f32 0.01, %v2676_v5  ;;  %v2380_v18 = vsel %vm2362_vm6, %v2353_v54, %v2371_v60  ;;  %v16780_v41 = vrot.slane %v16779_v24, 1 }
 0x1cd   : > { %v1839_v12 = vsel %vm845_vm1, %v16776_v8, %v16775_v56  ;;  %8086 = vmatmul.msk.f32.gmra.mxu1 %vm2756_vm5, %v2380_v18  ;;  %v16777_v56 = vrot.slane %v11212_v17, 2  ;;  %v16778_v18 = vrot.slane %v11057_v42, 2  ;;  %v16785_v42 = vrot.slane %v11155_v53, 1 }
 0x1ce   : > { %v2703_v34 = vsel %vm2685_vm7, %v2676_v5, %v2694_v16  ;;  %v1860_v54 = vadd.f32 %v1839_v12, %v11080_v31  ;;  %v16781_v16 = vrot.slane %v16746_v63, 1  ;;  %v16782_v12 = vrot.slane %v11228_v46, 3 }
 0x1cf   : > { %8096 = vmatmul.msk.f32.gmra.mxu2 %vm2756_vm5, %v2703_v34  ;;  %v1896_v5 = vsel %vm906_vm2, %v16778_v18, %v16777_v56  ;;  %v16783_v34 = vrot.slane %v11071_v51, 3  ;;  %v16786_v56 = vrot.slane %v11003_v43, 1  ;;  %v16787_v63 = vrot.slane %v11235_v15, 4 }
 0x1d0   : > { %v2162_v8 = vsel %vm845_vm1, %v16781_v16, %v16780_v41  ;;  %v1917_v31 = vadd.f32 %v1896_v5, %v1860_v54  ;;  %v16788_v41 = vrot.slane %v11076_v47, 4  ;;  %v16789_v5 = vld [vmem:[#allocation48_spill] sm:$0xff]  ;;  %v16791_v51 = vrot.slane %v16754_v50, 2 }
 0x1d1   : > { %v1953_v29 = vsel %vm967_vm3, %v16783_v34, %v16782_v12  ;;  %v2183_v60 = vadd.f32 %v2162_v8, %v16784_v22  ;;  %v2485_v18 = vsel %vm845_vm1, %v16786_v56, %v16785_v42  ;;  %v16790_v16 = vrot.slane %v16789_v5, 2  ;;  %v16792_v34 = vld [vmem:[#allocation50_spill] sm:$0xff]  ;;  %v1805_v56 = vpop.permute.xlu1 %1804 }
 0x1d2   : > { %v2010_v54 = vsel %vm1028_vm4, %v16788_v41, %v16787_v63  ;;  %v16793_v22 = vrot.slane %v16792_v34, 3  ;;  %v16794_v8 = vrot.slane %v16762_v14, 3  ;;  %v2506_v42 = vadd.f32 %v2485_v18, %v11025_v4 }
 0x1d3   : > { %v2219_v12 = vsel %vm906_vm2, %v16791_v51, %v16790_v16  ;;  %v1974_v20 = vadd.f32 %v1953_v29, %v1917_v31  ;;  %v16795_v47 = vrot.slane %v11163_v48, 2  ;;  %v16796_v63 = vrot.slane %v11022_v28, 2  ;;  %v11516_v31 = vpop.f32.mrf.mxu0 }
 0x1d4   : > { %v2276_v43 = vsel %vm967_vm3, %v16794_v8, %v16793_v22  ;;  %v2240_v61 = vadd.f32 %v2219_v12, %v2183_v60  ;;  %v2462_v50 = vmul.f32 %v11152_v21, %v2451_v3  ;;  %v16797_v51 = vrot.slane %v11172_v45, 3  ;;  %v11514_v60 = vpop.f32.mrf.mxu2 }
 0x1d5   : > { %v2542_v41 = vsel %vm906_vm2, %v16796_v63, %v16795_v47  ;;  %v16798_v14 = vrot.slane %v11029_v36, 3  ;;  %v2519_v4 = vmul.f32 %v11160_v6, %v2451_v3  ;;  %v2576_v29 = vmul.f32 %v11169_v62, %v2451_v3  ;;  %16799 = vst [vmem:[#allocation23_spill] sm:$0xff] %v11514_v60  ;;  %v16801_v47 = vld [vmem:[#allocation52_spill] sm:$0xff] }
 0x1d6   : > { %v2563_v16 = vadd.f32 %v2542_v41, %v2506_v42  ;;  %v2031_v28 = vadd.f32 %v2010_v54, %v1974_v20  ;;  %v2297_v18 = vadd.f32 %v2276_v43, %v2240_v61  ;;  %v2490_v12 = vrot.slane %v2462_v50, 1  ;;  %v11519_v42 = vpop.f32.mrf.mxu1 }
 0x1d7   : > { %v2599_v22 = vsel %vm967_vm3, %v16798_v14, %v16797_v51  ;;  %v1816_v8 = vmul.f32 %v11152_v21, %v1805_v56  ;;  %16800 = vst [vmem:[#allocation24_spill] sm:$0xff] %v11519_v42  ;;  %v11523_v36 = vmul.f32 %v11180_v19, %v11409_v30  ;;  %v16802_v63 = vrot.slane %v16801_v47, 4 }
 0x1d8   : > { %v16803_v41 = vrot.slane %v16765_v39, 4  ;;  %v2620_v14 = vadd.f32 %v2599_v22, %v2563_v16  ;;  %v16804_v60 = vrot.slane %v11183_v1, 4  ;;  %v16805_v20 = vrot.slane %v11032_v44, 4 }
 0x1d9   : > { %vm2040_vm8 = vcmp.ge.f32.partialorder %v2031_v28, 0.0  ;;  %v2049_v21 = vmul.f32 0.01, %v2031_v28  ;;  %v16806_v43 = vrot.slane %v11412_v58, 1  ;;  %v2547_v42 = vrot.slane %v2519_v4, 2 }
 0x1da   : > { %v2333_v51 = vsel %vm1028_vm4, %v16803_v41, %v16802_v63  ;;  %v2656_v61 = vsel %vm1028_vm4, %v16805_v20, %v16804_v60  ;;  %v2604_v57 = vrot.slane %v2576_v29, 3  ;;  %v11539_v39 = vmul.f32 %v11180_v19, %v2451_v3 }
 0x1db   : > { %v2354_v54 = vadd.f32 %v2333_v51, %v2297_v18  ;;  %v2491_v30 = vsel %vm845_vm1, %v16806_v43, %v2490_v12  ;;  %v2677_v50 = vadd.f32 %v2656_v61, %v2620_v14  ;;  %v2058_v16 = vsel %vm2040_vm8, %v2031_v28, %v2049_v21  ;;  %v11560_v61 = vpop.f32.mrf.mxu0 }
 0x1dc   : > { %v1844_v63 = vrot.slane %v1816_v8, 1  ;;  %8077 = vmatmul.msk.f32.gmra.mxu0 %vm2756_vm5, %v2058_v16  ;;  %v2509_v60 = vadd.f32 %v2491_v30, %v11424_v38  ;;  %v1873_v18 = vmul.f32 %v11160_v6, %v1805_v56  ;;  %v1956_v12 = vrot.slane %v11458_v23, 3  ;;  %v11558_v20 = vpop.f32.mrf.mxu2 }
 0x1dd   : > { %vm2363_vm9 = vcmp.ge.f32.partialorder %v2354_v54, 0.0  ;;  %v2372_v22 = vmul.f32 0.01, %v2354_v54  ;;  %vm2686_vm10 = vcmp.ge.f32.partialorder %v2677_v50, 0.0  ;;  %v2695_v44 = vmul.f32 0.01, %v2677_v50 }
 0x1de   : > { %v16807_v4 = vrot.slane %v11430_v52, 1  ;;  %v11549_v29 = vmul.f32 %v11169_v62, %v1805_v56  ;;  %v2013_v28 = vrot.slane %v11523_v36, 4  ;;  %v1901_v51 = vrot.slane %v1873_v18, 2  ;;  %v16814_v18 = vld [vmem:[#allocation13_spill] sm:$0xff] }
 0x1df   : > { %v2381_v41 = vsel %vm2363_vm9, %v2354_v54, %v2372_v22  ;;  %v2704_v8 = vsel %vm2686_vm10, %v2677_v50, %v2695_v44  ;;  %v16808_v38 = vrot.slane %v11320_v55, 1  ;;  %v16809_v6 = vrot.slane %v11207_v0, 1  ;;  %v11573_v50 = vpop.f32.mrf.mxu1 }
 0x1e0   : > { %v1845_v3 = vsel %vm845_vm1, %v16807_v4, %v1844_v63  ;;  %8087 = vmatmul.msk.f32.gmra.mxu1 %vm2756_vm5, %v2381_v41  ;;  %8097 = vmatmul.msk.f32.gmra.mxu2 %vm2756_vm5, %v2704_v8  ;;  %v16810_v62 = vrot.slane %v11415_v13, 2  ;;  %v16811_v54 = vrot.slane %v11418_v40, 3  ;;  %v2661_v30 = vrot.slane %v11539_v39, 4 }
 0x1e1   : > { %v1841_v14 = vsel %vm845_vm1, %v16809_v6, %v16808_v38  ;;  %v1863_v22 = vadd.f32 %v1845_v3, %v11454_v11  ;;  %v16812_v63 = vrot.slane %v11323_v32, 2  ;;  %v16813_v44 = vrot.slane %v11212_v17, 2  ;;  %v16817_v38 = vld [vmem:[#allocation51_spill] sm:$0xff] }
 0x1e2   : > { %v2548_v21 = vsel %vm906_vm2, %v16810_v62, %v2547_v42  ;;  %v11569_v43 = vsel %vm967_vm3, %v16811_v54, %v2604_v57  ;;  %v1861_v0 = vadd.f32 %v1841_v14, %v11232_v25  ;;  %v16815_v41 = vrot.slane %v16814_v18, 1 }
 0x1e3   : > { %v11575_v16 = vadd.f32 %v2548_v21, %v2509_v60  ;;  %v1898_v42 = vsel %vm906_vm2, %v16813_v44, %v16812_v63  ;;  %v16816_v57 = vrot.slane %v16779_v24, 1  ;;  %v1958_v25 = vrot.slane %v11549_v29, 3 }
 0x1e4   : > { %v11590_v8 = vmul.f32 %v11180_v19, %v1805_v56  ;;  %v1918_v60 = vadd.f32 %v1898_v42, %v1861_v0  ;;  %v16818_v3 = vrot.slane %v11434_v7, 2  ;;  %v16819_v6 = vrot.slane %v11326_v33, 3 }
 0x1e5   : > { %v2164_v4 = vsel %vm845_vm1, %v16816_v57, %v16815_v41  ;;  %v16820_v14 = vrot.slane %v11228_v46, 3  ;;  %v16821_v62 = vrot.slane %v10914_v59, 2  ;;  %v16822_v29 = vrot.slane %v16789_v5, 2 }
 0x1e6   : > { %v2184_v11 = vadd.f32 %v2164_v4, %v16817_v38  ;;  %v1902_v17 = vsel %vm906_vm2, %v16818_v3, %v1901_v51  ;;  %v16823_v56 = vrot.slane %v11302_v2, 1  ;;  %v16824_v21 = vrot.slane %v11155_v53, 1 }
 0x1e7   : > { %v1955_v24 = vsel %vm967_vm3, %v16820_v14, %v16819_v6  ;;  %v2221_v19 = vsel %vm906_vm2, %v16822_v29, %v16821_v62  ;;  %v16825_v51 = vrot.slane %v11332_v35, 4  ;;  %v16826_v63 = vrot.slane %v11235_v15, 4 }
 0x1e8   : > { %v2487_v54 = vsel %vm845_vm1, %v16824_v21, %v16823_v56  ;;  %v1975_v0 = vadd.f32 %v1955_v24, %v1918_v60  ;;  %v2241_v44 = vadd.f32 %v2221_v19, %v2184_v11  ;;  %v1920_v41 = vadd.f32 %v1902_v17, %v1863_v22 }
 0x1e9   : > { %v2012_v46 = vsel %vm1028_vm4, %v16826_v63, %v16825_v51  ;;  %v2507_v42 = vadd.f32 %v2487_v54, %v11198_v9  ;;  %v16827_v5 = vrot.slane %v10917_v10, 3  ;;  %v16828_v57 = vrot.slane %v16792_v34, 3  ;;  %v16833_v34 = vld [vmem:[#allocation40_spill] sm:$0xff]  ;;  %v11655_v51 = vpop.f32.mrf.mxu0 }
 0x1ea   : > { %v16829_v53 = vrot.slane %v11305_v49, 2  ;;  %v16830_v60 = vrot.slane %v11163_v48, 2  ;;  %v16831_v15 = vrot.slane %v11430_v52, 1  ;;  %v16832_v3 = vrot.slane %v11320_v55, 1  ;;  %v16838_v55 = vld [vmem:[#allocation41_spill] sm:$0xff] }
 0x1eb   : > { %v2278_v4 = vsel %vm967_vm3, %v16828_v57, %v16827_v5  ;;  %v2032_v9 = vadd.f32 %v2012_v46, %v1975_v0  ;;  %v16834_v14 = vrot.slane %v16833_v34, 4  ;;  %v16835_v24 = vrot.slane %v16801_v47, 4  ;;  %v11653_v0 = vpop.f32.mrf.mxu2  ;;  %v16845_v57 = vld [vmem:[#allocation12_spill] sm:$0xff] }
 0x1ec   : > { %v2544_v38 = vsel %vm906_vm2, %v16830_v60, %v16829_v53  ;;  %v1843_v11 = vsel %vm845_vm1, %v16832_v3, %v16831_v15  ;;  %v2298_v22 = vadd.f32 %v2278_v4, %v2241_v44  ;;  %v16836_v48 = vrot.slane %v11308_v26, 3  ;;  %v11657_v44 = vpop.f32.mrf.mxu1 }
 0x1ed   : > { %v2564_v17 = vadd.f32 %v2544_v38, %v2507_v42  ;;  %v1862_v6 = vadd.f32 %v1843_v11, %v11341_v27  ;;  %v2335_v62 = vsel %vm1028_vm4, %v16835_v24, %v16834_v14  ;;  %v16837_v29 = vrot.slane %v11172_v45, 3  ;;  %v16848_v11 = vld [vmem:[#allocation21_spill] sm:$0xff] }
 0x1ee   : > { %v16839_v19 = vrot.slane %v16838_v55, 4  ;;  %v16840_v56 = vrot.slane %v11183_v1, 4  ;;  %v16841_v27 = vrot.slane %v11434_v7, 2  ;;  %v16842_v54 = vrot.slane %v11323_v32, 2 }
 0x1ef   : > { %v2601_v52 = vsel %vm967_vm3, %v16837_v29, %v16836_v48  ;;  %vm2041_vm11 = vcmp.ge.f32.partialorder %v2032_v9, 0.0  ;;  %v2050_v45 = vmul.f32 0.01, %v2032_v9  ;;  %v2355_v63 = vadd.f32 %v2335_v62, %v2298_v22  ;;  %v16854_v29 = vld [vmem:[#allocation18_spill] sm:$0xff] }
 0x1f0   : > { %v2658_v21 = vsel %vm1028_vm4, %v16840_v56, %v16839_v19  ;;  %v1900_v47 = vsel %vm906_vm2, %v16842_v54, %v16841_v27  ;;  %v2621_v46 = vadd.f32 %v2601_v52, %v2564_v17  ;;  %v16843_v1 = vrot.slane %v11326_v33, 3  ;;  %v16849_v17 = vld [vmem:[#allocation32_spill] sm:$0xff] }
 0x1f1   : > { %v1919_v42 = vadd.f32 %v1900_v47, %v1862_v6  ;;  %v16844_v32 = vrot.slane %v11332_v35, 4  ;;  %v16846_v4 = vrot.slane %v16845_v57, 1  ;;  %v16847_v53 = vrot.slane %v16814_v18, 1  ;;  %v16857_v47 = vld [vmem:[#allocation17_spill] sm:$0xff] }
 0x1f2   : > { %v1957_v7 = vsel %vm967_vm3, %v16843_v1, %v1956_v12  ;;  %v2059_v38 = vsel %vm2041_vm11, %v2032_v9, %v2050_v45  ;;  %vm2364_vm12 = vcmp.ge.f32.partialorder %v2355_v63, 0.0  ;;  %v2373_v15 = vmul.f32 0.01, %v2355_v63 }
 0x1f3   : > { %v2014_v5 = vsel %vm1028_vm4, %v16844_v32, %v2013_v28  ;;  %v2166_v60 = vsel %vm845_vm1, %v16847_v53, %v16846_v4  ;;  %v2678_v3 = vadd.f32 %v2658_v21, %v2621_v46  ;;  %8078 = vmatmul.msk.f32.gmra.mxu0 %vm2756_vm5, %v2059_v38  ;;  %v1976_v33 = vadd.f32 %v1957_v7, %v1919_v42  ;;  %v16862_v7 = vld [vmem:[#allocation15_spill] sm:$0xff] }
 0x1f4   : > { %v2185_v22 = vadd.f32 %v2166_v60, %v16848_v11  ;;  %v16850_v6 = vrot.slane %v16849_v17, 2  ;;  %v16851_v35 = vrot.slane %v10914_v59, 2  ;;  %v16852_v24 = vrot.slane %v11412_v58, 1  ;;  %v16868_v11 = vld [vmem:[#allocation42_spill] sm:$0xff] }
 0x1f5   : > { %v16853_v18 = vrot.slane %v11302_v2, 1  ;;  %v2382_v62 = vsel %vm2364_vm12, %v2355_v63, %v2373_v15  ;;  %vm2687_vm13 = vcmp.ge.f32.partialorder %v2678_v3, 0.0  ;;  %v2696_v48 = vmul.f32 0.01, %v2678_v3 }
 0x1f6   : > { %v2223_v14 = vsel %vm906_vm2, %v16851_v35, %v16850_v6  ;;  %v2015_v19 = vrot.slane %v11590_v8, 4  ;;  %8088 = vmatmul.msk.f32.gmra.mxu1 %vm2756_vm5, %v2382_v62  ;;  %v2033_v56 = vadd.f32 %v2014_v5, %v1976_v33  ;;  %v16855_v59 = vrot.slane %v11415_v13, 2  ;;  %v16867_v33 = vld [vmem:[#allocation34_spill] sm:$0xff] }
 0x1f7   : > { %v2489_v9 = vsel %vm845_vm1, %v16853_v18, %v16852_v24  ;;  %v2242_v21 = vadd.f32 %v2223_v14, %v2185_v22  ;;  %v16856_v27 = vrot.slane %v11305_v49, 2  ;;  %v1959_v2 = vsel %vm967_vm3, %v1956_v12, %v1958_v25  ;;  %v11708_v12 = vpop.f32.mrf.mxu2  ;;  %v2820_v25 = vpop.f32.mrf.mxu0 }
 0x1f8   : > { %v2508_v52 = vadd.f32 %v2489_v9, %v16854_v29  ;;  %v2705_v54 = vsel %vm2687_vm13, %v2678_v3, %v2696_v48  ;;  %v16858_v45 = vrot.slane %v16857_v47, 3  ;;  %v16859_v63 = vrot.slane %v10917_v10, 3 }
 0x1f9   : > { %v2546_v58 = vsel %vm906_vm2, %v16856_v27, %v16855_v59  ;;  %8098 = vmatmul.msk.f32.gmra.mxu2 %vm2756_vm5, %v2705_v54  ;;  %vm2042_vm14 = vcmp.ge.f32.partialorder %v2033_v56, 0.0  ;;  %v2051_v13 = vmul.f32 0.01, %v2033_v56  ;;  %v16860_v49 = vrot.slane %v11418_v40, 3 }
 0x1fa   : > { %v2280_v8 = vsel %vm967_vm3, %v16859_v63, %v16858_v45  ;;  %v2565_v46 = vadd.f32 %v2546_v58, %v2508_v52  ;;  %v16861_v1 = vrot.slane %v11308_v26, 3  ;;  %v16863_v32 = vrot.slane %v16862_v7, 4  ;;  %v2903_v26 = vpop.f32.mrf.mxu1 }
 0x1fb   : > { %v2299_v42 = vadd.f32 %v2280_v8, %v2242_v21  ;;  %v16864_v10 = vrot.slane %v16833_v34, 4  ;;  %v16865_v4 = vrot.slane %v11421_v37, 4  ;;  %v16866_v53 = vrot.slane %v16838_v55, 4 }
 0x1fc   : > { %v2603_v23 = vsel %vm967_vm3, %v16861_v1, %v16860_v49  ;;  %v1977_v60 = vadd.f32 %v1959_v2, %v1920_v41  ;;  %v2060_v38 = vsel %vm2042_vm14, %v2033_v56, %v2051_v13  ;;  %v2016_v3 = vsel %vm1028_vm4, %v2013_v28, %v2015_v19  ;;  %v16869_v41 = vld [vmem:[#allocation33_spill] sm:$0xff]  ;;  %v11746_v2 = vld [vmem:[%s16873_s29] ss:$0 sm:$0xff]  ;;  %s7887_s29 = sshll.u32 %s648_s26, 4  ;;  %s7888_s29 = int_to_ptr.vmem [resolvable:$true] %s7887_s29 }
 0x1fd   : > { %v2337_v5 = vsel %vm1028_vm4, %v16864_v10, %v16863_v32  ;;  %v2622_v57 = vadd.f32 %v2603_v23, %v2565_v46  ;;  %v2660_v40 = vsel %vm1028_vm4, %v16866_v53, %v16865_v4  ;;  %v2300_v34 = vadd.f32 %v16868_v11, %v16867_v33  ;;  %8079 = vmatmul.msk.f32.gmra.mxu0 %vm2756_vm5, %v2060_v38  ;;  %v16874_v38 = vld [vmem:[#allocation19_spill] sm:$0xff] }
 0x1fe   : > { %v2356_v15 = vadd.f32 %v2337_v5, %v2299_v42  ;;  %v2034_v17 = vadd.f32 %v2016_v3, %v1977_v60  ;;  %v2623_v6 = vadd.f32 %v11569_v43, %v11575_v16  ;;  %v16870_v35 = vrot.slane %v16869_v41, 4 }
 0x1ff   : > { %v2679_v22 = vadd.f32 %v2660_v40, %v2622_v57  ;;  %v16871_v14 = vmov %v16863_v32  ;;  %v16872_v18 = vmov %v16865_v4  ;;  %v2986_v29 = vpop.f32.mrf.mxu2  ;;  %v2823_v52 = vpop.f32.mrf.mxu0  ;;  %v2837_v46 = vadd.f32 %v11746_v2, %v2820_v25 }
 0x200   : > { %vm2365_vm15 = vcmp.ge.f32.partialorder %v2356_v15, 0.0  ;;  %v2374_v55 = vmul.f32 0.01, %v2356_v15  ;;  %v2339_v36 = vsel %vm1028_vm4, %v16871_v14, %v16870_v35  ;;  %v2052_v24 = vmul.f32 0.01, %v2034_v17  ;;  %v16877_v35 = vld [vmem:[#allocation22_spill] sm:$0xff] }
 0x201   : > { %vm2688_vm6 = vcmp.ge.f32.partialorder %v2679_v22, 0.0  ;;  %v2697_v28 = vmul.f32 0.01, %v2679_v22  ;;  %v2662_v9 = vsel %vm1028_vm4, %v16872_v18, %v2661_v30  ;;  %vm2043_vm7 = vcmp.ge.f32.partialorder %v2034_v17, 0.0  ;;  %v16878_v18 = vld [vmem:[#allocation23_spill] sm:$0xff] }
 0x202   : > { %v2383_v43 = vsel %vm2365_vm15, %v2356_v15, %v2374_v55  ;;  %v2357_v16 = vadd.f32 %v2339_v36, %v2300_v34  ;;  %v2680_v62 = vadd.f32 %v2662_v9, %v2623_v6  ;;  %v2061_v19 = vsel %vm2043_vm7, %v2034_v17, %v2052_v24  ;;  %v2906_v39 = vpop.f32.mrf.mxu1  ;;  %v16875_v34 = vld [vmem:[#allocation24_spill] sm:$0xff] }
 0x203   : > { %8089 = vmatmul.msk.f32.gmra.mxu1 %vm2756_vm5, %v2383_v43  ;;  %v2706_v48 = vsel %vm2688_vm6, %v2679_v22, %v2697_v28  ;;  %v2838_v63 = vadd.f32 %v11746_v2, %v2823_v52  ;;  %v2836_v42 = vadd.f32 %v11746_v2, %v11655_v51  ;;  %v2835_v10 = vadd.f32 %v11746_v2, %v11560_v61 }
 0x204   : > { %8099 = vmatmul.msk.f32.gmra.mxu2 %vm2756_vm5, %v2706_v48  ;;  %v2698_v56 = vmul.f32 0.01, %v2680_v62  ;;  %v2375_v21 = vmul.f32 0.01, %v2357_v16  ;;  %vm2689_vm8 = vcmp.ge.f32.partialorder %v2680_v62, 0.0  ;;  %vm2366_vm9 = vcmp.ge.f32.partialorder %v2357_v16, 0.0 }
 0x205   : > { %8080 = vmatmul.msk.f32.gmra.mxu0 %vm2756_vm5, %v2061_v19  ;;  %v2921_v1 = vadd.f32 %v2906_v39, %v2838_v63  ;;  %v2920_v5 = vadd.f32 %v2903_v26, %v2837_v46  ;;  %v2834_v53 = vadd.f32 %v11746_v2, %v11516_v31  ;;  %v2919_v25 = vadd.f32 %v11657_v44, %v2836_v42  ;;  %v16876_v44 = vld [vmem:[#allocation14_spill] sm:$0xff]  ;;  %v16879_v48 = vld [vmem:[#allocation20_spill] sm:$0xff] }
 0x206   : > { %v2707_v37 = vsel %vm2689_vm8, %v2680_v62, %v2698_v56  ;;  %v2384_v30 = vsel %vm2366_vm9, %v2357_v16, %v2375_v21  ;;  %v2833_v15 = vadd.f32 %v11746_v2, %v16874_v38  ;;  %v2918_v61 = vadd.f32 %v11573_v50, %v2835_v10 }
 0x207   : > { %v2989_v59 = vpop.f32.mrf.mxu2  ;;  %v2826_v27 = vpop.f32.mrf.mxu0  ;;  %v3003_v40 = vadd.f32 %v2986_v29, %v2920_v5  ;;  %v3002_v3 = vadd.f32 %v11708_v12, %v2919_v25  ;;  %v2708_v11 = vlaneseq  ;;  %v2917_v22 = vadd.f32 %v16875_v34, %v2834_v53 }
 0x208   : > { %v2839_v45 = vadd.f32 %v11746_v2, %v2826_v27  ;;  %v3004_v57 = vadd.f32 %v2989_v59, %v2921_v1  ;;  %v2832_v17 = vadd.f32 %v11746_v2, %v16876_v44  ;;  %v3001_v6 = vadd.f32 %v11653_v0, %v2918_v61 }
 0x209   : > { %v3021_v41 = vmul.f32 0.01, %v3003_v40  ;;  %v2916_v12 = vadd.f32 %v16877_v35, %v2833_v15  ;;  %v3000_v14 = vadd.f32 %v11558_v20, %v2917_v22  ;;  %vm3012_vm13 = vcmp.ge.f32.partialorder %v3003_v40, 0.0 }
 0x20a   : > { %v2909_v58 = vpop.f32.mrf.mxu1  ;;  %v3022_v33 = vmul.f32 0.01, %v3004_v57  ;;  %vm3013_vm12 = vcmp.ge.f32.partialorder %v3004_v57, 0.0  ;;  %v3020_v50 = vmul.f32 0.01, %v3002_v3  ;;  %vm3011_vm14 = vcmp.ge.f32.partialorder %v3002_v3, 0.0 }
 0x20b   : > { %8090 = vmatmul.msk.f32.gmra.mxu1 %vm2756_vm5, %v2384_v30  ;;  %v2922_v13 = vadd.f32 %v2909_v58, %v2839_v45  ;;  %v11769_v24 = vshrl.u32 %v2708_v11, 7  ;;  %v2999_v9 = vadd.f32 %v16878_v18, %v2916_v12  ;;  %v3030_v43 = vsel %vm3012_vm13, %v3003_v40, %v3021_v41 }
 0x20c   : > { %8100 = vmatmul.msk.f32.gmra.mxu2 %vm2756_vm5, %v2707_v37  ;;  %v3031_v28 = vsel %vm3013_vm12, %v3004_v57, %v3022_v33  ;;  %v3019_v16 = vmul.f32 0.01, %v3001_v6  ;;  %v3029_v0 = vsel %vm3011_vm14, %v3002_v3, %v3020_v50  ;;  %vm3010_vm15 = vcmp.ge.f32.partialorder %v3001_v6, 0.0 }
 0x20d   : > { %v3018_v62 = vmul.f32 0.01, %v3000_v14  ;;  %vm3009_vm6 = vcmp.ge.f32.partialorder %v3000_v14, 0.0  ;;  %v11773_v20 = vand.u32 127, %v2708_v11  ;;  %v2716_v52 = vmul.u32 2, %v11769_v24 }
 0x20e   : > { %v3028_v19 = vsel %vm3010_vm15, %v3001_v6, %v3019_v16  ;;  %v3017_v56 = vmul.f32 0.01, %v2999_v9  ;;  %vm3008_vm7 = vcmp.ge.f32.partialorder %v2999_v9, 0.0  ;;  %v2710_v37 = vadd.s32 8, %v11769_v24 }
 0x20f   : > { %v2992_v54 = vpop.f32.mrf.mxu2  ;;  %v2829_v47 = vpop.f32.mrf.mxu0  ;;  %v3027_v21 = vsel %vm3009_vm6, %v3000_v14, %v3018_v62  ;;  %vm2721_vm8 = vcmp.eq.s32.totalorder %v11773_v20, %v2716_v52  ;;  %v8998_v59 = vmov 0.0   ;;  %v2713_v10 = vadd.s32 32, %v11769_v24 }
 0x210   : > { %v2840_v8 = vadd.f32 %v11746_v2, %v2829_v47  ;;  %v3005_v23 = vadd.f32 %v2992_v54, %v2922_v13  ;;  %v3026_v30 = vsel %vm3008_vm7, %v2999_v9, %v3017_v56  ;;  %v11779_v27 = vsel %vm2721_vm8, 1.0, %v8998_v59 }
 0x211   : > { %v2717_v54 = vmul.u32 2, %v2710_v37  ;;  %v2711_v47 = vadd.s32 16, %v11769_v24  ;;  %v2712_v13 = vadd.s32 24, %v11769_v24  ;;  %v2720_v5 = vmul.u32 2, %v2713_v10 }
 0x212   : > { %v2912_v49 = vpop.f32.mrf.mxu1  ;;  %v3023_v51 = vmul.f32 0.01, %v3005_v23  ;;  %vm3014_vm11 = vcmp.ge.f32.partialorder %v3005_v23, 0.0 }
 0x213   : > { %v2923_v7 = vadd.f32 %v2912_v49, %v2840_v8  ;;  %v2718_v8 = vmul.u32 2, %v2711_v47  ;;  %v2719_v49 = vmul.u32 2, %v2712_v13  ;;  %vm2725_vm14 = vcmp.eq.s32.totalorder %v11773_v20, %v2720_v5 }
 0x214   : > { %v3032_v55 = vsel %vm3014_vm11, %v3005_v23, %v3023_v51  ;;  %vm2722_vm11 = vcmp.eq.s32.totalorder %v11773_v20, %v2717_v54  ;;  %v11818_v53 = vsel %vm2725_vm14, 1.0, %v8998_v59  ;;  %v2736_v51 = vadd.s32 1, %v2716_v52 }
 0x215   : > { %v11786_v45 = vsel %vm2722_vm11, 1.0, %v8998_v59  ;;  %vm2723_vm12 = vcmp.eq.s32.totalorder %v11773_v20, %v2718_v8  ;;  %vm2724_vm13 = vcmp.eq.s32.totalorder %v11773_v20, %v2719_v49  ;;  %v2738_v34 = vadd.s32 1, %v2718_v8 }
 0x216   : > { %v11797_v42 = vsel %vm2723_vm12, 1.0, %v8998_v59  ;;  %vm2741_vm15 = vcmp.eq.s32.totalorder %v11773_v20, %v2736_v51  ;;  %v2739_v41 = vadd.s32 1, %v2719_v49  ;;  %v2740_v50 = vadd.s32 1, %v2720_v5 }
 0x217   : > { %v2995_v32 = vpop.f32.mrf.mxu2  ;;  %v2888_v31 = vpop.f32.mrf.mxu0  ;;  %v11828_v15 = vsel %vm2741_vm15, 1.0, %v8998_v59  ;;  %vm2743_vm7 = vcmp.eq.s32.totalorder %v11773_v20, %v2738_v34 }
 0x218   : > { %v3006_v4 = vadd.f32 %v2995_v32, %v2923_v7  ;;  %v2915_v36 = vadd.f32 %v2888_v31, %v2832_v17  ;;  %v11809_v32 = vsel %vm2724_vm13, 1.0, %v8998_v59  ;;  %v11840_v44 = vsel %vm2743_vm7, 1.0, %v8998_v59 }
 0x219   : > { %vm2744_vm8 = vcmp.eq.s32.totalorder %v11773_v20, %v2739_v41 }
 0x21a   : > { %vm3015_vm10 = vcmp.ge.f32.partialorder %v3006_v4, 0.0  ;;  %v3024_v60 = vmul.f32 0.01, %v3006_v4  ;;  %v2998_v29 = vadd.f32 %v16879_v48, %v2915_v36  ;;  %v11792_v46 = vpop.f32.mrf.mxu1  ;;  %v11846_v35 = vsel %vm2744_vm8, 1.0, %v8998_v59 }
 0x21c   : > { %v3033_v26 = vsel %vm3015_vm10, %v3006_v4, %v3024_v60  ;;  %v3016_v39 = vmul.f32 0.01, %v2998_v29  ;;  %vm3007_vm9 = vcmp.ge.f32.partialorder %v2998_v29, 0.0  ;;  %vm3034_vm10 = vcmask 588800  }
 0x21d   : > { %3057 = vmatpush.msra.mxu3 %v3033_v26 }
 0x21e   : > { %v3025_v58 = vsel %vm3007_vm9, %v2998_v29, %v3016_v39  ;;  %vm2745_vm9 = vcmp.eq.s32.totalorder %v11773_v20, %v2740_v50 }
 0x21f   : > { %3058 = vmatpush.msra.mxu3 %v3032_v55  ;;  %v11788_v63 = vpop.f32.mrf.mxu0  ;;  %v11803_v23 = vpop.f32.mrf.mxu2 }
 0x220   : > { %v3205_v49 = vadd.f32 %v11746_v2, %v11788_v63 }
 0x221   : > { %3059 = vmatpush.msra.mxu3 %v3031_v28 }
 0x222   : > { %v11806_v7 = vpop.f32.mrf.mxu1 }
 0x223   : > { %3060 = vmatpush.msra.mxu3 %v3030_v43 }
 0x225   : > { %3061 = vmatpush.msra.mxu3 %v3029_v0 }
 0x227   : > { %3062 = vmatpush.msra.mxu3 %v3028_v19  ;;  %v11799_v1 = vpop.f32.mrf.mxu0  ;;  %v11814_v57 = vpop.f32.mrf.mxu2 }
 0x228   : > { %v3206_v10 = vadd.f32 %v11746_v2, %v11799_v1 }
 0x229   : > { %3063 = vmatpush.msra.mxu3 %v3027_v21 }
 0x22a   : > { %v11820_v25 = vpop.f32.mrf.mxu1  ;;  %v3286_v63 = vadd.f32 %v11806_v7, %v3206_v10 }
 0x22b   : > { %3064 = vmatpush.msra.mxu3 %v3026_v30 }
 0x22d   : > { %3065 = vmatpush.msra.mxu3 %v3025_v58 }
 0x22e   : > { %8061 = vmatmul.msk.f32.vlgmr.msra.gmra.mxu3 %vm3034_vm10, %v11779_v27 }
 0x22f   : > { %3104 = vmatpush.msrb.mxu3 %v3033_v26  ;;  %v3184_v4 = vpop.f32.mrf.mxu0  ;;  %v11824_v40 = vpop.f32.mrf.mxu2  ;;  %v2737_v26 = vadd.s32 1, %v2717_v54 }
 0x231   : > { %3105 = vmatpush.msrb.mxu3 %v3032_v55  ;;  %vm2742_vm6 = vcmp.eq.s32.totalorder %v11773_v20, %v2737_v26 }
 0x232   : > { %v11834_v33 = vsel %vm2742_vm6, 1.0, %v8998_v59 }
 0x233   : > { %3106 = vmatpush.msrb.mxu3 %v3031_v28  ;;  %v11852_v28 = vsel %vm2745_vm9, 1.0, %v8998_v59 }
 0x235   : > { %3107 = vmatpush.msrb.mxu3 %v3030_v43 }
 0x236   : > { %8062 = vmatmul.msk.f32.gmra.mxu3 %vm3034_vm10, %v11786_v45 }
 0x237   : > { %3108 = vmatpush.msrb.mxu3 %v3029_v0  ;;  %v3187_v60 = vpop.f32.mrf.mxu0 }
 0x238   : > { %v3267_v38 = vpop.f32.mrf.mxu1  ;;  %v3208_v39 = vadd.f32 %v11746_v2, %v3187_v60 }
 0x239   : > { %3109 = vmatpush.msrb.mxu3 %v3028_v19 }
 0x23a   : > { %v3288_v5 = vadd.f32 %v3267_v38, %v3208_v39  ;;  %v11980_v39 = vld [vmem:[%s16880_s28 + $0x88] sm:$0xff] }
 0x23b   : > { %3110 = vmatpush.msrb.mxu3 %v3027_v21 }
 0x23d   : > { %3111 = vmatpush.msrb.mxu3 %v3026_v30 }
 0x23e   : > { %8063 = vmatmul.msk.f32.gmra.mxu3 %vm3034_vm10, %v11797_v42 }
 0x23f   : > { %3112 = vmatpush.msrb.mxu3 %v3025_v58  ;;  %v3207_v58 = vadd.f32 %v11746_v2, %v3184_v4 }
 0x241   : > { %v3347_v3 = vpop.f32.mrf.mxu2  ;;  %v3287_v4 = vadd.f32 %v11820_v25, %v3207_v58  ;;  %v12002_v58 = vld [vmem:[%s16880_s28 + $0x80] sm:$0xff] }
 0x242   : > { %v3368_v26 = vadd.f32 %v3347_v3, %v3288_v5 }
 0x243   : > { %v3367_v1 = vadd.f32 %v11824_v40, %v3287_v4 }
 0x244   : > { %vm3377_vm6 = vcmp.ge.f32.partialorder %v3368_v26, 0.0 }
 0x245   : > { %vm3376_vm7 = vcmp.ge.f32.partialorder %v3367_v1, 0.0 }
 0x246   : > { %8064 = vmatmul.msk.f32.gmra.mxu3 %vm3034_vm10, %v11809_v32 }
 0x247   : > { %v3190_v61 = vpop.f32.mrf.mxu0 }
 0x248   : > { %v3209_v29 = vadd.f32 %v11746_v2, %v3190_v61 }
 0x24a   : > { %v3270_v11 = vpop.f32.mrf.mxu1 }
 0x24b   : > { %v3289_v54 = vadd.f32 %v3270_v11, %v3209_v29  ;;  %v11939_v29 = vld [vmem:[%s16880_s28 + $0x30] sm:$0xff] }
 0x24e   : > { %8065 = vmatmul.msk.f32.gmra.mxu3 %vm3034_vm10, %v11818_v53 }
 0x252   : > { %v3350_v22 = vpop.f32.mrf.mxu2 }
 0x253   : > { %v3369_v51 = vadd.f32 %v3350_v22, %v3289_v54  ;;  %v3366_v22 = vadd.f32 %v11814_v57, %v3286_v63 }
 0x255   : > { %v3387_v38 = vmul.f32 0.01, %v3369_v51  ;;  %vm3378_vm15 = vcmp.ge.f32.partialorder %v3369_v51, 0.0  ;;  %v3384_v7 = vmul.f32 0.01, %v3366_v22  ;;  %vm3375_vm8 = vcmp.ge.f32.partialorder %v3366_v22, 0.0 }
 0x256   : > { %8066 = vmatmul.msk.f32.vlgmr.msrb.gmra.mxu3 %vm3034_vm10, %v11828_v15 }
 0x257   : > { %v3396_v3 = vsel %vm3378_vm15, %v3369_v51, %v3387_v38 }
 0x259   : > { %v3193_v31 = vpop.f32.mrf.mxu0 }
 0x25a   : > { %v3210_v62 = vadd.f32 %v11746_v2, %v3193_v31  ;;  %v3285_v31 = vadd.f32 %v11792_v46, %v3205_v49  ;;  %v3385_v46 = vmul.f32 0.01, %v3367_v1  ;;  %v8125_v49 = vld [vmem:[%s16880_s28 + $0x40] sm:$0xff] }
 0x25c   : > { %v3365_v25 = vadd.f32 %v11803_v23, %v3285_v31  ;;  %v3394_v40 = vsel %vm3376_vm7, %v3367_v1, %v3385_v46  ;;  %v3471_v23 = vmul.f32 0.01, %v11746_v2 }
 0x25d   : > { %v3273_v17 = vpop.f32.mrf.mxu1 }
 0x25e   : > { %8067 = vmatmul.msk.f32.gmra.mxu3 %vm3034_vm10, %v11834_v33  ;;  %v3290_v37 = vadd.f32 %v3273_v17, %v3210_v62  ;;  %vm3374_vm9 = vcmp.ge.f32.partialorder %v3365_v25, 0.0  ;;  %v11925_v62 = vld [vmem:[%s16880_s28 + $0x8] sm:$0xff] }
 0x263   : > { %v3353_v6 = vpop.f32.mrf.mxu2 }
 0x264   : > { %v3370_v47 = vadd.f32 %v3353_v6, %v3290_v37  ;;  %v11985_v37 = vld [vmem:[%s16880_s28 + $0x20] sm:$0xff] }
 0x266   : > { %8068 = vmatmul.msk.f32.gmra.mxu3 %vm3034_vm10, %v11840_v44  ;;  %v3388_v34 = vmul.f32 0.01, %v3370_v47  ;;  %vm3379_vm14 = vcmp.ge.f32.partialorder %v3370_v47, 0.0 }
 0x268   : > { %v3397_v6 = vsel %vm3379_vm14, %v3370_v47, %v3388_v34  ;;  %vm4386_vm14 = vcmask 408576  }
 0x26e   : > { %8069 = vmatmul.msk.f32.gmra.mxu3 %vm3034_vm10, %v11846_v35 }
 0x270   : > { %v3196_v55 = vpop.f32.mrf.mxu0 }
 0x271   : > { %v3211_v16 = vadd.f32 %v11746_v2, %v3196_v55  ;;  %v3386_v55 = vmul.f32 0.01, %v3368_v26 }
 0x273   : > { %v3276_v12 = vpop.f32.mrf.mxu1  ;;  %v3395_v41 = vsel %vm3377_vm6, %v3368_v26, %v3386_v55 }
 0x274   : > { %v3291_v52 = vadd.f32 %v3276_v12, %v3211_v16  ;;  %v3383_v12 = vmul.f32 0.01, %v3365_v25  ;;  %v11915_v16 = vld [vmem:[%s16880_s28 + $0x38] sm:$0x1] }
 0x276   : > { %8070 = vmatmul.msk.f32.gmra.mxu3 %vm3034_vm10, %v11852_v28  ;;  %v3392_v57 = vsel %vm3374_vm9, %v3365_v25, %v3383_v12 }
 0x27a   : > { %v3199_v14 = vpop.f32.mrf.mxu0 }
 0x27b   : > { %v3212_v43 = vadd.f32 %v11746_v2, %v3199_v14  ;;  %v3393_v14 = vsel %vm3375_vm8, %v3366_v22, %v3384_v7 }
 0x27c   : > { %v3356_v36 = vpop.f32.mrf.mxu2 }
 0x27d   : > { %v3371_v30 = vadd.f32 %v3356_v36, %v3291_v52  ;;  %v11952_v52 = vld [vmem:[%s16880_s28 + $0x90] sm:$0xff] }
 0x27f   : > { %v3389_v61 = vmul.f32 0.01, %v3371_v30  ;;  %vm3380_vm13 = vcmp.ge.f32.partialorder %v3371_v30, 0.0 }
 0x280   : > { %v3279_v24 = vpop.f32.mrf.mxu1 }
 0x281   : > { %v3292_v48 = vadd.f32 %v3279_v24, %v3212_v43  ;;  %v3398_v17 = vsel %vm3380_vm13, %v3371_v30, %v3389_v61  ;;  %v11908_v43 = vld [vmem:[%s16880_s28 + $0x10] sm:$0xff]  ;;  %v11992_v30 = vld [vmem:[%s16880_s28 + $0x60] sm:$0xff] }
 0x282   : > { %v3202_v9 = vpop.f32.mrf.mxu0 }
 0x283   : > { %v3213_v0 = vadd.f32 %v11746_v2, %v3202_v9  ;;  %v11903_v9 = vld [vmem:[%s16880_s28 + $0x18] sm:$0x1] }
 0x284   : > { %8151 = vmatpush.msk.msra.mxu2 %vm2784_vm0, %v11903_v9 }
 0x286   : > { %3625 = vmatpush.msra.mxu2 %v11908_v43 }
 0x287   : > { %v3359_v18 = vpop.f32.mrf.mxu2 }
 0x288   : > { %v3282_v20 = vpop.f32.mrf.mxu1  ;;  %v3372_v19 = vadd.f32 %v3359_v18, %v3292_v48  ;;  %v11934_v48 = vld [vmem:[%s16880_s28 + $0x98] sm:$0x1]  ;;  %3626 = vmatpush.msra.mxu2 %v11925_v62 }
 0x289   : > { %v3293_v56 = vadd.f32 %v3282_v20, %v3213_v0  ;;  %v11920_v0 = vld [vmem:[%s16880_s28 + $0x78] sm:$0x1]  ;;  %v11947_v20 = vld [vmem:[%s16880_s28 + $0x70] sm:$0xff] }
 0x28a   : > { %v3390_v13 = vmul.f32 0.01, %v3372_v19  ;;  %vm3381_vm12 = vcmp.ge.f32.partialorder %v3372_v19, 0.0 }
 0x28c   : > { %v3399_v11 = vsel %vm3381_vm12, %v3372_v19, %v3390_v13  ;;  %v11961_v19 = vld [vmem:[%s16880_s28] sm:$0xff]  ;;  %vm4399_vm12 = vcmask 1041408  }
 0x28d   : > { %3627 = vmatpush.msra.mxu2 %v11961_v19 }
 0x28f   : > { %v3362_v21 = vpop.f32.mrf.mxu2 }
 0x290   : > { %v3373_v59 = vadd.f32 %v3362_v21, %v3293_v56  ;;  %v11966_v56 = vld [vmem:[%s16880_s28 + $0x28] sm:$0xff] }
 0x291   : > { %v11973_v21 = vld [vmem:[%s16880_s28 + $0x68] sm:$0xff] }
 0x292   : > { %v3391_v8 = vmul.f32 0.01, %v3373_v59  ;;  %vm3382_vm11 = vcmp.ge.f32.partialorder %v3373_v59, 0.0 }
 0x294   : > { %v3400_v60 = vsel %vm3382_vm11, %v3373_v59, %v3391_v8  ;;  %vm3470_vm11 = vcmp.ge.f32.partialorder %v11746_v2, 0.0  ;;  %v8126_v8 = vld [vmem:[%s16880_s28 + $0x48] sm:$0xff] }
 0x295   : > { %3408 = vmatpush.msra.mxu3 %v3400_v60  ;;  %v3472_v36 = vsel %vm3470_vm11, %v11746_v2, %v3471_v23 }
 0x296   : > { %3480 = vmatpush.msrb.mxu0 %v3472_v36  ;;  %3512 = vmatpush.msra.mxu1 %v3472_v36 }
 0x297   : > { %3409 = vmatpush.msra.mxu3 %v3399_v11 }
 0x298   : > { %3481 = vmatpush.msrb.mxu0 %v3472_v36  ;;  %3513 = vmatpush.msra.mxu1 %v3472_v36 }
 0x299   : > { %3410 = vmatpush.msra.mxu3 %v3398_v17 }
 0x29a   : > { %3482 = vmatpush.msrb.mxu0 %v3472_v36  ;;  %3514 = vmatpush.msra.mxu1 %v3472_v36 }
 0x29b   : > { %3411 = vmatpush.msra.mxu3 %v3397_v6 }
 0x29c   : > { %3483 = vmatpush.msrb.mxu0 %v3472_v36  ;;  %3515 = vmatpush.msra.mxu1 %v3472_v36 }
 0x29d   : > { %3412 = vmatpush.msra.mxu3 %v3396_v3 }
 0x29e   : > { %3484 = vmatpush.msrb.mxu0 %v3472_v36  ;;  %3516 = vmatpush.msra.mxu1 %v3472_v36 }
 0x29f   : > { %3413 = vmatpush.msra.mxu3 %v3395_v41 }
 0x2a0   : > { %3485 = vmatpush.msrb.mxu0 %v3472_v36  ;;  %3517 = vmatpush.msra.mxu1 %v3472_v36 }
 0x2a1   : > { %3414 = vmatpush.msra.mxu3 %v3394_v40 }
 0x2a2   : > { %3486 = vmatpush.msrb.mxu0 %v3472_v36  ;;  %3518 = vmatpush.msra.mxu1 %v3472_v36 }
 0x2a3   : > { %3415 = vmatpush.msra.mxu3 %v3393_v14 }
 0x2a4   : > { %3487 = vmatpush.msrb.mxu0 %v3472_v36  ;;  %3519 = vmatpush.msra.mxu1 %v3472_v36 }
 0x2a5   : > { %3416 = vmatpush.msra.mxu3 %v3392_v57 }
 0x2a6   : > { %8101 = vmatmul.msk.f32.vlgmr.msra.gmra.mxu3 %vm3034_vm10, %v11779_v27  ;;  %3488 = vmatpush.msrb.mxu0 %v3472_v36 }
 0x2a7   : > { %3440 = vmatpush.msrb.mxu3 %v3400_v60  ;;  %3520 = vmatpush.msra.mxu1 %v3472_v36 }
 0x2a8   : > { %8111 = vmatmul.msk.f32.vlgmr.msrb.gmra.mxu0 %vm3034_vm10, %v11779_v27  ;;  %8116 = vmatmul.msk.f32.vlgmr.msra.gmra.mxu1 %vm3034_vm10, %v11828_v15 }
 0x2a9   : > { %3441 = vmatpush.msrb.mxu3 %v3399_v11  ;;  %8166 = vmatpush.msk.msra.mxu0 %vm2784_vm0, %v11920_v0 }
 0x2aa   : > { %8171 = vmatpush.msk.msrb.mxu1 %vm2784_vm0, %v11934_v48 }
 0x2ab   : > { %3442 = vmatpush.msrb.mxu3 %v3398_v17  ;;  %3785 = vmatpush.msra.mxu0 %v11947_v20 }
 0x2ac   : > { %3838 = vmatpush.msrb.mxu1 %v11952_v52 }
 0x2ad   : > { %3443 = vmatpush.msrb.mxu3 %v3397_v6  ;;  %3786 = vmatpush.msra.mxu0 %v11973_v21 }
 0x2ae   : > { %8102 = vmatmul.msk.f32.gmra.mxu3 %vm3034_vm10, %v11786_v45  ;;  %3839 = vmatpush.msrb.mxu1 %v11980_v39 }
 0x2af   : > { %3444 = vmatpush.msrb.mxu3 %v3396_v3  ;;  %3787 = vmatpush.msra.mxu0 %v11992_v30 }
 0x2b0   : > { %8112 = vmatmul.msk.f32.gmra.mxu0 %vm3034_vm10, %v11786_v45  ;;  %8117 = vmatmul.msk.f32.gmra.mxu1 %vm3034_vm10, %v11834_v33 }
 0x2b1   : > { %3445 = vmatpush.msrb.mxu3 %v3395_v41  ;;  %v11881_v50 = vpop.f32.mrf.mxu3  ;;  %3840 = vmatpush.msrb.mxu1 %v12002_v58 }
 0x2b3   : > { %3446 = vmatpush.msrb.mxu3 %v3394_v40  ;;  %8191 = vmatpush.msk.msra.mxu1 %vm2784_vm0, %v11920_v0 }
 0x2b5   : > { %3447 = vmatpush.msrb.mxu3 %v3393_v14  ;;  %4046 = vmatpush.msra.mxu1 %v11947_v20 }
 0x2b6   : > { %8103 = vmatmul.msk.f32.gmra.mxu3 %vm3034_vm10, %v11797_v42 }
 0x2b7   : > { %3448 = vmatpush.msrb.mxu3 %v3392_v57  ;;  %4047 = vmatpush.msra.mxu1 %v11973_v21 }
 0x2b8   : > { %8113 = vmatmul.msk.f32.gmra.mxu0 %vm3034_vm10, %v11797_v42  ;;  %8118 = vmatmul.msk.f32.gmra.mxu1 %vm3034_vm10, %v11840_v44  ;;  %v8128_v42 = vld [vmem:[%s16880_s28 + $0x58] sm:$0x1] }
 0x2b9   : > { %v11886_v24 = vpop.f32.mrf.mxu3  ;;  %8156 = vmatpush.msk.msra.mxu3 %vm2784_vm0, %v11915_v16  ;;  %8161 = vmatpush.msk.msrb.mxu2 %vm2784_vm0, %v8128_v42 }
 0x2ba   : > { %8186 = vmatpush.msk.msrb.mxu0 %vm2784_vm0, %v8128_v42  ;;  %4048 = vmatpush.msra.mxu1 %v11992_v30 }
 0x2bb   : > { %3679 = vmatpush.msra.mxu3 %v11939_v29 }
 0x2bd   : > { %3680 = vmatpush.msra.mxu3 %v11966_v56 }
 0x2be   : > { %8104 = vmatmul.msk.f32.gmra.mxu3 %vm3034_vm10, %v11809_v32 }
 0x2bf   : > { %3681 = vmatpush.msra.mxu3 %v11985_v37 }
 0x2c0   : > { %8114 = vmatmul.msk.f32.gmra.mxu0 %vm3034_vm10, %v11809_v32  ;;  %8119 = vmatmul.msk.f32.gmra.mxu1 %vm3034_vm10, %v11846_v35 }
 0x2c1   : > { %v11890_v2 = vpop.f32.mrf.mxu3 }
 0x2c6   : > { %8105 = vmatmul.msk.f32.gmra.mxu3 %vm3034_vm10, %v11818_v53 }
 0x2c8   : > { %8115 = vmatmul.msk.f32.gmra.mxu0 %vm3034_vm10, %v11818_v53  ;;  %8120 = vmatmul.msk.f32.gmra.mxu1 %vm3034_vm10, %v11852_v28 }
 0x2c9   : > { %v11898_v18 = vpop.f32.mrf.mxu3 }
 0x2ce   : > { %8106 = vmatmul.msk.f32.vlgmr.msrb.gmra.mxu3 %vm3034_vm10, %v11828_v15 }
 0x2cf   : > { %8176 = vmatpush.msk.msrb.mxu3 %vm2784_vm0, %v11903_v9 }
 0x2d1   : > { %v11996_v59 = vpop.f32.mrf.mxu3  ;;  %3895 = vmatpush.msrb.mxu3 %v11908_v43 }
 0x2d3   : > { %3896 = vmatpush.msrb.mxu3 %v11925_v62 }
 0x2d5   : > { %3897 = vmatpush.msrb.mxu3 %v11961_v19 }
 0x2d6   : > { %8107 = vmatmul.msk.f32.gmra.mxu3 %vm3034_vm10, %v11834_v33 }
 0x2d9   : > { %v3114_v54 = vpop.f32.mrf.mxu3 }
 0x2da   : > { %v12027_v47 = vmax.f32 %v11881_v50, %v3114_v54 }
 0x2dc   : > { %8152 = vmatmul.msk.f32.vlgmr.msra.gmra.mxu2 %vm2756_vm5, %v12027_v47  ;;  %v3752_v5 = vrot.slane %v12027_v47, 3  ;;  %v3805_v51 = vrot.slane %v12027_v47, 4  ;;  %v3646_v26 = vrot.slane %v12027_v47, 1  ;;  %v3699_v14 = vrot.slane %v12027_v47, 2 }
 0x2de   : > { %8108 = vmatmul.msk.f32.gmra.mxu3 %vm3034_vm10, %v11840_v44  ;;  %v8127_v44 = vld [vmem:[%s16880_s28 + $0x50] sm:$0xff] }
 0x2df   : > { %3732 = vmatpush.msrb.mxu2 %v8127_v44  ;;  %3996 = vmatpush.msrb.mxu0 %v8127_v44 }
 0x2e1   : > { %v3117_v32 = vpop.f32.mrf.mxu3  ;;  %3733 = vmatpush.msrb.mxu2 %v8126_v8  ;;  %3997 = vmatpush.msrb.mxu0 %v8126_v8 }
 0x2e2   : > { %v12047_v13 = vmax.f32 %v11886_v24, %v3117_v32 }
 0x2e3   : > { %3998 = vmatpush.msrb.mxu0 %v8125_v49  ;;  %3734 = vmatpush.msrb.mxu2 %v8125_v49 }
 0x2e4   : > { %8153 = vmatmul.msk.f32.gmra.mxu2 %vm2756_vm5, %v12047_v13  ;;  %v3806_v10 = vrot.slane %v12047_v13, 4  ;;  %v3647_v53 = vrot.slane %v12047_v13, 1  ;;  %v3700_v7 = vrot.slane %v12047_v13, 2 }
 0x2e5   : > { %8181 = vmatpush.msk.msra.mxu2 %vm2784_vm0, %v11915_v16 }
 0x2e6   : > { %8109 = vmatmul.msk.f32.gmra.mxu3 %vm3034_vm10, %v11846_v35  ;;  %v3753_v35 = vrot.slane %v12047_v13, 3  ;;  %v3807_v61 = vsel %vm1028_vm4, %v3805_v51, %v3806_v10  ;;  %v3701_v23 = vsel %vm906_vm2, %v3699_v14, %v3700_v7 }
 0x2e7   : > { %3946 = vmatpush.msra.mxu2 %v11939_v29  ;;  %8172 = vmatmul.msk.f32.vlgmr.msrb.gmra.mxu1 %vm2756_vm5, %v3807_v61 }
 0x2e8   : > { %v3754_v60 = vsel %vm967_vm3, %v3752_v5, %v3753_v35  ;;  %8211 = vmatpush.msk.msrb.mxu1 %vm2784_vm0, %v8128_v42 }
 0x2e9   : > { %v3120_v4 = vpop.f32.mrf.mxu3  ;;  %3947 = vmatpush.msra.mxu2 %v11966_v56  ;;  %8167 = vmatmul.msk.f32.vlgmr.msra.gmra.mxu0 %vm2756_vm5, %v3754_v60 }
 0x2ea   : > { %v12072_v11 = vmax.f32 %v11890_v2, %v3120_v4  ;;  %8206 = vmatpush.msk.msra.mxu0 %vm2784_vm0, %v11915_v16  ;;  %4254 = vmatpush.msrb.mxu1 %v8127_v44 }
 0x2eb   : > { %3948 = vmatpush.msra.mxu2 %v11985_v37 }
 0x2ec   : > { %8154 = vmatmul.msk.f32.gmra.mxu2 %vm2756_vm5, %v12072_v11  ;;  %v3755_v34 = vrot.slane %v12072_v11, 3  ;;  %v3808_v31 = vrot.slane %v12072_v11, 4  ;;  %4204 = vmatpush.msra.mxu0 %v11939_v29  ;;  %v3649_v63 = vrot.slane %v12072_v11, 1  ;;  %v3702_v16 = vrot.slane %v12072_v11, 2 }
 0x2ed   : > { %4255 = vmatpush.msrb.mxu1 %v8126_v8 }
 0x2ee   : > { %8110 = vmatmul.msk.f32.gmra.mxu3 %vm3034_vm10, %v11852_v28  ;;  %v3648_v28 = vsel %vm845_vm1, %v3646_v26, %v3647_v53  ;;  %v3756_v1 = vsel %vm967_vm3, %v3753_v35, %v3755_v34  ;;  %v3809_v17 = vsel %vm1028_vm4, %v3806_v10, %v3808_v31  ;;  %4205 = vmatpush.msra.mxu0 %v11966_v56 }
 0x2ef   : > { %8173 = vmatmul.msk.f32.gmra.mxu1 %vm2756_vm5, %v3809_v17  ;;  %v3650_v38 = vsel %vm845_vm1, %v3647_v53, %v3649_v63 }
 0x2f0   : > { %4206 = vmatpush.msra.mxu0 %v11985_v37  ;;  %4256 = vmatpush.msrb.mxu1 %v8125_v49 }
 0x2f1   : > { %8168 = vmatmul.msk.f32.gmra.mxu0 %vm2756_vm5, %v3756_v1  ;;  %v3123_v22 = vpop.f32.mrf.mxu3 }
 0x2f2   : > { %v3132_v6 = vmax.f32 %v11898_v18, %v3123_v22 }
 0x2f4   : > { %8155 = vmatmul.msk.f32.gmra.mxu2 %vm2756_vm5, %v3132_v6  ;;  %v3651_v55 = vrot.slane %v3132_v6, 1  ;;  %v3757_v25 = vrot.slane %v3132_v6, 3  ;;  %v3810_v3 = vrot.slane %v3132_v6, 4  ;;  %v3704_v56 = vrot.slane %v3132_v6, 2 }
 0x2f6   : > { %8157 = vmatmul.msk.f32.vlgmr.msra.gmra.mxu3 %vm2756_vm5, %v3648_v28  ;;  %v3758_v46 = vsel %vm967_vm3, %v3755_v34, %v3757_v25  ;;  %v3811_v41 = vsel %vm1028_vm4, %v3808_v31, %v3810_v3  ;;  %v3652_v40 = vsel %vm845_vm1, %v3649_v63, %v3651_v55  ;;  %v3705_v37 = vsel %vm906_vm2, %v3702_v16, %v3704_v56 }
 0x2f7   : > { %8196 = vmatpush.msk.msra.mxu3 %vm2784_vm0, %v11934_v48  ;;  %8174 = vmatmul.msk.f32.gmra.mxu1 %vm2756_vm5, %v3811_v41 }
 0x2f9   : > { %4096 = vmatpush.msra.mxu3 %v11952_v52  ;;  %8169 = vmatmul.msk.f32.gmra.mxu0 %vm2756_vm5, %v3758_v46  ;;  %v3126_v12 = vpop.f32.mrf.mxu3 }
 0x2fa   : > { %v3133_v57 = vmax.f32 %v11996_v59, %v3126_v12 }
 0x2fb   : > { %4097 = vmatpush.msra.mxu3 %v11980_v39 }
 0x2fc   : > { %8162 = vmatmul.msk.f32.vlgmr.msrb.gmra.mxu2 %vm2756_vm5, %v3701_v23  ;;  %v3653_v50 = vrot.slane %v3133_v57, 1  ;;  %v3759_v36 = vrot.slane %v3133_v57, 3  ;;  %v3812_v24 = vrot.slane %v3133_v57, 4  ;;  %v3706_v59 = vrot.slane %v3133_v57, 2 }
 0x2fd   : > { %4098 = vmatpush.msra.mxu3 %v12002_v58  ;;  %8201 = vmatpush.msk.msrb.mxu2 %vm2784_vm0, %v11903_v9  ;;  %v3703_v9 = vsel %vm906_vm2, %v3700_v7, %v3702_v16 }
 0x2fe   : > { %8158 = vmatmul.msk.f32.gmra.mxu3 %vm2756_vm5, %v3650_v38  ;;  %v3760_v2 = vsel %vm967_vm3, %v3757_v25, %v3759_v36  ;;  %v3813_v18 = vsel %vm1028_vm4, %v3810_v3, %v3812_v24  ;;  %v3654_v29 = vsel %vm845_vm1, %v3651_v55, %v3653_v50  ;;  %v3707_v54 = vsel %vm906_vm2, %v3704_v56, %v3706_v59 }
 0x2ff   : > { %8175 = vmatmul.msk.f32.gmra.mxu1 %vm2756_vm5, %v3813_v18  ;;  %4153 = vmatpush.msrb.mxu2 %v11908_v43 }
 0x301   : > { %8170 = vmatmul.msk.f32.gmra.mxu0 %vm2756_vm5, %v3760_v2  ;;  %4154 = vmatpush.msrb.mxu2 %v11925_v62 }
 0x303   : > { %4155 = vmatpush.msrb.mxu2 %v11961_v19 }
 0x304   : > { %8163 = vmatmul.msk.f32.gmra.mxu2 %vm2756_vm5, %v3703_v9 }
 0x306   : > { %8159 = vmatmul.msk.f32.gmra.mxu3 %vm2756_vm5, %v3652_v40 }
 0x30c   : > { %8164 = vmatmul.msk.f32.gmra.mxu2 %vm2756_vm5, %v3705_v37 }
 0x30e   : > { %8160 = vmatmul.msk.f32.gmra.mxu3 %vm2756_vm5, %v3654_v29 }
 0x314   : > { %8165 = vmatmul.msk.f32.gmra.mxu2 %vm2756_vm5, %v3707_v54 }
 0x325   : > { %v3490_v19 = vpop.f32.mrf.mxu0  ;;  %v3522_v5 = vpop.f32.mrf.mxu1 }
 0x326   : > { %v12197_v57 = vmax.f32 %v3490_v19, %v3522_v5 }
 0x328   : > { %v4174_v37 = vrot.slane %v12197_v57, 1 }
 0x329   : > { %v3418_v43 = vpop.f32.mrf.mxu3 }
 0x32d   : > { %v3493_v4 = vpop.f32.mrf.mxu0  ;;  %v3525_v31 = vpop.f32.mrf.mxu1 }
 0x32e   : > { %v12200_v50 = vmax.f32 %v3493_v4, %v3525_v31 }
 0x330   : > { %v4175_v59 = vrot.slane %v12200_v50, 1 }
 0x331   : > { %v3421_v62 = vpop.f32.mrf.mxu3 }
 0x335   : > { %v3528_v41 = vpop.f32.mrf.mxu1 }
 0x339   : > { %v3424_v42 = vpop.f32.mrf.mxu3 }
 0x341   : > { %v3427_v47 = vpop.f32.mrf.mxu3 }
 0x349   : > { %v3430_v44 = vpop.f32.mrf.mxu3 }
 0x351   : > { %v3450_v8 = vpop.f32.mrf.mxu3 }
 0x352   : > { %v12133_v32 = vmax.f32 %v3418_v43, %v3450_v8  ;;  %v3531_v43 = vpop.f32.mrf.mxu1  ;;  %v4176_v8 = vsel %vm845_vm1, %v4174_v37, %v4175_v59 }
 0x354   : > { %8177 = vmatmul.msk.f32.vlgmr.msrb.gmra.mxu3 %vm2756_vm5, %v12133_v32  ;;  %v3916_v35 = vrot.slane %v12133_v32, 1  ;;  %v3966_v10 = vrot.slane %v12133_v32, 2  ;;  %v4066_v12 = vrot.slane %v12133_v32, 4 }
 0x355   : > { %8216 = vmatpush.msk.msrb.mxu3 %vm2784_vm0, %v11920_v0 }
 0x357   : > { %4304 = vmatpush.msrb.mxu3 %v11947_v20  ;;  %v4016_v20 = vrot.slane %v12133_v32, 3 }
 0x359   : > { %v3453_v13 = vpop.f32.mrf.mxu3  ;;  %4305 = vmatpush.msrb.mxu3 %v11973_v21 }
 0x35a   : > { %v12141_v49 = vmax.f32 %v3421_v62, %v3453_v13  ;;  %v4224_v62 = vrot.slane %v12197_v57, 2 }
 0x35b   : > { %4306 = vmatpush.msrb.mxu3 %v11992_v30 }
 0x35c   : > { %8178 = vmatmul.msk.f32.gmra.mxu3 %vm2756_vm5, %v12141_v49  ;;  %v3917_v0 = vrot.slane %v12141_v49, 1  ;;  %v3967_v51 = vrot.slane %v12141_v49, 2  ;;  %v4017_v21 = vrot.slane %v12141_v49, 3  ;;  %v4067_v7 = vrot.slane %v12141_v49, 4 }
 0x35e   : > { %v3918_v53 = vsel %vm845_vm1, %v3916_v35, %v3917_v0  ;;  %v3968_v60 = vsel %vm906_vm2, %v3966_v10, %v3967_v51  ;;  %v4018_v61 = vsel %vm967_vm3, %v4016_v20, %v4017_v21  ;;  %v4068_v23 = vsel %vm1028_vm4, %v4066_v12, %v4067_v7 }
 0x35f   : > { %8182 = vmatmul.msk.f32.vlgmr.msra.gmra.mxu2 %vm2756_vm5, %v3918_v53  ;;  %8187 = vmatmul.msk.f32.vlgmr.msrb.gmra.mxu0 %vm2756_vm5, %v3968_v60  ;;  %v12172_v17 = vpop.f32.mrf.mxu2  ;;  %v3572_v60 = vld [vmem:[%s16882_s7 + $0x30] sm:$0x3] }
 0x360   : > { %8192 = vmatmul.msk.f32.vlgmr.msra.gmra.mxu1 %vm2756_vm5, %v4018_v61  ;;  %8221 = vmatpush.msk.msra.mxu2 %vm2784_vm0, %v11934_v48 }
 0x361   : > { %v3456_v30 = vpop.f32.mrf.mxu3  ;;  %8226 = vmatpush.msk.msrb.mxu0 %vm4399_vm12, %v3572_v60 }
 0x362   : > { %v12160_v26 = vmax.f32 %v3424_v42, %v3456_v30  ;;  %4354 = vmatpush.msra.mxu2 %v11952_v52  ;;  %v4225_v42 = vrot.slane %v12200_v50, 2  ;;  %v3571_v30 = vld [vmem:[%s16882_s7 + $0x28] sm:$0xff] }
 0x363   : > { %4413 = vmatpush.msrb.mxu0 %v3571_v30 }
 0x364   : > { %8179 = vmatmul.msk.f32.gmra.mxu3 %vm2756_vm5, %v12160_v26  ;;  %v3919_v11 = vrot.slane %v12160_v26, 1  ;;  %v3969_v28 = vrot.slane %v12160_v26, 2  ;;  %v4019_v34 = vrot.slane %v12160_v26, 3  ;;  %4355 = vmatpush.msra.mxu2 %v11980_v39  ;;  %v3496_v39 = vpop.f32.mrf.mxu0  ;;  %v4069_v56 = vrot.slane %v12160_v26, 4  ;;  %v3570_v26 = vld [vmem:[%s16882_s7 + $0x20] sm:$0xff] }
 0x365   : > { %v4226_v32 = vsel %vm906_vm2, %v4224_v62, %v4225_v42  ;;  %4414 = vmatpush.msrb.mxu0 %v3570_v26 }
 0x366   : > { %v3920_v48 = vsel %vm845_vm1, %v3917_v0, %v3919_v11  ;;  %v3970_v63 = vsel %vm906_vm2, %v3967_v51, %v3969_v28  ;;  %v4020_v1 = vsel %vm967_vm3, %v4017_v21, %v4019_v34  ;;  %4356 = vmatpush.msra.mxu2 %v12002_v58  ;;  %v3534_v0 = vpop.f32.mrf.mxu1  ;;  %v12241_v21 = vld [vmem:[%s16881_s6] ss:$0 sm:$0xff]  ;;  %s7877_s6 = scalar_lea.sflag [#allocation3], %s647_s27 }
 0x367   : > { %8183 = vmatmul.msk.f32.gmra.mxu2 %vm2756_vm5, %v3920_v48  ;;  %8188 = vmatmul.msk.f32.gmra.mxu0 %vm2756_vm5, %v3970_v63  ;;  %v12188_v46 = vpop.f32.mrf.mxu2  ;;  %v3569_v48 = vld [vmem:[%s16882_s7 + $0x18] sm:$0xff] }
 0x368   : > { %8193 = vmatmul.msk.f32.gmra.mxu1 %vm2756_vm5, %v4020_v1  ;;  %4415 = vmatpush.msrb.mxu0 %v3569_v48 }
 0x369   : > { %v3459_v52 = vpop.f32.mrf.mxu3 }
 0x36a   : > { %v12178_v38 = vmax.f32 %v3427_v47, %v3459_v52  ;;  %v4070_v47 = vsel %vm1028_vm4, %v4067_v7, %v4069_v56  ;;  %v3566_v7 = vld [vmem:[%s16882_s7] sm:$0xff] }
 0x36c   : > { %8180 = vmatmul.msk.f32.gmra.mxu3 %vm2756_vm5, %v12178_v38  ;;  %v3921_v22 = vrot.slane %v12178_v38, 1  ;;  %v3971_v6 = vrot.slane %v12178_v38, 2  ;;  %v4021_v55 = vrot.slane %v12178_v38, 3  ;;  %v3499_v18 = vpop.f32.mrf.mxu0  ;;  %v4071_v13 = vrot.slane %v12178_v38, 4 }
 0x36d   : > { %v12235_v20 = vmax.f32 %v3499_v18, %v3531_v43 }
 0x36e   : > { %v3922_v58 = vsel %vm845_vm1, %v3919_v11, %v3921_v22  ;;  %v3972_v25 = vsel %vm906_vm2, %v3969_v28, %v3971_v6  ;;  %v4022_v3 = vsel %vm967_vm3, %v4019_v34, %v4021_v55  ;;  %v4072_v51 = vsel %vm1028_vm4, %v4069_v56, %v4071_v13 }
 0x36f   : > { %8184 = vmatmul.msk.f32.gmra.mxu2 %vm2756_vm5, %v3922_v58  ;;  %8189 = vmatmul.msk.f32.gmra.mxu0 %vm2756_vm5, %v3972_v25  ;;  %v12215_v54 = vpop.f32.mrf.mxu2  ;;  %v3641_v11 = vadd.f32 %v12241_v21, %v12172_v17  ;;  %v4179_v28 = vrot.slane %v12235_v20, 1  ;;  %v4229_v31 = vrot.slane %v12235_v20, 2  ;;  %v3567_v25 = vld [vmem:[%s16882_s7 + $0x8] sm:$0xff] }
 0x370   : > { %8194 = vmatmul.msk.f32.gmra.mxu1 %vm2756_vm5, %v4022_v3  ;;  %v4274_v3 = vrot.slane %v12197_v57, 3  ;;  %v3643_v43 = vadd.f32 %v12241_v21, %v12215_v54 }
 0x371   : > { %v3462_v40 = vpop.f32.mrf.mxu3 }
 0x372   : > { %v12195_v14 = vmax.f32 %v3430_v44, %v3462_v40  ;;  %v12220_v44 = vmax.f32 %v3496_v39, %v3528_v41  ;;  %v4275_v41 = vrot.slane %v12200_v50, 3  ;;  %v3642_v40 = vadd.f32 %v12241_v21, %v12188_v46 }
 0x374   : > { %8197 = vmatmul.msk.f32.vlgmr.msra.gmra.mxu3 %vm2756_vm5, %v4068_v23  ;;  %v3923_v36 = vrot.slane %v12195_v14, 1  ;;  %v3973_v24 = vrot.slane %v12195_v14, 2  ;;  %v4023_v2 = vrot.slane %v12195_v14, 3  ;;  %v3502_v19 = vpop.f32.mrf.mxu0  ;;  %v4177_v49 = vrot.slane %v12220_v44, 1 }
 0x375   : > { %v4227_v35 = vrot.slane %v12220_v44, 2  ;;  %v4073_v4 = vrot.slane %v12195_v14, 4  ;;  %v12268_v39 = vmax.f32 %v3502_v19, %v3534_v0  ;;  %v4276_v18 = vsel %vm967_vm3, %v4274_v3, %v4275_v41 }
 0x376   : > { %v3924_v16 = vsel %vm845_vm1, %v3921_v22, %v3923_v36  ;;  %v3974_v29 = vsel %vm906_vm2, %v3971_v6, %v3973_v24  ;;  %v4024_v9 = vsel %vm967_vm3, %v4021_v55, %v4023_v2  ;;  %v4178_v53 = vsel %vm845_vm1, %v4175_v59, %v4177_v49  ;;  %v3568_v6 = vld [vmem:[%s16882_s7 + $0x10] sm:$0xff]  ;;  %v3842_v55 = vpop.f32.mrf.mxu1 }
 0x377   : > { %8185 = vmatmul.msk.f32.gmra.mxu2 %vm2756_vm5, %v3924_v16  ;;  %8190 = vmatmul.msk.f32.gmra.mxu0 %vm2756_vm5, %v3974_v29  ;;  %v12232_v5 = vpop.f32.mrf.mxu2  ;;  %v4228_v61 = vsel %vm906_vm2, %v4225_v42, %v4227_v35  ;;  %v4074_v52 = vsel %vm1028_vm4, %v4071_v13, %v4073_v4  ;;  %v4180_v17 = vsel %vm845_vm1, %v4177_v49, %v4179_v28  ;;  %v4181_v12 = vrot.slane %v12268_v39, 1 }
 0x378   : > { %8195 = vmatmul.msk.f32.gmra.mxu1 %vm2756_vm5, %v4024_v9  ;;  %v4230_v58 = vsel %vm906_vm2, %v4227_v35, %v4229_v31  ;;  %4416 = vmatpush.msrb.mxu0 %v3568_v6  ;;  %v4231_v23 = vrot.slane %v12268_v39, 2  ;;  %v4277_v59 = vrot.slane %v12220_v44, 3  ;;  %v4327_v30 = vrot.slane %v12220_v44, 4 }
 0x379   : > { %v3683_v10 = vpop.f32.mrf.mxu3  ;;  %v4182_v16 = vsel %vm845_vm1, %v4179_v28, %v4181_v12  ;;  %v8140_v12 = vld [vmem:[%s16882_s7 + $0x50] sm:$0xff] }
 0x37a   : > { %v3695_v63 = vadd.f32 %v3683_v10, %v3641_v11  ;;  %4417 = vmatpush.msrb.mxu0 %v3567_v25  ;;  %v4232_v9 = vsel %vm906_vm2, %v4229_v31, %v4231_v23  ;;  %v4278_v13 = vsel %vm967_vm3, %v4275_v41, %v4277_v59  ;;  %v4331_v25 = vrot.slane %v12268_v39, 4  ;;  %v8143_v41 = vld [vmem:[%s16882_s7 + $0x68] sm:$0x3]  ;;  %v8138_v23 = vld [vmem:[%s16882_s7 + $0x40] sm:$0xff] }
 0x37b   : > { %8231 = vmatpush.msk.msra.mxu1 %vm4399_vm12, %v8143_v41 }
 0x37c   : > { %8198 = vmatmul.msk.f32.gmra.mxu3 %vm2756_vm5, %v4070_v47  ;;  %v3789_v34 = vpop.f32.mrf.mxu0  ;;  %4418 = vmatpush.msrb.mxu0 %v3566_v7  ;;  %v4324_v47 = vrot.slane %v12197_v57, 4  ;;  %v8142_v7 = vld [vmem:[%s16882_s7 + $0x60] sm:$0xff] }
 0x37d   : > { %4461 = vmatpush.msra.mxu1 %v8142_v7 }
 0x37e   : > { %v3845_v37 = vpop.f32.mrf.mxu1 }
 0x37f   : > { %8202 = vmatmul.msk.f32.vlgmr.msrb.gmra.mxu2 %vm2756_vm5, %v12197_v57  ;;  %8207 = vmatmul.msk.f32.vlgmr.msra.gmra.mxu0 %vm2756_vm5, %v4176_v8  ;;  %v3736_v1 = vpop.f32.mrf.mxu2  ;;  %v4325_v8 = vrot.slane %v12200_v50, 4 }
 0x380   : > { %8212 = vmatmul.msk.f32.vlgmr.msrb.gmra.mxu1 %vm2756_vm5, %v4226_v32  ;;  %v3748_v22 = vadd.f32 %v3736_v1, %v3695_v63 }
 0x381   : > { %v3686_v38 = vpop.f32.mrf.mxu3  ;;  %v4326_v0 = vsel %vm1028_vm4, %v4324_v47, %v4325_v8  ;;  %v4328_v48 = vsel %vm1028_vm4, %v4325_v8, %v4327_v30 }
 0x382   : > { %v3801_v14 = vadd.f32 %v3789_v34, %v3748_v22  ;;  %v3696_v36 = vadd.f32 %v3686_v38, %v3642_v40 }
 0x384   : > { %8199 = vmatmul.msk.f32.gmra.mxu3 %vm2756_vm5, %v4072_v51  ;;  %v3792_v2 = vpop.f32.mrf.mxu0  ;;  %v3854_v29 = vadd.f32 %v3842_v55, %v3801_v14  ;;  %v4279_v51 = vrot.slane %v12235_v20, 3  ;;  %v8139_v14 = vld [vmem:[%s16882_s7 + $0x48] sm:$0xff] }
 0x386   : > { %v3862_v62 = vmul.f32 0.01, %v3854_v29  ;;  %vm3858_vm13 = vcmp.ge.f32.partialorder %v3854_v29, 0.0  ;;  %v4280_v11 = vsel %vm967_vm3, %v4277_v59, %v4279_v51 }
 0x387   : > { %8203 = vmatmul.msk.f32.gmra.mxu2 %vm2756_vm5, %v12200_v50  ;;  %8208 = vmatmul.msk.f32.gmra.mxu0 %vm2756_vm5, %v4178_v53  ;;  %v3739_v24 = vpop.f32.mrf.mxu2  ;;  %v3644_v50 = vadd.f32 %v12241_v21, %v12232_v5  ;;  %v4281_v5 = vrot.slane %v12268_v39, 3  ;;  %v8141_v39 = vld [vmem:[%s16882_s7 + $0x58] sm:$0xff] }
 0x388   : > { %8213 = vmatmul.msk.f32.gmra.mxu1 %vm2756_vm5, %v4228_v61  ;;  %v3749_v46 = vadd.f32 %v3739_v24, %v3696_v36  ;;  %v3866_v35 = vsel %vm3858_vm13, %v3854_v29, %v3862_v62  ;;  %v3848_v61 = vpop.f32.mrf.mxu1  ;;  %v8137_v36 = vld [vmem:[%s16882_s7 + $0x38] sm:$0xff] }
 0x389   : > { %v3689_v56 = vpop.f32.mrf.mxu3  ;;  %4462 = vmatpush.msra.mxu1 %v8141_v39 }
 0x38a   : > { %v3802_v42 = vadd.f32 %v3792_v2, %v3749_v46  ;;  %v3697_v32 = vadd.f32 %v3689_v56, %v3643_v43 }
 0x38b   : > { %4463 = vmatpush.msra.mxu1 %v8140_v12 }
 0x38c   : > { %8200 = vmatmul.msk.f32.gmra.mxu3 %vm2756_vm5, %v4074_v52  ;;  %v3855_v49 = vadd.f32 %v3845_v37, %v3802_v42  ;;  %v3795_v54 = vpop.f32.mrf.mxu0  ;;  %v4329_v52 = vrot.slane %v12235_v20, 4 }
 0x38d   : > { %4464 = vmatpush.msra.mxu1 %v8139_v14 }
 0x38e   : > { %v3863_v60 = vmul.f32 0.01, %v3855_v49  ;;  %vm3859_vm15 = vcmp.ge.f32.partialorder %v3855_v49, 0.0  ;;  %v4330_v55 = vsel %vm1028_vm4, %v4327_v30, %v4329_v52 }
 0x38f   : > { %8204 = vmatmul.msk.f32.gmra.mxu2 %vm2756_vm5, %v12220_v44  ;;  %8209 = vmatmul.msk.f32.gmra.mxu0 %vm2756_vm5, %v4180_v17  ;;  %v3742_v19 = vpop.f32.mrf.mxu2  ;;  %v4282_v17 = vsel %vm967_vm3, %v4279_v51, %v4281_v5  ;;  %v8150_v51 = vld [vmem:[%s16882_s7 + $0xa0] sm:$0x3] }
 0x390   : > { %8214 = vmatmul.msk.f32.gmra.mxu1 %vm2756_vm5, %v4230_v58  ;;  %v3750_v10 = vadd.f32 %v3742_v19, %v3697_v32  ;;  %v3867_v34 = vsel %vm3859_vm15, %v3855_v49, %v3863_v60  ;;  %v3851_v38 = vpop.f32.mrf.mxu1  ;;  %8236 = vmatpush.msk.msra.mxu3 %vm4399_vm12, %v8150_v51 }
 0x391   : > { %v3692_v57 = vpop.f32.mrf.mxu3  ;;  %4465 = vmatpush.msra.mxu1 %v8138_v23 }
 0x392   : > { %v3803_v53 = vadd.f32 %v3795_v54, %v3750_v10  ;;  %v3698_v4 = vadd.f32 %v3692_v57, %v3644_v50  ;;  %v8149_v57 = vld [vmem:[%s16882_s7 + $0x98] sm:$0xff] }
 0x393   : > { %4466 = vmatpush.msra.mxu1 %v8137_v36  ;;  %4509 = vmatpush.msra.mxu3 %v8149_v57 }
 0x394   : > { %8217 = vmatmul.msk.f32.vlgmr.msrb.gmra.mxu3 %vm2756_vm5, %v4276_v18  ;;  %v3856_v28 = vadd.f32 %v3848_v61, %v3803_v53  ;;  %v3798_v63 = vpop.f32.mrf.mxu0 }
 0x396   : > { %v3864_v44 = vmul.f32 0.01, %v3856_v28  ;;  %vm3860_vm6 = vcmp.ge.f32.partialorder %v3856_v28, 0.0 }
 0x397   : > { %8205 = vmatmul.msk.f32.gmra.mxu2 %vm2756_vm5, %v12235_v20  ;;  %8210 = vmatmul.msk.f32.gmra.mxu0 %vm2756_vm5, %v4182_v16  ;;  %v3745_v26 = vpop.f32.mrf.mxu2  ;;  %v4332_v20 = vsel %vm1028_vm4, %v4329_v52, %v4331_v25  ;;  %v8146_v52 = vld [vmem:[%s16882_s7 + $0x80] sm:$0xff] }
 0x398   : > { %8215 = vmatmul.msk.f32.gmra.mxu1 %vm2756_vm5, %v4232_v9  ;;  %v3751_v31 = vadd.f32 %v3745_v26, %v3698_v4  ;;  %v3868_v6 = vsel %vm3860_vm6, %v3856_v28, %v3864_v44  ;;  %v8148_v4 = vld [vmem:[%s16882_s7 + $0x90] sm:$0xff]  ;;  %v8147_v26 = vld [vmem:[%s16882_s7 + $0x88] sm:$0xff] }
 0x399   : > { %4510 = vmatpush.msra.mxu3 %v8148_v4 }
 0x39a   : > { %v3804_v1 = vadd.f32 %v3798_v63, %v3751_v31 }
 0x39b   : > { %4511 = vmatpush.msra.mxu3 %v8147_v26 }
 0x39c   : > { %8218 = vmatmul.msk.f32.gmra.mxu3 %vm2756_vm5, %v4278_v13  ;;  %v3857_v22 = vadd.f32 %v3851_v38, %v3804_v1  ;;  %v8145_v38 = vld [vmem:[%s16882_s7 + $0x78] sm:$0xff] }
 0x39d   : > { %4512 = vmatpush.msra.mxu3 %v8146_v52 }
 0x39e   : > { %v3865_v58 = vmul.f32 0.01, %v3857_v22  ;;  %vm3861_vm7 = vcmp.ge.f32.partialorder %v3857_v22, 0.0 }
 0x39f   : > { %8222 = vmatmul.msk.f32.vlgmr.msra.gmra.mxu2 %vm2756_vm5, %v4326_v0  ;;  %8227 = vmatmul.msk.f32.vlgmr.msrb.gmra.mxu0 %vm4386_vm14, %v3866_v35 }
 0x3a0   : > { %v3869_v3 = vsel %vm3861_vm7, %v3857_v22, %v3865_v58  ;;  %4513 = vmatpush.msra.mxu3 %v8145_v38 }
 0x3a4   : > { %8219 = vmatmul.msk.f32.gmra.mxu3 %vm2756_vm5, %v4280_v11 }
 0x3a7   : > { %8223 = vmatmul.msk.f32.gmra.mxu2 %vm2756_vm5, %v4328_v48  ;;  %8228 = vmatmul.msk.f32.gmra.mxu0 %vm4386_vm14, %v3867_v34 }
 0x3ac   : > { %8220 = vmatmul.msk.f32.gmra.mxu3 %vm2756_vm5, %v4282_v17 }
 0x3af   : > { %8224 = vmatmul.msk.f32.gmra.mxu2 %vm2756_vm5, %v4330_v55  ;;  %8229 = vmatmul.msk.f32.gmra.mxu0 %vm4386_vm14, %v3868_v6  ;;  %v8144_v6 = vld [vmem:[%s16882_s7 + $0x70] sm:$0xff]  ;;  %s8947_s7 = sshra.s32 %s7890_s22, 4  ;;  %s8948_s7 = int_to_ptr.hbm [resolvable:$true] %s8947_s7 }
 0x3b0   : > { %4514 = vmatpush.msra.mxu3 %v8144_v6  ;;  %s8949_s3 = scalar_lea.hbm %s8948_s7, 1  ;;  %p8954_p0 = scmp.lt.s32.totalorder %s8948_s7, %s16002_s21 }
 0x3b1   : > { %p8950_p11 = scmp.ne.s32.totalorder %s8948_s7, %s8949_s3  ;;  %p8955_p1 = scmp.lt.s32.totalorder %s8953_s5, %s8949_s3 }
 0x3b3   : > { %p8951_p12 = pnand %p8950_p11, %p9147_p5  ;;  %p8956_p2 = por %p8955_p1, %p8954_p0 }
 0x3b5   : > { %p8952_p13 = pneg %p8951_p12 }
 0x3b7   : > { %8225 = vmatmul.msk.f32.gmra.mxu2 %vm2756_vm5, %v4332_v20  ;;  %8230 = vmatmul.msk.f32.gmra.mxu0 %vm4386_vm14, %v3869_v3  ;;  %p8957_p3 = pnand %p8956_p2, %p8952_p13 }
 0x3d7   : > { %v3899_v40 = vpop.f32.mrf.mxu3 }
 0x3d8   : > { %v3911_v46 = vadd.f32 %v12241_v21, %v3899_v40 }
 0x3dc   : > { %v4000_v29 = vpop.f32.mrf.mxu0 }
 0x3dd   : > { %v4050_v56 = vpop.f32.mrf.mxu1 }
 0x3df   : > { %v3902_v24 = vpop.f32.mrf.mxu3 }
 0x3e0   : > { %v3912_v62 = vadd.f32 %v12241_v21, %v3902_v24 }
 0x3e2   : > { %v3950_v2 = vpop.f32.mrf.mxu2 }
 0x3e3   : > { %v3962_v9 = vadd.f32 %v3950_v2, %v3911_v46 }
 0x3e4   : > { %v4003_v42 = vpop.f32.mrf.mxu0 }
 0x3e5   : > { %v4012_v59 = vadd.f32 %v4000_v29, %v3962_v9  ;;  %v4053_v13 = vpop.f32.mrf.mxu1 }
 0x3e7   : > { %v3905_v18 = vpop.f32.mrf.mxu3  ;;  %v4062_v8 = vadd.f32 %v4050_v56, %v4012_v59 }
 0x3e8   : > { %v3913_v54 = vadd.f32 %v12241_v21, %v3905_v18 }
 0x3ea   : > { %v3953_v16 = vpop.f32.mrf.mxu2 }
 0x3eb   : > { %v3963_v47 = vadd.f32 %v3953_v16, %v3912_v62 }
 0x3ec   : > { %v4006_v60 = vpop.f32.mrf.mxu0 }
 0x3ed   : > { %v4013_v49 = vadd.f32 %v4003_v42, %v3963_v47  ;;  %v4056_v31 = vpop.f32.mrf.mxu1 }
 0x3ef   : > { %v3908_v37 = vpop.f32.mrf.mxu3  ;;  %v4063_v53 = vadd.f32 %v4053_v13, %v4013_v49 }
 0x3f0   : > { %v3914_v48 = vadd.f32 %v12241_v21, %v3908_v37 }
 0x3f2   : > { %v3956_v43 = vpop.f32.mrf.mxu2 }
 0x3f3   : > { %v3964_v50 = vadd.f32 %v3956_v43, %v3913_v54 }
 0x3f4   : > { %v4009_v22 = vpop.f32.mrf.mxu0 }
 0x3f5   : > { %v4014_v11 = vadd.f32 %v4006_v60, %v3964_v50  ;;  %v4059_v20 = vpop.f32.mrf.mxu1 }
 0x3f7   : > { %v4100_v32 = vpop.f32.mrf.mxu3  ;;  %v4064_v1 = vadd.f32 %v4056_v31, %v4014_v11 }
 0x3f8   : > { %v4112_v19 = vadd.f32 %v4100_v32, %v4062_v8 }
 0x3fa   : > { %vm4116_vm5 = vcmp.ge.f32.partialorder %v4112_v19, 0.0  ;;  %v4120_v35 = vmul.f32 0.01, %v4112_v19  ;;  %v3959_v10 = vpop.f32.mrf.mxu2 }
 0x3fb   : > { %v3965_v5 = vadd.f32 %v3959_v10, %v3914_v48 }
 0x3fc   : > { %v4124_v0 = vsel %vm4116_vm5, %v4112_v19, %v4120_v35  ;;  %v4208_v14 = vpop.f32.mrf.mxu0 }
 0x3fd   : > { %8232 = vmatmul.msk.f32.vlgmr.msra.gmra.mxu1 %vm4386_vm14, %v4124_v0  ;;  %v4015_v55 = vadd.f32 %v4009_v22, %v3965_v5  ;;  %v4258_v36 = vpop.f32.mrf.mxu1 }
 0x3ff   : > { %v4103_v61 = vpop.f32.mrf.mxu3  ;;  %v4065_v41 = vadd.f32 %v4059_v20, %v4015_v55 }
 0x400   : > { %v4113_v30 = vadd.f32 %v4103_v61, %v4063_v53 }
 0x402   : > { %v4121_v28 = vmul.f32 0.01, %v4113_v30  ;;  %v4157_v34 = vpop.f32.mrf.mxu2  ;;  %vm4117_vm8 = vcmp.ge.f32.partialorder %v4113_v30, 0.0 }
 0x403   : > { %v4169_v24 = vadd.f32 %v12241_v21, %v4157_v34 }
 0x404   : > { %v4125_v63 = vsel %vm4117_vm8, %v4113_v30, %v4121_v28  ;;  %v4211_v29 = vpop.f32.mrf.mxu0  ;;  %vm4544_vm8 = vcmask 261120  }
 0x405   : > { %8233 = vmatmul.msk.f32.gmra.mxu1 %vm4386_vm14, %v4125_v63  ;;  %v4220_v16 = vadd.f32 %v4208_v14, %v4169_v24  ;;  %v4261_v56 = vpop.f32.mrf.mxu1 }
 0x407   : > { %v4106_v44 = vpop.f32.mrf.mxu3  ;;  %v4270_v9 = vadd.f32 %v4258_v36, %v4220_v16 }
 0x408   : > { %v4114_v17 = vadd.f32 %v4106_v44, %v4064_v1 }
 0x40a   : > { %v4122_v58 = vmul.f32 0.01, %v4114_v17  ;;  %v4160_v25 = vpop.f32.mrf.mxu2  ;;  %vm4118_vm9 = vcmp.ge.f32.partialorder %v4114_v17, 0.0 }
 0x40b   : > { %v4170_v46 = vadd.f32 %v12241_v21, %v4160_v25 }
 0x40c   : > { %v4126_v3 = vsel %vm4118_vm9, %v4114_v17, %v4122_v58  ;;  %v4214_v13 = vpop.f32.mrf.mxu0  ;;  %v8918_v58 = vld [vmem:[%s16883_s8] ss:$0 sm:$0xff] }
 0x40d   : > { %8234 = vmatmul.msk.f32.gmra.mxu1 %vm4386_vm14, %v4126_v3  ;;  %v4221_v62 = vadd.f32 %v4211_v29, %v4170_v46  ;;  %v4264_v0 = vpop.f32.mrf.mxu1  ;;  %vm4601_vm5 = vcmp.ge.f32.partialorder %v8918_v58, 0.0  ;;  %v4602_v25 = vmul.f32 0.01, %v8918_v58 }
 0x40f   : > { %v4109_v7 = vpop.f32.mrf.mxu3  ;;  %v4271_v32 = vadd.f32 %v4261_v56, %v4221_v62  ;;  %v4603_v3 = vsel %vm4601_vm5, %v8918_v58, %v4602_v25  ;;  %v12581_v25 = vld [vmem:[%s16884_s9 + $0xe8] sm:$0xff]  ;;  %vm5154_vm5 = vcmask 97280  }
 0x410   : > { %v4115_v39 = vadd.f32 %v4109_v7, %v4065_v41  ;;  %4639 = vmatpush.msrb.mxu2 %v4603_v3  ;;  %4616 = vmatpush.msrb.mxu1 %v4603_v3 }
 0x412   : > { %v4123_v40 = vmul.f32 0.01, %v4115_v39  ;;  %v4163_v12 = vpop.f32.mrf.mxu2  ;;  %vm4119_vm11 = vcmp.ge.f32.partialorder %v4115_v39, 0.0  ;;  %4640 = vmatpush.msrb.mxu2 %v4603_v3  ;;  %4617 = vmatpush.msrb.mxu1 %v4603_v3 }
 0x413   : > { %v4171_v8 = vadd.f32 %v12241_v21, %v4163_v12  ;;  %v12407_v12 = vld [vmem:[%s16884_s9 + $0xd0] sm:$0xff] }
 0x414   : > { %v4127_v23 = vsel %vm4119_vm11, %v4115_v39, %v4123_v40  ;;  %v4217_v30 = vpop.f32.mrf.mxu0  ;;  %4641 = vmatpush.msrb.mxu2 %v4603_v3  ;;  %4618 = vmatpush.msrb.mxu1 %v4603_v3  ;;  %v12400_v39 = vld [vmem:[%s16884_s9 + $0xd8] sm:$0x3] }
 0x415   : > { %8235 = vmatmul.msk.f32.gmra.mxu1 %vm4386_vm14, %v4127_v23  ;;  %v4222_v10 = vadd.f32 %v4214_v13, %v4171_v8  ;;  %v4267_v34 = vpop.f32.mrf.mxu1 }
 0x416   : > { %4642 = vmatpush.msrb.mxu2 %v4603_v3  ;;  %4619 = vmatpush.msrb.mxu1 %v4603_v3  ;;  %v12590_v3 = vld [vmem:[%s16884_s9 + $0xe0] sm:$0xff] }
 0x417   : > { %v4308_v2 = vpop.f32.mrf.mxu3  ;;  %v4272_v53 = vadd.f32 %v4264_v0, %v4222_v10  ;;  %8247 = vmatmul.msk.f32.vlgmr.msrb.gmra.mxu2 %vm4544_vm8, %v11828_v15  ;;  %v12417_v10 = vld [vmem:[%s16884_s9 + $0x30] sm:$0x3]  ;;  %v12431_v0 = vld [vmem:[%s16884_s9 + $0x28] sm:$0xff] }
 0x418   : > { %v4320_v37 = vadd.f32 %v4308_v2, %v4270_v9  ;;  %8312 = vmatpush.msk.msra.mxu2 %vm4399_vm12, %v12400_v39 }
 0x41a   : > { %v4166_v18 = vpop.f32.mrf.mxu2  ;;  %4867 = vmatpush.msra.mxu2 %v12407_v12 }
 0x41b   : > { %v4172_v50 = vadd.f32 %v12241_v21, %v4166_v18 }
 0x41c   : > { %v4420_v38 = vpop.f32.mrf.mxu0 }
 0x41d   : > { %v4223_v26 = vadd.f32 %v4217_v30, %v4172_v50  ;;  %8245 = vmatmul.msk.f32.vlgmr.msrb.gmra.mxu1 %vm4544_vm8, %v11779_v27  ;;  %v4432_v16 = vadd.f32 %v8918_v58, %v4420_v38  ;;  %v12448_v50 = vld [vmem:[%s16884_s9 + $0x90] sm:$0xff]  ;;  %v8255_v30 = vld [vmem:[%s16884_s9 + $0x68] sm:$0x3] }
 0x41e   : > { %8306 = vmatpush.msk.msra.mxu1 %vm4399_vm12, %v8255_v30  ;;  %v12548_v38 = vld [vmem:[%s16884_s9 + $0xa8] sm:$0xff] }
 0x41f   : > { %v4311_v59 = vpop.f32.mrf.mxu3  ;;  %v4273_v48 = vadd.f32 %v4267_v34, %v4223_v26  ;;  %8248 = vmatmul.msk.f32.gmra.mxu2 %vm4544_vm8, %v11834_v33  ;;  %v8254_v26 = vld [vmem:[%s16884_s9 + $0x60] sm:$0xff]  ;;  %v8253_v34 = vld [vmem:[%s16884_s9 + $0x58] sm:$0xff] }
 0x420   : > { %v4321_v49 = vadd.f32 %v4311_v59, %v4271_v32  ;;  %4797 = vmatpush.msra.mxu1 %v8254_v26 }
 0x422   : > { %v4358_v43 = vpop.f32.mrf.mxu2  ;;  %4798 = vmatpush.msra.mxu1 %v8253_v34 }
 0x423   : > { %v4370_v42 = vadd.f32 %v4358_v43, %v4320_v37 }
 0x424   : > { %v4423_v22 = vpop.f32.mrf.mxu0 }
 0x425   : > { %vm4374_vm13 = vcmp.ge.f32.partialorder %v4370_v42, 0.0  ;;  %v4378_v47 = vmul.f32 0.01, %v4370_v42  ;;  %v4433_v24 = vadd.f32 %v8918_v58, %v4423_v22  ;;  %8246 = vmatmul.msk.f32.gmra.mxu1 %vm4544_vm8, %v11786_v45  ;;  %v8250_v22 = vld [vmem:[%s16884_s9 + $0x40] sm:$0xff] }
 0x427   : > { %v4382_v19 = vsel %vm4374_vm13, %v4370_v42, %v4378_v47  ;;  %v4314_v51 = vpop.f32.mrf.mxu3 }
 0x428   : > { %8237 = vmatmul.msk.f32.vlgmr.msra.gmra.mxu3 %vm4386_vm14, %v4382_v19  ;;  %v4322_v61 = vadd.f32 %v4314_v51, %v4272_v53  ;;  %v8261_v51 = vld [vmem:[%s16884_s9 + $0x98] sm:$0xff] }
 0x429   : > { %v12454_v53 = vld [vmem:[%s16884_s9 + $0x18] sm:$0xff] }
 0x42a   : > { %v4361_v35 = vpop.f32.mrf.mxu2 }
 0x42b   : > { %v4371_v54 = vadd.f32 %v4361_v35, %v4321_v49 }
 0x42c   : > { %v4426_v20 = vpop.f32.mrf.mxu0 }
 0x42d   : > { %v4379_v57 = vmul.f32 0.01, %v4371_v54  ;;  %vm4375_vm15 = vcmp.ge.f32.partialorder %v4371_v54, 0.0  ;;  %v4434_v23 = vadd.f32 %v8918_v58, %v4426_v20 }
 0x42f   : > { %v4383_v60 = vsel %vm4375_vm15, %v4371_v54, %v4379_v57  ;;  %v4317_v31 = vpop.f32.mrf.mxu3  ;;  %v12422_v54 = vld [vmem:[%s16884_s9 + $0xa0] sm:$0x3] }
 0x430   : > { %8238 = vmatmul.msk.f32.gmra.mxu3 %vm4386_vm14, %v4383_v60  ;;  %v4323_v5 = vadd.f32 %v4317_v31, %v4273_v48  ;;  %v12443_v57 = vld [vmem:[%s16884_s9 + $0x20] sm:$0xff]  ;;  %v12461_v60 = vld [vmem:[%s16884_s9 + $0x10] sm:$0xff]  ;;  %v8257_v31 = vld [vmem:[%s16884_s9 + $0x78] sm:$0xff] }
 0x431   : > { %v12514_v48 = vld [vmem:[%s16884_s9 + $0xb8] sm:$0xff] }
 0x432   : > { %v4364_v4 = vpop.f32.mrf.mxu2 }
 0x433   : > { %v4372_v11 = vadd.f32 %v4364_v4, %v4322_v61  ;;  %v12472_v61 = vld [vmem:[%s16884_s9 + $0x8] sm:$0xff] }
 0x434   : > { %v4429_v14 = vpop.f32.mrf.mxu0  ;;  %v8259_v4 = vld [vmem:[%s16884_s9 + $0x88] sm:$0xff] }
 0x435   : > { %v4380_v28 = vmul.f32 0.01, %v4372_v11  ;;  %vm4376_vm6 = vcmp.ge.f32.partialorder %v4372_v11, 0.0  ;;  %v4435_v2 = vadd.f32 %v8918_v58, %v4429_v14  ;;  %v12576_v58 = vld [vmem:[%s16884_s9 + $0xf0] sm:$0xff] }
 0x437   : > { %v4384_v63 = vsel %vm4376_vm6, %v4372_v11, %v4380_v28  ;;  %v8258_v11 = vld [vmem:[%s16884_s9 + $0x80] sm:$0xff] }
 0x438   : > { %8239 = vmatmul.msk.f32.gmra.mxu3 %vm4386_vm14, %v4384_v63  ;;  %v12502_v28 = vld [vmem:[%s16884_s9 + $0xc0] sm:$0xff]  ;;  %v12520_v63 = vld [vmem:[%s16884_s9 + $0x110] sm:$0x3] }
 0x43a   : > { %v4367_v1 = vpop.f32.mrf.mxu2 }
 0x43b   : > { %v4373_v21 = vadd.f32 %v4367_v1, %v4323_v5  ;;  %v8252_v5 = vld [vmem:[%s16884_s9 + $0x50] sm:$0xff] }
 0x43c   : > { %v8256_v1 = vld [vmem:[%s16884_s9 + $0x70] sm:$0xff]  ;;  %4799 = vmatpush.msra.mxu1 %v8252_v5 }
 0x43d   : > { %v4381_v44 = vmul.f32 0.01, %v4373_v21  ;;  %vm4377_vm7 = vcmp.ge.f32.partialorder %v4373_v21, 0.0 }
 0x43f   : > { %v4385_v52 = vsel %vm4377_vm7, %v4373_v21, %v4381_v44  ;;  %v12533_v21 = vld [vmem:[%s16884_s9 + $0xb0] sm:$0xff]  ;;  %v12540_v44 = vld [vmem:[%s16884_s9 + $0x108] sm:$0xff] }
 0x440   : > { %8240 = vmatmul.msk.f32.gmra.mxu3 %vm4386_vm14, %v4385_v52  ;;  %v8251_v52 = vld [vmem:[%s16884_s9 + $0x48] sm:$0xff] }
 0x441   : > { %4800 = vmatpush.msra.mxu1 %v8251_v52 }
 0x443   : > { %4801 = vmatpush.msra.mxu1 %v8250_v22 }
 0x47a   : > { %v4468_v17 = vpop.f32.mrf.mxu1 }
 0x47b   : > { %v4480_v37 = vadd.f32 %v4468_v17, %v4432_v16  ;;  %v12555_v17 = vld [vmem:[%s16884_s9 + $0x100] sm:$0xff] }
 0x482   : > { %v4471_v6 = vpop.f32.mrf.mxu1 }
 0x483   : > { %v4481_v29 = vadd.f32 %v4471_v6, %v4433_v24  ;;  %v12564_v6 = vld [vmem:[%s16884_s9 + $0xf8] sm:$0xff] }
 0x48a   : > { %v4474_v7 = vpop.f32.mrf.mxu1 }
 0x48b   : > { %v4482_v18 = vadd.f32 %v4474_v7, %v4434_v23 }
 0x492   : > { %v4477_v36 = vpop.f32.mrf.mxu1 }
 0x493   : > { %v4483_v46 = vadd.f32 %v4477_v36, %v4435_v2 }
 0x49a   : > { %v4621_v14 = vpop.f32.mrf.mxu1  ;;  %v4644_v36 = vpop.f32.mrf.mxu2 }
 0x4ab   : > { %v4516_v55 = vpop.f32.mrf.mxu3 }
 0x4ac   : > { %v4528_v62 = vadd.f32 %v4516_v55, %v4480_v37  ;;  %v8249_v55 = vld [vmem:[%s16884_s9 + $0x38] sm:$0xff] }
 0x4ad   : > { %4802 = vmatpush.msra.mxu1 %v8249_v55 }
 0x4ae   : > { %v4536_v13 = vmul.f32 0.01, %v4528_v62  ;;  %vm4532_vm15 = vcmp.ge.f32.partialorder %v4528_v62, 0.0 }
 0x4af   : > { %8318 = vmatpush.msk.msrb.mxu1 %vm4399_vm12, %v12417_v10 }
 0x4b0   : > { %v4540_v35 = vsel %vm4532_vm15, %v4528_v62, %v4536_v13  ;;  %v12631_v62 = vld [vmem:[%s15992_s11 + $0xc0] sm:$0xff]  ;;  %v4647_v13 = vpop.f32.mrf.mxu2 }
 0x4b1   : > { %4939 = vmatpush.msrb.mxu1 %v12431_v0 }
 0x4b3   : > { %v4519_v41 = vpop.f32.mrf.mxu3  ;;  %4940 = vmatpush.msrb.mxu1 %v12443_v57 }
 0x4b4   : > { %v4529_v59 = vadd.f32 %v4519_v41, %v4481_v29 }
 0x4b5   : > { %4941 = vmatpush.msrb.mxu1 %v12454_v53 }
 0x4b6   : > { %v4537_v32 = vmul.f32 0.01, %v4529_v59  ;;  %vm4533_vm13 = vcmp.ge.f32.partialorder %v4529_v59, 0.0 }
 0x4b7   : > { %4942 = vmatpush.msrb.mxu1 %v12461_v60 }
 0x4b8   : > { %v4541_v49 = vsel %vm4533_vm13, %v4529_v59, %v4537_v32  ;;  %v8302_v59 = vld [vmem:[%s15992_s11 + $0x130] sm:$0xf]  ;;  %v8300_v32 = vld [vmem:[%s15992_s11 + $0x120] sm:$0xff] }
 0x4b9   : > { %4943 = vmatpush.msrb.mxu1 %v12472_v61 }
 0x4bb   : > { %v4522_v40 = vpop.f32.mrf.mxu3 }
 0x4bc   : > { %v4530_v9 = vadd.f32 %v4522_v40, %v4482_v18 }
 0x4be   : > { %v4538_v47 = vmul.f32 0.01, %v4530_v9  ;;  %vm4534_vm11 = vcmp.ge.f32.partialorder %v4530_v9, 0.0 }
 0x4c0   : > { %v4542_v19 = vsel %vm4534_vm11, %v4530_v9, %v4538_v47 }
 0x4c3   : > { %v4525_v56 = vpop.f32.mrf.mxu3 }
 0x4c4   : > { %v4531_v43 = vadd.f32 %v4525_v56, %v4483_v46  ;;  %v12616_v46 = vld [vmem:[%s15992_s11 + $0xc8] sm:$0xf] }
 0x4c6   : > { %v4539_v42 = vmul.f32 0.01, %v4531_v43  ;;  %vm4535_vm9 = vcmp.ge.f32.partialorder %v4531_v43, 0.0 }
 0x4c8   : > { %v4543_v8 = vsel %vm4535_vm9, %v4531_v43, %v4539_v42  ;;  %v8301_v42 = vld [vmem:[%s15992_s11 + $0x128] sm:$0xff] }
 0x4c9   : > { %4561 = vmatpush.msrb.mxu3 %v4543_v8  ;;  %4588 = vmatpush.msra.mxu0 %v4543_v8  ;;  %v12643_v8 = vld [vmem:[%s15992_s11 + $0xb8] sm:$0xff] }
 0x4cb   : > { %4562 = vmatpush.msrb.mxu3 %v4542_v19  ;;  %4589 = vmatpush.msra.mxu0 %v4542_v19  ;;  %v4624_v19 = vpop.f32.mrf.mxu1 }
 0x4cd   : > { %4563 = vmatpush.msrb.mxu3 %v4541_v49  ;;  %4590 = vmatpush.msra.mxu0 %v4541_v49 }
 0x4cf   : > { %4564 = vmatpush.msrb.mxu3 %v4540_v35  ;;  %4591 = vmatpush.msra.mxu0 %v4540_v35  ;;  %v12656_v35 = vld [vmem:[%s15992_s11 + $0xb0] sm:$0xff] }
 0x4d0   : > { %8241 = vmatmul.msk.f32.vlgmr.msrb.gmra.mxu3 %vm4544_vm8, %v11779_v27  ;;  %8243 = vmatmul.msk.f32.vlgmr.msra.gmra.mxu0 %vm4544_vm8, %v11828_v15 }
 0x4d1   : > { %8303 = vmatpush.msk.msrb.mxu0 %vm4399_vm12, %v12417_v10  ;;  %8309 = vmatpush.msk.msra.mxu3 %vm4399_vm12, %v12422_v54  ;;  %v12664_v10 = vld [vmem:[%s15992_s11 + $0xa8] sm:$0xff] }
 0x4d3   : > { %4762 = vmatpush.msrb.mxu0 %v12431_v0  ;;  %4832 = vmatpush.msra.mxu3 %v8261_v51  ;;  %v12669_v0 = vmax.f32 %v4624_v19, %v4647_v13 }
 0x4d5   : > { %4763 = vmatpush.msrb.mxu0 %v12443_v57  ;;  %4833 = vmatpush.msra.mxu3 %v12448_v50  ;;  %v12680_v57 = vld [vmem:[%s15992_s11 + $0xa0] sm:$0xff] }
 0x4d7   : > { %4764 = vmatpush.msrb.mxu0 %v12454_v53  ;;  %4834 = vmatpush.msra.mxu3 %v8259_v4  ;;  %v12690_v53 = vld [vmem:[%s15992_s11 + $0x98] sm:$0xff] }
 0x4d8   : > { %8242 = vmatmul.msk.f32.gmra.mxu3 %vm4544_vm8, %v11786_v45  ;;  %8244 = vmatmul.msk.f32.gmra.mxu0 %vm4544_vm8, %v11834_v33  ;;  %v12485_v45 = vld [vmem:[%s16884_s9 + $0xc8] sm:$0xff]  ;;  %v12490_v33 = vld [vmem:[%s16884_s9] sm:$0xff] }
 0x4d9   : > { %4765 = vmatpush.msrb.mxu0 %v12461_v60  ;;  %4868 = vmatpush.msra.mxu2 %v12485_v45 }
 0x4da   : > { %4835 = vmatpush.msra.mxu3 %v8258_v11  ;;  %4944 = vmatpush.msrb.mxu1 %v12490_v33 }
 0x4db   : > { %4766 = vmatpush.msrb.mxu0 %v12472_v61  ;;  %4869 = vmatpush.msra.mxu2 %v12502_v28  ;;  %v4955_v61 = vrot.slane %v12669_v0, 1 }
 0x4dc   : > { %4836 = vmatpush.msra.mxu3 %v8257_v31 }
 0x4dd   : > { %4767 = vmatpush.msrb.mxu0 %v12490_v33  ;;  %4870 = vmatpush.msra.mxu2 %v12514_v48  ;;  %v12704_v33 = vld [vmem:[%s15992_s11 + $0x90] sm:$0xff] }
 0x4de   : > { %4837 = vmatpush.msra.mxu3 %v8256_v1 }
 0x4df   : > { %8315 = vmatpush.msk.msra.mxu0 %vm4399_vm12, %v12520_v63  ;;  %4871 = vmatpush.msra.mxu2 %v12533_v21 }
 0x4e0   : > { %8321 = vmatpush.msk.msrb.mxu3 %vm4399_vm12, %v8255_v30  ;;  %v8297_v30 = vld [vmem:[%s15992_s11 + $0x108] sm:$0xff] }
 0x4e1   : > { %4902 = vmatpush.msra.mxu0 %v12540_v44  ;;  %4872 = vmatpush.msra.mxu2 %v12548_v38 }
 0x4e2   : > { %4971 = vmatpush.msrb.mxu3 %v8254_v26  ;;  %v12712_v26 = vld [vmem:[%s15992_s11 + $0x88] sm:$0xff] }
 0x4e3   : > { %4903 = vmatpush.msra.mxu0 %v12555_v17  ;;  %8324 = vmatpush.msk.msrb.mxu2 %vm4399_vm12, %v12422_v54  ;;  %v12667_v54 = vmax.f32 %v4621_v14, %v4644_v36  ;;  %v4702_v14 = vld [vmem:[%s15992_s11 + $0x58] sm:$0xff]  ;;  %v4700_v36 = vld [vmem:[%s15992_s11 + $0x48] sm:$0xff] }
 0x4e4   : > { %4972 = vmatpush.msrb.mxu3 %v8253_v34 }
 0x4e5   : > { %4904 = vmatpush.msra.mxu0 %v12564_v6  ;;  %5003 = vmatpush.msrb.mxu2 %v8261_v51  ;;  %v8299_v51 = vld [vmem:[%s15992_s11 + $0x118] sm:$0xff]  ;;  %v4954_v60 = vrot.slane %v12667_v54, 1 }
 0x4e6   : > { %4973 = vmatpush.msrb.mxu3 %v8252_v5  ;;  %v8295_v5 = vld [vmem:[%s15992_s11 + $0xf8] sm:$0xff] }
 0x4e7   : > { %4905 = vmatpush.msra.mxu0 %v12576_v58  ;;  %5004 = vmatpush.msrb.mxu2 %v12448_v50  ;;  %v8298_v50 = vld [vmem:[%s15992_s11 + $0x110] sm:$0xff] }
 0x4e8   : > { %4974 = vmatpush.msrb.mxu3 %v8251_v52  ;;  %v12750_v52 = vld [vmem:[%s15992_s11 + $0x70] sm:$0xff] }
 0x4e9   : > { %4906 = vmatpush.msra.mxu0 %v12581_v25  ;;  %5005 = vmatpush.msrb.mxu2 %v8259_v4  ;;  %v4986_v4 = vrot.slane %v12667_v54, 2 }
 0x4ea   : > { %4975 = vmatpush.msrb.mxu3 %v8250_v22  ;;  %v8293_v22 = vld [vmem:[%s15992_s11 + $0xe8] sm:$0xff] }
 0x4eb   : > { %4907 = vmatpush.msra.mxu0 %v12590_v3  ;;  %5006 = vmatpush.msrb.mxu2 %v8258_v11  ;;  %v4956_v11 = vsel %vm845_vm1, %v4954_v60, %v4955_v61 }
 0x4ec   : > { %4976 = vmatpush.msrb.mxu3 %v8249_v55 }
 0x4ed   : > { %5007 = vmatpush.msrb.mxu2 %v8257_v31  ;;  %v5018_v31 = vrot.slane %v12667_v54, 3 }
 0x4ef   : > { %5008 = vmatpush.msrb.mxu2 %v8256_v1  ;;  %v12739_v1 = vld [vmem:[%s15992_s11 + $0x78] sm:$0xff] }
 0x54d   : > { %v4593_v20 = vpop.f32.mrf.mxu0 }
 0x553   : > { %v4566_v41 = vpop.f32.mrf.mxu3 }
 0x554   : > { %v4599_v7 = vmax.f32 %v4566_v41, %v4593_v20  ;;  %v8290_v41 = vld [vmem:[%s15992_s11 + $0xd0] sm:$0xff] }
 0x555   : > { %v4596_v40 = vpop.f32.mrf.mxu0 }
 0x556   : > { %8304 = vmatmul.msk.f32.vlgmr.msrb.gmra.mxu0 %vm4386_vm14, %v4599_v7  ;;  %v4777_v2 = vrot.slane %v4599_v7, 1  ;;  %v4812_v18 = vrot.slane %v4599_v7, 2  ;;  %v4847_v29 = vrot.slane %v4599_v7, 3  ;;  %v4882_v47 = vrot.slane %v4599_v7, 4 }
 0x557   : > { %8327 = vmatpush.msk.msrb.mxu0 %vm4399_vm12, %v12400_v39 }
 0x559   : > { %5035 = vmatpush.msrb.mxu0 %v12407_v12 }
 0x55b   : > { %v4569_v23 = vpop.f32.mrf.mxu3  ;;  %5036 = vmatpush.msrb.mxu0 %v12485_v45  ;;  %v4987_v45 = vrot.slane %v12669_v0, 2 }
 0x55c   : > { %v12605_v24 = vmax.f32 %v4569_v23, %v4596_v40  ;;  %v4703_v40 = vld [vmem:[%s15992_s11 + $0x60] sm:$0xf]  ;;  %v4701_v23 = vld [vmem:[%s15992_s11 + $0x50] sm:$0xff] }
 0x55d   : > { %5037 = vmatpush.msrb.mxu0 %v12502_v28  ;;  %v8296_v28 = vld [vmem:[%s15992_s11 + $0x100] sm:$0xff]  ;;  %v4988_v34 = vsel %vm906_vm2, %v4986_v4, %v4987_v45 }
 0x55e   : > { %8305 = vmatmul.msk.f32.gmra.mxu0 %vm4386_vm14, %v12605_v24  ;;  %v4778_v16 = vrot.slane %v12605_v24, 1  ;;  %v4813_v39 = vrot.slane %v12605_v24, 2  ;;  %v4848_v12 = vrot.slane %v12605_v24, 3  ;;  %v4883_v43 = vrot.slane %v12605_v24, 4  ;;  %v4699_v24 = vld [vmem:[%s15992_s11 + $0x40] sm:$0xff] }
 0x55f   : > { %5038 = vmatpush.msrb.mxu0 %v12514_v48  ;;  %v5019_v48 = vrot.slane %v12669_v0, 3 }
 0x560   : > { %v4779_v9 = vsel %vm845_vm1, %v4777_v2, %v4778_v16  ;;  %v4814_v56 = vsel %vm906_vm2, %v4812_v18, %v4813_v39  ;;  %v4849_v37 = vsel %vm967_vm3, %v4847_v29, %v4848_v12  ;;  %v4884_v49 = vsel %vm1028_vm4, %v4882_v47, %v4883_v43  ;;  %v4698_v2 = vld [vmem:[%s15992_s11 + $0x38] sm:$0xff]  ;;  %v4697_v18 = vld [vmem:[%s15992_s11 + $0x30] sm:$0xff] }
 0x561   : > { %8307 = vmatmul.msk.f32.vlgmr.msra.gmra.mxu1 %vm4386_vm14, %v4779_v9  ;;  %8310 = vmatmul.msk.f32.vlgmr.msra.gmra.mxu3 %vm4386_vm14, %v4814_v56  ;;  %vm5089_vm2 = vcmask 818176   ;;  %v4694_v29 = vld [vmem:[%s15992_s11 + $0x18] sm:$0xff]  ;;  %v4692_v9 = vld [vmem:[%s15992_s11 + $0x8] sm:$0xff] }
 0x562   : > { %8313 = vmatmul.msk.f32.vlgmr.msra.gmra.mxu2 %vm4386_vm14, %v4849_v37  ;;  %8333 = vmatpush.msk.msra.mxu3 %vm1028_vm4, %v12616_v46  ;;  %v4691_v37 = vld [vmem:[%s15992_s11] sm:$0xff] }
 0x563   : > { %8336 = vmatpush.msk.msra.mxu2 %vm1028_vm4, %v8302_v59  ;;  %5039 = vmatpush.msrb.mxu0 %v12533_v21  ;;  %v8294_v21 = vld [vmem:[%s15992_s11 + $0xf0] sm:$0xff] }
 0x564   : > { %5099 = vmatpush.msra.mxu3 %v12631_v62  ;;  %8330 = vmatpush.msk.msra.mxu1 %vm4399_vm12, %v12520_v63  ;;  %v12729_v63 = vld [vmem:[%s15992_s11 + $0x80] sm:$0xff] }
 0x565   : > { %5127 = vmatpush.msra.mxu2 %v8301_v42  ;;  %5040 = vmatpush.msrb.mxu0 %v12548_v38  ;;  %v12758_v38 = vld [vmem:[%s15991_s10] ss:$0 sm:$0xff] }
 0x566   : > { %8316 = vmatmul.msk.f32.vlgmr.msra.gmra.mxu0 %vm4386_vm14, %v4884_v49  ;;  %5100 = vmatpush.msra.mxu3 %v12643_v8  ;;  %v4741_v55 = vmul.f32 0.01, %v12758_v38  ;;  %vm4740_vm1 = vcmp.ge.f32.partialorder %v12758_v38, 0.0 }
 0x567   : > { %5128 = vmatpush.msra.mxu2 %v8300_v32  ;;  %5067 = vmatpush.msra.mxu1 %v12540_v44  ;;  %v5020_v44 = vsel %vm967_vm3, %v5018_v31, %v5019_v48 }
 0x568   : > { %5101 = vmatpush.msra.mxu3 %v12656_v35  ;;  %v4742_v20 = vsel %vm4740_vm1, %v12758_v38, %v4741_v55  ;;  %vm6122_vm1 = vcmask 15360  }
 0x569   : > { %8308 = vmatmul.msk.f32.gmra.mxu1 %vm4386_vm14, %v4778_v16  ;;  %8311 = vmatmul.msk.f32.gmra.mxu3 %vm4386_vm14, %v4813_v39  ;;  %v4696_v16 = vld [vmem:[%s15992_s11 + $0x28] sm:$0xff]  ;;  %v4695_v39 = vld [vmem:[%s15992_s11 + $0x20] sm:$0xff] }
 0x56a   : > { %8314 = vmatmul.msk.f32.gmra.mxu2 %vm4386_vm14, %v4848_v12  ;;  %5102 = vmatpush.msra.mxu3 %v12664_v10  ;;  %v4693_v12 = vld [vmem:[%s15992_s11 + $0x10] sm:$0xff] }
 0x56b   : > { %5129 = vmatpush.msra.mxu2 %v8299_v51  ;;  %5068 = vmatpush.msra.mxu1 %v12555_v17  ;;  %v12763_v17 = vld [vmem:[%s15992_s11 + $0x68] sm:$0xff] }
 0x56c   : > { %5103 = vmatpush.msra.mxu3 %v12680_v57 }
 0x56d   : > { %5130 = vmatpush.msra.mxu2 %v8298_v50  ;;  %5069 = vmatpush.msra.mxu1 %v12564_v6  ;;  %v8292_v6 = vld [vmem:[%s15992_s11 + $0xe0] sm:$0xff] }
 0x56e   : > { %8317 = vmatmul.msk.f32.gmra.mxu0 %vm4386_vm14, %v4883_v43  ;;  %5104 = vmatpush.msra.mxu3 %v12690_v53 }
 0x56f   : > { %5131 = vmatpush.msra.mxu2 %v8297_v30  ;;  %5070 = vmatpush.msra.mxu1 %v12576_v58  ;;  %v8291_v58 = vld [vmem:[%s15992_s11 + $0xd8] sm:$0xff] }
 0x570   : > { %5105 = vmatpush.msra.mxu3 %v12704_v33 }
 0x571   : > { %8319 = vmatmul.msk.f32.vlgmr.msrb.gmra.mxu1 %vm4386_vm14, %v12667_v54  ;;  %8322 = vmatmul.msk.f32.vlgmr.msrb.gmra.mxu3 %vm4386_vm14, %v4956_v11 }
 0x572   : > { %8325 = vmatmul.msk.f32.vlgmr.msrb.gmra.mxu2 %vm4386_vm14, %v4988_v34  ;;  %5106 = vmatpush.msra.mxu3 %v12712_v26 }
 0x573   : > { %5132 = vmatpush.msra.mxu2 %v8296_v28  ;;  %5071 = vmatpush.msra.mxu1 %v12581_v25  ;;  %v5050_v25 = vrot.slane %v12667_v54, 4 }
 0x574   : > { %5107 = vmatpush.msra.mxu3 %v12729_v63 }
 0x575   : > { %5133 = vmatpush.msra.mxu2 %v8295_v5  ;;  %5072 = vmatpush.msra.mxu1 %v12590_v3  ;;  %v5051_v3 = vrot.slane %v12669_v0, 4 }
 0x576   : > { %8328 = vmatmul.msk.f32.vlgmr.msrb.gmra.mxu0 %vm4386_vm14, %v5020_v44  ;;  %5108 = vmatpush.msra.mxu3 %v12739_v1 }
 0x577   : > { %5134 = vmatpush.msra.mxu2 %v8294_v21  ;;  %v5052_v7 = vsel %vm1028_vm4, %v5050_v25, %v5051_v3 }
 0x578   : > { %5109 = vmatpush.msra.mxu3 %v12750_v52 }
 0x579   : > { %8320 = vmatmul.msk.f32.gmra.mxu1 %vm4386_vm14, %v12669_v0  ;;  %8323 = vmatmul.msk.f32.gmra.mxu3 %vm4386_vm14, %v4955_v61 }
 0x57a   : > { %8326 = vmatmul.msk.f32.gmra.mxu2 %vm4386_vm14, %v4987_v45  ;;  %5110 = vmatpush.msra.mxu3 %v12763_v17 }
 0x57b   : > { %5135 = vmatpush.msra.mxu2 %v8293_v22 }
 0x57c   : > { %8343 = vmatpush.msk.msrb.mxu3 %vm1028_vm4, %v4703_v40 }
 0x57d   : > { %5136 = vmatpush.msra.mxu2 %v8292_v6 }
 0x57e   : > { %8329 = vmatmul.msk.f32.gmra.mxu0 %vm4386_vm14, %v5019_v48  ;;  %5216 = vmatpush.msrb.mxu3 %v4702_v14 }
 0x57f   : > { %5137 = vmatpush.msra.mxu2 %v8291_v58  ;;  %v12843_v58 = vld [vmem:[%s15993_s12] ss:$0 sm:$0xff] }
 0x580   : > { %5217 = vmatpush.msrb.mxu3 %v4701_v23 }
 0x581   : > { %8331 = vmatmul.msk.f32.vlgmr.msra.gmra.mxu1 %vm4386_vm14, %v5052_v7  ;;  %8334 = vmatmul.msk.f32.vlgmr.msra.gmra.mxu3 %vm5089_vm2, %v4742_v20 }
 0x582   : > { %5138 = vmatpush.msra.mxu2 %v8290_v41  ;;  %5218 = vmatpush.msrb.mxu3 %v4700_v36 }
 0x583   : > { %8337 = vmatmul.msk.f32.vlgmr.msra.gmra.mxu2 %vm5089_vm2, %v4742_v20 }
 0x584   : > { %5219 = vmatpush.msrb.mxu3 %v4699_v24 }
 0x586   : > { %5220 = vmatpush.msrb.mxu3 %v4698_v2 }
 0x588   : > { %5221 = vmatpush.msrb.mxu3 %v4697_v18 }
 0x589   : > { %8332 = vmatmul.msk.f32.gmra.mxu1 %vm4386_vm14, %v5051_v3  ;;  %8335 = vmatmul.msk.f32.gmra.mxu3 %vm5089_vm2, %v4742_v20 }
 0x58a   : > { %5222 = vmatpush.msrb.mxu3 %v4696_v16 }
 0x58b   : > { %8338 = vmatmul.msk.f32.gmra.mxu2 %vm5089_vm2, %v4742_v20 }
 0x58c   : > { %5223 = vmatpush.msrb.mxu3 %v4695_v39  ;;  %v12864_v39 = vld [vmem:[%s15994_s13 + $0xc0] sm:$0xf] }
 0x58d   : > { %8557 = vmatpush.msk.msrb.mxu2 %vm1028_vm4, %v12864_v39 }
 0x58e   : > { %5224 = vmatpush.msrb.mxu3 %v4694_v29  ;;  %v12869_v29 = vld [vmem:[%s15994_s13 + $0xb0] sm:$0xff] }
 0x58f   : > { %5637 = vmatpush.msrb.mxu2 %v12869_v29 }
 0x590   : > { %5225 = vmatpush.msrb.mxu3 %v4693_v12 }
 0x592   : > { %5226 = vmatpush.msrb.mxu3 %v4692_v9  ;;  %v12885_v9 = vld [vmem:[%s15994_s13 + $0x90] sm:$0xff] }
 0x594   : > { %5227 = vmatpush.msrb.mxu3 %v4691_v37 }
 0x5d3   : > { %v4769_v56 = vpop.f32.mrf.mxu0 }
 0x5d4   : > { %v4775_v42 = vadd.f32 %v12758_v38, %v4769_v56  ;;  %v12892_v56 = vld [vmem:[%s15994_s13 + $0x80] sm:$0xff] }
 0x5db   : > { %v4772_v59 = vpop.f32.mrf.mxu0 }
 0x5dc   : > { %v4776_v51 = vadd.f32 %v12758_v38, %v4772_v59 }
 0x5de   : > { %v4804_v43 = vpop.f32.mrf.mxu1 }
 0x5df   : > { %v4810_v47 = vadd.f32 %v4804_v43, %v4775_v42 }
 0x5e3   : > { %v4909_v49 = vpop.f32.mrf.mxu0 }
 0x5e4   : > { %v4839_v32 = vpop.f32.mrf.mxu3 }
 0x5e5   : > { %v4845_v19 = vadd.f32 %v4839_v32, %v4810_v47  ;;  %v4874_v13 = vpop.f32.mrf.mxu2 }
 0x5e6   : > { %v4807_v0 = vpop.f32.mrf.mxu1 }
 0x5e7   : > { %v4880_v54 = vadd.f32 %v4874_v13, %v4845_v19  ;;  %v4811_v61 = vadd.f32 %v4807_v0, %v4776_v51  ;;  %v12948_v0 = vld [vmem:[%s15994_s13 + $0x30] sm:$0xff]  ;;  %v12955_v51 = vld [vmem:[%s15994_s13 + $0x20] sm:$0xff] }
 0x5e9   : > { %v4915_v50 = vadd.f32 %v4909_v49, %v4880_v54  ;;  %v12938_v54 = vld [vmem:[%s15994_s13 + $0x40] sm:$0xff] }
 0x5eb   : > { %vm4917_vm3 = vcmp.ge.f32.partialorder %v4915_v50, 0.0  ;;  %v4919_v60 = vmul.f32 0.01, %v4915_v50  ;;  %v4912_v34 = vpop.f32.mrf.mxu0 }
 0x5ec   : > { %v4842_v30 = vpop.f32.mrf.mxu3 }
 0x5ed   : > { %v4921_v4 = vsel %vm4917_vm3, %v4915_v50, %v4919_v60  ;;  %v4846_v45 = vadd.f32 %v4842_v30, %v4811_v61  ;;  %v4877_v11 = vpop.f32.mrf.mxu2  ;;  %v12960_v50 = vld [vmem:[%s15994_s13 + $0x180] sm:$0xff]  ;;  %v12965_v60 = vld [vmem:[%s15994_s13 + $0x188] sm:$0xff]  ;;  %v12972_v61 = vld [vmem:[%s15994_s13 + $0x10] sm:$0xff] }
 0x5ee   : > { %8344 = vmatmul.msk.f32.vlgmr.msrb.gmra.mxu3 %vm5089_vm2, %v4921_v4  ;;  %v4946_v14 = vpop.f32.mrf.mxu1  ;;  %16886 = vst [vmem:[#allocation45_spill] sm:$0xff] %v12965_v60  ;;  %v12977_v30 = vld [vmem:[%s15994_s13 + $0x170] sm:$0xff]  ;;  %v12982_v4 = vld [vmem:[%s15994_s13 + $0x178] sm:$0xff] }
 0x5ef   : > { %v4881_v28 = vadd.f32 %v4877_v11, %v4846_v45  ;;  %v4952_v12 = vadd.f32 %v12758_v38, %v4946_v14  ;;  %16887 = vst [vmem:[#allocation46_spill] sm:$0xff] %v12982_v4  ;;  %v12988_v45 = vld [vmem:[%s15994_s13] sm:$0xff]  ;;  %v13085_v14 = vld [vmem:[%s15994_s13 + $0x110] sm:$0xff] }
 0x5f0   : > { %v12993_v11 = vld [vmem:[%s15994_s13 + $0x160] sm:$0xff] }
 0x5f1   : > { %v4916_v31 = vadd.f32 %v4912_v34, %v4881_v28  ;;  %v13000_v28 = vld [vmem:[%s15994_s13 + $0x168] sm:$0xff]  ;;  %v13005_v34 = vld [vmem:[%s15994_s13 + $0x260] sm:$0xf] }
 0x5f2   : > { %16888 = vst [vmem:[#allocation30_spill] sm:$0xff] %v13000_v28 }
 0x5f3   : > { %vm4918_vm14 = vcmp.ge.f32.partialorder %v4916_v31, 0.0  ;;  %v4920_v48 = vmul.f32 0.01, %v4916_v31 }
 0x5f4   : > { %v4978_v5 = vpop.f32.mrf.mxu3 }
 0x5f5   : > { %v5010_v21 = vpop.f32.mrf.mxu2  ;;  %v4922_v44 = vsel %vm4918_vm14, %v4916_v31, %v4920_v48  ;;  %v13011_v31 = vld [vmem:[%s15994_s13 + $0x150] sm:$0xff]  ;;  %v13018_v48 = vld [vmem:[%s15994_s13 + $0x158] sm:$0xff] }
 0x5f6   : > { %8345 = vmatmul.msk.f32.gmra.mxu3 %vm5089_vm2, %v4922_v44  ;;  %v4949_v16 = vpop.f32.mrf.mxu1  ;;  %16889 = vst [vmem:[#allocation27_spill] sm:$0xff] %v13018_v48  ;;  %v13037_v44 = vld [vmem:[%s15994_s13 + $0x148] sm:$0xff] }
 0x5f7   : > { %v4953_v43 = vadd.f32 %v12758_v38, %v4949_v16  ;;  %16890 = vst [vmem:[#allocation25_spill] sm:$0xff] %v13037_v44  ;;  %v13121_v16 = vld [vmem:[%s15994_s13 + $0xf0] sm:$0xff] }
 0x5fc   : > { %v4981_v22 = vpop.f32.mrf.mxu3 }
 0x5fd   : > { %v5013_v6 = vpop.f32.mrf.mxu2 }
 0x5fe   : > { %v5074_v59 = vpop.f32.mrf.mxu1 }
 0x604   : > { %v5112_v55 = vpop.f32.mrf.mxu3 }
 0x605   : > { %v5118_v3 = vadd.f32 %v12843_v58, %v5112_v55  ;;  %v13055_v55 = vld [vmem:[%s15994_s13 + $0x138] sm:$0xff] }
 0x606   : > { %v12845_v25 = vpop.f32.mrf.mxu2  ;;  %v5077_v38 = vpop.f32.mrf.mxu1  ;;  %16891 = vst [vmem:[#allocation28_spill] sm:$0xff] %v13055_v55 }
 0x607   : > { %v5146_v41 = vadd.f32 %v12845_v25, %v5118_v3  ;;  %v13060_v3 = vld [vmem:[%s15994_s13 + $0x230] sm:$0xff] }
 0x609   : > { %v5150_v24 = vmul.f32 0.01, %v5146_v41  ;;  %vm5148_vm7 = vcmp.ge.f32.partialorder %v5146_v41, 0.0 }
 0x60b   : > { %v5152_v18 = vsel %vm5148_vm7, %v5146_v41, %v5150_v24  ;;  %v13073_v41 = vld [vmem:[%s15994_s13 + $0x128] sm:$0xff]  ;;  %v13103_v24 = vld [vmem:[%s15994_s13 + $0x100] sm:$0xff] }
 0x60c   : > { %v5115_v20 = vpop.f32.mrf.mxu3  ;;  %16892 = vst [vmem:[#allocation49_spill] sm:$0xff] %v13073_v41 }
 0x60d   : > { %v5119_v7 = vadd.f32 %v12843_v58, %v5115_v20  ;;  %v13067_v20 = vld [vmem:[%s15994_s13 + $0x120] sm:$0xff] }
 0x60e   : > { %v12850_v40 = vpop.f32.mrf.mxu2 }
 0x60f   : > { %v5147_v23 = vadd.f32 %v12850_v40, %v5119_v7  ;;  %v13078_v7 = vld [vmem:[%s15994_s13 + $0x220] sm:$0xff] }
 0x611   : > { %v5151_v36 = vmul.f32 0.01, %v5147_v23  ;;  %vm5149_vm6 = vcmp.ge.f32.partialorder %v5147_v23, 0.0 }
 0x613   : > { %v5153_v2 = vsel %vm5149_vm6, %v5147_v23, %v5151_v36  ;;  %v13091_v23 = vld [vmem:[%s15994_s13 + $0x118] sm:$0xff]  ;;  %v13096_v36 = vld [vmem:[%s15994_s13 + $0x210] sm:$0xff] }
 0x614   : > { %8339 = vmatpush.msk.msra.mxu0 %vm1028_vm4, %v5153_v2  ;;  %8341 = vmatpush.msk.msrb.mxu1 %vm1028_vm4, %v5153_v2  ;;  %16893 = vst [vmem:[#allocation29_spill] sm:$0xff] %v13091_v23  ;;  %v13109_v2 = vld [vmem:[%s15994_s13 + $0x108] sm:$0xff] }
 0x615   : > { %16894 = vst [vmem:[#allocation35_spill] sm:$0xff] %v13109_v2 }
 0x616   : > { %5175 = vmatpush.msra.mxu0 %v5152_v18  ;;  %5197 = vmatpush.msrb.mxu1 %v5152_v18  ;;  %v13114_v18 = vld [vmem:[%s15994_s13 + $0x200] sm:$0xff] }
 0x617   : > { %8340 = vmatmul.msk.f32.vlgmr.msra.gmra.mxu0 %vm5154_vm5, %v11779_v27  ;;  %8342 = vmatmul.msk.f32.vlgmr.msrb.gmra.mxu1 %vm5154_vm5, %v11828_v15 }
 0x618   : > { %8346 = vmatpush.msk.msrb.mxu0 %vm1028_vm4, %v12616_v46  ;;  %v12877_v46 = vld [vmem:[%s15994_s13 + $0xa0] sm:$0xff] }
 0x619   : > { %5638 = vmatpush.msrb.mxu2 %v12877_v46 }
 0x61a   : > { %5247 = vmatpush.msrb.mxu0 %v12631_v62  ;;  %v4984_v62 = vadd.f32 %v4978_v5, %v4952_v12  ;;  %v13023_v5 = vld [vmem:[%s15994_s13 + $0x250] sm:$0xff]  ;;  %v13127_v12 = vld [vmem:[%s15994_s13 + $0xf8] sm:$0xff] }
 0x61b   : > { %5639 = vmatpush.msrb.mxu2 %v12885_v9  ;;  %16895 = vst [vmem:[#allocation16_spill] sm:$0xff] %v13127_v12 }
 0x61c   : > { %5248 = vmatpush.msrb.mxu0 %v12643_v8  ;;  %v12899_v8 = vld [vmem:[%s15994_s13 + $0x70] sm:$0xff]  ;;  %v5016_v37 = vadd.f32 %v5010_v21, %v4984_v62  ;;  %v13031_v21 = vld [vmem:[%s15994_s13 + $0x140] sm:$0xff] }
 0x61d   : > { %5640 = vmatpush.msrb.mxu2 %v12892_v56  ;;  %v13132_v62 = vld [vmem:[%s15994_s13 + $0x1f0] sm:$0xff] }
 0x61e   : > { %5249 = vmatpush.msrb.mxu0 %v12656_v35  ;;  %v5042_v35 = vpop.f32.mrf.mxu0 }
 0x61f   : > { %5641 = vmatpush.msrb.mxu2 %v12899_v8  ;;  %v5048_v42 = vadd.f32 %v5042_v35, %v5016_v37  ;;  %v13139_v37 = vld [vmem:[%s15994_s13 + $0xe0] sm:$0xff]  ;;  %v13145_v35 = vld [vmem:[%s15994_s13 + $0xe8] sm:$0xff] }
 0x620   : > { %5250 = vmatpush.msrb.mxu0 %v12664_v10  ;;  %v4985_v10 = vadd.f32 %v4981_v22, %v4953_v43  ;;  %v13042_v22 = vld [vmem:[%s15994_s13 + $0x240] sm:$0xff]  ;;  %16896 = vst [vmem:[#allocation43_spill] sm:$0xff] %v13145_v35  ;;  %v13157_v43 = vld [vmem:[%s15994_s13 + $0xd0] sm:$0xff] }
 0x621   : > { %v5080_v47 = vadd.f32 %v5074_v59, %v5048_v42  ;;  %v13150_v59 = vld [vmem:[%s15994_s13 + $0x1e0] sm:$0xff]  ;;  %v13168_v42 = vld [vmem:[%s15994_s13 + $0x1d0] sm:$0xff] }
 0x622   : > { %5251 = vmatpush.msrb.mxu0 %v12680_v57  ;;  %v5017_v32 = vadd.f32 %v5013_v6, %v4985_v10  ;;  %v13049_v6 = vld [vmem:[%s15994_s13 + $0x130] sm:$0xff]  ;;  %v13163_v10 = vld [vmem:[%s15994_s13 + $0xd8] sm:$0xff] }
 0x623   : > { %v5084_v57 = vmul.f32 0.01, %v5080_v47  ;;  %vm5082_vm8 = vcmp.ge.f32.partialorder %v5080_v47, 0.0  ;;  %16897 = vst [vmem:[#allocation36_spill] sm:$0xff] %v13163_v10 }
 0x624   : > { %5252 = vmatpush.msrb.mxu0 %v12690_v53 }
 0x625   : > { %v5086_v53 = vsel %vm5082_vm8, %v5080_v47, %v5084_v57  ;;  %v13175_v47 = vld [vmem:[%s15994_s13 + $0x330] sm:$0xf]  ;;  %v13186_v57 = vld [vmem:[%s15994_s13 + $0x1c0] sm:$0xff] }
 0x626   : > { %5253 = vmatpush.msrb.mxu0 %v12704_v33  ;;  %v5045_v19 = vpop.f32.mrf.mxu0 }
 0x627   : > { %v5049_v13 = vadd.f32 %v5045_v19, %v5017_v32  ;;  %v13180_v32 = vld [vmem:[%s15994_s13 + $0x338] sm:$0xf]  ;;  %v13193_v19 = vld [vmem:[%s15994_s13 + $0x320] sm:$0xff] }
 0x628   : > { %5254 = vmatpush.msrb.mxu0 %v12712_v26  ;;  %16898 = vst [vmem:[#allocation31_spill] sm:$0xff] %v13180_v32 }
 0x629   : > { %v5081_v49 = vadd.f32 %v5077_v38, %v5049_v13  ;;  %v13198_v38 = vld [vmem:[%s15994_s13 + $0x328] sm:$0xff]  ;;  %v13210_v13 = vld [vmem:[%s15994_s13 + $0x1b0] sm:$0xff] }
 0x62a   : > { %5255 = vmatpush.msrb.mxu0 %v12729_v63  ;;  %v12917_v63 = vld [vmem:[%s15994_s13 + $0x60] sm:$0xff]  ;;  %16899 = vst [vmem:[#allocation37_spill] sm:$0xff] %v13198_v38 }
 0x62b   : > { %v5085_v33 = vmul.f32 0.01, %v5081_v49  ;;  %vm5083_vm9 = vcmp.ge.f32.partialorder %v5081_v49, 0.0  ;;  %5642 = vmatpush.msrb.mxu2 %v12917_v63 }
 0x62c   : > { %5256 = vmatpush.msrb.mxu0 %v12739_v1  ;;  %v12922_v1 = vld [vmem:[%s15994_s13 + $0x50] sm:$0xff] }
 0x62d   : > { %v5087_v26 = vsel %vm5083_vm9, %v5081_v49, %v5085_v33  ;;  %5643 = vmatpush.msrb.mxu2 %v12922_v1  ;;  %v13220_v49 = vld [vmem:[%s15994_s13 + $0x318] sm:$0xff]  ;;  %v13226_v33 = vld [vmem:[%s15994_s13 + $0x1a0] sm:$0xff] }
 0x62e   : > { %5257 = vmatpush.msrb.mxu0 %v12750_v52  ;;  %v12928_v52 = vld [vmem:[%s15994_s13 + $0x190] sm:$0xf]  ;;  %16900 = vst [vmem:[#allocation53_spill] sm:$0xff] %v13220_v49 }
 0x62f   : > { %8561 = vmatpush.msk.msra.mxu3 %vm1028_vm4, %v12928_v52  ;;  %5644 = vmatpush.msrb.mxu2 %v12938_v54 }
 0x630   : > { %5258 = vmatpush.msrb.mxu0 %v12763_v17  ;;  %v12933_v17 = vld [vmem:[%s15994_s13 + $0x198] sm:$0xf] }
 0x631   : > { %8347 = vmatmul.msk.f32.vlgmr.msrb.gmra.mxu0 %vm5089_vm2, %v5086_v53  ;;  %16885 = vst [vmem:[#allocation26_spill] sm:$0xff] %v12933_v17  ;;  %5645 = vmatpush.msrb.mxu2 %v12948_v0  ;;  %v13215_v53 = vld [vmem:[%s15994_s13 + $0x310] sm:$0xff] }
 0x632   : > { %8563 = vmatpush.msk.msra.mxu0 %vm1028_vm4, %v12933_v17  ;;  %5688 = vmatpush.msra.mxu3 %v12960_v50 }
 0x633   : > { %5646 = vmatpush.msrb.mxu2 %v12955_v51 }
 0x634   : > { %5708 = vmatpush.msra.mxu0 %v12965_v60  ;;  %5689 = vmatpush.msra.mxu3 %v12977_v30  ;;  %v13356_v60 = vld [vmem:[%s15994_s13 + $0x400] sm:$0xf] }
 0x635   : > { %5647 = vmatpush.msrb.mxu2 %v12972_v61  ;;  %16910 = vst [vmem:[#allocation40_spill] sm:$0xff] %v13356_v60 }
 0x636   : > { %5709 = vmatpush.msra.mxu0 %v12982_v4  ;;  %5690 = vmatpush.msra.mxu3 %v12993_v11 }
 0x637   : > { %5648 = vmatpush.msrb.mxu2 %v12988_v45 }
 0x638   : > { %5710 = vmatpush.msra.mxu0 %v13000_v28  ;;  %5691 = vmatpush.msra.mxu3 %v13011_v31 }
 0x639   : > { %8348 = vmatmul.msk.f32.gmra.mxu0 %vm5089_vm2, %v5087_v26  ;;  %8565 = vmatpush.msk.msra.mxu2 %vm1028_vm4, %v13005_v34  ;;  %v13233_v26 = vld [vmem:[%s15994_s13 + $0x300] sm:$0xff] }
 0x63a   : > { %5711 = vmatpush.msra.mxu0 %v13018_v48  ;;  %5692 = vmatpush.msra.mxu3 %v13031_v21  ;;  %v13340_v48 = vld [vmem:[%s15994_s13 + $0x270] sm:$0xff] }
 0x63b   : > { %5739 = vmatpush.msra.mxu2 %v13023_v5 }
 0x63c   : > { %5712 = vmatpush.msra.mxu0 %v13037_v44  ;;  %5693 = vmatpush.msra.mxu3 %v13049_v6  ;;  %v13328_v44 = vld [vmem:[%s15994_s13 + $0x280] sm:$0xff] }
 0x63d   : > { %5740 = vmatpush.msra.mxu2 %v13042_v22 }
 0x63e   : > { %5713 = vmatpush.msra.mxu0 %v13055_v55  ;;  %5694 = vmatpush.msra.mxu3 %v13067_v20  ;;  %v13316_v55 = vld [vmem:[%s15994_s13 + $0x290] sm:$0xff] }
 0x63f   : > { %5741 = vmatpush.msra.mxu2 %v13060_v3 }
 0x640   : > { %5714 = vmatpush.msra.mxu0 %v13073_v41  ;;  %5695 = vmatpush.msra.mxu3 %v13085_v14  ;;  %v13304_v41 = vld [vmem:[%s15994_s13 + $0x2a0] sm:$0xff] }
 0x641   : > { %5742 = vmatpush.msra.mxu2 %v13078_v7 }
 0x642   : > { %5715 = vmatpush.msra.mxu0 %v13091_v23  ;;  %5696 = vmatpush.msra.mxu3 %v13103_v24  ;;  %v13292_v23 = vld [vmem:[%s15994_s13 + $0x2b0] sm:$0xff] }
 0x643   : > { %5743 = vmatpush.msra.mxu2 %v13096_v36 }
 0x644   : > { %5716 = vmatpush.msra.mxu0 %v13109_v2  ;;  %5697 = vmatpush.msra.mxu3 %v13121_v16  ;;  %v13280_v2 = vld [vmem:[%s15994_s13 + $0x2c0] sm:$0xff] }
 0x645   : > { %5744 = vmatpush.msra.mxu2 %v13114_v18 }
 0x646   : > { %5717 = vmatpush.msra.mxu0 %v13127_v12  ;;  %5698 = vmatpush.msra.mxu3 %v13139_v37  ;;  %v13268_v12 = vld [vmem:[%s15994_s13 + $0x2d0] sm:$0xff] }
 0x647   : > { %5745 = vmatpush.msra.mxu2 %v13132_v62 }
 0x648   : > { %5718 = vmatpush.msra.mxu0 %v13145_v35  ;;  %5699 = vmatpush.msra.mxu3 %v13157_v43  ;;  %v13261_v35 = vld [vmem:[%s15994_s13 + $0x2e8] sm:$0xff] }
 0x649   : > { %5746 = vmatpush.msra.mxu2 %v13150_v59  ;;  %16903 = vst [vmem:[#allocation47_spill] sm:$0xff] %v13261_v35 }
 0x64a   : > { %5719 = vmatpush.msra.mxu0 %v13163_v10  ;;  %8569 = vmatpush.msk.msrb.mxu3 %vm1028_vm4, %v13175_v47  ;;  %v13256_v10 = vld [vmem:[%s15994_s13 + $0x2e0] sm:$0xff] }
 0x64b   : > { %5747 = vmatpush.msra.mxu2 %v13168_v42 }
 0x64c   : > { %8571 = vmatpush.msk.msrb.mxu0 %vm1028_vm4, %v13180_v32  ;;  %5790 = vmatpush.msrb.mxu3 %v13193_v19  ;;  %v13244_v32 = vld [vmem:[%s15994_s13 + $0x2f0] sm:$0xff] }
 0x64d   : > { %5748 = vmatpush.msra.mxu2 %v13186_v57 }
 0x64e   : > { %5810 = vmatpush.msrb.mxu0 %v13198_v38  ;;  %5791 = vmatpush.msrb.mxu3 %v13215_v53  ;;  %v13238_v38 = vld [vmem:[%s15994_s13 + $0x308] sm:$0xff] }
 0x64f   : > { %5749 = vmatpush.msra.mxu2 %v13210_v13  ;;  %16901 = vst [vmem:[#allocation38_spill] sm:$0xff] %v13238_v38 }
 0x650   : > { %5811 = vmatpush.msrb.mxu0 %v13220_v49  ;;  %v13249_v49 = vld [vmem:[%s15994_s13 + $0x2f8] sm:$0xff]  ;;  %5792 = vmatpush.msrb.mxu3 %v13233_v26 }
 0x651   : > { %5750 = vmatpush.msra.mxu2 %v13226_v33  ;;  %16902 = vst [vmem:[#allocation44_spill] sm:$0xff] %v13249_v49 }
 0x652   : > { %5812 = vmatpush.msrb.mxu0 %v13238_v38  ;;  %5793 = vmatpush.msrb.mxu3 %v13244_v32  ;;  %v13273_v38 = vld [vmem:[%s15994_s13 + $0x2d8] sm:$0xff] }
 0x653   : > { %16904 = vst [vmem:[#allocation39_spill] sm:$0xff] %v13273_v38 }
 0x654   : > { %5813 = vmatpush.msrb.mxu0 %v13249_v49  ;;  %5794 = vmatpush.msrb.mxu3 %v13256_v10  ;;  %v13285_v49 = vld [vmem:[%s15994_s13 + $0x2c8] sm:$0xff] }
 0x655   : > { %16905 = vst [vmem:[#allocation48_spill] sm:$0xff] %v13285_v49 }
 0x656   : > { %5814 = vmatpush.msrb.mxu0 %v13261_v35  ;;  %5795 = vmatpush.msrb.mxu3 %v13268_v12  ;;  %v13297_v35 = vld [vmem:[%s15994_s13 + $0x2b8] sm:$0xff] }
 0x657   : > { %16906 = vst [vmem:[#allocation50_spill] sm:$0xff] %v13297_v35 }
 0x658   : > { %5815 = vmatpush.msrb.mxu0 %v13273_v38  ;;  %5796 = vmatpush.msrb.mxu3 %v13280_v2  ;;  %v13309_v38 = vld [vmem:[%s15994_s13 + $0x2a8] sm:$0xff] }
 0x659   : > { %16907 = vst [vmem:[#allocation52_spill] sm:$0xff] %v13309_v38 }
 0x65a   : > { %5816 = vmatpush.msrb.mxu0 %v13285_v49  ;;  %5797 = vmatpush.msrb.mxu3 %v13292_v23  ;;  %v13321_v49 = vld [vmem:[%s15994_s13 + $0x298] sm:$0xff] }
 0x65b   : > { %16908 = vst [vmem:[#allocation13_spill] sm:$0xff] %v13321_v49 }
 0x65c   : > { %5817 = vmatpush.msrb.mxu0 %v13297_v35  ;;  %5798 = vmatpush.msrb.mxu3 %v13304_v41  ;;  %v13333_v35 = vld [vmem:[%s15994_s13 + $0x288] sm:$0xff] }
 0x65d   : > { %16909 = vst [vmem:[#allocation51_spill] sm:$0xff] %v13333_v35 }
 0x65e   : > { %5818 = vmatpush.msrb.mxu0 %v13309_v38  ;;  %5799 = vmatpush.msrb.mxu3 %v13316_v55  ;;  %v13345_v38 = vld [vmem:[%s15994_s13 + $0x278] sm:$0xff] }
 0x660   : > { %5819 = vmatpush.msrb.mxu0 %v13321_v49  ;;  %5800 = vmatpush.msrb.mxu3 %v13328_v44 }
 0x662   : > { %5820 = vmatpush.msrb.mxu0 %v13333_v35  ;;  %5801 = vmatpush.msrb.mxu3 %v13340_v48  ;;  %v13363_v35 = vld [vmem:[%s15994_s13 + $0x3f0] sm:$0xff] }
 0x663   : > { %16911 = vst [vmem:[#allocation41_spill] sm:$0xff] %v13363_v35 }
 0x664   : > { %5821 = vmatpush.msrb.mxu0 %v13345_v38 }
 0x694   : > { %v5177_v28 = vpop.f32.mrf.mxu0  ;;  %v5199_v49 = vpop.f32.mrf.mxu1 }
 0x695   : > { %v13351_v4 = vmax.f32 %v5177_v28, %v5199_v49  ;;  %v13371_v28 = vld [vmem:[%s15994_s13 + $0x3e0] sm:$0xff]  ;;  %v13381_v49 = vld [vmem:[%s15994_s13 + $0x3d0] sm:$0xff] }
 0x697   : > { %8558 = vmatmul.msk.f32.vlgmr.msrb.gmra.mxu2 %vm5089_vm2, %v13351_v4  ;;  %v5675_v17 = vrot.slane %v13351_v4, 1 }
 0x698   : > { %8573 = vmatpush.msk.msrb.mxu2 %vm1028_vm4, %v13356_v60  ;;  %v16169_v60 = vrot.slane %v13351_v4, 2 }
 0x699   : > { %8562 = vmatmul.msk.f32.vlgmr.msra.gmra.mxu3 %vm5089_vm2, %v5675_v17  ;;  %8564 = vmatmul.msk.f32.vlgmr.msra.gmra.mxu0 %vm5089_vm2, %v5675_v17  ;;  %v13389_v17 = vld [vmem:[%s15994_s13 + $0x3c0] sm:$0xff] }
 0x69a   : > { %5841 = vmatpush.msrb.mxu2 %v13363_v35  ;;  %8577 = vmatpush.msk.msra.mxu3 %vm1028_vm4, %v12864_v39  ;;  %v5777_v35 = vrot.slane %v13351_v4, 3  ;;  %v13397_v39 = vld [vmem:[%s15994_s13 + $0x3b0] sm:$0xff] }
 0x69b   : > { %16912 = vst [vmem:[#allocation12_spill] sm:$0xff] %v13397_v39 }
 0x69c   : > { %5842 = vmatpush.msrb.mxu2 %v13371_v28  ;;  %5892 = vmatpush.msra.mxu3 %v12869_v29  ;;  %v13407_v29 = vld [vmem:[%s15994_s13 + $0x3a0] sm:$0xff] }
 0x69d   : > { %16913 = vst [vmem:[#allocation21_spill] sm:$0xff] %v13407_v29 }
 0x69e   : > { %5843 = vmatpush.msrb.mxu2 %v13381_v49  ;;  %5893 = vmatpush.msra.mxu3 %v12877_v46  ;;  %v13416_v46 = vld [vmem:[%s15994_s13 + $0x390] sm:$0xff] }
 0x69f   : > { %8566 = vmatmul.msk.f32.vlgmr.msra.gmra.mxu2 %vm5089_vm2, %v16169_v60  ;;  %16914 = vst [vmem:[#allocation32_spill] sm:$0xff] %v13416_v46  ;;  %v5229_v60 = vpop.f32.mrf.mxu3 }
 0x6a0   : > { %5844 = vmatpush.msrb.mxu2 %v13389_v17  ;;  %5894 = vmatpush.msra.mxu3 %v12885_v9  ;;  %v13422_v9 = vld [vmem:[%s15994_s13 + $0xc8] sm:$0xf] }
 0x6a1   : > { %8570 = vmatmul.msk.f32.vlgmr.msrb.gmra.mxu3 %vm5089_vm2, %v5777_v35  ;;  %8572 = vmatmul.msk.f32.vlgmr.msrb.gmra.mxu0 %vm5089_vm2, %v5777_v35  ;;  %v13428_v35 = vld [vmem:[%s15994_s13 + $0x380] sm:$0xff] }
 0x6a2   : > { %5845 = vmatpush.msrb.mxu2 %v13397_v39  ;;  %5895 = vmatpush.msra.mxu3 %v12892_v56  ;;  %16915 = vst [vmem:[#allocation18_spill] sm:$0xff] %v13428_v35  ;;  %v13436_v56 = vld [vmem:[%s15994_s13 + $0xb8] sm:$0xff]  ;;  %v16178_v39 = vrot.slane %v13351_v4, 4 }
 0x6a3   : > { %8579 = vmatpush.msk.msra.mxu0 %vm1028_vm4, %v13422_v9 }
 0x6a4   : > { %5846 = vmatpush.msrb.mxu2 %v13407_v29  ;;  %5896 = vmatpush.msra.mxu3 %v12899_v8  ;;  %v13442_v8 = vld [vmem:[%s15994_s13 + $0x370] sm:$0xff] }
 0x6a5   : > { %16916 = vst [vmem:[#allocation17_spill] sm:$0xff] %v13442_v8  ;;  %5912 = vmatpush.msra.mxu0 %v13436_v56 }
 0x6a6   : > { %5847 = vmatpush.msrb.mxu2 %v13416_v46  ;;  %5897 = vmatpush.msra.mxu3 %v12917_v63  ;;  %v13449_v46 = vld [vmem:[%s15994_s13 + $0xa8] sm:$0xff]  ;;  %v13455_v63 = vld [vmem:[%s15994_s13 + $0x360] sm:$0xff] }
 0x6a7   : > { %16917 = vst [vmem:[#allocation15_spill] sm:$0xff] %v13455_v63  ;;  %5913 = vmatpush.msra.mxu0 %v13449_v46 }
 0x6a8   : > { %5848 = vmatpush.msrb.mxu2 %v13428_v35  ;;  %5898 = vmatpush.msra.mxu3 %v12922_v1  ;;  %v13462_v35 = vld [vmem:[%s15994_s13 + $0x98] sm:$0xff]  ;;  %v13468_v1 = vld [vmem:[%s15994_s13 + $0x350] sm:$0xff] }
 0x6a9   : > { %16918 = vst [vmem:[#allocation34_spill] sm:$0xff] %v13468_v1  ;;  %5914 = vmatpush.msra.mxu0 %v13462_v35 }
 0x6aa   : > { %5849 = vmatpush.msrb.mxu2 %v13442_v8  ;;  %5899 = vmatpush.msra.mxu3 %v12938_v54  ;;  %v13475_v8 = vld [vmem:[%s15994_s13 + $0x88] sm:$0xff]  ;;  %v13481_v54 = vld [vmem:[%s15994_s13 + $0x340] sm:$0xff] }
 0x6ab   : > { %16919 = vst [vmem:[#allocation42_spill] sm:$0xff] %v13481_v54  ;;  %5915 = vmatpush.msra.mxu0 %v13475_v8 }
 0x6ac   : > { %5850 = vmatpush.msrb.mxu2 %v13455_v63  ;;  %5900 = vmatpush.msra.mxu3 %v12948_v0  ;;  %v13488_v63 = vld [vmem:[%s15994_s13 + $0x78] sm:$0xff]  ;;  %v13497_v0 = vld [vmem:[%s15994_s13 + $0x68] sm:$0xff] }
 0x6ad   : > { %5916 = vmatpush.msra.mxu0 %v13488_v63 }
 0x6ae   : > { %v5260_v29 = vpop.f32.mrf.mxu0  ;;  %5851 = vmatpush.msrb.mxu2 %v13468_v1  ;;  %5901 = vmatpush.msra.mxu3 %v12955_v51  ;;  %v5235_v1 = vadd.f32 %v12843_v58, %v5229_v60  ;;  %v5232_v51 = vpop.f32.mrf.mxu3  ;;  %v13519_v60 = vld [vmem:[%s15994_s13 + $0x48] sm:$0xff] }
 0x6af   : > { %5917 = vmatpush.msra.mxu0 %v13497_v0 }
 0x6b0   : > { %5852 = vmatpush.msrb.mxu2 %v13481_v54  ;;  %5902 = vmatpush.msra.mxu3 %v12972_v61  ;;  %v13508_v54 = vld [vmem:[%s15994_s13 + $0x58] sm:$0xff]  ;;  %v5266_v61 = vadd.f32 %v5260_v29, %v5235_v1  ;;  %v16934_v1 = vld [vmem:[#allocation36_spill] sm:$0xff] }
 0x6b1   : > { %8574 = vmatmul.msk.f32.vlgmr.msrb.gmra.mxu2 %vm5089_vm2, %v16178_v39  ;;  %5918 = vmatpush.msra.mxu0 %v13508_v54  ;;  %v5236_v39 = vadd.f32 %v12843_v58, %v5232_v51  ;;  %v13537_v58 = vld [vmem:[%s15994_s13 + $0x28] sm:$0xff] }
 0x6b2   : > { %8581 = vmatpush.msk.msra.mxu2 %vm1028_vm4, %v12928_v52  ;;  %5903 = vmatpush.msra.mxu3 %v12988_v45  ;;  %v13528_v45 = vld [vmem:[%s15994_s13 + $0x38] sm:$0xff]  ;;  %v16937_v51 = vld [vmem:[#allocation53_spill] sm:$0xff] }
 0x6b3   : > { %5919 = vmatpush.msra.mxu0 %v13519_v60 }
 0x6b4   : > { %8585 = vmatpush.msk.msrb.mxu3 %vm1028_vm4, %v13005_v34  ;;  %5937 = vmatpush.msra.mxu2 %v12960_v50  ;;  %v5268_v34 = vadd.f32 %v5266_v61, %v12845_v25  ;;  %v13546_v25 = vld [vmem:[%s15994_s13 + $0x18] sm:$0xff] }
 0x6b5   : > { %5920 = vmatpush.msra.mxu0 %v13528_v45  ;;  %v16938_v61 = vld [vmem:[#allocation38_spill] sm:$0xff] }
 0x6b6   : > { %5982 = vmatpush.msrb.mxu3 %v13023_v5  ;;  %v5263_v52 = vpop.f32.mrf.mxu0  ;;  %5938 = vmatpush.msra.mxu2 %v12977_v30  ;;  %v5272_v5 = vmul.f32 0.01, %v5268_v34  ;;  %vm5270_vm13 = vcmp.ge.f32.partialorder %v5268_v34, 0.0 }
 0x6b7   : > { %v5267_v29 = vadd.f32 %v5263_v52, %v5236_v39  ;;  %5921 = vmatpush.msra.mxu0 %v13537_v58  ;;  %v16926_v39 = vld [vmem:[#allocation27_spill] sm:$0xff] }
 0x6b8   : > { %5983 = vmatpush.msrb.mxu3 %v13042_v22  ;;  %5939 = vmatpush.msra.mxu2 %v12993_v11  ;;  %v5274_v22 = vsel %vm5270_vm13, %v5268_v34, %v5272_v5  ;;  %v16940_v52 = vld [vmem:[#allocation47_spill] sm:$0xff]  ;;  %v16942_v34 = vld [vmem:[#allocation48_spill] sm:$0xff] }
 0x6b9   : > { %v5269_v50 = vadd.f32 %v5267_v29, %v12850_v40  ;;  %5922 = vmatpush.msra.mxu0 %v13546_v25  ;;  %v13554_v40 = vld [vmem:[%s15994_s13 + $0x8] sm:$0xff]  ;;  %v16943_v29 = vld [vmem:[#allocation50_spill] sm:$0xff]  ;;  %v16946_v5 = vld [vmem:[#allocation51_spill] sm:$0xff] }
 0x6ba   : > { %5984 = vmatpush.msrb.mxu3 %v13060_v3  ;;  %5940 = vmatpush.msra.mxu2 %v13011_v31  ;;  %v13563_v31 = vld [vmem:[%s15994_s13 + $0x268] sm:$0xf]  ;;  %v8398_v3 = vld [vmem:[%s15994_s13 + $0x238] sm:$0xff] }
 0x6bb   : > { %vm5271_vm11 = vcmp.ge.f32.partialorder %v5269_v50, 0.0  ;;  %v5273_v30 = vmul.f32 0.01, %v5269_v50  ;;  %5923 = vmatpush.msra.mxu0 %v13554_v40 }
 0x6bc   : > { %5985 = vmatpush.msrb.mxu3 %v13078_v7  ;;  %5941 = vmatpush.msra.mxu2 %v13031_v21  ;;  %v13572_v21 = vld [vmem:[%s15994_s13 + $0x258] sm:$0xff] }
 0x6bd   : > { %v5275_v11 = vsel %vm5271_vm11, %v5269_v50, %v5273_v30  ;;  %8587 = vmatpush.msk.msrb.mxu0 %vm1028_vm4, %v13563_v31  ;;  %v8394_v7 = vld [vmem:[%s15994_s13 + $0x218] sm:$0xff]  ;;  %v16944_v50 = vld [vmem:[#allocation52_spill] sm:$0xff]  ;;  %v5612_v30 = vld [vmem:[%s15997_s16] sm:$0x3] }
 0x6be   : > { %5986 = vmatpush.msrb.mxu3 %v13096_v36  ;;  %8349 = vmatpush.msk.msra.mxu1 %vm1028_vm4, %v5275_v11  ;;  %v8390_v36 = vld [vmem:[%s15994_s13 + $0x1f8] sm:$0xff] }
 0x6bf   : > { %5942 = vmatpush.msra.mxu2 %v13049_v6  ;;  %6002 = vmatpush.msrb.mxu0 %v13572_v21  ;;  %v8400_v6 = vld [vmem:[%s15994_s13 + $0x248] sm:$0xff] }
 0x6c0   : > { %5987 = vmatpush.msrb.mxu3 %v13114_v18  ;;  %5294 = vmatpush.msra.mxu1 %v5274_v22  ;;  %v8386_v18 = vld [vmem:[%s15994_s13 + $0x1d8] sm:$0xff] }
 0x6c1   : > { %5943 = vmatpush.msra.mxu2 %v13067_v20  ;;  %8350 = vmatmul.msk.f32.vlgmr.msra.gmra.mxu1 %vm5154_vm5, %v11779_v27  ;;  %v8396_v20 = vld [vmem:[%s15994_s13 + $0x228] sm:$0xff] }
 0x6c2   : > { %8351 = vmatpush.msk.msrb.mxu1 %vm1028_vm4, %v5275_v11  ;;  %6003 = vmatpush.msrb.mxu0 %v8400_v6 }
 0x6c3   : > { %5944 = vmatpush.msra.mxu2 %v13085_v14  ;;  %5988 = vmatpush.msrb.mxu3 %v13132_v62  ;;  %v8392_v14 = vld [vmem:[%s15994_s13 + $0x208] sm:$0xff]  ;;  %v8382_v62 = vld [vmem:[%s15994_s13 + $0x1b8] sm:$0xff] }
 0x6c4   : > { %5314 = vmatpush.msrb.mxu1 %v5274_v22  ;;  %6004 = vmatpush.msrb.mxu0 %v8398_v3 }
 0x6c5   : > { %5945 = vmatpush.msra.mxu2 %v13103_v24  ;;  %5989 = vmatpush.msrb.mxu3 %v13150_v59  ;;  %v8388_v24 = vld [vmem:[%s15994_s13 + $0x1e8] sm:$0xff] }
 0x6c6   : > { %8559 = vmatpush.msk.msra.mxu1 %vm1028_vm4, %v13422_v9  ;;  %6005 = vmatpush.msrb.mxu0 %v8396_v20  ;;  %v13700_v59 = vld [vmem:[%s15994_s13 + $0x3a8] sm:$0xff] }
 0x6c7   : > { %5946 = vmatpush.msra.mxu2 %v13121_v16  ;;  %5990 = vmatpush.msrb.mxu3 %v13168_v42  ;;  %v8384_v16 = vld [vmem:[%s15994_s13 + $0x1c8] sm:$0xff]  ;;  %v13718_v42 = vld [vmem:[%s15994_s13 + $0x378] sm:$0xff] }
 0x6c8   : > { %5657 = vmatpush.msra.mxu1 %v13436_v56  ;;  %6006 = vmatpush.msrb.mxu0 %v8394_v7  ;;  %v16928_v9 = vld [vmem:[#allocation28_spill] sm:$0xff]  ;;  %v16931_v56 = vld [vmem:[#allocation35_spill] sm:$0xff] }
 0x6c9   : > { %5947 = vmatpush.msra.mxu2 %v13139_v37  ;;  %8352 = vmatmul.msk.f32.vlgmr.msrb.gmra.mxu1 %vm5154_vm5, %v11828_v15  ;;  %v8380_v37 = vld [vmem:[%s15994_s13 + $0x1a8] sm:$0xff] }
 0x6ca   : > { %5658 = vmatpush.msra.mxu1 %v13449_v46  ;;  %6007 = vmatpush.msrb.mxu0 %v8392_v14  ;;  %v16927_v46 = vld [vmem:[#allocation25_spill] sm:$0xff] }
 0x6cb   : > { %5948 = vmatpush.msra.mxu2 %v13157_v43  ;;  %5991 = vmatpush.msrb.mxu3 %v13186_v57  ;;  %v13706_v43 = vld [vmem:[%s15994_s13 + $0x398] sm:$0xff]  ;;  %v13736_v57 = vld [vmem:[%s15994_s13 + $0x348] sm:$0xff] }
 0x6cc   : > { %5659 = vmatpush.msra.mxu1 %v13462_v35  ;;  %6008 = vmatpush.msrb.mxu0 %v8390_v36  ;;  %v16929_v35 = vld [vmem:[#allocation49_spill] sm:$0xff] }
 0x6cd   : > { %8589 = vmatpush.msk.msrb.mxu2 %vm1028_vm4, %v13175_v47  ;;  %5992 = vmatpush.msrb.mxu3 %v13210_v13  ;;  %v13724_v47 = vld [vmem:[%s15994_s13 + $0x368] sm:$0xff]  ;;  %v16922_v13 = vld [vmem:[#allocation26_spill] sm:$0xff] }
 0x6ce   : > { %5660 = vmatpush.msra.mxu1 %v13475_v8  ;;  %6009 = vmatpush.msrb.mxu0 %v8388_v24  ;;  %v16932_v8 = vld [vmem:[#allocation16_spill] sm:$0xff] }
 0x6cf   : > { %6027 = vmatpush.msrb.mxu2 %v13193_v19  ;;  %5993 = vmatpush.msrb.mxu3 %v13226_v33  ;;  %v16921_v19 = vrot.slane %v13351_v4, 4  ;;  %v16924_v33 = vld [vmem:[#allocation46_spill] sm:$0xff] }
 0x6d0   : > { %5661 = vmatpush.msra.mxu1 %v13488_v63  ;;  %6010 = vmatpush.msrb.mxu0 %v8386_v18  ;;  %v16933_v63 = vld [vmem:[#allocation43_spill] sm:$0xff] }
 0x6d1   : > { %6028 = vmatpush.msrb.mxu2 %v13215_v53  ;;  %v16923_v53 = vld [vmem:[#allocation45_spill] sm:$0xff] }
 0x6d2   : > { %5662 = vmatpush.msra.mxu1 %v13497_v0  ;;  %6011 = vmatpush.msrb.mxu0 %v8384_v16  ;;  %v16936_v0 = vld [vmem:[#allocation37_spill] sm:$0xff] }
 0x6d3   : > { %6029 = vmatpush.msrb.mxu2 %v13233_v26  ;;  %v16925_v26 = vld [vmem:[#allocation30_spill] sm:$0xff] }
 0x6d4   : > { %5663 = vmatpush.msra.mxu1 %v13508_v54  ;;  %6012 = vmatpush.msrb.mxu0 %v8382_v62  ;;  %v16935_v54 = vld [vmem:[#allocation31_spill] sm:$0xff] }
 0x6d5   : > { %6030 = vmatpush.msrb.mxu2 %v13244_v32  ;;  %v13730_v32 = vld [vmem:[%s15994_s13 + $0x358] sm:$0xff] }
 0x6d6   : > { %5664 = vmatpush.msra.mxu1 %v13519_v60  ;;  %6013 = vmatpush.msrb.mxu0 %v8380_v37  ;;  %v16939_v60 = vld [vmem:[#allocation44_spill] sm:$0xff] }
 0x6d7   : > { %6031 = vmatpush.msrb.mxu2 %v13256_v10  ;;  %v13712_v10 = vld [vmem:[%s15994_s13 + $0x388] sm:$0xff] }
 0x6d8   : > { %5665 = vmatpush.msra.mxu1 %v13528_v45  ;;  %v16941_v45 = vld [vmem:[#allocation39_spill] sm:$0xff] }
 0x6d9   : > { %6032 = vmatpush.msrb.mxu2 %v13268_v12  ;;  %v13694_v12 = vld [vmem:[%s15994_s13 + $0x3b8] sm:$0xff] }
 0x6da   : > { %5666 = vmatpush.msra.mxu1 %v13537_v58 }
 0x6db   : > { %6033 = vmatpush.msrb.mxu2 %v13280_v2  ;;  %v13688_v2 = vld [vmem:[%s15994_s13 + $0x3c8] sm:$0xff] }
 0x6dc   : > { %5667 = vmatpush.msra.mxu1 %v13546_v25  ;;  %v16945_v25 = vld [vmem:[#allocation13_spill] sm:$0xff] }
 0x6dd   : > { %6034 = vmatpush.msrb.mxu2 %v13292_v23  ;;  %v13682_v23 = vld [vmem:[%s15994_s13 + $0x3d8] sm:$0xff] }
 0x6de   : > { %5668 = vmatpush.msra.mxu1 %v13554_v40  ;;  %v13773_v40 = vperm.slane %v5612_v30, 0 }
 0x6df   : > { %6035 = vmatpush.msrb.mxu2 %v13304_v41  ;;  %8560 = vmatmul.msk.f32.vlgmr.msra.gmra.mxu1 %vm5089_vm2, %v13351_v4  ;;  %v13676_v41 = vld [vmem:[%s15994_s13 + $0x3e8] sm:$0xff] }
 0x6e0   : > { %8567 = vmatpush.msk.msrb.mxu1 %vm1028_vm4, %v13563_v31  ;;  %v6118_v31 = vmul.f32 0.01, %v13773_v40  ;;  %vm6116_vm15 = vcmp.ge.f32.partialorder %v13773_v40, 0.0 }
 0x6e1   : > { %6036 = vmatpush.msrb.mxu2 %v13316_v55  ;;  %v13661_v55 = vld [vmem:[%s15994_s13 + $0x408] sm:$0xf] }
 0x6e2   : > { %5759 = vmatpush.msrb.mxu1 %v13572_v21 }
 0x6e3   : > { %6037 = vmatpush.msrb.mxu2 %v13328_v44  ;;  %v16920_v44 = vrot.slane %v13351_v4, 2  ;;  %v16930_v4 = vld [vmem:[#allocation29_spill] sm:$0xff] }
 0x6e4   : > { %5760 = vmatpush.msrb.mxu1 %v8400_v6  ;;  %v16947_v6 = vld [vmem:[#allocation40_spill] sm:$0xff] }
 0x6e5   : > { %6038 = vmatpush.msrb.mxu2 %v13340_v48  ;;  %v13669_v48 = vld [vmem:[%s15994_s13 + $0x3f8] sm:$0xff] }
 0x6e6   : > { %5761 = vmatpush.msrb.mxu1 %v8398_v3  ;;  %v13790_v3 = vperm.slane %v5612_v30, 1  ;;  %v14061_v30 = vld [vmem:[%s15996_s15 + $0x200] sm:$0xff] }
 0x6e8   : > { %5762 = vmatpush.msrb.mxu1 %v8396_v20  ;;  %v16948_v20 = vld [vmem:[#allocation41_spill] sm:$0xff] }
 0x6ea   : > { %5763 = vmatpush.msrb.mxu1 %v8394_v7  ;;  %v6119_v7 = vmul.f32 0.01, %v13790_v3 }
 0x6ec   : > { %5764 = vmatpush.msrb.mxu1 %v8392_v14 }
 0x6ee   : > { %5765 = vmatpush.msrb.mxu1 %v8390_v36 }
 0x6f0   : > { %5766 = vmatpush.msrb.mxu1 %v8388_v24 }
 0x6f2   : > { %5767 = vmatpush.msrb.mxu1 %v8386_v18  ;;  %v16950_v18 = vld [vmem:[#allocation21_spill] sm:$0xff] }
 0x6f4   : > { %5768 = vmatpush.msrb.mxu1 %v8384_v16  ;;  %v13832_v16 = vld [vmem:[%s15996_s15 + $0x2f0] sm:$0xff] }
 0x6f6   : > { %5769 = vmatpush.msrb.mxu1 %v8382_v62  ;;  %v16951_v62 = vld [vmem:[#allocation32_spill] sm:$0xff] }
 0x6f8   : > { %5770 = vmatpush.msrb.mxu1 %v8380_v37  ;;  %v13840_v37 = vld [vmem:[%s15996_s15 + $0x2e0] sm:$0xff] }
 0x6f9   : > { %8568 = vmatmul.msk.f32.vlgmr.msrb.gmra.mxu1 %vm5089_vm2, %v16920_v44  ;;  %v13848_v44 = vld [vmem:[%s15996_s15 + $0x2d0] sm:$0xff] }
 0x6fa   : > { %8575 = vmatpush.msk.msra.mxu1 %vm1028_vm4, %v13661_v55 }
 0x6fc   : > { %5861 = vmatpush.msra.mxu1 %v13669_v48 }
 0x6fe   : > { %5862 = vmatpush.msra.mxu1 %v13676_v41 }
 0x700   : > { %5863 = vmatpush.msra.mxu1 %v13682_v23 }
 0x702   : > { %5864 = vmatpush.msra.mxu1 %v13688_v2 }
 0x704   : > { %5865 = vmatpush.msra.mxu1 %v13694_v12 }
 0x706   : > { %5866 = vmatpush.msra.mxu1 %v13700_v59 }
 0x708   : > { %5867 = vmatpush.msra.mxu1 %v13706_v43 }
 0x70a   : > { %5868 = vmatpush.msra.mxu1 %v13712_v10 }
 0x70c   : > { %5869 = vmatpush.msra.mxu1 %v13718_v42 }
 0x70e   : > { %5870 = vmatpush.msra.mxu1 %v13724_v47 }
 0x710   : > { %5871 = vmatpush.msra.mxu1 %v13730_v32 }
 0x712   : > { %5872 = vmatpush.msra.mxu1 %v13736_v57 }
 0x713   : > { %8576 = vmatmul.msk.f32.vlgmr.msra.gmra.mxu1 %vm5089_vm2, %v16921_v19  ;;  %v13909_v19 = vld [vmem:[%s15996_s15 + $0x290] sm:$0xff] }
 0x714   : > { %8583 = vmatpush.msk.msrb.mxu1 %vm1028_vm4, %v16922_v13  ;;  %v13915_v13 = vld [vmem:[%s15996_s15 + $0x260] sm:$0xff] }
 0x716   : > { %5957 = vmatpush.msrb.mxu1 %v16923_v53  ;;  %v13921_v53 = vld [vmem:[%s15996_s15 + $0x410] sm:$0xff] }
 0x718   : > { %5958 = vmatpush.msrb.mxu1 %v16924_v33  ;;  %v13927_v33 = vld [vmem:[%s15996_s15 + $0x2f8] sm:$0xff] }
 0x719   : > { %16959 = vst [vmem:[#allocation24_spill] sm:$0xff] %v13927_v33 }
 0x71a   : > { %5959 = vmatpush.msrb.mxu1 %v16925_v26  ;;  %v13934_v26 = vld [vmem:[%s15996_s15 + $0x288] sm:$0xff] }
 0x71b   : > { %16960 = vst [vmem:[#allocation14_spill] sm:$0xff] %v13934_v26 }
 0x71c   : > { %5960 = vmatpush.msrb.mxu1 %v16926_v39  ;;  %v13940_v39 = vld [vmem:[%s15996_s15 + $0x250] sm:$0xff] }
 0x71e   : > { %5961 = vmatpush.msrb.mxu1 %v16927_v46  ;;  %v13946_v46 = vld [vmem:[%s15996_s15 + $0x400] sm:$0xff] }
 0x720   : > { %5962 = vmatpush.msrb.mxu1 %v16928_v9  ;;  %v13952_v9 = vld [vmem:[%s15996_s15 + $0x2e8] sm:$0xff] }
 0x721   : > { %16961 = vst [vmem:[#allocation22_spill] sm:$0xff] %v13952_v9 }
 0x722   : > { %5963 = vmatpush.msrb.mxu1 %v16929_v35  ;;  %v13958_v35 = vld [vmem:[%s15996_s15 + $0x278] sm:$0xff] }
 0x723   : > { %16962 = vst [vmem:[#allocation23_spill] sm:$0xff] %v13958_v35 }
 0x724   : > { %5964 = vmatpush.msrb.mxu1 %v16930_v4  ;;  %v13964_v4 = vld [vmem:[%s15996_s15 + $0x240] sm:$0xff] }
 0x726   : > { %5965 = vmatpush.msrb.mxu1 %v16931_v56  ;;  %v13969_v56 = vld [vmem:[%s15996_s15 + $0x3f0] sm:$0xff] }
 0x728   : > { %5966 = vmatpush.msrb.mxu1 %v16932_v8  ;;  %v13976_v8 = vld [vmem:[%s15996_s15 + $0x2d8] sm:$0xff] }
 0x729   : > { %16963 = vst [vmem:[#allocation20_spill] sm:$0xff] %v13976_v8 }
 0x72a   : > { %5967 = vmatpush.msrb.mxu1 %v16933_v63  ;;  %v13982_v63 = vld [vmem:[%s15996_s15 + $0x268] sm:$0xff] }
 0x72b   : > { %16964 = vst [vmem:[#allocation26_spill] sm:$0xff] %v13982_v63 }
 0x72c   : > { %5968 = vmatpush.msrb.mxu1 %v16934_v1  ;;  %v13988_v1 = vld [vmem:[%s15996_s15 + $0x230] sm:$0xff] }
 0x72e   : > { %8591 = vmatpush.msk.msra.mxu1 %vm1028_vm4, %v16935_v54  ;;  %v13993_v54 = vld [vmem:[%s15996_s15 + $0x3e0] sm:$0xff] }
 0x730   : > { %6047 = vmatpush.msra.mxu1 %v16936_v0  ;;  %v14000_v0 = vld [vmem:[%s15996_s15 + $0x2c8] sm:$0xff] }
 0x731   : > { %16965 = vst [vmem:[#allocation45_spill] sm:$0xff] %v14000_v0 }
 0x732   : > { %6048 = vmatpush.msra.mxu1 %v16937_v51  ;;  %v14006_v51 = vld [vmem:[%s15996_s15 + $0x258] sm:$0xff] }
 0x733   : > { %16966 = vst [vmem:[#allocation46_spill] sm:$0xff] %v14006_v51 }
 0x734   : > { %6049 = vmatpush.msra.mxu1 %v16938_v61  ;;  %v14012_v61 = vld [vmem:[%s15996_s15 + $0x220] sm:$0xff] }
 0x736   : > { %6050 = vmatpush.msra.mxu1 %v16939_v60  ;;  %v14019_v60 = vld [vmem:[%s15996_s15 + $0x2b8] sm:$0xff] }
 0x737   : > { %16967 = vst [vmem:[#allocation30_spill] sm:$0xff] %v14019_v60 }
 0x738   : > { %6051 = vmatpush.msra.mxu1 %v16940_v52  ;;  %v14025_v52 = vld [vmem:[%s15996_s15 + $0x3d0] sm:$0xff] }
 0x73a   : > { %6052 = vmatpush.msra.mxu1 %v16941_v45  ;;  %v5606_v45 = vld [vmem:[%s15995_s14] sm:$0x3] }
 0x73c   : > { %6053 = vmatpush.msra.mxu1 %v16942_v34  ;;  %v14034_v34 = vld [vmem:[%s15996_s15 + $0x210] sm:$0xff] }
 0x73e   : > { %6054 = vmatpush.msra.mxu1 %v16943_v29  ;;  %v5296_v58 = vpop.f32.mrf.mxu1  ;;  %v14040_v29 = vld [vmem:[%s15996_s15 + $0x248] sm:$0xff] }
 0x73f   : > { %16968 = vst [vmem:[#allocation27_spill] sm:$0xff] %v14040_v29 }
 0x740   : > { %6055 = vmatpush.msra.mxu1 %v16944_v50  ;;  %v14048_v50 = vld [vmem:[%s15996_s15 + $0x2a8] sm:$0xff] }
 0x741   : > { %16969 = vst [vmem:[#allocation25_spill] sm:$0xff] %v14048_v50 }
 0x742   : > { %6056 = vmatpush.msra.mxu1 %v16945_v25  ;;  %v14055_v25 = vld [vmem:[%s15996_s15 + $0x3c0] sm:$0xff] }
 0x744   : > { %6057 = vmatpush.msra.mxu1 %v16946_v5  ;;  %v14067_v5 = vld [vmem:[%s15996_s15 + $0x238] sm:$0xff] }
 0x745   : > { %16970 = vst [vmem:[#allocation28_spill] sm:$0xff] %v14067_v5 }
 0x746   : > { %6058 = vmatpush.msra.mxu1 %v13345_v38  ;;  %v5316_v11 = vpop.f32.mrf.mxu1  ;;  %v6120_v38 = vsel %vm6116_vm15, %v13773_v40, %v6118_v31  ;;  %v14078_v31 = vld [vmem:[%s15996_s15 + $0x3b0] sm:$0xff] }
 0x747   : > { %v13777_v22 = vmax.f32 %v5296_v58, %v5316_v11  ;;  %v14042_v58 = vperm.slane %v5606_v45, 1  ;;  %v14073_v11 = vld [vmem:[%s15996_s15 + $0x298] sm:$0xff] }
 0x748   : > { %16971 = vst [vmem:[#allocation49_spill] sm:$0xff] %v14073_v11 }
 0x749   : > { %8578 = vmatmul.msk.f32.vlgmr.msra.gmra.mxu3 %vm5089_vm2, %v13777_v22  ;;  %8580 = vmatmul.msk.f32.vlgmr.msra.gmra.mxu0 %vm5089_vm2, %v13777_v22  ;;  %v5930_v21 = vrot.slane %v13777_v22, 1  ;;  %v5975_v14 = vrot.slane %v13777_v22, 2  ;;  %v6020_v36 = vrot.slane %v13777_v22, 3 }
 0x74a   : > { %8593 = vmatpush.msk.msra.mxu3 %vm1028_vm4, %v16947_v6  ;;  %8595 = vmatpush.msk.msra.mxu0 %vm1028_vm4, %v13661_v55  ;;  %vm6117_vm4 = vcmp.ge.f32.partialorder %v13790_v3, 0.0  ;;  %v16952_v55 = vld [vmem:[#allocation18_spill] sm:$0xff]  ;;  %v14091_v6 = vld [vmem:[%s15996_s15 + $0x4a0] sm:$0xff] }
 0x74b   : > { %8582 = vmatmul.msk.f32.vlgmr.msra.gmra.mxu2 %vm5089_vm2, %v5930_v21  ;;  %8584 = vmatmul.msk.f32.vlgmr.msrb.gmra.mxu1 %vm5089_vm2, %v5930_v21  ;;  %v6121_v24 = vsel %vm6117_vm4, %v13790_v3, %v6119_v7  ;;  %v14086_v21 = vld [vmem:[%s15996_s15 + $0x1f0] sm:$0xff]  ;;  %v14111_v7 = vld [vmem:[%s15996_s15 + $0x1e0] sm:$0xff] }
 0x74c   : > { %6072 = vmatpush.msra.mxu3 %v16948_v20  ;;  %6092 = vmatpush.msra.mxu0 %v13669_v48  ;;  %v16953_v48 = vld [vmem:[#allocation17_spill] sm:$0xff] }
 0x74d   : > { %8597 = vmatpush.msk.msra.mxu2 %vm4399_vm12, %v6120_v38  ;;  %8601 = vmatpush.msk.msrb.mxu1 %vm4399_vm12, %v6120_v38  ;;  %v14099_v38 = vld [vmem:[%s15996_s15 + $0x3a0] sm:$0xff]  ;;  %v14105_v20 = vld [vmem:[%s15996_s15 + $0x228] sm:$0xff] }
 0x74e   : > { %6073 = vmatpush.msra.mxu3 %v13371_v28  ;;  %6093 = vmatpush.msra.mxu0 %v13676_v41  ;;  %v13813_v28 = vld [vmem:[%s15996_s15 + $0x310] sm:$0xff]  ;;  %v13858_v41 = vld [vmem:[%s15996_s15 + $0x2c0] sm:$0xff]  ;;  %16972 = vst [vmem:[#allocation29_spill] sm:$0xff] %v14105_v20 }
 0x750   : > { %6074 = vmatpush.msra.mxu3 %v13381_v49  ;;  %6094 = vmatpush.msra.mxu0 %v13682_v23  ;;  %v16949_v49 = vld [vmem:[#allocation12_spill] sm:$0xff]  ;;  %v16954_v23 = vld [vmem:[#allocation15_spill] sm:$0xff] }
 0x751   : > { %8586 = vmatmul.msk.f32.vlgmr.msrb.gmra.mxu3 %vm5089_vm2, %v5975_v14  ;;  %8588 = vmatmul.msk.f32.vlgmr.msrb.gmra.mxu0 %vm5089_vm2, %v5975_v14  ;;  %v14116_v14 = vld [vmem:[%s15996_s15 + $0x490] sm:$0xff] }
 0x752   : > { %6075 = vmatpush.msra.mxu3 %v13389_v17  ;;  %6095 = vmatpush.msra.mxu0 %v13688_v2  ;;  %v13823_v17 = vld [vmem:[%s15996_s15 + $0x300] sm:$0xff]  ;;  %v13867_v2 = vld [vmem:[%s15996_s15 + $0x2b0] sm:$0xff] }
 0x753   : > { %8590 = vmatmul.msk.f32.vlgmr.msrb.gmra.mxu2 %vm5089_vm2, %v6020_v36  ;;  %8592 = vmatmul.msk.f32.vlgmr.msra.gmra.mxu1 %vm5089_vm2, %v6020_v36  ;;  %v14124_v36 = vld [vmem:[%s15996_s15 + $0x390] sm:$0xff] }
 0x754   : > { %6076 = vmatpush.msra.mxu3 %v16949_v49  ;;  %6096 = vmatpush.msra.mxu0 %v13694_v12  ;;  %v16955_v12 = vld [vmem:[#allocation34_spill] sm:$0xff] }
 0x755   : > { %6245 = vmatpush.msra.mxu1 %v13813_v28  ;;  %8599 = vmatpush.msk.msrb.mxu2 %vm4399_vm12, %v6121_v24  ;;  %v14132_v49 = vld [vmem:[%s15996_s15 + $0x1d0] sm:$0xff] }
 0x756   : > { %6077 = vmatpush.msra.mxu3 %v16950_v18  ;;  %6097 = vmatpush.msra.mxu0 %v13700_v59  ;;  %v6065_v59 = vrot.slane %v13777_v22, 4  ;;  %v5621_v22 = vmul.f32 0.01, %v14042_v58  ;;  %v14137_v18 = vld [vmem:[%s15996_s15 + $0x480] sm:$0xff] }
 0x757   : > { %6246 = vmatpush.msra.mxu1 %v13823_v17 }
 0x758   : > { %6078 = vmatpush.msra.mxu3 %v16951_v62  ;;  %6098 = vmatpush.msra.mxu0 %v13706_v43  ;;  %v13876_v43 = vld [vmem:[%s15996_s15 + $0x280] sm:$0xff] }
 0x759   : > { %6247 = vmatpush.msra.mxu1 %v13832_v16  ;;  %v14146_v62 = vld [vmem:[%s15996_s15 + $0x380] sm:$0xff] }
 0x75a   : > { %6079 = vmatpush.msra.mxu3 %v16952_v55  ;;  %6099 = vmatpush.msra.mxu0 %v13712_v10  ;;  %v16956_v10 = vld [vmem:[#allocation42_spill] sm:$0xff] }
 0x75b   : > { %8598 = vmatmul.msk.f32.vlgmr.msra.gmra.mxu2 %vm6122_vm1, %v11779_v27  ;;  %6248 = vmatpush.msra.mxu1 %v13840_v37  ;;  %v14151_v55 = vld [vmem:[%s15996_s15 + $0x218] sm:$0xff] }
 0x75c   : > { %6080 = vmatpush.msra.mxu3 %v16953_v48  ;;  %6100 = vmatpush.msra.mxu0 %v13718_v42  ;;  %v13884_v42 = vld [vmem:[%s15996_s15 + $0x318] sm:$0xff]  ;;  %16973 = vst [vmem:[#allocation35_spill] sm:$0xff] %v14151_v55  ;;  %v14156_v48 = vld [vmem:[%s15996_s15 + $0x1c0] sm:$0xff] }
 0x75d   : > { %8603 = vmatpush.msk.msra.mxu2 %vm4399_vm12, %v6121_v24  ;;  %6249 = vmatpush.msra.mxu1 %v13848_v44  ;;  %16957 = vst [vmem:[#allocation33_spill] sm:$0xff] %v13884_v42 }
 0x75e   : > { %6081 = vmatpush.msra.mxu3 %v16954_v23  ;;  %6101 = vmatpush.msra.mxu0 %v13724_v47  ;;  %v13889_v47 = vld [vmem:[%s15996_s15 + $0x2a0] sm:$0xff]  ;;  %v14161_v23 = vld [vmem:[%s15996_s15 + $0x470] sm:$0xff] }
 0x75f   : > { %6250 = vmatpush.msra.mxu1 %v13858_v41 }
 0x760   : > { %6082 = vmatpush.msra.mxu3 %v16955_v12  ;;  %6102 = vmatpush.msra.mxu0 %v13730_v32  ;;  %v13896_v32 = vld [vmem:[%s15996_s15 + $0x270] sm:$0xff] }
 0x761   : > { %6251 = vmatpush.msra.mxu1 %v13867_v2  ;;  %v14171_v12 = vld [vmem:[%s15996_s15 + $0x370] sm:$0xff] }
 0x762   : > { %6083 = vmatpush.msra.mxu3 %v16956_v10  ;;  %6103 = vmatpush.msra.mxu0 %v13736_v57  ;;  %v13904_v57 = vld [vmem:[%s15996_s15 + $0x308] sm:$0xff]  ;;  %v14178_v10 = vperm.slane %v5606_v45, 0  ;;  %v14197_v45 = vld [vmem:[%s15996_s15 + $0x360] sm:$0xff] }
 0x763   : > { %8594 = vmatmul.msk.f32.vlgmr.msra.gmra.mxu3 %vm5089_vm2, %v6065_v59  ;;  %8596 = vmatmul.msk.f32.vlgmr.msra.gmra.mxu0 %vm5089_vm2, %v6065_v59  ;;  %16958 = vst [vmem:[#allocation19_spill] sm:$0xff] %v13904_v57  ;;  %vm5619_vm2 = vcmp.ge.f32.partialorder %v14042_v58, 0.0  ;;  %v14176_v59 = vld [vmem:[%s15996_s15 + $0x208] sm:$0xff] }
 0x764   : > { %6218 = vmatpush.msrb.mxu3 %v13876_v43  ;;  %8600 = vmatmul.msk.f32.vlgmr.msrb.gmra.mxu2 %vm6122_vm1, %v11779_v27  ;;  %v14127_v24 = vsel %vm5619_vm2, %v14042_v58, %v5621_v22  ;;  %16974 = vst [vmem:[#allocation16_spill] sm:$0xff] %v14176_v59  ;;  %v14183_v22 = vld [vmem:[%s15996_s15 + $0x1b0] sm:$0xff]  ;;  %vm5618_vm3 = vcmp.ge.f32.partialorder %v14178_v10, 0.0 }
 0x765   : > { %6285 = vmatpush.msrb.mxu2 %v13884_v42  ;;  %6252 = vmatpush.msra.mxu1 %v13889_v47 }
 0x766   : > { %6219 = vmatpush.msrb.mxu3 %v13896_v32  ;;  %8602 = vmatmul.msk.f32.vlgmr.msrb.gmra.mxu1 %vm6122_vm1, %v11828_v15 }
 0x767   : > { %6286 = vmatpush.msrb.mxu2 %v13904_v57  ;;  %6253 = vmatpush.msra.mxu1 %v13909_v19  ;;  %v14371_v57 = vld [vmem:[%s15996_s15 + $0x498] sm:$0xff] }
 0x768   : > { %6220 = vmatpush.msrb.mxu3 %v13915_v13  ;;  %6258 = vmatpush.msrb.mxu0 %v13934_v26  ;;  %16997 = vst [vmem:[#allocation34_spill] sm:$0xff] %v14371_v57  ;;  %v14525_v26 = vpop.f32.mrf.mxu2 }
 0x769   : > { %6300 = vmatpush.msrb.mxu1 %v13921_v53  ;;  %6287 = vmatpush.msrb.mxu2 %v13927_v33  ;;  %v14296_v33 = vld [vmem:[%s15996_s15 + $0x330] sm:$0xff] }
 0x76a   : > { %6221 = vmatpush.msrb.mxu3 %v13940_v39  ;;  %6259 = vmatpush.msrb.mxu0 %v13958_v35  ;;  %v14340_v35 = vld [vmem:[%s15996_s15 + $0x3c8] sm:$0xff] }
 0x76b   : > { %6301 = vmatpush.msrb.mxu1 %v13946_v46  ;;  %6288 = vmatpush.msrb.mxu2 %v13952_v9  ;;  %v14265_v9 = vld [vmem:[%s15996_s15 + $0x408] sm:$0xff]  ;;  %16992 = vst [vmem:[#allocation21_spill] sm:$0xff] %v14340_v35 }
 0x76c   : > { %6222 = vmatpush.msrb.mxu3 %v13964_v4  ;;  %6260 = vmatpush.msrb.mxu0 %v13982_v63  ;;  %16983 = vst [vmem:[#allocation39_spill] sm:$0xff] %v14265_v9  ;;  %v14270_v63 = vld [vmem:[%s15996_s15 + $0x340] sm:$0xff] }
 0x76d   : > { %6302 = vmatpush.msrb.mxu1 %v13969_v56  ;;  %6289 = vmatpush.msrb.mxu2 %v13976_v8  ;;  %v14247_v8 = vld [vmem:[%s15996_s15 + $0x350] sm:$0xff] }
 0x76e   : > { %6223 = vmatpush.msrb.mxu3 %v13988_v1  ;;  %6261 = vmatpush.msrb.mxu0 %v14006_v51  ;;  %v14252_v51 = vld [vmem:[%s15996_s15 + $0x430] sm:$0xff] }
 0x76f   : > { %6303 = vmatpush.msrb.mxu1 %v13993_v54  ;;  %6290 = vmatpush.msrb.mxu2 %v14000_v0  ;;  %v14228_v0 = vld [vmem:[%s15996_s15 + $0x190] sm:$0xff]  ;;  %16981 = vst [vmem:[#allocation44_spill] sm:$0xff] %v14252_v51 }
 0x770   : > { %6224 = vmatpush.msrb.mxu3 %v14012_v61  ;;  %8604 = vmatmul.msk.f32.vlgmr.msra.gmra.mxu2 %vm6122_vm1, %v11828_v15 }
 0x771   : > { %6291 = vmatpush.msrb.mxu2 %v14019_v60  ;;  %6304 = vmatpush.msrb.mxu1 %v14025_v52  ;;  %v5620_v60 = vmul.f32 0.01, %v14178_v10 }
 0x772   : > { %6225 = vmatpush.msrb.mxu3 %v14034_v34  ;;  %6262 = vmatpush.msrb.mxu0 %v14040_v29  ;;  %v14242_v29 = vld [vmem:[%s15996_s15 + $0x418] sm:$0xff] }
 0x773   : > { %6292 = vmatpush.msrb.mxu2 %v14048_v50  ;;  %6305 = vmatpush.msrb.mxu1 %v14055_v25  ;;  %v14202_v50 = vld [vmem:[%s15996_s15 + $0x1f8] sm:$0xff]  ;;  %16980 = vst [vmem:[#allocation38_spill] sm:$0xff] %v14242_v29 }
 0x774   : > { %6226 = vmatpush.msrb.mxu3 %v14061_v30  ;;  %6263 = vmatpush.msrb.mxu0 %v14067_v5  ;;  %16976 = vst [vmem:[#allocation36_spill] sm:$0xff] %v14202_v50  ;;  %v14223_v5 = vld [vmem:[%s15996_s15 + $0x1e8] sm:$0xff] }
 0x775   : > { %6293 = vmatpush.msrb.mxu2 %v14073_v11  ;;  %6306 = vmatpush.msrb.mxu1 %v14078_v31  ;;  %v14188_v11 = vld [vmem:[%s15996_s15 + $0x460] sm:$0xff]  ;;  %16978 = vst [vmem:[#allocation37_spill] sm:$0xff] %v14223_v5 }
 0x776   : > { %6227 = vmatpush.msrb.mxu3 %v14086_v21  ;;  %6264 = vmatpush.msrb.mxu0 %v14105_v20  ;;  %16975 = vst [vmem:[#allocation43_spill] sm:$0xff] %v14188_v11  ;;  %v14207_v20 = vld [vmem:[%s15996_s15 + $0x1a0] sm:$0xff] }
 0x777   : > { %6327 = vmatpush.msra.mxu2 %v14091_v6  ;;  %6307 = vmatpush.msrb.mxu1 %v14099_v38 }
 0x778   : > { %6228 = vmatpush.msrb.mxu3 %v14111_v7  ;;  %8606 = vmatmul.msk.f32.vlgmr.msrb.gmra.mxu2 %vm3034_vm10, %v14127_v24 }
 0x779   : > { %6328 = vmatpush.msra.mxu2 %v14116_v14  ;;  %6308 = vmatpush.msrb.mxu1 %v14124_v36 }
 0x77a   : > { %6229 = vmatpush.msrb.mxu3 %v14132_v49  ;;  %6265 = vmatpush.msrb.mxu0 %v14151_v55  ;;  %v14212_v55 = vld [vmem:[%s15996_s15 + $0x450] sm:$0xff] }
 0x77b   : > { %6329 = vmatpush.msra.mxu2 %v14137_v18  ;;  %6309 = vmatpush.msrb.mxu1 %v14146_v62  ;;  %16977 = vst [vmem:[#allocation31_spill] sm:$0xff] %v14212_v55 }
 0x77c   : > { %6230 = vmatpush.msrb.mxu3 %v14156_v48  ;;  %6266 = vmatpush.msrb.mxu0 %v14176_v59  ;;  %v14233_v59 = vld [vmem:[%s15996_s15 + $0x440] sm:$0xff] }
 0x77d   : > { %6330 = vmatpush.msra.mxu2 %v14161_v23  ;;  %6310 = vmatpush.msrb.mxu1 %v14171_v12  ;;  %16979 = vst [vmem:[#allocation53_spill] sm:$0xff] %v14233_v59 }
 0x77e   : > { %6231 = vmatpush.msrb.mxu3 %v14183_v22  ;;  %6267 = vmatpush.msrb.mxu0 %v14202_v50  ;;  %v14255_v50 = vsel %vm5618_vm3, %v14178_v10, %v5620_v60  ;;  %v14277_v60 = vld [vmem:[%s15996_s15 + $0x420] sm:$0xff] }
 0x77f   : > { %6331 = vmatpush.msra.mxu2 %v14188_v11  ;;  %6311 = vmatpush.msrb.mxu1 %v14197_v45  ;;  %16982 = vst [vmem:[#allocation47_spill] sm:$0xff] %v14255_v50 }
 0x780   : > { %6232 = vmatpush.msrb.mxu3 %v14207_v20  ;;  %8605 = vmatmul.msk.f32.vlgmr.msra.gmra.mxu1 %vm3034_vm10, %v14127_v24  ;;  %16984 = vst [vmem:[#allocation48_spill] sm:$0xff] %v14277_v60 }
 0x781   : > { %6332 = vmatpush.msra.mxu2 %v14212_v55  ;;  %6268 = vmatpush.msrb.mxu0 %v14223_v5  ;;  %v14282_v5 = vld [vmem:[%s15996_s15 + $0x1d8] sm:$0xff] }
 0x782   : > { %6233 = vmatpush.msrb.mxu3 %v14228_v0  ;;  %6312 = vmatpush.msrb.mxu1 %v14247_v8  ;;  %16985 = vst [vmem:[#allocation50_spill] sm:$0xff] %v14282_v5 }
 0x783   : > { %6333 = vmatpush.msra.mxu2 %v14233_v59  ;;  %6234 = vmatmul.f32.vlgmr.msrb.gmra.mxu3 %v14255_v50  ;;  %v14307_v59 = vld [vmem:[%s15996_s15 + $0x3e8] sm:$0xff] }
 0x784   : > { %6340 = vmatpush.msra.mxu3 %v14242_v29  ;;  %v14289_v29 = vld [vmem:[%s15996_s15 + $0x3f8] sm:$0xff]  ;;  %6313 = vmatpush.msrb.mxu1 %v14270_v63  ;;  %16988 = vst [vmem:[#allocation51_spill] sm:$0xff] %v14307_v59 }
 0x785   : > { %6334 = vmatpush.msra.mxu2 %v14252_v51  ;;  %16986 = vst [vmem:[#allocation52_spill] sm:$0xff] %v14289_v29  ;;  %v14301_v51 = vld [vmem:[%s15996_s15 + $0x1c8] sm:$0xff]  ;;  %6269 = vmatpush.msrb.mxu0 %v14282_v5  ;;  %v14327_v5 = vld [vmem:[%s15996_s15 + $0x3d8] sm:$0xff] }
 0x786   : > { %6341 = vmatpush.msra.mxu3 %v14265_v9  ;;  %16987 = vst [vmem:[#allocation13_spill] sm:$0xff] %v14301_v51  ;;  %v14316_v9 = vld [vmem:[%s15996_s15 + $0x320] sm:$0xff]  ;;  %6314 = vmatpush.msrb.mxu1 %v14296_v33 }
 0x787   : > { %6335 = vmatpush.msra.mxu2 %v14277_v60  ;;  %v14321_v60 = vld [vmem:[%s15996_s15 + $0x1b8] sm:$0xff]  ;;  %16990 = vst [vmem:[#allocation41_spill] sm:$0xff] %v14327_v5  ;;  %6270 = vmatpush.msrb.mxu0 %v14301_v51 }
 0x788   : > { %8607 = vmatmul.msk.f32.vlgmr.msra.gmra.mxu2 %vm3034_vm10, %v14127_v24  ;;  %6342 = vmatpush.msra.mxu3 %v14289_v29  ;;  %16989 = vst [vmem:[#allocation40_spill] sm:$0xff] %v14321_v60  ;;  %v14334_v29 = vld [vmem:[%s15996_s15 + $0x1a8] sm:$0xff]  ;;  %v14348_v51 = vld [vmem:[%s15996_s15 + $0x198] sm:$0xff] }
 0x789   : > { %16991 = vst [vmem:[#allocation12_spill] sm:$0xff] %v14334_v29  ;;  %6315 = vmatpush.msrb.mxu1 %v14316_v9  ;;  %6271 = vmatpush.msrb.mxu0 %v14321_v60  ;;  %v14359_v60 = vld [vmem:[%s15996_s15 + $0x4a8] sm:$0xff] }
 0x78a   : > { %6343 = vmatpush.msra.mxu3 %v14307_v59  ;;  %6316 = vmatmul.f32.vlgmr.msrb.gmra.mxu1 %v14255_v50  ;;  %16993 = vst [vmem:[#allocation32_spill] sm:$0xff] %v14348_v51  ;;  %v14353_v59 = vld [vmem:[%s15996_s15 + $0x3b8] sm:$0xff] }
 0x78b   : > { %16994 = vst [vmem:[#allocation18_spill] sm:$0xff] %v14353_v59  ;;  %6272 = vmatpush.msrb.mxu0 %v14334_v29  ;;  %v14378_v29 = vld [vmem:[%s15996_s15 + $0x398] sm:$0xff] }
 0x78c   : > { %6344 = vmatpush.msra.mxu3 %v14327_v5  ;;  %16995 = vst [vmem:[#allocation17_spill] sm:$0xff] %v14359_v60  ;;  %v14365_v5 = vld [vmem:[%s15996_s15 + $0x3a8] sm:$0xff] }
 0x78d   : > { %16996 = vst [vmem:[#allocation15_spill] sm:$0xff] %v14365_v5  ;;  %6273 = vmatpush.msrb.mxu0 %v14348_v51  ;;  %v14396_v51 = vld [vmem:[%s15996_s15 + $0x478] sm:$0xff] }
 0x78e   : > { %6345 = vmatpush.msra.mxu3 %v14340_v35  ;;  %16998 = vst [vmem:[#allocation42_spill] sm:$0xff] %v14378_v29  ;;  %v14383_v35 = vld [vmem:[%s15996_s15 + $0x488] sm:$0xff]  ;;  %6274 = vmatmul.f32.vlgmr.msrb.gmra.mxu0 %v14255_v50 }
 0x78f   : > { %6367 = vmatpush.msra.mxu0 %v14359_v60  ;;  %16999 = vst [vmem:[#allocation54_spill] sm:$0xff] %v14383_v35  ;;  %v14391_v60 = vld [vmem:[%s15996_s15 + $0x388] sm:$0xff] }
 0x790   : > { %6346 = vmatpush.msra.mxu3 %v14353_v59  ;;  %17000 = vst [vmem:[#allocation55_spill] sm:$0xff] %v14391_v60 }
 0x791   : > { %6368 = vmatpush.msra.mxu0 %v14371_v57  ;;  %17001 = vst [vmem:[#allocation56_spill] sm:$0xff] %v14396_v51  ;;  %v14408_v57 = vld [vmem:[%s15996_s15 + $0x468] sm:$0xff] }
 0x792   : > { %6347 = vmatpush.msra.mxu3 %v14365_v5  ;;  %v14403_v5 = vld [vmem:[%s15996_s15 + $0x378] sm:$0xff]  ;;  %17003 = vst [vmem:[#allocation58_spill] sm:$0xff] %v14408_v57 }
 0x793   : > { %6369 = vmatpush.msra.mxu0 %v14383_v35  ;;  %17002 = vst [vmem:[#allocation57_spill] sm:$0xff] %v14403_v5  ;;  %v14420_v35 = vld [vmem:[%s15996_s15 + $0x458] sm:$0xff] }
 0x794   : > { %6348 = vmatpush.msra.mxu3 %v14378_v29  ;;  %v14415_v29 = vld [vmem:[%s15996_s15 + $0x368] sm:$0xff]  ;;  %17005 = vst [vmem:[#allocation60_spill] sm:$0xff] %v14420_v35 }
 0x795   : > { %6370 = vmatpush.msra.mxu0 %v14396_v51  ;;  %17004 = vst [vmem:[#allocation59_spill] sm:$0xff] %v14415_v29  ;;  %v14432_v51 = vld [vmem:[%s15996_s15 + $0x448] sm:$0xff] }
 0x796   : > { %6349 = vmatpush.msra.mxu3 %v14391_v60  ;;  %v14427_v60 = vld [vmem:[%s15996_s15 + $0x358] sm:$0xff]  ;;  %17007 = vst [vmem:[#allocation62_spill] sm:$0xff] %v14432_v51 }
 0x797   : > { %6371 = vmatpush.msra.mxu0 %v14408_v57  ;;  %17006 = vst [vmem:[#allocation61_spill] sm:$0xff] %v14427_v60  ;;  %v14444_v57 = vld [vmem:[%s15996_s15 + $0x438] sm:$0xff] }
 0x798   : > { %6350 = vmatpush.msra.mxu3 %v14403_v5  ;;  %v14439_v5 = vld [vmem:[%s15996_s15 + $0x348] sm:$0xff]  ;;  %17009 = vst [vmem:[#allocation64_spill] sm:$0xff] %v14444_v57 }
 0x799   : > { %6372 = vmatpush.msra.mxu0 %v14420_v35  ;;  %17008 = vst [vmem:[#allocation63_spill] sm:$0xff] %v14439_v5  ;;  %v14456_v35 = vld [vmem:[%s15996_s15 + $0x428] sm:$0xff] }
 0x79a   : > { %6351 = vmatpush.msra.mxu3 %v14415_v29  ;;  %v14451_v29 = vld [vmem:[%s15996_s15 + $0x338] sm:$0xff]  ;;  %17011 = vst [vmem:[#allocation66_spill] sm:$0xff] %v14456_v35 }
 0x79b   : > { %6373 = vmatpush.msra.mxu0 %v14432_v51  ;;  %17010 = vst [vmem:[#allocation65_spill] sm:$0xff] %v14451_v29  ;;  %v14470_v51 = vld [vmem:[%s15996_s15 + $0x188] sm:$0xff] }
 0x79c   : > { %6352 = vmatpush.msra.mxu3 %v14427_v60  ;;  %v14463_v60 = vld [vmem:[%s15996_s15 + $0x328] sm:$0xff]  ;;  %17013 = vst [vmem:[#allocation68_spill] sm:$0xff] %v14470_v51 }
 0x79d   : > { %6374 = vmatpush.msra.mxu0 %v14444_v57  ;;  %17012 = vst [vmem:[#allocation67_spill] sm:$0xff] %v14463_v60  ;;  %v14479_v57 = vld [vmem:[%s15996_s15 + $0x178] sm:$0xff] }
 0x79e   : > { %6353 = vmatpush.msra.mxu3 %v14439_v5  ;;  %17014 = vst [vmem:[#allocation69_spill] sm:$0xff] %v14479_v57  ;;  %v14503_v5 = vld [vmem:[%s15996_s15 + $0x138] sm:$0xff] }
 0x79f   : > { %6375 = vmatpush.msra.mxu0 %v14456_v35  ;;  %v14485_v35 = vld [vmem:[%s15996_s15 + $0x168] sm:$0xff]  ;;  %17018 = vst [vmem:[#allocation73_spill] sm:$0xff] %v14503_v5 }
 0x7a0   : > { %6354 = vmatpush.msra.mxu3 %v14451_v29  ;;  %8608 = vmatmul.msk.f32.vlgmr.msra.gmra.mxu0 %vm3034_vm10, %v14127_v24  ;;  %17015 = vst [vmem:[#allocation70_spill] sm:$0xff] %v14485_v35  ;;  %v14497_v29 = vld [vmem:[%s15996_s15 + $0x148] sm:$0xff] }
 0x7a1   : > { %17017 = vst [vmem:[#allocation72_spill] sm:$0xff] %v14497_v29 }
 0x7a2   : > { %6355 = vmatpush.msra.mxu3 %v14463_v60  ;;  %v14491_v60 = vld [vmem:[%s15996_s15 + $0x158] sm:$0xff] }
 0x7a3   : > { %6356 = vmatmul.f32.vlgmr.msra.gmra.mxu3 %v14255_v50  ;;  %17016 = vst [vmem:[#allocation71_spill] sm:$0xff] %v14491_v60 }
 0x7a4   : > { %6543 = vmatpush.msrb.mxu3 %v14470_v51  ;;  %v5670_v51 = vpop.f32.mrf.mxu1 }
 0x7a5   : > { %v5674_v59 = vadd.f32 %v5670_v51, %v14042_v58 }
 0x7a6   : > { %6544 = vmatpush.msrb.mxu3 %v14479_v57  ;;  %v14509_v57 = vld [vmem:[%s15996_s15 + $0x128] sm:$0xff] }
 0x7a7   : > { %17019 = vst [vmem:[#allocation74_spill] sm:$0xff] %v14509_v57 }
 0x7a8   : > { %6545 = vmatpush.msrb.mxu3 %v14485_v35  ;;  %v14515_v35 = vld [vmem:[%s15996_s15 + $0x118] sm:$0xff] }
 0x7a9   : > { %17020 = vst [vmem:[#allocation75_spill] sm:$0xff] %v14515_v35 }
 0x7aa   : > { %6546 = vmatpush.msrb.mxu3 %v14491_v60  ;;  %v5721_v60 = vpop.f32.mrf.mxu0 }
 0x7ac   : > { %6547 = vmatpush.msrb.mxu3 %v14497_v29  ;;  %v14522_v29 = vld [vmem:[%s15996_s15 + $0x108] sm:$0xff]  ;;  %v5772_v55 = vpop.f32.mrf.mxu1 }
 0x7ae   : > { %6548 = vmatpush.msrb.mxu3 %v14503_v5  ;;  %v5725_v5 = vadd.f32 %v5721_v60, %v5674_v59 }
 0x7b0   : > { %6549 = vmatpush.msrb.mxu3 %v14509_v57  ;;  %v5776_v57 = vadd.f32 %v5772_v55, %v5725_v5  ;;  %v14539_v5 = vpop.f32.mrf.mxu3 }
 0x7b2   : > { %6550 = vmatpush.msrb.mxu3 %v14515_v35  ;;  %v5823_v51 = vpop.f32.mrf.mxu0  ;;  %v14534_v35 = vpop.f32.mrf.mxu2 }
 0x7b3   : > { %v5827_v50 = vadd.f32 %v5823_v51, %v5776_v57 }
 0x7b4   : > { %6551 = vmatpush.msrb.mxu3 %v14522_v29  ;;  %v5874_v42 = vpop.f32.mrf.mxu1 }
 0x7b5   : > { %8618 = vmatmul.msk.f32.vlgmr.msrb.gmra.mxu3 %vm3034_vm10, %v14127_v24  ;;  %v5878_v11 = vadd.f32 %v5874_v42, %v5827_v50 }
 0x7b6   : > { %6588 = vmatpush.msra.mxu3 %v13813_v28 }
 0x7b7   : > { %v5882_v28 = vmul.f32 0.01, %v5878_v11  ;;  %vm5880_vm14 = vcmp.ge.f32.partialorder %v5878_v11, 0.0 }
 0x7b8   : > { %6589 = vmatpush.msra.mxu3 %v13823_v17  ;;  %v14553_v42 = vpop.f32.mrf.mxu3 }
 0x7b9   : > { %v14542_v17 = vsel %vm5880_vm14, %v5878_v11, %v5882_v28 }
 0x7ba   : > { %6590 = vmatpush.msra.mxu3 %v13832_v16  ;;  %v14547_v16 = vpop.f32.mrf.mxu2 }
 0x7bc   : > { %6591 = vmatpush.msra.mxu3 %v13840_v37 }
 0x7be   : > { %6592 = vmatpush.msra.mxu3 %v13848_v44 }
 0x7c0   : > { %6593 = vmatpush.msra.mxu3 %v13858_v41 }
 0x7c2   : > { %6594 = vmatpush.msra.mxu3 %v13867_v2 }
 0x7c4   : > { %6595 = vmatpush.msra.mxu3 %v13889_v47 }
 0x7c6   : > { %6596 = vmatpush.msra.mxu3 %v13909_v19  ;;  %v5925_v37 = vpop.f32.mrf.mxu0 }
 0x7c7   : > { %8619 = vmatmul.msk.f32.vlgmr.msra.gmra.mxu3 %vm3034_vm10, %v14542_v17  ;;  %v5929_v44 = vadd.f32 %v5925_v37, %v14042_v58 }
 0x7c8   : > { %6646 = vmatpush.msrb.mxu3 %v13921_v53  ;;  %v5970_v41 = vpop.f32.mrf.mxu1 }
 0x7c9   : > { %v5974_v2 = vadd.f32 %v5970_v41, %v5929_v44 }
 0x7ca   : > { %6647 = vmatpush.msrb.mxu3 %v13946_v46 }
 0x7cc   : > { %6648 = vmatpush.msrb.mxu3 %v13969_v56  ;;  %v5905_v46 = vpop.f32.mrf.mxu3 }
 0x7ce   : > { %6649 = vmatpush.msrb.mxu3 %v13993_v54  ;;  %v5950_v47 = vpop.f32.mrf.mxu2  ;;  %v6015_v57 = vpop.f32.mrf.mxu0  ;;  %v5928_v54 = vadd.f32 %v5905_v46, %v14178_v10  ;;  %v14596_v46 = vld [vmem:[%s15996_s15 + $0x170] sm:$0xff] }
 0x7cf   : > { %v6019_v19 = vadd.f32 %v6015_v57, %v5974_v2  ;;  %v14588_v57 = vld [vmem:[%s15996_s15 + $0x180] sm:$0xff] }
 0x7d0   : > { %6650 = vmatpush.msrb.mxu3 %v14025_v52  ;;  %v6060_v50 = vpop.f32.mrf.mxu1  ;;  %v5973_v58 = vadd.f32 %v5950_v47, %v5928_v54  ;;  %v14613_v54 = vld [vmem:[%s15996_s15 + $0x150] sm:$0xff] }
 0x7d1   : > { %v14558_v53 = vadd.f32 %v6060_v50, %v6019_v19 }
 0x7d2   : > { %6651 = vmatpush.msrb.mxu3 %v14055_v25 }
 0x7d4   : > { %6652 = vmatpush.msrb.mxu3 %v14078_v31  ;;  %v5995_v52 = vpop.f32.mrf.mxu3 }
 0x7d5   : > { %v6018_v11 = vadd.f32 %v5995_v52, %v5973_v58  ;;  %v14619_v52 = vld [vmem:[%s15996_s15 + $0x140] sm:$0xff] }
 0x7d6   : > { %6653 = vmatpush.msrb.mxu3 %v14099_v38  ;;  %v6040_v56 = vpop.f32.mrf.mxu2 }
 0x7d8   : > { %6654 = vmatpush.msrb.mxu3 %v14124_v36  ;;  %v6063_v36 = vadd.f32 %v6040_v56, %v6018_v11  ;;  %v14605_v56 = vld [vmem:[%s15996_s15 + $0x160] sm:$0xff] }
 0x7d9   : > { %v14631_v11 = vld [vmem:[%s15996_s15 + $0x120] sm:$0xff] }
 0x7da   : > { %6655 = vmatpush.msrb.mxu3 %v14146_v62 }
 0x7dc   : > { %6656 = vmatpush.msrb.mxu3 %v14171_v12 }
 0x7de   : > { %6657 = vmatpush.msrb.mxu3 %v14197_v45  ;;  %v6148_v25 = vpop.f32.mrf.mxu2 }
 0x7e0   : > { %6658 = vmatpush.msrb.mxu3 %v14247_v8  ;;  %v14590_v19 = vpop.f32.mrf.mxu0 }
 0x7e2   : > { %6659 = vmatpush.msrb.mxu3 %v14270_v63 }
 0x7e3   : > { %v6190_v31 = vpop.f32.mrf.mxu1 }
 0x7e4   : > { %6660 = vmatpush.msrb.mxu3 %v14296_v33  ;;  %v14571_v38 = vmax.f32 %v6148_v25, %v6190_v31  ;;  %v14625_v25 = vld [vmem:[%s15996_s15 + $0x130] sm:$0xff] }
 0x7e5   : > { %v14637_v31 = vld [vmem:[%s15996_s15 + $0x110] sm:$0xff] }
 0x7e6   : > { %6661 = vmatpush.msrb.mxu3 %v14316_v9  ;;  %v6085_v62 = vpop.f32.mrf.mxu3 }
 0x7e7   : > { %v6108_v55 = vadd.f32 %v6085_v62, %v6063_v36  ;;  %v6168_v59 = vpop.f32.mrf.mxu2  ;;  %v14643_v36 = vld [vmem:[%s15996_s15 + $0x100] sm:$0xff] }
 0x7e9   : > { %vm6110_vm6 = vcmp.ge.f32.partialorder %v6108_v55, 0.0  ;;  %v6112_v12 = vmul.f32 0.01, %v6108_v55 }
 0x7eb   : > { %v14573_v45 = vsel %vm6110_vm6, %v6108_v55, %v6112_v12 }
 0x7ec   : > { %6662 = vmatmul.f32.vlgmr.msrb.gmra.mxu3 %v14573_v45 }
 0x7f3   : > { %v6210_v8 = vpop.f32.mrf.mxu2 }
 0x7f4   : > { %v14576_v63 = vmax.f32 %v6168_v59, %v6210_v8 }
 0x7fb   : > { %v6295_v33 = vpop.f32.mrf.mxu2 }
 0x7fd   : > { %v6255_v60 = vpop.f32.mrf.mxu1 }
 0x806   : > { %v6235_v51 = vpop.f32.mrf.mxu3 }
 0x807   : > { %v14578_v28 = vadd.f32 %v6255_v60, %v6235_v51  ;;  %v6317_v9 = vpop.f32.mrf.mxu1  ;;  %v14683_v51 = vld [vmem:[%s15996_s15 + $0xe8] sm:$0xff] }
 0x809   : > { %17021 = vst [vmem:[#allocation76_spill] sm:$0xff] %v14578_v28  ;;  %v6298_v37 = vadd.f32 %v14578_v28, %v13773_v40  ;;  %v17031_v28 = vld [vmem:[#allocation23_spill] sm:$0xff] }
 0x80b   : > { %v6337_v44 = vpop.f32.mrf.mxu2  ;;  %v6275_v58 = vpop.f32.mrf.mxu0 }
 0x80c   : > { %v14582_v41 = vadd.f32 %v6337_v44, %v6317_v9  ;;  %v14646_v62 = vadd.f32 %v6295_v33, %v6275_v58  ;;  %v14712_v9 = vld [vmem:[%s15996_s15 + $0xc8] sm:$0xff] }
 0x80d   : > { %v14741_v44 = vld [vmem:[%s15996_s15 + $0xa8] sm:$0xff] }
 0x80e   : > { %17022 = vst [vmem:[#allocation77_spill] sm:$0xff] %v14582_v41  ;;  %v6380_v2 = vadd.f32 %v14582_v41, %v6298_v37  ;;  %v6299_v59 = vadd.f32 %v14646_v62, %v13790_v3 }
 0x80f   : > { %17023 = vst [vmem:[#allocation78_spill] sm:$0xff] %v14646_v62  ;;  %v17036_v62 = vld [vmem:[#allocation22_spill] sm:$0xff] }
 0x810   : > { %vm6382_vm7 = vcmp.ge.f32.partialorder %v6380_v2, 0.0  ;;  %v6384_v47 = vmul.f32 0.01, %v6380_v2 }
 0x812   : > { %v6386_v50 = vsel %vm6382_vm7, %v6380_v2, %v6384_v47  ;;  %v14768_v47 = vld [vmem:[%s15996_s15 + $0x88] sm:$0xff] }
 0x813   : > { %8613 = vmatpush.msk.msra.mxu1 %vm4399_vm12, %v6386_v50  ;;  %8609 = vmatpush.msk.msrb.mxu2 %vm4399_vm12, %v6386_v50 }
 0x814   : > { %8610 = vmatmul.msk.f32.vlgmr.msrb.gmra.mxu2 %vm6122_vm1, %v11779_v27  ;;  %8614 = vmatmul.msk.f32.vlgmr.msra.gmra.mxu1 %vm6122_vm1, %v11828_v15 }
 0x815   : > { %6503 = vmatpush.msrb.mxu1 %v14588_v57 }
 0x817   : > { %6504 = vmatpush.msrb.mxu1 %v14596_v46 }
 0x819   : > { %6505 = vmatpush.msrb.mxu1 %v14605_v56 }
 0x81b   : > { %6506 = vmatpush.msrb.mxu1 %v14613_v54 }
 0x81d   : > { %6507 = vmatpush.msrb.mxu1 %v14619_v52  ;;  %v6377_v55 = vpop.f32.mrf.mxu0 }
 0x81f   : > { %6508 = vmatpush.msrb.mxu1 %v14625_v25 }
 0x821   : > { %6509 = vmatpush.msrb.mxu1 %v14631_v11 }
 0x823   : > { %6510 = vmatpush.msrb.mxu1 %v14637_v31 }
 0x825   : > { %6511 = vmatpush.msrb.mxu1 %v14643_v36 }
 0x826   : > { %v6357_v12 = vpop.f32.mrf.mxu3  ;;  %8617 = vmatmul.msk.f32.vlgmr.msrb.gmra.mxu1 %vm3034_vm10, %v14127_v24  ;;  %v14668_v24 = vld [vmem:[%s15996_s15 + $0xf8] sm:$0xff] }
 0x827   : > { %6561 = vmatpush.msra.mxu1 %v13876_v43  ;;  %v14654_v8 = vadd.f32 %v6377_v55, %v6357_v12  ;;  %v14663_v43 = vld [vmem:[%s15996_s15 + $0xf0] sm:$0xff]  ;;  %v14808_v55 = vld [vmem:[%s15996_s15 + $0x58] sm:$0xff]  ;;  %v14823_v12 = vld [vmem:[%s15996_s15 + $0x48] sm:$0xff] }
 0x829   : > { %17024 = vst [vmem:[#allocation79_spill] sm:$0xff] %v14654_v8  ;;  %6562 = vmatpush.msra.mxu1 %v13896_v32  ;;  %v6381_v60 = vadd.f32 %v14654_v8, %v6299_v59  ;;  %v17032_v8 = vld [vmem:[#allocation53_spill] sm:$0xff] }
 0x82b   : > { %6563 = vmatpush.msra.mxu1 %v13915_v13  ;;  %vm6383_vm5 = vcmp.ge.f32.partialorder %v6381_v60, 0.0  ;;  %v6385_v33 = vmul.f32 0.01, %v6381_v60  ;;  %v5673_v13 = vadd.f32 %v14525_v26, %v14178_v10  ;;  %v14691_v26 = vld [vmem:[%s15996_s15 + $0xd0] sm:$0xff] }
 0x82d   : > { %6564 = vmatpush.msra.mxu1 %v13940_v39  ;;  %v6387_v32 = vsel %vm6383_vm5, %v6381_v60, %v6385_v33  ;;  %v14678_v39 = vld [vmem:[%s15996_s15 + $0xe0] sm:$0xff]  ;;  %v5724_v10 = vadd.f32 %v14539_v5, %v5673_v13  ;;  %v14727_v5 = vld [vmem:[%s15996_s15 + $0xb8] sm:$0xff]  ;;  %v14851_v33 = vld [vmem:[%s15996_s15 + $0x28] sm:$0xff] }
 0x82e   : > { %8611 = vmatpush.msk.msra.mxu2 %vm4399_vm12, %v6387_v32  ;;  %8615 = vmatpush.msk.msrb.mxu0 %vm4399_vm12, %v6387_v32  ;;  %v14838_v60 = vld [vmem:[%s15996_s15 + $0x38] sm:$0xff]  ;;  %v14877_v13 = vld [vmem:[%s15996_s15 + $0x8] sm:$0xff] }
 0x82f   : > { %6565 = vmatpush.msra.mxu1 %v13964_v4  ;;  %v14696_v4 = vld [vmem:[%s15996_s15 + $0xd8] sm:$0xff]  ;;  %8612 = vmatmul.msk.f32.vlgmr.msra.gmra.mxu2 %vm6122_vm1, %v11779_v27  ;;  %v5775_v37 = vadd.f32 %v14534_v35, %v5724_v10  ;;  %v14749_v35 = vld [vmem:[%s15996_s15 + $0x90] sm:$0xff] }
 0x830   : > { %6476 = vmatpush.msrb.mxu2 %v14663_v43  ;;  %6516 = vmatpush.msra.mxu0 %v14668_v24  ;;  %v14864_v32 = vld [vmem:[%s15996_s15 + $0x18] sm:$0xff] }
 0x831   : > { %6566 = vmatpush.msra.mxu1 %v13988_v1  ;;  %v14707_v1 = vld [vmem:[%s15996_s15 + $0xc0] sm:$0xff]  ;;  %8616 = vmatmul.msk.f32.vlgmr.msrb.gmra.mxu0 %vm6122_vm1, %v11828_v15  ;;  %v5826_v2 = vadd.f32 %v14553_v42, %v5775_v37  ;;  %v14782_v42 = vld [vmem:[%s15996_s15 + $0x78] sm:$0xff] }
 0x832   : > { %6477 = vmatpush.msrb.mxu2 %v14678_v39  ;;  %6517 = vmatpush.msra.mxu0 %v14683_v51  ;;  %v17025_v10 = vld [vmem:[#allocation43_spill] sm:$0xff] }
 0x833   : > { %6567 = vmatpush.msra.mxu1 %v14012_v61  ;;  %v14722_v61 = vld [vmem:[%s15996_s15 + $0xb0] sm:$0xff]  ;;  %v5877_v50 = vadd.f32 %v14547_v16, %v5826_v2  ;;  %v14795_v16 = vld [vmem:[%s15996_s15 + $0x68] sm:$0xff]  ;;  %v17026_v37 = vld [vmem:[#allocation47_spill] sm:$0xff] }
 0x834   : > { %6478 = vmatpush.msrb.mxu2 %v14691_v26  ;;  %6518 = vmatpush.msra.mxu0 %v14696_v4  ;;  %v17027_v2 = vld [vmem:[#allocation33_spill] sm:$0xff] }
 0x835   : > { %6568 = vmatpush.msra.mxu1 %v14034_v34  ;;  %v14736_v34 = vld [vmem:[%s15996_s15 + $0xa0] sm:$0xff]  ;;  %v5881_v58 = vmul.f32 0.01, %v5877_v50  ;;  %vm5879_vm8 = vcmp.ge.f32.partialorder %v5877_v50, 0.0 }
 0x836   : > { %6479 = vmatpush.msrb.mxu2 %v14707_v1  ;;  %6519 = vmatpush.msra.mxu0 %v14712_v9 }
 0x837   : > { %6569 = vmatpush.msra.mxu1 %v14061_v30  ;;  %v14754_v30 = vld [vmem:[%s15996_s15 + $0x98] sm:$0xff]  ;;  %v14825_v59 = vsel %vm5879_vm8, %v5877_v50, %v5881_v58 }
 0x838   : > { %6480 = vmatpush.msrb.mxu2 %v14722_v61  ;;  %6520 = vmatpush.msra.mxu0 %v14727_v5  ;;  %v17028_v50 = vld [vmem:[#allocation14_spill] sm:$0xff]  ;;  %v17029_v58 = vld [vmem:[#allocation31_spill] sm:$0xff] }
 0x839   : > { %6570 = vmatpush.msra.mxu1 %v14086_v21  ;;  %v14763_v21 = vld [vmem:[%s15996_s15 + $0x80] sm:$0xff] }
 0x83a   : > { %6481 = vmatpush.msrb.mxu2 %v14736_v34  ;;  %6521 = vmatpush.msra.mxu0 %v14741_v44 }
 0x83b   : > { %6571 = vmatpush.msra.mxu1 %v14111_v7  ;;  %v14777_v7 = vld [vmem:[%s15996_s15 + $0x70] sm:$0xff] }
 0x83c   : > { %6482 = vmatpush.msrb.mxu2 %v14749_v35  ;;  %6522 = vmatpush.msra.mxu0 %v14754_v30 }
 0x83d   : > { %6572 = vmatpush.msra.mxu1 %v14132_v49  ;;  %v14790_v49 = vld [vmem:[%s15996_s15 + $0x60] sm:$0xff] }
 0x83e   : > { %6483 = vmatpush.msrb.mxu2 %v14763_v21  ;;  %6523 = vmatpush.msra.mxu0 %v14768_v47 }
 0x83f   : > { %6573 = vmatpush.msra.mxu1 %v14156_v48  ;;  %v14803_v48 = vld [vmem:[%s15996_s15 + $0x50] sm:$0xff] }
 0x840   : > { %6484 = vmatpush.msrb.mxu2 %v14777_v7  ;;  %6524 = vmatpush.msra.mxu0 %v14782_v42 }
 0x841   : > { %6574 = vmatpush.msra.mxu1 %v14183_v22  ;;  %v14816_v22 = vld [vmem:[%s15996_s15 + $0x40] sm:$0xff] }
 0x842   : > { %6485 = vmatpush.msrb.mxu2 %v14790_v49  ;;  %6525 = vmatpush.msra.mxu0 %v14795_v16 }
 0x843   : > { %6575 = vmatpush.msra.mxu1 %v14207_v20  ;;  %v14831_v20 = vld [vmem:[%s15996_s15 + $0x30] sm:$0xff] }
 0x844   : > { %6486 = vmatpush.msrb.mxu2 %v14803_v48  ;;  %6526 = vmatpush.msra.mxu0 %v14808_v55 }
 0x845   : > { %6576 = vmatpush.msra.mxu1 %v14228_v0  ;;  %v14845_v0 = vld [vmem:[%s15996_s15 + $0x20] sm:$0xff] }
 0x846   : > { %6577 = vmatmul.f32.vlgmr.msra.gmra.mxu1 %v14825_v59  ;;  %6487 = vmatpush.msrb.mxu2 %v14816_v22 }
 0x847   : > { %6673 = vmatpush.msrb.mxu1 %v14091_v6  ;;  %6527 = vmatpush.msra.mxu0 %v14823_v12  ;;  %v14858_v6 = vld [vmem:[%s15996_s15 + $0x10] sm:$0xff] }
 0x848   : > { %6488 = vmatpush.msrb.mxu2 %v14831_v20 }
 0x849   : > { %6674 = vmatpush.msrb.mxu1 %v14116_v14  ;;  %6528 = vmatpush.msra.mxu0 %v14838_v60  ;;  %v14871_v14 = vld [vmem:[%s15996_s15] sm:$0xff] }
 0x84a   : > { %6489 = vmatpush.msrb.mxu2 %v14845_v0 }
 0x84b   : > { %6675 = vmatpush.msrb.mxu1 %v14137_v18  ;;  %6529 = vmatpush.msra.mxu0 %v14851_v33  ;;  %v6109_v18 = vadd.f32 %v14590_v19, %v14558_v53  ;;  %v17033_v53 = vld [vmem:[#allocation24_spill] sm:$0xff]  ;;  %v17034_v19 = vld [vmem:[#allocation26_spill] sm:$0xff] }
 0x84c   : > { %6490 = vmatpush.msrb.mxu2 %v14858_v6 }
 0x84d   : > { %6676 = vmatpush.msrb.mxu1 %v14161_v23  ;;  %6530 = vmatpush.msra.mxu0 %v14864_v32  ;;  %v17030_v23 = vld [vmem:[#allocation19_spill] sm:$0xff]  ;;  %v6113_v41 = vmul.f32 0.01, %v6109_v18  ;;  %vm6111_vm9 = vcmp.ge.f32.partialorder %v6109_v18, 0.0 }
 0x84e   : > { %6491 = vmatpush.msrb.mxu2 %v14871_v14 }
 0x84f   : > { %6677 = vmatpush.msrb.mxu1 %v17025_v10  ;;  %6531 = vmatpush.msra.mxu0 %v14877_v13  ;;  %v17035_v10 = vld [vmem:[#allocation44_spill] sm:$0xff] }
 0x850   : > { %6492 = vmatmul.f32.vlgmr.msrb.gmra.mxu2 %v17026_v37  ;;  %6532 = vmatmul.f32.vlgmr.msra.gmra.mxu0 %v17026_v37  ;;  %v17049_v37 = vld [vmem:[#allocation38_spill] sm:$0xff] }
 0x851   : > { %6628 = vmatpush.msrb.mxu0 %v17027_v2  ;;  %6601 = vmatpush.msra.mxu2 %v17028_v50  ;;  %v14897_v2 = vsel %vm6111_vm9, %v6109_v18, %v6113_v41  ;;  %v17037_v50 = vld [vmem:[#allocation46_spill] sm:$0xff]  ;;  %v17044_v41 = vld [vmem:[#allocation29_spill] sm:$0xff] }
 0x852   : > { %6678 = vmatpush.msrb.mxu1 %v17029_v58  ;;  %v17038_v58 = vld [vmem:[#allocation48_spill] sm:$0xff]  ;;  %v17045_v18 = vld [vmem:[#allocation25_spill] sm:$0xff] }
 0x853   : > { %6629 = vmatpush.msrb.mxu0 %v17030_v23  ;;  %6602 = vmatpush.msra.mxu2 %v17031_v28  ;;  %v17039_v28 = vld [vmem:[#allocation20_spill] sm:$0xff]  ;;  %v17041_v23 = vld [vmem:[#allocation45_spill] sm:$0xff] }
 0x854   : > { %6679 = vmatpush.msrb.mxu1 %v17032_v8  ;;  %v17040_v8 = vld [vmem:[#allocation27_spill] sm:$0xff] }
 0x855   : > { %6630 = vmatpush.msrb.mxu0 %v17033_v53  ;;  %6603 = vmatpush.msra.mxu2 %v17034_v19  ;;  %v17042_v53 = vld [vmem:[#allocation28_spill] sm:$0xff]  ;;  %v17046_v19 = vld [vmem:[#allocation35_spill] sm:$0xff] }
 0x856   : > { %6680 = vmatpush.msrb.mxu1 %v17035_v10  ;;  %v17047_v10 = vld [vmem:[#allocation49_spill] sm:$0xff] }
 0x857   : > { %6631 = vmatpush.msrb.mxu0 %v17036_v62  ;;  %6604 = vmatpush.msra.mxu2 %v17037_v50  ;;  %v17043_v62 = vld [vmem:[#allocation30_spill] sm:$0xff]  ;;  %v17048_v50 = vld [vmem:[#allocation16_spill] sm:$0xff] }
 0x858   : > { %6681 = vmatpush.msrb.mxu1 %v17038_v58  ;;  %v17050_v58 = vld [vmem:[#allocation36_spill] sm:$0xff] }
 0x859   : > { %8621 = vmatmul.msk.f32.vlgmr.msrb.gmra.mxu1 %vm3034_vm10, %v14897_v2  ;;  %6632 = vmatpush.msrb.mxu0 %v17039_v28  ;;  %v17051_v28 = vld [vmem:[#allocation39_spill] sm:$0xff] }
 0x85a   : > { %6605 = vmatpush.msra.mxu2 %v17040_v8  ;;  %v17052_v8 = vld [vmem:[#allocation37_spill] sm:$0xff] }
 0x85b   : > { %6633 = vmatpush.msrb.mxu0 %v17041_v23  ;;  %v17053_v23 = vld [vmem:[#allocation52_spill] sm:$0xff] }
 0x85c   : > { %6606 = vmatpush.msra.mxu2 %v17042_v53  ;;  %v17054_v53 = vld [vmem:[#allocation50_spill] sm:$0xff] }
 0x85d   : > { %6634 = vmatpush.msrb.mxu0 %v17043_v62  ;;  %v17055_v62 = vld [vmem:[#allocation51_spill] sm:$0xff] }
 0x85e   : > { %6607 = vmatpush.msra.mxu2 %v17044_v41  ;;  %v17056_v41 = vld [vmem:[#allocation13_spill] sm:$0xff] }
 0x85f   : > { %6635 = vmatpush.msrb.mxu0 %v17045_v18  ;;  %v17057_v18 = vld [vmem:[#allocation41_spill] sm:$0xff] }
 0x860   : > { %6608 = vmatpush.msra.mxu2 %v17046_v19  ;;  %v17058_v19 = vld [vmem:[#allocation40_spill] sm:$0xff] }
 0x861   : > { %6636 = vmatpush.msrb.mxu0 %v17047_v10  ;;  %v17060_v10 = vld [vmem:[#allocation12_spill] sm:$0xff] }
 0x862   : > { %6609 = vmatpush.msra.mxu2 %v17048_v50  ;;  %8620 = vmatmul.msk.f32.vlgmr.msrb.gmra.mxu0 %vm3034_vm10, %v14542_v17  ;;  %v17059_v17 = vld [vmem:[#allocation21_spill] sm:$0xff]  ;;  %v17061_v50 = vld [vmem:[#allocation18_spill] sm:$0xff] }
 0x863   : > { %6686 = vmatpush.msra.mxu0 %v17049_v37  ;;  %v17062_v37 = vld [vmem:[#allocation32_spill] sm:$0xff] }
 0x864   : > { %6610 = vmatpush.msra.mxu2 %v17050_v58  ;;  %v17063_v58 = vld [vmem:[#allocation15_spill] sm:$0xff] }
 0x865   : > { %6687 = vmatpush.msra.mxu0 %v17051_v28  ;;  %v17064_v28 = vld [vmem:[#allocation17_spill] sm:$0xff] }
 0x866   : > { %6611 = vmatpush.msra.mxu2 %v17052_v8  ;;  %v17065_v8 = vld [vmem:[#allocation42_spill] sm:$0xff] }
 0x867   : > { %6688 = vmatpush.msra.mxu0 %v17053_v23  ;;  %v17066_v23 = vld [vmem:[#allocation34_spill] sm:$0xff] }
 0x868   : > { %6612 = vmatpush.msra.mxu2 %v17054_v53  ;;  %v17067_v53 = vld [vmem:[#allocation55_spill] sm:$0xff] }
 0x869   : > { %6689 = vmatpush.msra.mxu0 %v17055_v62  ;;  %v17068_v62 = vld [vmem:[#allocation54_spill] sm:$0xff] }
 0x86a   : > { %6613 = vmatpush.msra.mxu2 %v17056_v41  ;;  %v17069_v41 = vld [vmem:[#allocation57_spill] sm:$0xff] }
 0x86b   : > { %6690 = vmatpush.msra.mxu0 %v17057_v18  ;;  %v17070_v18 = vld [vmem:[#allocation56_spill] sm:$0xff] }
 0x86c   : > { %6614 = vmatpush.msra.mxu2 %v17058_v19  ;;  %v17071_v19 = vld [vmem:[#allocation59_spill] sm:$0xff] }
 0x86d   : > { %6691 = vmatpush.msra.mxu0 %v17059_v17  ;;  %v17072_v17 = vld [vmem:[#allocation58_spill] sm:$0xff] }
 0x86e   : > { %6615 = vmatpush.msra.mxu2 %v17060_v10  ;;  %v17074_v10 = vld [vmem:[#allocation60_spill] sm:$0xff] }
 0x86f   : > { %6692 = vmatpush.msra.mxu0 %v17061_v50  ;;  %v17075_v50 = vld [vmem:[#allocation63_spill] sm:$0xff] }
 0x870   : > { %6616 = vmatpush.msra.mxu2 %v17062_v37  ;;  %v17076_v37 = vld [vmem:[#allocation62_spill] sm:$0xff] }
 0x871   : > { %6617 = vmatmul.f32.vlgmr.msra.gmra.mxu2 %v14825_v59  ;;  %6693 = vmatpush.msra.mxu0 %v17063_v58  ;;  %v17073_v59 = vld [vmem:[#allocation61_spill] sm:$0xff] }
 0x872   : > { %6713 = vmatpush.msrb.mxu2 %v17064_v28  ;;  %v17077_v58 = vld [vmem:[#allocation65_spill] sm:$0xff]  ;;  %v17078_v28 = vld [vmem:[#allocation64_spill] sm:$0xff] }
 0x873   : > { %6694 = vmatpush.msra.mxu0 %v17065_v8  ;;  %v17079_v8 = vld [vmem:[#allocation67_spill] sm:$0xff] }
 0x874   : > { %6714 = vmatpush.msrb.mxu2 %v17066_v23  ;;  %v17080_v23 = vld [vmem:[#allocation66_spill] sm:$0xff] }
 0x875   : > { %6695 = vmatpush.msra.mxu0 %v17067_v53 }
 0x876   : > { %6715 = vmatpush.msrb.mxu2 %v17068_v62 }
 0x877   : > { %6696 = vmatpush.msra.mxu0 %v17069_v41  ;;  %v6553_v41 = vpop.f32.mrf.mxu3 }
 0x878   : > { %6716 = vmatpush.msrb.mxu2 %v17070_v18 }
 0x879   : > { %6697 = vmatpush.msra.mxu0 %v17071_v19 }
 0x87a   : > { %6717 = vmatpush.msrb.mxu2 %v17072_v17 }
 0x87b   : > { %6698 = vmatpush.msra.mxu0 %v17073_v59 }
 0x87c   : > { %6718 = vmatpush.msrb.mxu2 %v17074_v10 }
 0x87d   : > { %6699 = vmatpush.msra.mxu0 %v17075_v50 }
 0x87e   : > { %6719 = vmatpush.msrb.mxu2 %v17076_v37 }
 0x87f   : > { %6700 = vmatpush.msra.mxu0 %v17077_v58  ;;  %v6598_v18 = vpop.f32.mrf.mxu3 }
 0x880   : > { %6720 = vmatpush.msrb.mxu2 %v17078_v28 }
 0x881   : > { %6701 = vmatpush.msra.mxu0 %v17079_v8 }
 0x882   : > { %6721 = vmatpush.msrb.mxu2 %v17080_v23  ;;  %6702 = vmatmul.f32.vlgmr.msra.gmra.mxu0 %v14573_v45  ;;  %v7137_v23 = vld [vmem:[%s15998_s17 + $0x140] sm:$0xff] }
 0x883   : > { %8622 = vmatmul.msk.f32.vlgmr.msrb.gmra.mxu2 %vm3034_vm10, %v14897_v2  ;;  %6849 = vmatpush.msrb.mxu0 %v14588_v57 }
 0x885   : > { %6850 = vmatpush.msrb.mxu0 %v14596_v46 }
 0x887   : > { %6851 = vmatpush.msrb.mxu0 %v14605_v56  ;;  %v6663_v59 = vpop.f32.mrf.mxu3 }
 0x889   : > { %6852 = vmatpush.msrb.mxu0 %v14613_v54 }
 0x88b   : > { %6853 = vmatpush.msrb.mxu0 %v14619_v52 }
 0x88d   : > { %6854 = vmatpush.msrb.mxu0 %v14625_v25 }
 0x88f   : > { %6855 = vmatpush.msrb.mxu0 %v14631_v11 }
 0x891   : > { %6856 = vmatpush.msrb.mxu0 %v14637_v31  ;;  %v6451_v57 = vpop.f32.mrf.mxu1 }
 0x893   : > { %6857 = vmatpush.msrb.mxu0 %v14643_v36 }
 0x894   : > { %8631 = vmatmul.msk.f32.vlgmr.msrb.gmra.mxu0 %vm3034_vm10, %v14897_v2 }
 0x897   : > { %v6411_v53 = vpop.f32.mrf.mxu2 }
 0x898   : > { %v14963_v46 = vmax.f32 %v6411_v53, %v6451_v57  ;;  %v7135_v53 = vld [vmem:[%s15998_s17 + $0x130] sm:$0xff] }
 0x8a3   : > { %v6513_v52 = vpop.f32.mrf.mxu1 }
 0x8ae   : > { %v6471_v62 = vpop.f32.mrf.mxu0 }
 0x8b2   : > { %v6431_v56 = vpop.f32.mrf.mxu2 }
 0x8b3   : > { %v14965_v54 = vmax.f32 %v6431_v56, %v6471_v62  ;;  %v7133_v62 = vld [vmem:[%s15998_s17 + $0x120] sm:$0xff] }
 0x8c3   : > { %v6578_v25 = vpop.f32.mrf.mxu1 }
 0x8c4   : > { %v6599_v17 = vadd.f32 %v6598_v18, %v6578_v25  ;;  %v17082_v25 = vld [vmem:[#allocation69_spill] sm:$0xff]  ;;  %v7129_v18 = vld [vmem:[%s15998_s17 + $0x100] sm:$0xff] }
 0x8d3   : > { %v6493_v11 = vpop.f32.mrf.mxu2 }
 0x8d4   : > { %v6514_v19 = vadd.f32 %v6513_v52, %v6493_v11  ;;  %v17081_v52 = vld [vmem:[#allocation68_spill] sm:$0xff] }
 0x8d5   : > { %v8681_v11 = vld [vmem:[%s15998_s17 + $0x280] sm:$0xff] }
 0x8d6   : > { %v6683_v31 = vpop.f32.mrf.mxu1  ;;  %v14968_v36 = vadd.f32 %v6514_v19, %v13773_v40  ;;  %v17084_v19 = vld [vmem:[#allocation71_spill] sm:$0xff] }
 0x8d7   : > { %v6684_v50 = vadd.f32 %v6683_v31, %v6663_v59  ;;  %v8677_v31 = vld [vmem:[%s15998_s17 + $0x260] sm:$0xff] }
 0x8d8   : > { %v6641_v10 = vadd.f32 %v6599_v17, %v14968_v36  ;;  %v8675_v17 = vld [vmem:[%s15998_s17 + $0x250] sm:$0xff]  ;;  %v8673_v59 = vld [vmem:[%s15998_s17 + $0x240] sm:$0xff]  ;;  %vm7002_vm4 = vcmp.ge.f32.partialorder %v14968_v36, 0.0 }
 0x8da   : > { %v6726_v37 = vadd.f32 %v6684_v50, %v6641_v10  ;;  %v17088_v10 = vld [vmem:[#allocation75_spill] sm:$0xff] }
 0x8db   : > { %v8653_v50 = vld [vmem:[%s15998_s17 + $0x1a0] sm:$0xff] }
 0x8dc   : > { %vm6728_vm11 = vcmp.ge.f32.partialorder %v6726_v37, 0.0  ;;  %v6730_v58 = vmul.f32 0.01, %v6726_v37 }
 0x8de   : > { %v6732_v28 = vsel %vm6728_vm11, %v6726_v37, %v6730_v58  ;;  %v7121_v37 = vld [vmem:[%s15998_s17 + $0xc0] sm:$0xff]  ;;  %v7119_v58 = vld [vmem:[%s15998_s17 + $0xb0] sm:$0xff] }
 0x8df   : > { %8623 = vmatpush.msk.msra.mxu1 %vm4399_vm12, %v6732_v28 }
 0x8e0   : > { %8624 = vmatmul.msk.f32.vlgmr.msra.gmra.mxu1 %vm6122_vm1, %v11779_v27 }
 0x8e1   : > { %8627 = vmatpush.msk.msrb.mxu1 %vm4399_vm12, %v6732_v28  ;;  %v7117_v28 = vld [vmem:[%s15998_s17 + $0xa0] sm:$0xff] }
 0x8e3   : > { %6862 = vmatpush.msra.mxu1 %v14668_v24  ;;  %v6533_v24 = vpop.f32.mrf.mxu0 }
 0x8e5   : > { %6863 = vmatpush.msra.mxu1 %v14683_v51  ;;  %v6554_v51 = vadd.f32 %v6553_v41, %v6533_v24  ;;  %v7131_v41 = vld [vmem:[%s15998_s17 + $0x110] sm:$0xff] }
 0x8e6   : > { %v7115_v24 = vld [vmem:[%s15998_s17 + $0x90] sm:$0xff] }
 0x8e7   : > { %6864 = vmatpush.msra.mxu1 %v14696_v4  ;;  %v6557_v4 = vadd.f32 %v6554_v51, %v13790_v3  ;;  %v7113_v51 = vld [vmem:[%s15998_s17 + $0x80] sm:$0xff] }
 0x8e8   : > { %8628 = vmatmul.msk.f32.vlgmr.msrb.gmra.mxu1 %vm6122_vm1, %v11828_v15 }
 0x8e9   : > { %6865 = vmatpush.msra.mxu1 %v14712_v9  ;;  %vm7003_vm13 = vcmp.ge.f32.partialorder %v6557_v4, 0.0 }
 0x8eb   : > { %6866 = vmatpush.msra.mxu1 %v14727_v5  ;;  %v6638_v9 = vpop.f32.mrf.mxu0 }
 0x8ed   : > { %6867 = vmatpush.msra.mxu1 %v14741_v44  ;;  %v7005_v44 = vmul.f32 0.01, %v6557_v4 }
 0x8ef   : > { %6868 = vmatpush.msra.mxu1 %v14754_v30  ;;  %v7145_v30 = vld [vmem:[%s15998_s17 + $0x180] sm:$0xff] }
 0x8f1   : > { %6869 = vmatpush.msra.mxu1 %v14768_v47  ;;  %v14998_v47 = vsel %vm7003_vm13, %v6557_v4, %v7005_v44  ;;  %v7105_v44 = vld [vmem:[%s15998_s17 + $0x40] sm:$0xff] }
 0x8f3   : > { %6870 = vmatpush.msra.mxu1 %v14782_v42 }
 0x8f4   : > { %v6618_v5 = vpop.f32.mrf.mxu2 }
 0x8f5   : > { %6871 = vmatpush.msra.mxu1 %v14795_v16  ;;  %v6639_v42 = vadd.f32 %v6638_v9, %v6618_v5  ;;  %v7143_v16 = vld [vmem:[%s15998_s17 + $0x170] sm:$0xff]  ;;  %v7109_v9 = vld [vmem:[%s15998_s17 + $0x60] sm:$0xff] }
 0x8f6   : > { %v7107_v5 = vld [vmem:[%s15998_s17 + $0x50] sm:$0xff] }
 0x8f7   : > { %6872 = vmatpush.msra.mxu1 %v14808_v55  ;;  %v7141_v55 = vld [vmem:[%s15998_s17 + $0x160] sm:$0xff] }
 0x8f9   : > { %6873 = vmatpush.msra.mxu1 %v14823_v12 }
 0x8fb   : > { %6874 = vmatpush.msra.mxu1 %v14838_v60 }
 0x8fd   : > { %6875 = vmatpush.msra.mxu1 %v14851_v33  ;;  %v6642_v33 = vadd.f32 %v6639_v42, %v6557_v4  ;;  %v7111_v4 = vld [vmem:[%s15998_s17 + $0x70] sm:$0xff]  ;;  %v7101_v42 = vld [vmem:[%s15998_s17 + $0x20] sm:$0xff] }
 0x8ff   : > { %6876 = vmatpush.msra.mxu1 %v14864_v32  ;;  %v6703_v12 = vpop.f32.mrf.mxu0 }
 0x901   : > { %6877 = vmatpush.msra.mxu1 %v14877_v13  ;;  %v7139_v13 = vld [vmem:[%s15998_s17 + $0x150] sm:$0xff] }
 0x902   : > { %6878 = vmatmul.f32.vlgmr.msra.gmra.mxu1 %v14573_v45 }
 0x903   : > { %8643 = vmatpush.msk.msrb.mxu1 %vm4399_vm12, %v14998_v47 }
 0x905   : > { %7177 = vmatpush.msra.mxu1 %v7145_v30  ;;  %v7103_v30 = vld [vmem:[%s15998_s17 + $0x30] sm:$0xff] }
 0x906   : > { %v6723_v60 = vpop.f32.mrf.mxu2 }
 0x907   : > { %7178 = vmatpush.msra.mxu1 %v7143_v16  ;;  %v6724_v32 = vadd.f32 %v6723_v60, %v6703_v12  ;;  %v7099_v16 = vld [vmem:[%s15998_s17 + $0x10] sm:$0xff]  ;;  %v8682_v12 = vld [vmem:[%s15998_s17 + $0x288] sm:$0xff]  ;;  %v8680_v60 = vld [vmem:[%s15998_s17 + $0x278] sm:$0xff] }
 0x909   : > { %7179 = vmatpush.msra.mxu1 %v7141_v55  ;;  %v6727_v8 = vadd.f32 %v6724_v32, %v6642_v33  ;;  %v7097_v55 = vld [vmem:[%s15998_s17] sm:$0xff]  ;;  %v8678_v33 = vld [vmem:[%s15998_s17 + $0x268] sm:$0xff]  ;;  %v8676_v32 = vld [vmem:[%s15998_s17 + $0x258] sm:$0xff] }
 0x90a   : > { %8644 = vmatmul.msk.f32.vlgmr.msrb.gmra.mxu1 %vm6122_vm1, %v11779_v27 }
 0x90b   : > { %7180 = vmatpush.msra.mxu1 %v7139_v13  ;;  %vm6729_vm15 = vcmp.ge.f32.partialorder %v6727_v8, 0.0  ;;  %v6731_v57 = vmul.f32 0.01, %v6727_v8  ;;  %v8674_v13 = vld [vmem:[%s15998_s17 + $0x248] sm:$0xff] }
 0x90d   : > { %7181 = vmatpush.msra.mxu1 %v7137_v23  ;;  %v6733_v56 = vsel %vm6729_vm15, %v6727_v8, %v6731_v57  ;;  %v8672_v8 = vld [vmem:[%s15998_s17 + $0x238] sm:$0xff]  ;;  %v8670_v23 = vld [vmem:[%s15998_s17 + $0x228] sm:$0xff] }
 0x90e   : > { %8625 = vmatpush.msk.msra.mxu3 %vm4399_vm12, %v6733_v56  ;;  %8629 = vmatpush.msk.msra.mxu2 %vm4399_vm12, %v6733_v56  ;;  %v8668_v57 = vld [vmem:[%s15998_s17 + $0x218] sm:$0xff] }
 0x90f   : > { %7182 = vmatpush.msra.mxu1 %v7135_v53  ;;  %8626 = vmatmul.msk.f32.vlgmr.msra.gmra.mxu3 %vm6122_vm1, %v11779_v27  ;;  %v8666_v53 = vld [vmem:[%s15998_s17 + $0x208] sm:$0xff] }
 0x910   : > { %6822 = vmatpush.msrb.mxu3 %v14663_v43  ;;  %6889 = vmatpush.msrb.mxu2 %v17081_v52  ;;  %v17083_v43 = vld [vmem:[#allocation70_spill] sm:$0xff]  ;;  %v8662_v52 = vld [vmem:[%s15998_s17 + $0x1e8] sm:$0xff] }
 0x911   : > { %7183 = vmatpush.msra.mxu1 %v7133_v62  ;;  %8630 = vmatmul.msk.f32.vlgmr.msra.gmra.mxu2 %vm6122_vm1, %v11828_v15  ;;  %v8664_v62 = vld [vmem:[%s15998_s17 + $0x1f8] sm:$0xff] }
 0x912   : > { %6823 = vmatpush.msrb.mxu3 %v14678_v39  ;;  %6890 = vmatpush.msrb.mxu2 %v17082_v25  ;;  %v8679_v39 = vld [vmem:[%s15998_s17 + $0x270] sm:$0xff]  ;;  %v8658_v25 = vld [vmem:[%s15998_s17 + $0x1c8] sm:$0xff] }
 0x913   : > { %7184 = vmatpush.msra.mxu1 %v7131_v41  ;;  %v8660_v41 = vld [vmem:[%s15998_s17 + $0x1d8] sm:$0xff] }
 0x914   : > { %6824 = vmatpush.msrb.mxu3 %v14691_v26  ;;  %6891 = vmatpush.msrb.mxu2 %v17083_v43  ;;  %v17085_v26 = vld [vmem:[#allocation72_spill] sm:$0xff]  ;;  %v8656_v43 = vld [vmem:[%s15998_s17 + $0x1b8] sm:$0xff] }
 0x915   : > { %7185 = vmatpush.msra.mxu1 %v7129_v18 }
 0x916   : > { %6825 = vmatpush.msrb.mxu3 %v14707_v1  ;;  %6892 = vmatpush.msrb.mxu2 %v17084_v19  ;;  %v17086_v1 = vld [vmem:[#allocation73_spill] sm:$0xff] }
 0x917   : > { %8649 = vmatmul.msk.f32.vlgmr.msra.gmra.mxu1 %vm3034_vm10, %v14576_v63  ;;  %v8654_v19 = vld [vmem:[%s15998_s17 + $0x1a8] sm:$0xff] }
 0x918   : > { %7290 = vmatpush.msrb.mxu1 %v8681_v11  ;;  %6826 = vmatpush.msrb.mxu3 %v14722_v61  ;;  %v17087_v61 = vld [vmem:[#allocation74_spill] sm:$0xff] }
 0x919   : > { %6893 = vmatpush.msrb.mxu2 %v17085_v26  ;;  %v8751_v26 = vld [vmem:[%s15998_s17 + $0x4a0] sm:$0xff] }
 0x91a   : > { %7291 = vmatpush.msrb.mxu1 %v8679_v39  ;;  %6827 = vmatpush.msrb.mxu3 %v14736_v34  ;;  %v8671_v34 = vld [vmem:[%s15998_s17 + $0x230] sm:$0xff]  ;;  %v8652_v39 = vld [vmem:[%s15998_s17 + $0x198] sm:$0xff] }
 0x91b   : > { %6894 = vmatpush.msrb.mxu2 %v17086_v1  ;;  %v8749_v1 = vld [vmem:[%s15998_s17 + $0x490] sm:$0xff] }
 0x91c   : > { %7292 = vmatpush.msrb.mxu1 %v8677_v31  ;;  %6828 = vmatpush.msrb.mxu3 %v14749_v35  ;;  %v8669_v35 = vld [vmem:[%s15998_s17 + $0x220] sm:$0xff]  ;;  %v8752_v31 = vld [vmem:[%s15998_s17 + $0x4a8] sm:$0xff] }
 0x91d   : > { %6895 = vmatpush.msrb.mxu2 %v17087_v61  ;;  %v8748_v61 = vld [vmem:[%s15998_s17 + $0x488] sm:$0xff] }
 0x91e   : > { %7293 = vmatpush.msrb.mxu1 %v8675_v17  ;;  %6829 = vmatpush.msrb.mxu3 %v14763_v21  ;;  %v8667_v21 = vld [vmem:[%s15998_s17 + $0x210] sm:$0xff]  ;;  %v8750_v17 = vld [vmem:[%s15998_s17 + $0x498] sm:$0xff] }
 0x91f   : > { %6896 = vmatpush.msrb.mxu2 %v17088_v10  ;;  %v8746_v10 = vld [vmem:[%s15998_s17 + $0x478] sm:$0xff] }
 0x920   : > { %7294 = vmatpush.msrb.mxu1 %v8673_v59  ;;  %6830 = vmatpush.msrb.mxu3 %v14777_v7  ;;  %v8663_v7 = vld [vmem:[%s15998_s17 + $0x1f0] sm:$0xff] }
 0x921   : > { %6897 = vmatpush.msrb.mxu2 %v14522_v29  ;;  %v8665_v29 = vld [vmem:[%s15998_s17 + $0x200] sm:$0xff]  ;;  %v8745_v59 = vld [vmem:[%s15998_s17 + $0x470] sm:$0xff] }
 0x922   : > { %7295 = vmatpush.msrb.mxu1 %v8671_v34  ;;  %8632 = vmatmul.msk.f32.vlgmr.msrb.gmra.mxu2 %vm3034_vm10, %v14897_v2  ;;  %v8655_v2 = vld [vmem:[%s15998_s17 + $0x1b0] sm:$0xff]  ;;  %v8743_v34 = vld [vmem:[%s15998_s17 + $0x460] sm:$0xff] }
 0x923   : > { %6831 = vmatpush.msrb.mxu3 %v14790_v49  ;;  %v8661_v49 = vld [vmem:[%s15998_s17 + $0x1e0] sm:$0xff] }
 0x924   : > { %7296 = vmatpush.msrb.mxu1 %v8669_v35  ;;  %v8744_v35 = vld [vmem:[%s15998_s17 + $0x468] sm:$0xff] }
 0x925   : > { %6832 = vmatpush.msrb.mxu3 %v14803_v48  ;;  %v8659_v48 = vld [vmem:[%s15998_s17 + $0x1d0] sm:$0xff] }
 0x926   : > { %7297 = vmatpush.msrb.mxu1 %v8667_v21  ;;  %v8741_v21 = vld [vmem:[%s15998_s17 + $0x450] sm:$0xff] }
 0x927   : > { %6833 = vmatpush.msrb.mxu3 %v14816_v22  ;;  %v7004_v22 = vmul.f32 0.01, %v14968_v36 }
 0x928   : > { %7298 = vmatpush.msrb.mxu1 %v8665_v29  ;;  %v8742_v29 = vld [vmem:[%s15998_s17 + $0x458] sm:$0xff] }
 0x929   : > { %6834 = vmatpush.msrb.mxu3 %v14831_v20  ;;  %v8657_v20 = vld [vmem:[%s15998_s17 + $0x1c0] sm:$0xff] }
 0x92a   : > { %7299 = vmatpush.msrb.mxu1 %v8663_v7  ;;  %v8739_v7 = vld [vmem:[%s15998_s17 + $0x440] sm:$0xff] }
 0x92b   : > { %6835 = vmatpush.msrb.mxu3 %v14845_v0  ;;  %v7127_v0 = vld [vmem:[%s15998_s17 + $0xf0] sm:$0xff] }
 0x92c   : > { %7300 = vmatpush.msrb.mxu1 %v8661_v49  ;;  %v8740_v49 = vld [vmem:[%s15998_s17 + $0x448] sm:$0xff] }
 0x92d   : > { %6836 = vmatpush.msrb.mxu3 %v14858_v6  ;;  %v15112_v6 = vsel %vm7002_vm4, %v14968_v36, %v7004_v22  ;;  %v8651_v36 = vld [vmem:[%s15998_s17 + $0x190] sm:$0xff]  ;;  %v8738_v22 = vld [vmem:[%s15998_s17 + $0x438] sm:$0xff] }
 0x92e   : > { %7301 = vmatpush.msrb.mxu1 %v8659_v48  ;;  %v8737_v48 = vld [vmem:[%s15998_s17 + $0x430] sm:$0xff] }
 0x92f   : > { %6837 = vmatpush.msrb.mxu3 %v14871_v14  ;;  %v7125_v14 = vld [vmem:[%s15998_s17 + $0xe0] sm:$0xff] }
 0x930   : > { %7302 = vmatpush.msrb.mxu1 %v8657_v20  ;;  %6838 = vmatmul.f32.vlgmr.msrb.gmra.mxu3 %v14573_v45  ;;  %v7123_v45 = vld [vmem:[%s15998_s17 + $0xd0] sm:$0xff]  ;;  %v8735_v20 = vld [vmem:[%s15998_s17 + $0x420] sm:$0xff] }
 0x931   : > { %8641 = vmatpush.msk.msra.mxu3 %vm4399_vm12, %v15112_v6 }
 0x932   : > { %7303 = vmatpush.msrb.mxu1 %v8655_v2 }
 0x933   : > { %7150 = vmatpush.msrb.mxu3 %v7127_v0  ;;  %v8736_v0 = vld [vmem:[%s15998_s17 + $0x428] sm:$0xff] }
 0x934   : > { %7304 = vmatpush.msrb.mxu1 %v8653_v50 }
 0x935   : > { %7151 = vmatpush.msrb.mxu3 %v7125_v14 }
 0x936   : > { %7305 = vmatpush.msrb.mxu1 %v8651_v36 }
 0x937   : > { %7152 = vmatpush.msrb.mxu3 %v7123_v45  ;;  %7306 = vmatmul.f32.vlgmr.msrb.gmra.mxu1 %v14963_v46 }
 0x938   : > { %8642 = vmatmul.msk.f32.vlgmr.msra.gmra.mxu3 %vm6122_vm1, %v11779_v27  ;;  %7457 = vmatpush.msra.mxu1 %v8751_v26  ;;  %v8691_v26 = vld [vmem:[%s15998_s17 + $0x2d0] sm:$0xff] }
 0x939   : > { %7153 = vmatpush.msrb.mxu3 %v7121_v37 }
 0x93a   : > { %7458 = vmatpush.msra.mxu1 %v8749_v1  ;;  %v7114_v1 = vld [vmem:[%s15998_s17 + $0x88] sm:$0xff] }
 0x93b   : > { %7154 = vmatpush.msrb.mxu3 %v7119_v58 }
 0x93d   : > { %7155 = vmatpush.msrb.mxu3 %v7117_v28  ;;  %v17089_v28 = vld [vmem:[#allocation78_spill] sm:$0xff] }
 0x93f   : > { %7156 = vmatpush.msrb.mxu3 %v7115_v24 }
 0x941   : > { %7157 = vmatpush.msrb.mxu3 %v7113_v51  ;;  %v17090_v51 = vld [vmem:[#allocation79_spill] sm:$0xff] }
 0x943   : > { %7158 = vmatpush.msrb.mxu3 %v7111_v4 }
 0x945   : > { %7159 = vmatpush.msrb.mxu3 %v7109_v9 }
 0x947   : > { %7160 = vmatpush.msrb.mxu3 %v7107_v5 }
 0x949   : > { %7161 = vmatpush.msrb.mxu3 %v7105_v44  ;;  %v6859_v44 = vpop.f32.mrf.mxu0 }
 0x94b   : > { %7162 = vmatpush.msrb.mxu3 %v7103_v30 }
 0x94d   : > { %7163 = vmatpush.msrb.mxu3 %v7101_v42 }
 0x94f   : > { %7164 = vmatpush.msrb.mxu3 %v7099_v16  ;;  %v17091_v16 = vld [vmem:[#allocation76_spill] sm:$0xff] }
 0x951   : > { %7165 = vmatpush.msrb.mxu3 %v7097_v55 }
 0x952   : > { %7166 = vmatmul.f32.vlgmr.msrb.gmra.mxu3 %v14571_v38 }
 0x953   : > { %7330 = vmatpush.msra.mxu3 %v8682_v12  ;;  %v7146_v12 = vld [vmem:[%s15998_s17 + $0x188] sm:$0xff] }
 0x955   : > { %7331 = vmatpush.msra.mxu3 %v8680_v60  ;;  %v17092_v60 = vld [vmem:[#allocation77_spill] sm:$0xff] }
 0x957   : > { %7332 = vmatpush.msra.mxu3 %v8678_v33 }
 0x959   : > { %7333 = vmatpush.msra.mxu3 %v8676_v32  ;;  %v7144_v32 = vld [vmem:[%s15998_s17 + $0x178] sm:$0xff] }
 0x95b   : > { %7334 = vmatpush.msra.mxu3 %v8674_v13 }
 0x95d   : > { %7335 = vmatpush.msra.mxu3 %v8672_v8  ;;  %v6757_v56 = vpop.f32.mrf.mxu1  ;;  %v7140_v8 = vld [vmem:[%s15998_s17 + $0x158] sm:$0xff] }
 0x95f   : > { %7336 = vmatpush.msra.mxu3 %v8670_v23  ;;  %v7138_v23 = vld [vmem:[%s15998_s17 + $0x148] sm:$0xff] }
 0x961   : > { %7337 = vmatpush.msra.mxu3 %v8668_v57  ;;  %v7136_v57 = vld [vmem:[%s15998_s17 + $0x138] sm:$0xff] }
 0x963   : > { %7338 = vmatpush.msra.mxu3 %v8666_v53  ;;  %v7128_v53 = vld [vmem:[%s15998_s17 + $0xf8] sm:$0xff] }
 0x965   : > { %7339 = vmatpush.msra.mxu3 %v8664_v62  ;;  %v6797_v18 = vpop.f32.mrf.mxu1  ;;  %v7130_v62 = vld [vmem:[%s15998_s17 + $0x108] sm:$0xff] }
 0x966   : > { %v15213_v11 = vmax.f32 %v6757_v56, %v6797_v18  ;;  %v7126_v56 = vld [vmem:[%s15998_s17 + $0xe8] sm:$0xff] }
 0x967   : > { %7340 = vmatpush.msra.mxu3 %v8662_v52  ;;  %v8699_v52 = vld [vmem:[%s15998_s17 + $0x310] sm:$0xff]  ;;  %v7122_v18 = vld [vmem:[%s15998_s17 + $0xc8] sm:$0xff] }
 0x969   : > { %7341 = vmatpush.msra.mxu3 %v8660_v41  ;;  %v7124_v41 = vld [vmem:[%s15998_s17 + $0xd8] sm:$0xff] }
 0x96b   : > { %7342 = vmatpush.msra.mxu3 %v8658_v25  ;;  %v8697_v25 = vld [vmem:[%s15998_s17 + $0x300] sm:$0xff] }
 0x96d   : > { %7343 = vmatpush.msra.mxu3 %v8656_v43  ;;  %v8695_v43 = vld [vmem:[%s15998_s17 + $0x2f0] sm:$0xff] }
 0x96f   : > { %7344 = vmatpush.msra.mxu3 %v8654_v19  ;;  %v7120_v19 = vld [vmem:[%s15998_s17 + $0xb8] sm:$0xff] }
 0x971   : > { %7345 = vmatpush.msra.mxu3 %v8652_v39  ;;  %v7118_v39 = vld [vmem:[%s15998_s17 + $0xa8] sm:$0xff] }
 0x972   : > { %7346 = vmatmul.f32.vlgmr.msra.gmra.mxu3 %v14963_v46  ;;  %v8747_v46 = vld [vmem:[%s15998_s17 + $0x480] sm:$0xff] }
 0x973   : > { %7497 = vmatpush.msrb.mxu3 %v8752_v31  ;;  %7459 = vmatpush.msra.mxu1 %v8747_v46  ;;  %v7116_v31 = vld [vmem:[%s15998_s17 + $0x98] sm:$0xff] }
 0x974   : > { %v7112_v46 = vld [vmem:[%s15998_s17 + $0x78] sm:$0xff] }
 0x975   : > { %7498 = vmatpush.msrb.mxu3 %v8750_v17  ;;  %7460 = vmatpush.msra.mxu1 %v8745_v59  ;;  %v8687_v17 = vld [vmem:[%s15998_s17 + $0x2b0] sm:$0xff]  ;;  %v7110_v59 = vld [vmem:[%s15998_s17 + $0x68] sm:$0xff] }
 0x977   : > { %7499 = vmatpush.msrb.mxu3 %v8748_v61  ;;  %7461 = vmatpush.msra.mxu1 %v8743_v34  ;;  %v8685_v61 = vld [vmem:[%s15998_s17 + $0x2a0] sm:$0xff]  ;;  %v7108_v34 = vld [vmem:[%s15998_s17 + $0x58] sm:$0xff] }
 0x979   : > { %7500 = vmatpush.msrb.mxu3 %v8746_v10  ;;  %7462 = vmatpush.msra.mxu1 %v8741_v21  ;;  %v8683_v10 = vld [vmem:[%s15998_s17 + $0x290] sm:$0xff]  ;;  %v7106_v21 = vld [vmem:[%s15998_s17 + $0x48] sm:$0xff] }
 0x97b   : > { %7501 = vmatpush.msrb.mxu3 %v8744_v35  ;;  %7463 = vmatpush.msra.mxu1 %v8739_v7  ;;  %v8733_v35 = vld [vmem:[%s15998_s17 + $0x410] sm:$0xff]  ;;  %v7104_v7 = vld [vmem:[%s15998_s17 + $0x38] sm:$0xff] }
 0x97d   : > { %7502 = vmatpush.msrb.mxu3 %v8742_v29  ;;  %7464 = vmatpush.msra.mxu1 %v8737_v48  ;;  %v8731_v29 = vld [vmem:[%s15998_s17 + $0x400] sm:$0xff]  ;;  %v7102_v48 = vld [vmem:[%s15998_s17 + $0x28] sm:$0xff] }
 0x97f   : > { %7503 = vmatpush.msrb.mxu3 %v8740_v49  ;;  %7465 = vmatpush.msra.mxu1 %v8735_v20  ;;  %v6879_v45 = vpop.f32.mrf.mxu1  ;;  %v8729_v49 = vld [vmem:[%s15998_s17 + $0x3f0] sm:$0xff]  ;;  %v7100_v20 = vld [vmem:[%s15998_s17 + $0x18] sm:$0xff] }
 0x981   : > { %7504 = vmatpush.msrb.mxu3 %v8738_v22  ;;  %v8727_v22 = vld [vmem:[%s15998_s17 + $0x3e0] sm:$0xff] }
 0x983   : > { %7505 = vmatpush.msrb.mxu3 %v8736_v0  ;;  %v8725_v0 = vld [vmem:[%s15998_s17 + $0x3d0] sm:$0xff] }
 0x992   : > { %v6777_v2 = vpop.f32.mrf.mxu3 }
 0x994   : > { %v6817_v14 = vpop.f32.mrf.mxu2 }
 0x995   : > { %v6821_v50 = vmax.f32 %v6777_v2, %v6817_v14  ;;  %v7098_v2 = vld [vmem:[%s15998_s17 + $0x8] sm:$0xff]  ;;  %v8723_v14 = vld [vmem:[%s15998_s17 + $0x3c0] sm:$0xff] }
 0x997   : > { %8753 = vmatmul.msk.f32.vlgmr.msra.gmra.mxu1 %vm3034_vm10, %v6821_v50  ;;  %8754 = vmatmul.msk.f32.vlgmr.msrb.gmra.mxu3 %vm3034_vm10, %v6821_v50  ;;  %v8700_v50 = vld [vmem:[%s15998_s17 + $0x318] sm:$0xff] }
 0x9a5   : > { %v6899_v36 = vpop.f32.mrf.mxu2 }
 0x9a6   : > { %v6900_v37 = vadd.f32 %v6899_v36, %v6879_v45  ;;  %v8721_v45 = vld [vmem:[%s15998_s17 + $0x3b0] sm:$0xff]  ;;  %v8698_v36 = vld [vmem:[%s15998_s17 + $0x308] sm:$0xff] }
 0x9a8   : > { %v6903_v58 = vadd.f32 %v6900_v37, %v13790_v3  ;;  %v8719_v37 = vld [vmem:[%s15998_s17 + $0x3a0] sm:$0xff] }
 0x9aa   : > { %v6905_v24 = vadd.f32 %v6903_v58, %v17089_v28  ;;  %v8696_v58 = vld [vmem:[%s15998_s17 + $0x2f8] sm:$0xff]  ;;  %v8694_v28 = vld [vmem:[%s15998_s17 + $0x2e8] sm:$0xff] }
 0x9ac   : > { %v6907_v4 = vadd.f32 %v6905_v24, %v17090_v51  ;;  %v8715_v24 = vld [vmem:[%s15998_s17 + $0x380] sm:$0xff]  ;;  %v8692_v51 = vld [vmem:[%s15998_s17 + $0x2d8] sm:$0xff] }
 0x9ae   : > { %vm6909_vm2 = vcmp.ge.f32.partialorder %v6907_v4, 0.0  ;;  %v6911_v9 = vmul.f32 0.01, %v6907_v4 }
 0x9b0   : > { %v6913_v5 = vsel %vm6909_vm2, %v6907_v4, %v6911_v9  ;;  %v8713_v4 = vld [vmem:[%s15998_s17 + $0x370] sm:$0xff]  ;;  %v8690_v9 = vld [vmem:[%s15998_s17 + $0x2c8] sm:$0xff] }
 0x9b1   : > { %8635 = vmatpush.msk.msra.mxu2 %vm4399_vm12, %v6913_v5 }
 0x9b2   : > { %8636 = vmatmul.msk.f32.vlgmr.msra.gmra.mxu2 %vm6122_vm1, %v11779_v27 }
 0x9b3   : > { %8639 = vmatpush.msk.msrb.mxu2 %vm4399_vm12, %v6913_v5  ;;  %v6839_v30 = vpop.f32.mrf.mxu3  ;;  %v8711_v5 = vld [vmem:[%s15998_s17 + $0x360] sm:$0xff] }
 0x9b4   : > { %v6860_v42 = vadd.f32 %v6859_v44, %v6839_v30  ;;  %v8688_v44 = vld [vmem:[%s15998_s17 + $0x2b8] sm:$0xff]  ;;  %v8709_v30 = vld [vmem:[%s15998_s17 + $0x350] sm:$0xff] }
 0x9b5   : > { %8647 = vmatpush.msk.msra.mxu2 %vm4399_vm12, %v14998_v47 }
 0x9b6   : > { %v6902_v3 = vadd.f32 %v6860_v42, %v13773_v40  ;;  %v7142_v40 = vld [vmem:[%s15998_s17 + $0x168] sm:$0xff] }
 0x9b7   : > { %v8686_v42 = vld [vmem:[%s15998_s17 + $0x2a8] sm:$0xff] }
 0x9b8   : > { %v6904_v55 = vadd.f32 %v6902_v3, %v17091_v16  ;;  %v8707_v3 = vld [vmem:[%s15998_s17 + $0x340] sm:$0xff]  ;;  %v8684_v16 = vld [vmem:[%s15998_s17 + $0x298] sm:$0xff] }
 0x9ba   : > { %v6906_v33 = vadd.f32 %v6904_v55, %v17092_v60  ;;  %8640 = vmatmul.msk.f32.vlgmr.msrb.gmra.mxu2 %vm6122_vm1, %v11828_v15  ;;  %v8705_v55 = vld [vmem:[%s15998_s17 + $0x330] sm:$0xff]  ;;  %v8703_v60 = vld [vmem:[%s15998_s17 + $0x320] sm:$0xff] }
 0x9bb   : > { %7217 = vmatpush.msrb.mxu2 %v7146_v12  ;;  %v8734_v12 = vld [vmem:[%s15998_s17 + $0x418] sm:$0xff] }
 0x9bc   : > { %vm6908_vm3 = vcmp.ge.f32.partialorder %v6906_v33, 0.0  ;;  %v6910_v47 = vmul.f32 0.01, %v6906_v33 }
 0x9bd   : > { %7218 = vmatpush.msrb.mxu2 %v7144_v32  ;;  %v8786_v32 = vld [vmem:[%s15998_s17 + $0x5a8] sm:$0xff] }
 0x9be   : > { %v6912_v13 = vsel %vm6908_vm3, %v6906_v33, %v6910_v47  ;;  %v8732_v33 = vld [vmem:[%s15998_s17 + $0x408] sm:$0xff]  ;;  %7610 = vmatpush.msra.mxu3 %v8786_v32  ;;  %v8803_v47 = vld [vmem:[%s15998_s17 + $0x630] sm:$0xff]  ;;  %v8823_v32 = vld [vmem:[%s15998_s17 + $0x6c0] sm:$0xff] }
 0x9bf   : > { %7219 = vmatpush.msrb.mxu2 %v7142_v40  ;;  %8633 = vmatpush.msk.msra.mxu0 %vm4399_vm12, %v6912_v13  ;;  %v8784_v40 = vld [vmem:[%s15998_s17 + $0x598] sm:$0xff] }
 0x9c0   : > { %8634 = vmatmul.msk.f32.vlgmr.msra.gmra.mxu0 %vm6122_vm1, %v11779_v27  ;;  %v7134_v27 = vld [vmem:[%s15998_s17 + $0x128] sm:$0xff]  ;;  %7611 = vmatpush.msra.mxu3 %v8784_v40  ;;  %v8796_v40 = vld [vmem:[%s15998_s17 + $0x5f8] sm:$0xff] }
 0x9c1   : > { %8637 = vmatpush.msk.msrb.mxu0 %vm4399_vm12, %v6912_v13  ;;  %7220 = vmatpush.msrb.mxu2 %v7140_v8  ;;  %v8782_v13 = vld [vmem:[%s15998_s17 + $0x588] sm:$0xff] }
 0x9c2   : > { %8648 = vmatmul.msk.f32.vlgmr.msra.gmra.mxu2 %vm6122_vm1, %v11828_v15  ;;  %v8728_v8 = vld [vmem:[%s15998_s17 + $0x3e8] sm:$0xff]  ;;  %7612 = vmatpush.msra.mxu3 %v8782_v13  ;;  %v8821_v13 = vld [vmem:[%s15998_s17 + $0x6b0] sm:$0xff] }
 0x9c3   : > { %8645 = vmatpush.msk.msra.mxu0 %vm4399_vm12, %v15112_v6  ;;  %7221 = vmatpush.msrb.mxu2 %v7138_v23  ;;  %v7132_v6 = vld [vmem:[%s15998_s17 + $0x118] sm:$0xff]  ;;  %v8801_v23 = vld [vmem:[%s15998_s17 + $0x620] sm:$0xff] }
 0x9c5   : > { %7222 = vmatpush.msrb.mxu2 %v7136_v57  ;;  %v8785_v57 = vld [vmem:[%s15998_s17 + $0x5a0] sm:$0xff] }
 0x9c6   : > { %7570 = vmatpush.msrb.mxu1 %v8785_v57  ;;  %v8852_v57 = vld [vmem:[%s15998_s17 + $0x7a8] sm:$0xff] }
 0x9c7   : > { %7223 = vmatpush.msrb.mxu2 %v7134_v27  ;;  %v8780_v27 = vld [vmem:[%s15998_s17 + $0x578] sm:$0xff] }
 0x9c8   : > { %8638 = vmatmul.msk.f32.vlgmr.msrb.gmra.mxu0 %vm6122_vm1, %v11828_v15  ;;  %7613 = vmatpush.msra.mxu3 %v8780_v27  ;;  %v8819_v27 = vld [vmem:[%s15998_s17 + $0x6a0] sm:$0xff] }
 0x9c9   : > { %7190 = vmatpush.msrb.mxu0 %v7128_v53  ;;  %7224 = vmatpush.msrb.mxu2 %v7132_v6  ;;  %v8783_v53 = vld [vmem:[%s15998_s17 + $0x590] sm:$0xff]  ;;  %v8726_v6 = vld [vmem:[%s15998_s17 + $0x3d8] sm:$0xff] }
 0x9ca   : > { %7571 = vmatpush.msrb.mxu1 %v8783_v53  ;;  %v8792_v53 = vld [vmem:[%s15998_s17 + $0x5d8] sm:$0xff] }
 0x9cb   : > { %7191 = vmatpush.msrb.mxu0 %v7126_v56  ;;  %7225 = vmatpush.msrb.mxu2 %v7130_v62  ;;  %v8799_v56 = vld [vmem:[%s15998_s17 + $0x610] sm:$0xff]  ;;  %v8778_v62 = vld [vmem:[%s15998_s17 + $0x568] sm:$0xff] }
 0x9cc   : > { %8650 = vmatmul.msk.f32.vlgmr.msrb.gmra.mxu2 %vm3034_vm10, %v14576_v63  ;;  %v8693_v63 = vld [vmem:[%s15998_s17 + $0x2e0] sm:$0xff]  ;;  %7614 = vmatpush.msra.mxu3 %v8778_v62  ;;  %v8850_v62 = vld [vmem:[%s15998_s17 + $0x798] sm:$0xff] }
 0x9cd   : > { %7317 = vmatpush.msra.mxu2 %v8699_v52  ;;  %7192 = vmatpush.msrb.mxu0 %v7124_v41  ;;  %v8724_v52 = vld [vmem:[%s15998_s17 + $0x3c8] sm:$0xff]  ;;  %v8797_v41 = vld [vmem:[%s15998_s17 + $0x600] sm:$0xff] }
 0x9cf   : > { %7318 = vmatpush.msra.mxu2 %v8697_v25  ;;  %7193 = vmatpush.msrb.mxu0 %v7122_v18  ;;  %v8776_v25 = vld [vmem:[%s15998_s17 + $0x558] sm:$0xff]  ;;  %v8781_v18 = vld [vmem:[%s15998_s17 + $0x580] sm:$0xff] }
 0x9d0   : > { %8646 = vmatmul.msk.f32.vlgmr.msra.gmra.mxu0 %vm6122_vm1, %v11828_v15  ;;  %v8689_v15 = vld [vmem:[%s15998_s17 + $0x2c0] sm:$0xff]  ;;  %7572 = vmatpush.msrb.mxu1 %v8781_v18  ;;  %v8848_v18 = vld [vmem:[%s15998_s17 + $0x788] sm:$0xff] }
 0x9d1   : > { %7319 = vmatpush.msra.mxu2 %v8695_v43  ;;  %7194 = vmatpush.msrb.mxu0 %v7120_v19  ;;  %v8722_v43 = vld [vmem:[%s15998_s17 + $0x3b8] sm:$0xff]  ;;  %v8795_v19 = vld [vmem:[%s15998_s17 + $0x5f0] sm:$0xff] }
 0x9d2   : > { %7615 = vmatpush.msra.mxu3 %v8776_v25  ;;  %v8855_v25 = vld [vmem:[%s15998_s17 + $0x7c0] sm:$0xff] }
 0x9d3   : > { %7320 = vmatpush.msra.mxu2 %v8693_v63  ;;  %7195 = vmatpush.msrb.mxu0 %v7118_v39  ;;  %v8779_v63 = vld [vmem:[%s15998_s17 + $0x570] sm:$0xff]  ;;  %v8774_v39 = vld [vmem:[%s15998_s17 + $0x548] sm:$0xff] }
 0x9d4   : > { %7573 = vmatpush.msrb.mxu1 %v8779_v63  ;;  %7616 = vmatpush.msra.mxu3 %v8774_v39  ;;  %v8838_v63 = vld [vmem:[%s15998_s17 + $0x738] sm:$0xff] }
 0x9d5   : > { %7321 = vmatpush.msra.mxu2 %v8691_v26  ;;  %7196 = vmatpush.msrb.mxu0 %v7116_v31  ;;  %v8777_v26 = vld [vmem:[%s15998_s17 + $0x560] sm:$0xff]  ;;  %v8720_v31 = vld [vmem:[%s15998_s17 + $0x3a8] sm:$0xff]  ;;  %v8846_v39 = vld [vmem:[%s15998_s17 + $0x778] sm:$0xff] }
 0x9d6   : > { %7574 = vmatpush.msrb.mxu1 %v8777_v26  ;;  %v8813_v26 = vld [vmem:[%s15998_s17 + $0x670] sm:$0xff] }
 0x9d7   : > { %7322 = vmatpush.msra.mxu2 %v8689_v15  ;;  %7197 = vmatpush.msrb.mxu0 %v7114_v1  ;;  %v8793_v15 = vld [vmem:[%s15998_s17 + $0x5e0] sm:$0xff]  ;;  %v8772_v1 = vld [vmem:[%s15998_s17 + $0x538] sm:$0xff] }
 0x9d8   : > { %7617 = vmatpush.msra.mxu3 %v8772_v1  ;;  %v8844_v1 = vld [vmem:[%s15998_s17 + $0x768] sm:$0xff] }
 0x9d9   : > { %7323 = vmatpush.msra.mxu2 %v8687_v17  ;;  %7198 = vmatpush.msrb.mxu0 %v7112_v46  ;;  %v8775_v17 = vld [vmem:[%s15998_s17 + $0x550] sm:$0xff]  ;;  %v8718_v46 = vld [vmem:[%s15998_s17 + $0x398] sm:$0xff] }
 0x9da   : > { %7575 = vmatpush.msrb.mxu1 %v8775_v17  ;;  %v8811_v17 = vld [vmem:[%s15998_s17 + $0x660] sm:$0xff] }
 0x9db   : > { %7324 = vmatpush.msra.mxu2 %v8685_v61  ;;  %7199 = vmatpush.msrb.mxu0 %v7110_v59  ;;  %v8791_v61 = vld [vmem:[%s15998_s17 + $0x5d0] sm:$0xff]  ;;  %v8770_v59 = vld [vmem:[%s15998_s17 + $0x528] sm:$0xff] }
 0x9dc   : > { %7618 = vmatpush.msra.mxu3 %v8770_v59  ;;  %v8842_v59 = vld [vmem:[%s15998_s17 + $0x758] sm:$0xff] }
 0x9dd   : > { %7325 = vmatpush.msra.mxu2 %v8683_v10  ;;  %7200 = vmatpush.msrb.mxu0 %v7108_v34  ;;  %v8773_v10 = vld [vmem:[%s15998_s17 + $0x540] sm:$0xff]  ;;  %v8716_v34 = vld [vmem:[%s15998_s17 + $0x388] sm:$0xff] }
 0x9de   : > { %8701 = vmatmul.msk.f32.vlgmr.msra.gmra.mxu2 %vm3034_vm10, %v14965_v54  ;;  %7576 = vmatpush.msrb.mxu1 %v8773_v10  ;;  %v8832_v10 = vld [vmem:[%s15998_s17 + $0x708] sm:$0xff] }
 0x9df   : > { %7430 = vmatpush.msrb.mxu2 %v8733_v35  ;;  %7201 = vmatpush.msrb.mxu0 %v7106_v21  ;;  %v8789_v35 = vld [vmem:[%s15998_s17 + $0x5c0] sm:$0xff]  ;;  %v8768_v21 = vld [vmem:[%s15998_s17 + $0x518] sm:$0xff] }
 0x9e0   : > { %7619 = vmatpush.msra.mxu3 %v8768_v21  ;;  %v8840_v21 = vld [vmem:[%s15998_s17 + $0x748] sm:$0xff] }
 0x9e1   : > { %7431 = vmatpush.msrb.mxu2 %v8731_v29  ;;  %7202 = vmatpush.msrb.mxu0 %v7104_v7  ;;  %v8771_v29 = vld [vmem:[%s15998_s17 + $0x530] sm:$0xff]  ;;  %v8714_v7 = vld [vmem:[%s15998_s17 + $0x378] sm:$0xff] }
 0x9e2   : > { %7577 = vmatpush.msrb.mxu1 %v8771_v29  ;;  %v8807_v29 = vld [vmem:[%s15998_s17 + $0x640] sm:$0xff] }
 0x9e3   : > { %7432 = vmatpush.msrb.mxu2 %v8729_v49  ;;  %7203 = vmatpush.msrb.mxu0 %v7102_v48  ;;  %v8787_v49 = vld [vmem:[%s15998_s17 + $0x5b0] sm:$0xff] }
 0x9e4   : > { %v8837_v48 = vld [vmem:[%s15998_s17 + $0x730] sm:$0xff] }
 0x9e5   : > { %7433 = vmatpush.msrb.mxu2 %v8727_v22  ;;  %7204 = vmatpush.msrb.mxu0 %v7100_v20  ;;  %v8766_v22 = vld [vmem:[%s15998_s17 + $0x508] sm:$0xff] }
 0x9e6   : > { %v8712_v20 = vld [vmem:[%s15998_s17 + $0x368] sm:$0xff]  ;;  %7620 = vmatpush.msra.mxu3 %v8766_v22 }
 0x9e7   : > { %7434 = vmatpush.msrb.mxu2 %v8725_v0  ;;  %7205 = vmatpush.msrb.mxu0 %v7098_v2  ;;  %v8835_v0 = vld [vmem:[%s15998_s17 + $0x720] sm:$0xff]  ;;  %v8710_v2 = vld [vmem:[%s15998_s17 + $0x358] sm:$0xff]  ;;  %v8828_v22 = vld [vmem:[%s15998_s17 + $0x6e8] sm:$0xff] }
 0x9e8   : > { %7206 = vmatmul.f32.vlgmr.msrb.gmra.mxu0 %v14571_v38  ;;  %v8717_v38 = vld [vmem:[%s15998_s17 + $0x390] sm:$0xff] }
 0x9e9   : > { %7435 = vmatpush.msrb.mxu2 %v8723_v14  ;;  %7357 = vmatpush.msra.mxu0 %v8700_v50  ;;  %v8708_v14 = vld [vmem:[%s15998_s17 + $0x348] sm:$0xff]  ;;  %v8706_v50 = vld [vmem:[%s15998_s17 + $0x338] sm:$0xff] }
 0x9eb   : > { %7436 = vmatpush.msrb.mxu2 %v8721_v45  ;;  %7358 = vmatpush.msra.mxu0 %v8698_v36  ;;  %v8764_v45 = vld [vmem:[%s15998_s17 + $0x4f8] sm:$0xff]  ;;  %v8833_v36 = vld [vmem:[%s15998_s17 + $0x710] sm:$0xff] }
 0x9ec   : > { %7621 = vmatpush.msra.mxu3 %v8764_v45  ;;  %v8822_v45 = vld [vmem:[%s15998_s17 + $0x6b8] sm:$0xff] }
 0x9ed   : > { %7437 = vmatpush.msrb.mxu2 %v8719_v37  ;;  %7359 = vmatpush.msra.mxu0 %v8696_v58  ;;  %v8704_v37 = vld [vmem:[%s15998_s17 + $0x328] sm:$0xff]  ;;  %v8769_v58 = vld [vmem:[%s15998_s17 + $0x520] sm:$0xff] }
 0x9ee   : > { %7578 = vmatpush.msrb.mxu1 %v8769_v58 }
 0x9ef   : > { %7438 = vmatpush.msrb.mxu2 %v8717_v38  ;;  %7360 = vmatpush.msra.mxu0 %v8694_v28  ;;  %v8762_v38 = vld [vmem:[%s15998_s17 + $0x4e8] sm:$0xff]  ;;  %v8831_v28 = vld [vmem:[%s15998_s17 + $0x700] sm:$0xff] }
 0x9f0   : > { %7622 = vmatpush.msra.mxu3 %v8762_v38 }
 0x9f1   : > { %7439 = vmatpush.msrb.mxu2 %v8715_v24  ;;  %7361 = vmatpush.msra.mxu0 %v8692_v51  ;;  %v8767_v24 = vld [vmem:[%s15998_s17 + $0x510] sm:$0xff]  ;;  %v8804_v51 = vld [vmem:[%s15998_s17 + $0x638] sm:$0xff] }
 0x9f2   : > { %7579 = vmatpush.msrb.mxu1 %v8767_v24  ;;  %v8816_v24 = vld [vmem:[%s15998_s17 + $0x688] sm:$0xff] }
 0x9f3   : > { %7440 = vmatpush.msrb.mxu2 %v8713_v4  ;;  %7362 = vmatpush.msra.mxu0 %v8690_v9  ;;  %v8760_v4 = vld [vmem:[%s15998_s17 + $0x4d8] sm:$0xff]  ;;  %v8829_v9 = vld [vmem:[%s15998_s17 + $0x6f0] sm:$0xff] }
 0x9f4   : > { %7623 = vmatpush.msra.mxu3 %v8760_v4  ;;  %v8812_v4 = vld [vmem:[%s15998_s17 + $0x668] sm:$0xff] }
 0x9f5   : > { %7441 = vmatpush.msrb.mxu2 %v8711_v5  ;;  %7363 = vmatpush.msra.mxu0 %v8688_v44  ;;  %v8765_v5 = vld [vmem:[%s15998_s17 + $0x500] sm:$0xff]  ;;  %v8758_v44 = vld [vmem:[%s15998_s17 + $0x4c8] sm:$0xff] }
 0x9f6   : > { %7580 = vmatpush.msrb.mxu1 %v8765_v5  ;;  %7624 = vmatpush.msra.mxu3 %v8758_v44  ;;  %v8810_v44 = vld [vmem:[%s15998_s17 + $0x658] sm:$0xff] }
 0x9f7   : > { %7442 = vmatpush.msrb.mxu2 %v8709_v30  ;;  %7364 = vmatpush.msra.mxu0 %v8686_v42  ;;  %v8802_v30 = vld [vmem:[%s15998_s17 + $0x628] sm:$0xff]  ;;  %v8827_v42 = vld [vmem:[%s15998_s17 + $0x6e0] sm:$0xff] }
 0x9f9   : > { %7443 = vmatpush.msrb.mxu2 %v8707_v3  ;;  %7365 = vmatpush.msra.mxu0 %v8684_v16  ;;  %v8800_v3 = vld [vmem:[%s15998_s17 + $0x618] sm:$0xff]  ;;  %v8763_v16 = vld [vmem:[%s15998_s17 + $0x4f0] sm:$0xff] }
 0x9fa   : > { %8702 = vmatmul.msk.f32.vlgmr.msra.gmra.mxu0 %vm3034_vm10, %v14965_v54  ;;  %v8730_v54 = vld [vmem:[%s15998_s17 + $0x3f8] sm:$0xff]  ;;  %7581 = vmatpush.msrb.mxu1 %v8763_v16  ;;  %v7031_v16 = vpop.f32.mrf.mxu3 }
 0x9fb   : > { %7444 = vmatpush.msrb.mxu2 %v8705_v55  ;;  %7470 = vmatpush.msrb.mxu0 %v8734_v12  ;;  %v8756_v55 = vld [vmem:[%s15998_s17 + $0x4b8] sm:$0xff]  ;;  %v8825_v12 = vld [vmem:[%s15998_s17 + $0x6d0] sm:$0xff] }
 0x9fc   : > { %7625 = vmatpush.msra.mxu3 %v8756_v55 }
 0x9fd   : > { %7445 = vmatpush.msrb.mxu2 %v8703_v60  ;;  %7471 = vmatpush.msrb.mxu0 %v8732_v33  ;;  %v8761_v60 = vld [vmem:[%s15998_s17 + $0x4e0] sm:$0xff]  ;;  %v8856_v33 = vld [vmem:[%s15998_s17 + $0x7c8] sm:$0xff] }
 0x9fe   : > { %7446 = vmatmul.f32.vlgmr.msrb.gmra.mxu2 %v15213_v11  ;;  %7582 = vmatpush.msrb.mxu1 %v8761_v60  ;;  %v7811_v60 = vld [vmem:[%s16000_s19 + $0x78] sm:$0xff] }
 0x9ff   : > { %7472 = vmatpush.msrb.mxu0 %v8730_v54  ;;  %7597 = vmatpush.msra.mxu2 %v8803_v47  ;;  %v8759_v54 = vld [vmem:[%s15998_s17 + $0x4d0] sm:$0xff]  ;;  %v8854_v47 = vld [vmem:[%s15998_s17 + $0x7b8] sm:$0xff] }
 0xa00   : > { %7777 = vmatpush.msrb.mxu3 %v8856_v33  ;;  %7583 = vmatpush.msrb.mxu1 %v8759_v54  ;;  %v7827_v33 = vld [vmem:[%s16000_s19 + $0xf8] sm:$0xff]  ;;  %v7809_v54 = vld [vmem:[%s16000_s19 + $0x68] sm:$0xff] }
 0xa01   : > { %7473 = vmatpush.msrb.mxu0 %v8728_v8  ;;  %7598 = vmatpush.msra.mxu2 %v8801_v23  ;;  %v8757_v8 = vld [vmem:[%s15998_s17 + $0x4c0] sm:$0xff]  ;;  %v8794_v23 = vld [vmem:[%s15998_s17 + $0x5e8] sm:$0xff] }
 0xa02   : > { %7778 = vmatpush.msrb.mxu3 %v8854_v47  ;;  %7584 = vmatpush.msrb.mxu1 %v8757_v8  ;;  %v7825_v47 = vld [vmem:[%s16000_s19 + $0xe8] sm:$0xff]  ;;  %v7824_v8 = vld [vmem:[%s16000_s19 + $0xe0] sm:$0xff] }
 0xa03   : > { %7474 = vmatpush.msrb.mxu0 %v8726_v6  ;;  %7599 = vmatpush.msra.mxu2 %v8799_v56  ;;  %v8790_v6 = vld [vmem:[%s15998_s17 + $0x5c8] sm:$0xff]  ;;  %v8755_v56 = vld [vmem:[%s15998_s17 + $0x4b0] sm:$0xff] }
 0xa04   : > { %7779 = vmatpush.msrb.mxu3 %v8852_v57  ;;  %7585 = vmatpush.msrb.mxu1 %v8755_v56  ;;  %v7823_v57 = vld [vmem:[%s16000_s19 + $0xd8] sm:$0xff]  ;;  %v7821_v56 = vld [vmem:[%s16000_s19 + $0xc8] sm:$0xff] }
 0xa05   : > { %7475 = vmatpush.msrb.mxu0 %v8724_v52  ;;  %7600 = vmatpush.msra.mxu2 %v8797_v41  ;;  %v8788_v52 = vld [vmem:[%s15998_s17 + $0x5b8] sm:$0xff]  ;;  %v8817_v41 = vld [vmem:[%s15998_s17 + $0x690] sm:$0xff] }
 0xa06   : > { %7780 = vmatpush.msrb.mxu3 %v8850_v62  ;;  %7737 = vmatpush.msra.mxu1 %v8855_v25  ;;  %v7804_v62 = vld [vmem:[%s16000_s19 + $0x40] sm:$0xff] }
 0xa07   : > { %7476 = vmatpush.msrb.mxu0 %v8722_v43  ;;  %7601 = vmatpush.msra.mxu2 %v8795_v19  ;;  %v8815_v43 = vld [vmem:[%s15998_s17 + $0x680] sm:$0xff]  ;;  %v8853_v19 = vld [vmem:[%s15998_s17 + $0x7b0] sm:$0xff] }
 0xa08   : > { %7781 = vmatpush.msrb.mxu3 %v8848_v18  ;;  %7738 = vmatpush.msra.mxu1 %v8853_v19 }
 0xa09   : > { %7477 = vmatpush.msrb.mxu0 %v8720_v31  ;;  %7602 = vmatpush.msra.mxu2 %v8793_v15  ;;  %v8851_v31 = vld [vmem:[%s15998_s17 + $0x7a0] sm:$0xff]  ;;  %v8836_v15 = vld [vmem:[%s15998_s17 + $0x728] sm:$0xff] }
 0xa0a   : > { %7782 = vmatpush.msrb.mxu3 %v8846_v39  ;;  %7739 = vmatpush.msra.mxu1 %v8851_v31  ;;  %v7802_v39 = vld [vmem:[%s16000_s19 + $0x30] sm:$0xff]  ;;  %v7801_v31 = vld [vmem:[%s16000_s19 + $0x28] sm:$0xff] }
 0xa0b   : > { %7478 = vmatpush.msrb.mxu0 %v8718_v46  ;;  %7603 = vmatpush.msra.mxu2 %v8791_v61  ;;  %v8849_v46 = vld [vmem:[%s15998_s17 + $0x790] sm:$0xff]  ;;  %v8834_v61 = vld [vmem:[%s15998_s17 + $0x718] sm:$0xff] }
 0xa0c   : > { %7783 = vmatpush.msrb.mxu3 %v8844_v1  ;;  %7740 = vmatpush.msra.mxu1 %v8849_v46 }
 0xa0d   : > { %7479 = vmatpush.msrb.mxu0 %v8716_v34  ;;  %7604 = vmatpush.msra.mxu2 %v8789_v35  ;;  %v8809_v34 = vld [vmem:[%s15998_s17 + $0x650] sm:$0xff]  ;;  %v8847_v35 = vld [vmem:[%s15998_s17 + $0x780] sm:$0xff] }
 0xa0e   : > { %7784 = vmatpush.msrb.mxu3 %v8842_v59  ;;  %7741 = vmatpush.msra.mxu1 %v8847_v35  ;;  %v7800_v59 = vld [vmem:[%s16000_s19 + $0x20] sm:$0xff]  ;;  %v7815_v35 = vld [vmem:[%s16000_s19 + $0x98] sm:$0xff] }
 0xa0f   : > { %7480 = vmatpush.msrb.mxu0 %v8714_v7  ;;  %7605 = vmatpush.msra.mxu2 %v8787_v49  ;;  %v8845_v7 = vld [vmem:[%s15998_s17 + $0x770] sm:$0xff]  ;;  %v8830_v49 = vld [vmem:[%s15998_s17 + $0x6f8] sm:$0xff] }
 0xa10   : > { %7785 = vmatpush.msrb.mxu3 %v8840_v21  ;;  %7742 = vmatpush.msra.mxu1 %v8845_v7  ;;  %v7798_v21 = vld [vmem:[%s16000_s19 + $0x10] sm:$0xff]  ;;  %v7797_v7 = vld [vmem:[%s16000_s19 + $0x8] sm:$0xff] }
 0xa11   : > { %7710 = vmatpush.msrb.mxu2 %v8837_v48  ;;  %7481 = vmatpush.msrb.mxu0 %v8712_v20  ;;  %v8843_v48 = vld [vmem:[%s15998_s17 + $0x760] sm:$0xff]  ;;  %v8841_v20 = vld [vmem:[%s15998_s17 + $0x750] sm:$0xff] }
 0xa12   : > { %7743 = vmatpush.msra.mxu1 %v8843_v48  ;;  %v7796_v48 = vld [vmem:[%s16000_s19] sm:$0xff] }
 0xa13   : > { %7711 = vmatpush.msrb.mxu2 %v8835_v0  ;;  %7482 = vmatpush.msrb.mxu0 %v8710_v2  ;;  %v8826_v2 = vld [vmem:[%s15998_s17 + $0x6d8] sm:$0xff] }
 0xa14   : > { %7744 = vmatpush.msra.mxu1 %v8841_v20 }
 0xa15   : > { %7483 = vmatpush.msrb.mxu0 %v8708_v14  ;;  %7712 = vmatpush.msrb.mxu2 %v8833_v36  ;;  %v8839_v14 = vld [vmem:[%s15998_s17 + $0x740] sm:$0xff]  ;;  %v8820_v36 = vld [vmem:[%s15998_s17 + $0x6a8] sm:$0xff] }
 0xa16   : > { %7745 = vmatpush.msra.mxu1 %v8839_v14 }
 0xa17   : > { %7484 = vmatpush.msrb.mxu0 %v8706_v50  ;;  %7713 = vmatpush.msrb.mxu2 %v8831_v28  ;;  %v8824_v50 = vld [vmem:[%s15998_s17 + $0x6c8] sm:$0xff]  ;;  %v8818_v28 = vld [vmem:[%s15998_s17 + $0x698] sm:$0xff] }
 0xa19   : > { %7485 = vmatpush.msrb.mxu0 %v8704_v37  ;;  %7714 = vmatpush.msrb.mxu2 %v8829_v9 }
 0xa1a   : > { %7486 = vmatmul.f32.vlgmr.msrb.gmra.mxu0 %v15213_v11  ;;  %v8798_v11 = vld [vmem:[%s15998_s17 + $0x608] sm:$0xff] }
 0xa1b   : > { %7637 = vmatpush.msra.mxu0 %v8804_v51  ;;  %7715 = vmatpush.msrb.mxu2 %v8827_v42  ;;  %v8814_v51 = vld [vmem:[%s15998_s17 + $0x678] sm:$0xff]  ;;  %v7051_v42 = vpop.f32.mrf.mxu1 }
 0xa1d   : > { %7638 = vmatpush.msra.mxu0 %v8802_v30  ;;  %7716 = vmatpush.msrb.mxu2 %v8825_v12  ;;  %v8808_v30 = vld [vmem:[%s15998_s17 + $0x648] sm:$0xff] }
 0xa1f   : > { %7639 = vmatpush.msra.mxu0 %v8800_v3  ;;  %7717 = vmatpush.msrb.mxu2 %v8823_v32  ;;  %v7810_v32 = vld [vmem:[%s16000_s19 + $0x70] sm:$0xff] }
 0xa21   : > { %7640 = vmatpush.msra.mxu0 %v8798_v11  ;;  %7718 = vmatpush.msrb.mxu2 %v8821_v13  ;;  %v7808_v13 = vld [vmem:[%s16000_s19 + $0x60] sm:$0xff] }
 0xa23   : > { %7641 = vmatpush.msra.mxu0 %v8796_v40  ;;  %7719 = vmatpush.msrb.mxu2 %v8819_v27  ;;  %v7826_v40 = vld [vmem:[%s16000_s19 + $0xf0] sm:$0xff]  ;;  %v7187_v19 = vpop.f32.mrf.mxu1 }
 0xa24   : > { %v7806_v27 = vld [vmem:[%s16000_s19 + $0x50] sm:$0xff] }
 0xa25   : > { %7642 = vmatpush.msra.mxu0 %v8794_v23  ;;  %7720 = vmatpush.msrb.mxu2 %v8817_v41  ;;  %v7807_v23 = vld [vmem:[%s16000_s19 + $0x58] sm:$0xff] }
 0xa26   : > { %v7803_v41 = vld [vmem:[%s16000_s19 + $0x38] sm:$0xff] }
 0xa27   : > { %7643 = vmatpush.msra.mxu0 %v8792_v53  ;;  %7721 = vmatpush.msrb.mxu2 %v8815_v43  ;;  %v7822_v53 = vld [vmem:[%s16000_s19 + $0xd0] sm:$0xff]  ;;  %v7819_v43 = vld [vmem:[%s16000_s19 + $0xb8] sm:$0xff] }
 0xa29   : > { %7644 = vmatpush.msra.mxu0 %v8790_v6  ;;  %7722 = vmatpush.msrb.mxu2 %v8813_v26  ;;  %v7805_v6 = vld [vmem:[%s16000_s19 + $0x48] sm:$0xff]  ;;  %v7818_v26 = vld [vmem:[%s16000_s19 + $0xb0] sm:$0xff] }
 0xa2b   : > { %7645 = vmatpush.msra.mxu0 %v8788_v52  ;;  %7723 = vmatpush.msrb.mxu2 %v8811_v17  ;;  %v7820_v52 = vld [vmem:[%s16000_s19 + $0xc0] sm:$0xff]  ;;  %v7307_v46 = vpop.f32.mrf.mxu1 }
 0xa2d   : > { %7750 = vmatpush.msrb.mxu0 %v8838_v63  ;;  %7724 = vmatpush.msrb.mxu2 %v8809_v34  ;;  %v7167_v63 = vpop.f32.mrf.mxu3  ;;  %v7799_v34 = vld [vmem:[%s16000_s19 + $0x18] sm:$0xff] }
 0xa2f   : > { %7751 = vmatpush.msrb.mxu0 %v8836_v15  ;;  %7725 = vmatpush.msrb.mxu2 %v8807_v29  ;;  %v7817_v15 = vld [vmem:[%s16000_s19 + $0xa8] sm:$0xff]  ;;  %v7814_v29 = vld [vmem:[%s16000_s19 + $0x90] sm:$0xff] }
 0xa31   : > { %7752 = vmatpush.msrb.mxu0 %v8834_v61 }
 0xa33   : > { %7753 = vmatpush.msrb.mxu0 %v8832_v10  ;;  %v7816_v10 = vld [vmem:[%s16000_s19 + $0xa0] sm:$0xff] }
 0xa35   : > { %7754 = vmatpush.msrb.mxu0 %v8830_v49  ;;  %v6957_v0 = vpop.f32.mrf.mxu2  ;;  %v7347_v61 = vpop.f32.mrf.mxu3  ;;  %v7813_v49 = vld [vmem:[%s16000_s19 + $0x88] sm:$0xff] }
 0xa37   : > { %7755 = vmatpush.msrb.mxu0 %v8828_v22  ;;  %v7812_v22 = vld [vmem:[%s16000_s19 + $0x80] sm:$0xff] }
 0xa39   : > { %7756 = vmatpush.msrb.mxu0 %v8826_v2  ;;  %v7467_v2 = vpop.f32.mrf.mxu1 }
 0xa3b   : > { %7757 = vmatpush.msrb.mxu0 %v8824_v50 }
 0xa3d   : > { %7758 = vmatpush.msrb.mxu0 %v8822_v45  ;;  %v6937_v37 = vpop.f32.mrf.mxu0  ;;  %v6997_v58 = vpop.f32.mrf.mxu2 }
 0xa3e   : > { %v7001_v38 = vmax.f32 %v6957_v0, %v6997_v58  ;;  %v7507_v14 = vpop.f32.mrf.mxu3 }
 0xa3f   : > { %7759 = vmatpush.msrb.mxu0 %v8820_v36 }
 0xa40   : > { %8805 = vmatmul.msk.f32.vlgmr.msra.gmra.mxu2 %vm3034_vm10, %v7001_v38  ;;  %8806 = vmatmul.msk.f32.vlgmr.msra.gmra.mxu0 %vm3034_vm10, %v7001_v38 }
 0xa41   : > { %7760 = vmatpush.msrb.mxu0 %v8818_v28  ;;  %7854 = vmatpush.msra.mxu2 %v7827_v33 }
 0xa43   : > { %7761 = vmatpush.msrb.mxu0 %v8816_v24  ;;  %7855 = vmatpush.msra.mxu2 %v7826_v40 }
 0xa45   : > { %v6977_v9 = vpop.f32.mrf.mxu0  ;;  %7762 = vmatpush.msrb.mxu0 %v8814_v51  ;;  %v7091_v3 = vpop.f32.mrf.mxu2  ;;  %7856 = vmatpush.msra.mxu2 %v7825_v47  ;;  %v7188_v51 = vadd.f32 %v7187_v19, %v7167_v63 }
 0xa46   : > { %v7000_v5 = vmax.f32 %v6937_v37, %v6977_v9  ;;  %v7095_v11 = vmax.f32 %v7051_v42, %v7091_v3 }
 0xa47   : > { %7763 = vmatpush.msrb.mxu0 %v8812_v4  ;;  %7857 = vmatpush.msra.mxu2 %v7824_v8 }
 0xa48   : > { %7586 = vmatmul.f32.vlgmr.msrb.gmra.mxu1 %v7000_v5  ;;  %7626 = vmatmul.f32.vlgmr.msra.gmra.mxu3 %v7000_v5 }
 0xa49   : > { %7764 = vmatpush.msrb.mxu0 %v8810_v44  ;;  %7834 = vmatpush.msrb.mxu1 %v7811_v60  ;;  %v7096_v44 = vld [vmem:[%s15999_s18] sm:$0x3] }
 0xa4a   : > { %7858 = vmatpush.msra.mxu2 %v7823_v57 }
 0xa4b   : > { %7765 = vmatpush.msrb.mxu0 %v8808_v30  ;;  %7835 = vmatpush.msrb.mxu1 %v7810_v32 }
 0xa4c   : > { %7859 = vmatpush.msra.mxu2 %v7822_v53 }
 0xa4d   : > { %v7071_v55 = vpop.f32.mrf.mxu0  ;;  %7836 = vmatpush.msrb.mxu1 %v7809_v54 }
 0xa4e   : > { %v7094_v12 = vmax.f32 %v7031_v16, %v7071_v55  ;;  %7860 = vmatpush.msra.mxu2 %v7821_v56 }
 0xa4f   : > { %7837 = vmatpush.msrb.mxu1 %v7808_v13  ;;  %v7227_v25 = vpop.f32.mrf.mxu2 }
 0xa50   : > { %8858 = vmatmul.msk.f32.vlgmr.msrb.gmra.mxu3 %vm3034_vm10, %v7095_v11  ;;  %7726 = vmatmul.f32.vlgmr.msrb.gmra.mxu2 %v7094_v12 }
 0xa51   : > { %7766 = vmatmul.f32.vlgmr.msrb.gmra.mxu0 %v7094_v12  ;;  %8857 = vmatmul.msk.f32.vlgmr.msra.gmra.mxu1 %vm3034_vm10, %v7095_v11 }
 0xa52   : > { %7838 = vmatpush.msrb.mxu1 %v7807_v23  ;;  %7861 = vmatpush.msra.mxu2 %v7820_v52 }
 0xa54   : > { %7839 = vmatpush.msrb.mxu1 %v7806_v27  ;;  %7862 = vmatpush.msra.mxu2 %v7819_v43 }
 0xa56   : > { %7840 = vmatpush.msrb.mxu1 %v7805_v6  ;;  %7863 = vmatpush.msra.mxu2 %v7818_v26 }
 0xa58   : > { %7841 = vmatpush.msrb.mxu1 %v7804_v62  ;;  %7864 = vmatpush.msra.mxu2 %v7817_v15 }
 0xa5a   : > { %7842 = vmatpush.msrb.mxu1 %v7803_v41  ;;  %7865 = vmatpush.msra.mxu2 %v7816_v10  ;;  %v7828_v41 = vld [vmem:[%s16001_s20] sm:$0x1] }
 0xa5c   : > { %7843 = vmatpush.msrb.mxu1 %v7802_v39  ;;  %7866 = vmatpush.msra.mxu2 %v7815_v35 }
 0xa5e   : > { %7844 = vmatpush.msrb.mxu1 %v7801_v31  ;;  %7867 = vmatpush.msra.mxu2 %v7814_v29 }
 0xa60   : > { %7845 = vmatpush.msrb.mxu1 %v7800_v59  ;;  %7868 = vmatpush.msra.mxu2 %v7813_v49 }
 0xa61   : > { %v7327_v1 = vpop.f32.mrf.mxu2 }
 0xa62   : > { %7846 = vmatpush.msrb.mxu1 %v7799_v34  ;;  %7869 = vmatpush.msra.mxu2 %v7812_v22  ;;  %v7328_v5 = vadd.f32 %v7327_v1, %v7307_v46 }
 0xa64   : > { %7847 = vmatpush.msrb.mxu1 %v7798_v21 }
 0xa65   : > { %v7207_v18 = vpop.f32.mrf.mxu0 }
 0xa66   : > { %7848 = vmatpush.msrb.mxu1 %v7797_v7  ;;  %v7228_v50 = vadd.f32 %v7227_v25, %v7207_v18 }
 0xa68   : > { %7849 = vmatpush.msrb.mxu1 %v7796_v48  ;;  %v7232_v36 = vrot.slane %v7228_v50, 7 }
 0xa6a   : > { %v7233_v30 = vsel %vm2784_vm0, %v7188_v51, %v7232_v36 }
 0xa6b   : > { %v7235_v55 = vadd.f32 %v7233_v30, %v7096_v44 }
 0xa77   : > { %v7367_v17 = vpop.f32.mrf.mxu0 }
 0xa78   : > { %v7368_v45 = vadd.f32 %v7367_v17, %v7347_v61 }
 0xa7a   : > { %v7372_v4 = vrot.slane %v7368_v45, 7 }
 0xa7c   : > { %v7373_v3 = vsel %vm2784_vm0, %v7328_v5, %v7372_v4 }
 0xa7d   : > { %v7375_v32 = vadd.f32 %v7373_v3, %v7235_v55 }
 0xa81   : > { %v7447_v20 = vpop.f32.mrf.mxu2 }
 0xa82   : > { %v7468_v11 = vadd.f32 %v7467_v2, %v7447_v20 }
 0xa97   : > { %v7487_v0 = vpop.f32.mrf.mxu0 }
 0xa98   : > { %v7508_v37 = vadd.f32 %v7507_v14, %v7487_v0 }
 0xa9a   : > { %v7512_v42 = vrot.slane %v7508_v37, 7 }
 0xa9c   : > { %v7513_v12 = vsel %vm2784_vm0, %v7468_v11, %v7512_v42 }
 0xa9d   : > { %v7515_v8 = vadd.f32 %v7513_v12, %v7375_v32 }
 0xabd   : > { %v7647_v58 = vpop.f32.mrf.mxu0 }
 0xac3   : > { %v7607_v38 = vpop.f32.mrf.mxu2 }
 0xac5   : > { %v7587_v28 = vpop.f32.mrf.mxu1 }
 0xac6   : > { %v7608_v60 = vadd.f32 %v7607_v38, %v7587_v28 }
 0xacb   : > { %v7627_v24 = vpop.f32.mrf.mxu3 }
 0xacc   : > { %v7648_v9 = vadd.f32 %v7647_v58, %v7627_v24 }
 0xace   : > { %v7652_v16 = vrot.slane %v7648_v9, 7  ;;  %v7767_v33 = vpop.f32.mrf.mxu0  ;;  %v7747_v23 = vpop.f32.mrf.mxu1 }
 0xad0   : > { %v7653_v47 = vsel %vm2784_vm0, %v7608_v60, %v7652_v16 }
 0xad1   : > { %v7655_v53 = vadd.f32 %v7653_v47, %v7515_v8 }
 0xad3   : > { %v7787_v40 = vpop.f32.mrf.mxu3  ;;  %v7727_v54 = vpop.f32.mrf.mxu2 }
 0xad4   : > { %v7788_v13 = vadd.f32 %v7787_v40, %v7767_v33  ;;  %v7748_v27 = vadd.f32 %v7747_v23, %v7727_v54 }
 0xad6   : > { %v7792_v57 = vrot.slane %v7788_v13, 7 }
 0xad8   : > { %v7793_v6 = vsel %vm2784_vm0, %v7748_v27, %v7792_v57  ;;  %vm7874_vm0 = vcmask 16384  }
 0xad9   : > { %v7795_v56 = vadd.f32 %v7793_v6, %v7655_v53 }
 0xadb   : > { %v7830_v62 = vperm.slane %v7795_v56, 0  ;;  %v7831_v52 = vperm.slane %v7795_v56, 1 }
 0xadd   : > { %7850 = vmatmul.f32.vlgmr.msrb.gmra.mxu1 %v7830_v62  ;;  %7870 = vmatmul.f32.vlgmr.msra.gmra.mxu2 %v7831_v52 }
 0xb5a   : > { %v7851_v25 = vpop.f32.mrf.mxu1 }
 0xb5b   : > { %v7852_v18 = vadd.f32 %v7851_v25, %v7828_v41 }
 0xb60   : > { %v7871_v43 = vpop.f32.mrf.mxu2 }
 0xb61   : > { %v7872_v19 = vadd.f32 %v7871_v43, %v7852_v18 }
 0xb63   : > { %7875 = vst.msk [vmem:[%s648_s26] sm:$0x1] %vm7874_vm0, %v7872_v19 }
 0xb64   : > { %8960 = shalt.err (!%p8957_p3)
}
 0xb65   : > { %8866 = dma.vmem_to_hbm [thread:$0]  (%p9147_p5), %s7888_s29, 16, %s7890_s22, %s7877_s6  }
 0xb66 PF: > { %s17094_s27 = sld [smem:[#allocation7_spill]] }
 0xb67   : > { %s17095_s26 = sld [smem:[#allocation5_spill]] }
 0xb6c   : > { %p8872_p4 = scmp.ge.s32.totalorder %s17094_s27, 2 }
 0xb6d   : > { %s7901_s9 = sand.u32 1, %s17095_s26  }
 0xb6e   : > { %p8869_p7 = pnand %p8872_p4, %p9151_p6  ;;  %s7902_s4 = scalar_lea.sflag [#allocation3], %s7901_s9 }
 0xb70   : > { %p8870_p8 = pneg %p8869_p7 }
 0xb72   : > { %8978 = dma.done.wait (%p8870_p8), %s7902_s4, 16  }
 0xb73   : > { %8980 = vsyncadd (%p8870_p8), %s7902_s4, 4294967280  ;;  %s17097_s27 = sld [smem:[#allocation8_spill]]  ;;  %s17100_s2 = smov %s8987_s25 }
 0xb74   : > { %s17098_s7 = sld [smem:[#allocation6_spill]] }
 0xb75   : > { %s17099_s26 = sld [smem:[#allocation9_spill]] }
 0xb79   : > { %p31_p9 = scmp.ge.s32.totalorder %s17097_s27, 4  }
 0xb7a   : > { %s17101_s25 = smov %s17098_s7 }
 0xb7b   :  { %33 = sbr.rel (!%p31_p9) target bundleno = 14 (0xe), region = 173 }
 0xb80   :  { %7907 = vsyncpa [#allocation3], 1 }
 0xb81   :  { %7909 = vsyncpa [#allocation3 + $0x1], 1 }

</bundles_post_ra>
